<compile_context>
chip_gen: v7x
topology: tpu7x:2x2x1
jax: 0.10.0
libtpu: 0.0.40
codegen_flags: <defaults>
</compile_context>

<pallas_src>
import functools
import math

import jax
import jax.numpy as jnp
from jax.experimental import pallas as pl
from jax.experimental.pallas import tpu as pltpu


_BF = jnp.bfloat16


# ----------------------------------------------------------------------------- small helpers
def _gelu(x):
    # TODO(synk): PyTorch nn.GELU defaults to the exact erf-GELU; tanh approximation is used
    # for guaranteed EUP lowering (deviation ~1e-3).
    c = math.sqrt(2.0 / math.pi)
    return 0.5 * x * (1.0 + jnp.tanh(c * (x + 0.044715 * x * x * x)))


def _ln(x, g, b, eps):
    mu = jnp.mean(x, axis=-1, keepdims=True)
    xc = x - mu
    var = jnp.mean(xc * xc, axis=-1, keepdims=True)
    return xc * jax.lax.rsqrt(var + eps) * g + b


def _pick_bb(B, cap=8):
    """Largest divisor of B that is <= cap (batch elements per grid step)."""
    bb = min(B, cap)
    while B % bb:
        bb -= 1
    return bb


# ----------------------------------------------------------------------------- P3Embed fused kernel
def _p3embed_kernel(x_ref, w1_ref, b1_ref, w2ah_ref, w2al_ref, b2a_ref,
                    w2b_ref, b2b_ref, o_ref, *, S, k, bb):
    # x_ref block: (bb, k*S, Cin); per batch element, rows are k-major
    # (row j*S + s = neighbor j of centroid s).
    Cin = x_ref.shape[2]
    E = w1_ref.shape[1]
    E2 = w2al_ref.shape[1]

    x = x_ref[...].reshape(bb * k * S, Cin).astype(_BF)
    # conv1 (Conv(6,E,bias=False) -> Conv(E,E,bias=True) -> BN folded) + ReLU, one big matmul
    h = jnp.dot(x, w1_ref[...], preferred_element_type=jnp.float32) + b1_ref[...]
    h = jnp.maximum(h, 0.0)                                            # (bb*k*S, E) f32

    # conv2a on concat([max, feats]): "feats" half as one big matmul; "max" half added below
    h2lo = jnp.dot(h.astype(_BF), w2al_ref[...],
                   preferred_element_type=jnp.float32)                 # (bb*k*S, 2E) f32

    for b in range(bb):
        base = b * k * S
        hb = h[base:base + k * S]                                      # (k*S, E)
        hmax = hb[0:S]
        for j in range(1, k):                                          # k-max over neighbors
            hmax = jnp.maximum(hmax, hb[j * S:(j + 1) * S])
        m2 = jnp.dot(hmax.astype(_BF), w2ah_ref[...],
                     preferred_element_type=jnp.float32)               # (S, 2E)
        # broadcast the pooled-max contribution over the k neighbor slabs (no k-way concat)
        h2 = h2lo[base:base + k * S].reshape(k, S, E2) + m2[None] + b2a_ref[...]
        h2 = jnp.maximum(h2, 0.0)                                      # (k, S, 2E)
        # conv2b + ReLU
        h3 = jnp.dot(h2.reshape(k * S, E2).astype(_BF), w2b_ref[...],
                     preferred_element_type=jnp.float32) + b2b_ref[...]
        h3 = jnp.maximum(h3, 0.0)                                      # (k*S, E)
        out = h3[0:S]
        for j in range(1, k):                                          # final k-max
            out = jnp.maximum(out, h3[j * S:(j + 1) * S])
        o_ref[b] = out                                                 # (S, E)


def p3embed(g, pe, *, S, k):
    """g: (B, k*S, Cin) k-major grouped [points, feats]. Returns (B, S, E) float32."""
    B, _, Cin = g.shape
    E = pe["w1"].shape[1]
    bb = _pick_bb(B)
    return pl.pallas_call(
        functools.partial(_p3embed_kernel, S=S, k=k, bb=bb),
        out_shape=jax.ShapeDtypeStruct((B, S, E), jnp.float32),
        grid=(B // bb,),
        in_specs=[
            pl.BlockSpec((bb, k * S, Cin), lambda i: (i, 0, 0)),
            pl.BlockSpec(pe["w1"].shape, lambda i: (0, 0)),
            pl.BlockSpec((1, E), lambda i: (0, 0)),
            pl.BlockSpec((E, 2 * E), lambda i: (0, 0)),
            pl.BlockSpec((E, 2 * E), lambda i: (0, 0)),
            pl.BlockSpec((1, 2 * E), lambda i: (0, 0)),
            pl.BlockSpec((2 * E, E), lambda i: (0, 0)),
            pl.BlockSpec((1, E), lambda i: (0, 0)),
        ],
        out_specs=pl.BlockSpec((bb, S, E), lambda i: (i, 0, 0)),
        compiler_params=pltpu.CompilerParams(dimension_semantics=("parallel",)),
    )(g, pe["w1"], pe["b1"], pe["w2a_hi"], pe["w2a_lo"], pe["b2a"], pe["w2b"], pe["b2b"])


# ----------------------------------------------------------------------------- token proj + pos-MLP + cls rows
def _token_embed_kernel(f_ref, c_ref, clst_ref, clsp_ref, pw_ref, pb_ref,
                        w1_ref, b1_ref, w2_ref, b2_ref, tok_ref, pos_ref, *, bb, S):
    E = f_ref.shape[2]
    f = f_ref[...].reshape(bb * S, E).astype(_BF)
    c = c_ref[...].reshape(bb * S, 3).astype(_BF)
    tok = jnp.dot(f, pw_ref[...], preferred_element_type=jnp.float32) + pb_ref[...]   # (bb*S, D)
    h = jnp.dot(c, w1_ref[...], preferred_element_type=jnp.float32) + b1_ref[...]
    h = _gelu(h)
    pz = jnp.dot(h.astype(_BF), w2_ref[...], preferred_element_type=jnp.float32) + b2_ref[...]
    cls_t = clst_ref[...]                                              # (1, D)
    cls_p = clsp_ref[...]
    for b in range(bb):
        tok_ref[b] = jnp.concatenate([cls_t, tok[b * S:(b + 1) * S]], axis=0)   # (S+1, D)
        pos_ref[b] = jnp.concatenate([cls_p, pz[b * S:(b + 1) * S]], axis=0)


def token_embed(f_out, cntrd, params):
    B, S, E = f_out.shape
    D = params["proj_w"].shape[1]
    Hd = params["pos_w1"].shape[1]
    L = S + 1
    bb = _pick_bb(B)
    return pl.pallas_call(
        functools.partial(_token_embed_kernel, bb=bb, S=S),
        out_shape=(jax.ShapeDtypeStruct((B, L, D), jnp.float32),
                   jax.ShapeDtypeStruct((B, L, D), jnp.float32)),
        grid=(B // bb,),
        in_specs=[
            pl.BlockSpec((bb, S, E), lambda i: (i, 0, 0)),
            pl.BlockSpec((bb, S, 3), lambda i: (i, 0, 0)),
            pl.BlockSpec((1, D), lambda i: (0, 0)),          # cls_token
            pl.BlockSpec((1, D), lambda i: (0, 0)),          # cls_pos
            pl.BlockSpec((E, D), lambda i: (0, 0)),
            pl.BlockSpec((1, D), lambda i: (0, 0)),
            pl.BlockSpec((3, Hd), lambda i: (0, 0)),
            pl.BlockSpec((1, Hd), lambda i: (0, 0)),
            pl.BlockSpec((Hd, D), lambda i: (0, 0)),
            pl.BlockSpec((1, D), lambda i: (0, 0)),
        ],
        out_specs=(pl.BlockSpec((bb, L, D), lambda i: (i, 0, 0)),
                   pl.BlockSpec((bb, L, D), lambda i: (i, 0, 0))),
        compiler_params=pltpu.CompilerParams(dimension_semantics=("parallel",)),
    )(f_out, cntrd, params["cls_token"], params["cls_pos"],
      params["proj_w"], params["proj_b"],
      params["pos_w1"], params["pos_b1"], params["pos_w2"], params["pos_b2"])


# ----------------------------------------------------------------------------- fused ViT trunk (all blocks + final LN)
def _vit_stack_kernel(x0_ref, pos_ref, ln1g_ref, ln1b_ref, qkvw_ref, qkvb_ref,
                      pw_ref, pb_ref, ln2g_ref, ln2b_ref, f1w_ref, f1b_ref,
                      f2w_ref, f2b_ref, ng_ref, nb_ref, o_ref, *, heads, depth, eps):
    d = pl.program_id(1)

    # initialize the resident token state from the embedding on the first depth step
    @pl.when(d == 0)
    def _():
        o_ref[...] = x0_ref[...]

    xin = o_ref[0] + pos_ref[0]                                        # (L, D) f32
    L, D = xin.shape
    dh = D // heads
    scale = dh ** -0.5

    # ---- attention: x + attn(norm1(x)) ----
    y = _ln(xin, ln1g_ref[0], ln1b_ref[0], eps).astype(_BF)
    qkv = jnp.dot(y, qkvw_ref[0], preferred_element_type=jnp.float32) + qkvb_ref[0]   # (L, 3D)

    scores = []
    for h in range(heads):
        q = (qkv[:, h * dh:(h + 1) * dh] * scale).astype(_BF)          # pre-scaled q
        kk = qkv[:, D + h * dh:D + (h + 1) * dh].astype(_BF)
        scores.append(jax.lax.dot_general(
            q, kk, (((1,), (1,)), ((), ())), preferred_element_type=jnp.float32))
    s_all = jnp.stack(scores, axis=0)                                  # (heads, L, L)
    s_all = s_all - jnp.max(s_all, axis=-1, keepdims=True)
    p_all = jnp.exp(s_all)
    # TODO(synk): approx EUP reciprocal (~1e-3); use an exact divide for parity validation.
    p_all = p_all * pl.reciprocal(jnp.sum(p_all, axis=-1, keepdims=True), approx=True)

    pw = pw_ref[0]                                                     # (D, D) bf16
    acc = jnp.zeros((L, D), jnp.float32)
    for h in range(heads):
        v = qkv[:, 2 * D + h * dh:2 * D + (h + 1) * dh].astype(_BF)
        oh = jnp.dot(p_all[h].astype(_BF), v, preferred_element_type=jnp.float32)      # (L, dh)
        # fold the head-concat into row-blocks of the output projection
        acc = acc + jnp.dot(oh.astype(_BF), pw[h * dh:(h + 1) * dh, :],
                            preferred_element_type=jnp.float32)
    y1 = xin + acc + pb_ref[0]

    # ---- MLP: x + fc2(gelu(fc1(norm2(x)))) ----
    z = _ln(y1, ln2g_ref[0], ln2b_ref[0], eps).astype(_BF)
    z = jnp.dot(z, f1w_ref[0], preferred_element_type=jnp.float32) + f1b_ref[0]
    z = jnp.dot(_gelu(z).astype(_BF), f2w_ref[0], preferred_element_type=jnp.float32) + f2b_ref[0]
    newf = y1 + z

    @pl.when(d < depth - 1)
    def _():
        o_ref[0] = newf

    @pl.when(d == depth - 1)                                           # fold final LayerNorm
    def _():
        o_ref[0] = _ln(newf, ng_ref[...], nb_ref[...], eps)


def vit_blocks_fused(tok, pos, stk, norm_g, norm_b, *, heads, eps=1e-6):
    B, L, D = tok.shape
    depth = stk["qkv_w"].shape[0]
    hid = stk["fc1_w"].shape[2]
    return pl.pallas_call(
        functools.partial(_vit_stack_kernel, heads=heads, depth=depth, eps=eps),
        out_shape=jax.ShapeDtypeStruct((B, L, D), jnp.float32),
        grid=(B, depth),
        in_specs=[
            pl.BlockSpec((1, L, D), lambda b, d: (b, 0, 0)),       # initial tokens
            pl.BlockSpec((1, L, D), lambda b, d: (b, 0, 0)),       # pos embed
            pl.BlockSpec((1, 1, D), lambda b, d: (d, 0, 0)),       # ln1_g
            pl.BlockSpec((1, 1, D), lambda b, d: (d, 0, 0)),       # ln1_b
            pl.BlockSpec((1, D, 3 * D), lambda b, d: (d, 0, 0)),   # qkv_w
            pl.BlockSpec((1, 1, 3 * D), lambda b, d: (d, 0, 0)),   # qkv_b
            pl.BlockSpec((1, D, D), lambda b, d: (d, 0, 0)),       # attn_proj_w
            pl.BlockSpec((1, 1, D), lambda b, d: (d, 0, 0)),       # attn_proj_b
            pl.BlockSpec((1, 1, D), lambda b, d: (d, 0, 0)),       # ln2_g
            pl.BlockSpec((1, 1, D), lambda b, d: (d, 0, 0)),       # ln2_b
            pl.BlockSpec((1, D, hid), lambda b, d: (d, 0, 0)),     # fc1_w
            pl.BlockSpec((1, 1, hid), lambda b, d: (d, 0, 0)),     # fc1_b
            pl.BlockSpec((1, hid, D), lambda b, d: (d, 0, 0)),     # fc2_w
            pl.BlockSpec((1, 1, D), lambda b, d: (d, 0, 0)),       # fc2_b
            pl.BlockSpec((1, D), lambda b, d: (0, 0)),             # final norm gamma
            pl.BlockSpec((1, D), lambda b, d: (0, 0)),             # final norm beta
        ],
        out_specs=pl.BlockSpec((1, L, D), lambda b, d: (b, 0, 0)),  # resident across depth
        compiler_params=pltpu.CompilerParams(
            dimension_semantics=("parallel", "arbitrary"),
            vmem_limit_bytes=32 * 1024 * 1024),
    )(tok, pos, stk["ln1_g"], stk["ln1_b"], stk["qkv_w"], stk["qkv_b"],
      stk["attn_proj_w"], stk["attn_proj_b"], stk["ln2_g"], stk["ln2_b"],
      stk["fc1_w"], stk["fc1_b"], stk["fc2_w"], stk["fc2_b"], norm_g, norm_b)


# ----------------------------------------------------------------------------- plain-JAX glue (data-dependent ops)
# TODO(synk): FPS / kNN are data-dependent sequential argmax + gathers; kept as plain JAX.
def farthest_point_sampling(points, n_samples):
    """points: (B, N, D) -> int32 indices (B, n_samples). Deterministic start index 0
    (the reference uses torch.randint for the first point)."""
    B, N, D = points.shape
    n_samples = min(n_samples, N)

    def body(i, state):
        centroids, distance, farthest = state
        centroids = centroids.at[:, i].set(farthest)
        idx = jnp.broadcast_to(farthest[:, None, None], (B, 1, D))
        cpts = jnp.take_along_axis(points, idx, axis=1)          # (B, 1, D)
        dist = jnp.sum((points - cpts) ** 2, axis=2)             # (B, N)
        distance = jnp.minimum(distance, dist)
        farthest = jnp.argmax(distance, axis=1).astype(jnp.int32)
        return centroids, distance, farthest

    centroids = jnp.zeros((B, n_samples), jnp.int32)
    distance = jnp.full((B, N), 1e10, jnp.float32)
    farthest = jnp.zeros((B,), jnp.int32)
    centroids, _, _ = jax.lax.fori_loop(0, n_samples, body, (centroids, distance, farthest))
    return centroids


def group_knn(pnts, cntrds, feats, k):
    """pnts (B,N,3), cntrds (B,S,3), feats (B,N,Df) -> ((B,S,k,3), (B,S,k,Df))."""
    d2 = jnp.sum((cntrds[:, :, None, :] - pnts[:, None, :, :]) ** 2, axis=-1)  # (B,S,N)
    _, idx = jax.lax.top_k(-d2, k)                                             # (B,S,k)
    grouped_pnts = jax.vmap(lambda pts, ix: pts[ix])(pnts, idx)
    grouped_feats = jax.vmap(lambda ft, ix: ft[ix])(feats, idx)
    return grouped_pnts, grouped_feats


# ----------------------------------------------------------------------------- parameters (BN folded, bf16 weights)
def init_params(key, *, in_channels=3, pe_dim=32, vit_dim=32, heads=4, depth=2,
                mlp_ratio=4, k_neighbors=16):
    E, D = pe_dim, vit_dim
    keys = jax.random.split(key, 256)
    ctr = iter(range(256))

    def nrm(shape, std=0.02):
        return (std * jax.random.normal(keys[next(ctr)], shape)).astype(jnp.float32)

    def bnfold(C, eps=1e-5):
        # BatchNorm2d at PyTorch init, eval mode: gamma=1, beta=0, mean=0, var=1.
        gamma = jnp.ones((C,), jnp.float32)
        beta = jnp.zeros((C,), jnp.float32)
        mean = jnp.zeros((C,), jnp.float32)
        var = jnp.ones((C,), jnp.float32)
        s = gamma * jax.lax.rsqrt(var + eps)
        return s, beta - mean * s

    # conv1 = Conv2d(6,E,bias=False) -> Conv2d(E,E,bias=True) -> BN -> ReLU (no act between
    # the two convs in the reference, so the algebraic fusion w1 = w1a @ w1b is exact).
    w1a = nrm((in_channels + 3, E))
    w1b = nrm((E, E)); b1b = nrm((E,))
    w2a = nrm((2 * E, 2 * E))                        # Conv2d(2E,2E,bias=False)+BN+ReLU
    w2b = nrm((2 * E, E))                            # Conv2d(2E, E,bias=False)+BN+ReLU
    bn1_s, bn1_t = bnfold(E)
    bn2a_s, bn2a_t = bnfold(2 * E)
    bn2b_s, bn2b_t = bnfold(E)

    w1 = (w1a @ w1b) * bn1_s[None, :]
    b1 = b1b * bn1_s + bn1_t
    w2a_f = w2a * bn2a_s[None, :]
    w2b_f = w2b * bn2b_s[None, :]
    p3 = dict(
        w1=w1.astype(_BF), b1=b1.reshape(1, E),
        w2a_hi=w2a_f[:E].astype(_BF), w2a_lo=w2a_f[E:].astype(_BF),
        b2a=bn2a_t.reshape(1, 2 * E),
        w2b=w2b_f.astype(_BF), b2b=bn2b_t.reshape(1, E),
    )

    def stack(mk):
        return jnp.stack([mk() for _ in range(depth)], axis=0)

    blocks = dict(
        ln1_g=jnp.ones((depth, 1, D), jnp.float32), ln1_b=jnp.zeros((depth, 1, D), jnp.float32),
        qkv_w=stack(lambda: nrm((D, 3 * D))).astype(_BF),
        qkv_b=stack(lambda: nrm((1, 3 * D))),
        attn_proj_w=stack(lambda: nrm((D, D))).astype(_BF),
        attn_proj_b=stack(lambda: nrm((1, D))),
        ln2_g=jnp.ones((depth, 1, D), jnp.float32), ln2_b=jnp.zeros((depth, 1, D), jnp.float32),
        fc1_w=stack(lambda: nrm((D, mlp_ratio * D))).astype(_BF),
        fc1_b=stack(lambda: nrm((1, mlp_ratio * D))),
        fc2_w=stack(lambda: nrm((mlp_ratio * D, D))).astype(_BF),
        fc2_b=stack(lambda: nrm((1, D))),
    )
    return dict(
        k=k_neighbors, pe_dim=E, vit_dim=D, heads=heads, depth=depth,
        p3=p3,
        proj_w=nrm((E, D)).astype(_BF), proj_b=nrm((1, D)),
        pos_w1=nrm((3, 128)).astype(_BF), pos_b1=nrm((1, 128)),
        pos_w2=nrm((128, D)).astype(_BF), pos_b2=nrm((1, D)),
        cls_token=nrm((1, D)), cls_pos=nrm((1, D)),
        blocks=blocks,
        norm_g=jnp.ones((1, D), jnp.float32), norm_b=jnp.zeros((1, D), jnp.float32),
    )


# ----------------------------------------------------------------------------- forward
def pointvit_forward(params, p, x=None):
    """p: (B, N, 3) float32. Returns (p_list, x_list, feats) like the PyTorch module."""
    if x is None:
        x = jnp.transpose(p, (0, 2, 1))                       # (B, 3, N)
    feats_in = x
    B, N, _ = p.shape
    k = params["k"]
    H = params["heads"]

    # ---- P3Embed (single stage: sample_ratio=0.25, scale=4 => stages=1) ----
    cur_pnt = p
    cur_feat = jnp.transpose(feats_in, (0, 2, 1))             # (B, N, 3)
    S = N // 4
    cidx = farthest_point_sampling(cur_pnt, S)                # (B, S)
    cntrd_pnt = jnp.take_along_axis(
        cur_pnt, jnp.broadcast_to(cidx[..., None], (B, S, 3)), axis=1)
    dp, fj = group_knn(cur_pnt, cntrd_pnt, cur_feat, k)       # (B,S,k,3) each
    # k-major layout so per-neighbor slabs are sublane-aligned slices inside the kernel
    g = jnp.concatenate([dp, fj], axis=-1)                    # (B, S, k, 6)
    g = jnp.transpose(g, (0, 2, 1, 3)).reshape(B, k * S, 6)   # (B, k*S, 6)

    f_out = p3embed(g, params["p3"], S=S, k=k)                # (B, S, E)

    p_list = [p, cntrd_pnt]
    x_list = [feats_in, jnp.transpose(f_out, (0, 2, 1))]      # (B, E, S) matches torch

    # ---- token projection + positional MLP + cls rows (one fused call) ----
    tok, pos = token_embed(f_out, cntrd_pnt, params)          # (B, S+1, D) each

    # ---- all ViT blocks + final LayerNorm in ONE pallas_call (grid = (B, depth)) ----
    feats = vit_blocks_fused(tok, pos, params["blocks"],
                             params["norm_g"], params["norm_b"], heads=H)
    return p_list, x_list, feats


# ----------------------------------------------------------------------------- main
if __name__ == "__main__":
    key = jax.random.PRNGKey(0)
    kp, kd = jax.random.split(key)
    B, N = 2, 128                      # 128 points -> 32 centroids -> 33 tokens
    p = jax.random.normal(kd, (B, N, 3), jnp.float32)
    params = init_params(kp, pe_dim=32, vit_dim=32, heads=4, depth=2, k_neighbors=16)

    fwd = jax.jit(functools.partial(pointvit_forward, params))
    p_list, x_list, feats = fwd(p)
    jax.block_until_ready(feats)

    S = N // 4
    assert p_list[0].shape == (B, N, 3) and p_list[1].shape == (B, S, 3)
    assert x_list[0].shape == (B, 3, N) and x_list[1].shape == (B, params["pe_dim"], S)
    assert feats.shape == (B, S + 1, params["vit_dim"])
    assert bool(jnp.all(jnp.isfinite(feats)))
    print("KERNEL_OK")
</pallas_src>

<mosaic_0001>
module attributes {stable_mosaic.version = 11 : i64} {
  func.func @_p3embed_kernel(%arg0: i32, %arg1: memref<2x512x6xf32, #tpu.memory_space<vmem>>, %arg2: memref<6x32xbf16, #tpu.memory_space<vmem>>, %arg3: memref<1x32xf32, #tpu.memory_space<vmem>>, %arg4: memref<32x64xbf16, #tpu.memory_space<vmem>>, %arg5: memref<32x64xbf16, #tpu.memory_space<vmem>>, %arg6: memref<1x64xf32, #tpu.memory_space<vmem>>, %arg7: memref<64x32xbf16, #tpu.memory_space<vmem>>, %arg8: memref<1x32xf32, #tpu.memory_space<vmem>>, %arg9: memref<2x32x32xf32, #tpu.memory_space<vmem>>) attributes {dimension_semantics = [#tpu.dimension_semantics<parallel>], iteration_bounds = array<i64: 1>, scalar_prefetch = 0 : i64, scratch_operands = 0 : i64, tpu.core_type = #tpu.core_type<tc>, window_params = [{transform_indices = @transform_0, window_bounds = array<i64: 2, 512, 6>}, {pipeline_mode = #tpu.pipeline_mode<synchronous>, transform_indices = @transform_1, window_bounds = array<i64: 6, 32>}, {pipeline_mode = #tpu.pipeline_mode<synchronous>, transform_indices = @transform_2, window_bounds = array<i64: 1, 32>}, {pipeline_mode = #tpu.pipeline_mode<synchronous>, transform_indices = @transform_3, window_bounds = array<i64: 32, 64>}, {pipeline_mode = #tpu.pipeline_mode<synchronous>, transform_indices = @transform_4, window_bounds = array<i64: 32, 64>}, {pipeline_mode = #tpu.pipeline_mode<synchronous>, transform_indices = @transform_5, window_bounds = array<i64: 1, 64>}, {pipeline_mode = #tpu.pipeline_mode<synchronous>, transform_indices = @transform_6, window_bounds = array<i64: 64, 32>}, {pipeline_mode = #tpu.pipeline_mode<synchronous>, transform_indices = @transform_7, window_bounds = array<i64: 1, 32>}, {transform_indices = @transform_8, window_bounds = array<i64: 2, 32, 32>}]} {
    %c0 = arith.constant 0 : index
    %c0_0 = arith.constant 0 : index
    %c0_1 = arith.constant 0 : index
    %0 = vector.load %arg1[%c0, %c0_0, %c0_1] : memref<2x512x6xf32, #tpu.memory_space<vmem>>, vector<2x512x6xf32>
    %1 = vector.shape_cast %0 : vector<2x512x6xf32> to vector<1024x6xf32>
    %2 = arith.truncf %1 : vector<1024x6xf32> to vector<1024x6xbf16>
    %c0_2 = arith.constant 0 : index
    %c0_3 = arith.constant 0 : index
    %3 = vector.load %arg2[%c0_2, %c0_3] : memref<6x32xbf16, #tpu.memory_space<vmem>>, vector<6x32xbf16>
    %cst = arith.constant dense<0.000000e+00> : vector<1024x32xf32>
    %4 = tpu.matmul %2, %3, %cst {dimension_numbers = #tpu.dot_dimension_numbers<[1], [0], [0], [1], [0, 0, 1, 1], [], []>} : vector<1024x6xbf16>, vector<6x32xbf16>, vector<1024x32xf32> -> vector<1024x32xf32>
    %c0_4 = arith.constant 0 : index
    %c0_5 = arith.constant 0 : index
    %5 = vector.load %arg3[%c0_4, %c0_5] : memref<1x32xf32, #tpu.memory_space<vmem>>, vector<1x32xf32>
    %6 = vector.broadcast %5 : vector<1x32xf32> to vector<1024x32xf32>
    %7 = arith.addf %4, %6 : vector<1024x32xf32>
    %cst_6 = arith.constant 0.000000e+00 : f32
    %8 = vector.broadcast %cst_6 : f32 to vector<1024x32xf32>
    %9 = arith.maximumf %7, %8 : vector<1024x32xf32>
    %10 = arith.truncf %9 : vector<1024x32xf32> to vector<1024x32xbf16>
    %c0_7 = arith.constant 0 : index
    %c0_8 = arith.constant 0 : index
    %11 = vector.load %arg5[%c0_7, %c0_8] : memref<32x64xbf16, #tpu.memory_space<vmem>>, vector<32x64xbf16>
    %cst_9 = arith.constant dense<0.000000e+00> : vector<1024x64xf32>
    %12 = tpu.matmul %10, %11, %cst_9 {dimension_numbers = #tpu.dot_dimension_numbers<[1], [0], [0], [1], [0, 0, 1, 1], [], []>} : vector<1024x32xbf16>, vector<32x64xbf16>, vector<1024x64xf32> -> vector<1024x64xf32>
    %13 = vector.extract_strided_slice %9 {offsets = [0, 0], sizes = [512, 32], strides = [1, 1]} : vector<1024x32xf32> to vector<512x32xf32>
    %14 = vector.extract_strided_slice %13 {offsets = [0, 0], sizes = [32, 32], strides = [1, 1]} : vector<512x32xf32> to vector<32x32xf32>
    %15 = vector.extract_strided_slice %13 {offsets = [32, 0], sizes = [32, 32], strides = [1, 1]} : vector<512x32xf32> to vector<32x32xf32>
    %16 = arith.maximumf %14, %15 : vector<32x32xf32>
    %17 = vector.extract_strided_slice %13 {offsets = [64, 0], sizes = [32, 32], strides = [1, 1]} : vector<512x32xf32> to vector<32x32xf32>
    %18 = arith.maximumf %16, %17 : vector<32x32xf32>
    %19 = vector.extract_strided_slice %13 {offsets = [96, 0], sizes = [32, 32], strides = [1, 1]} : vector<512x32xf32> to vector<32x32xf32>
    %20 = arith.maximumf %18, %19 : vector<32x32xf32>
    %21 = vector.extract_strided_slice %13 {offsets = [128, 0], sizes = [32, 32], strides = [1, 1]} : vector<512x32xf32> to vector<32x32xf32>
    %22 = arith.maximumf %20, %21 : vector<32x32xf32>
    %23 = vector.extract_strided_slice %13 {offsets = [160, 0], sizes = [32, 32], strides = [1, 1]} : vector<512x32xf32> to vector<32x32xf32>
    %24 = arith.maximumf %22, %23 : vector<32x32xf32>
    %25 = vector.extract_strided_slice %13 {offsets = [192, 0], sizes = [32, 32], strides = [1, 1]} : vector<512x32xf32> to vector<32x32xf32>
    %26 = arith.maximumf %24, %25 : vector<32x32xf32>
    %27 = vector.extract_strided_slice %13 {offsets = [224, 0], sizes = [32, 32], strides = [1, 1]} : vector<512x32xf32> to vector<32x32xf32>
    %28 = arith.maximumf %26, %27 : vector<32x32xf32>
    %29 = vector.extract_strided_slice %13 {offsets = [256, 0], sizes = [32, 32], strides = [1, 1]} : vector<512x32xf32> to vector<32x32xf32>
    %30 = arith.maximumf %28, %29 : vector<32x32xf32>
    %31 = vector.extract_strided_slice %13 {offsets = [288, 0], sizes = [32, 32], strides = [1, 1]} : vector<512x32xf32> to vector<32x32xf32>
    %32 = arith.maximumf %30, %31 : vector<32x32xf32>
    %33 = vector.extract_strided_slice %13 {offsets = [320, 0], sizes = [32, 32], strides = [1, 1]} : vector<512x32xf32> to vector<32x32xf32>
    %34 = arith.maximumf %32, %33 : vector<32x32xf32>
    %35 = vector.extract_strided_slice %13 {offsets = [352, 0], sizes = [32, 32], strides = [1, 1]} : vector<512x32xf32> to vector<32x32xf32>
    %36 = arith.maximumf %34, %35 : vector<32x32xf32>
    %37 = vector.extract_strided_slice %13 {offsets = [384, 0], sizes = [32, 32], strides = [1, 1]} : vector<512x32xf32> to vector<32x32xf32>
    %38 = arith.maximumf %36, %37 : vector<32x32xf32>
    %39 = vector.extract_strided_slice %13 {offsets = [416, 0], sizes = [32, 32], strides = [1, 1]} : vector<512x32xf32> to vector<32x32xf32>
    %40 = arith.maximumf %38, %39 : vector<32x32xf32>
    %41 = vector.extract_strided_slice %13 {offsets = [448, 0], sizes = [32, 32], strides = [1, 1]} : vector<512x32xf32> to vector<32x32xf32>
    %42 = arith.maximumf %40, %41 : vector<32x32xf32>
    %43 = vector.extract_strided_slice %13 {offsets = [480, 0], sizes = [32, 32], strides = [1, 1]} : vector<512x32xf32> to vector<32x32xf32>
    %44 = arith.maximumf %42, %43 : vector<32x32xf32>
    %45 = arith.truncf %44 : vector<32x32xf32> to vector<32x32xbf16>
    %c0_10 = arith.constant 0 : index
    %c0_11 = arith.constant 0 : index
    %46 = vector.load %arg4[%c0_10, %c0_11] : memref<32x64xbf16, #tpu.memory_space<vmem>>, vector<32x64xbf16>
    %cst_12 = arith.constant dense<0.000000e+00> : vector<32x64xf32>
    %47 = tpu.matmul %45, %46, %cst_12 {dimension_numbers = #tpu.dot_dimension_numbers<[1], [0], [0], [1], [0, 0, 1, 1], [], []>} : vector<32x32xbf16>, vector<32x64xbf16>, vector<32x64xf32> -> vector<32x64xf32>
    %48 = vector.extract_strided_slice %12 {offsets = [0, 0], sizes = [512, 64], strides = [1, 1]} : vector<1024x64xf32> to vector<512x64xf32>
    %49 = vector.shape_cast %48 : vector<512x64xf32> to vector<16x32x64xf32>
    %50 = vector.shape_cast %47 : vector<32x64xf32> to vector<1x32x64xf32>
    %51 = vector.broadcast %50 : vector<1x32x64xf32> to vector<16x32x64xf32>
    %52 = arith.addf %49, %51 : vector<16x32x64xf32>
    %c0_13 = arith.constant 0 : index
    %c0_14 = arith.constant 0 : index
    %53 = vector.load %arg6[%c0_13, %c0_14] : memref<1x64xf32, #tpu.memory_space<vmem>>, vector<1x64xf32>
    %54 = vector.shape_cast %53 : vector<1x64xf32> to vector<1x1x64xf32>
    %55 = vector.broadcast %54 : vector<1x1x64xf32> to vector<16x32x64xf32>
    %56 = arith.addf %52, %55 : vector<16x32x64xf32>
    %cst_15 = arith.constant 0.000000e+00 : f32
    %57 = vector.broadcast %cst_15 : f32 to vector<16x32x64xf32>
    %58 = arith.maximumf %56, %57 : vector<16x32x64xf32>
    %59 = vector.shape_cast %58 : vector<16x32x64xf32> to vector<512x64xf32>
    %60 = arith.truncf %59 : vector<512x64xf32> to vector<512x64xbf16>
    %c0_16 = arith.constant 0 : index
    %c0_17 = arith.constant 0 : index
    %61 = vector.load %arg7[%c0_16, %c0_17] : memref<64x32xbf16, #tpu.memory_space<vmem>>, vector<64x32xbf16>
    %cst_18 = arith.constant dense<0.000000e+00> : vector<512x32xf32>
    %62 = tpu.matmul %60, %61, %cst_18 {dimension_numbers = #tpu.dot_dimension_numbers<[1], [0], [0], [1], [0, 0, 1, 1], [], []>} : vector<512x64xbf16>, vector<64x32xbf16>, vector<512x32xf32> -> vector<512x32xf32>
    %c0_19 = arith.constant 0 : index
    %c0_20 = arith.constant 0 : index
    %63 = vector.load %arg8[%c0_19, %c0_20] : memref<1x32xf32, #tpu.memory_space<vmem>>, vector<1x32xf32>
    %64 = vector.broadcast %63 : vector<1x32xf32> to vector<512x32xf32>
    %65 = arith.addf %62, %64 : vector<512x32xf32>
    %cst_21 = arith.constant 0.000000e+00 : f32
    %66 = vector.broadcast %cst_21 : f32 to vector<512x32xf32>
    %67 = arith.maximumf %65, %66 : vector<512x32xf32>
    %68 = vector.extract_strided_slice %67 {offsets = [0, 0], sizes = [32, 32], strides = [1, 1]} : vector<512x32xf32> to vector<32x32xf32>
    %69 = vector.extract_strided_slice %67 {offsets = [32, 0], sizes = [32, 32], strides = [1, 1]} : vector<512x32xf32> to vector<32x32xf32>
    %70 = arith.maximumf %68, %69 : vector<32x32xf32>
    %71 = vector.extract_strided_slice %67 {offsets = [64, 0], sizes = [32, 32], strides = [1, 1]} : vector<512x32xf32> to vector<32x32xf32>
    %72 = arith.maximumf %70, %71 : vector<32x32xf32>
    %73 = vector.extract_strided_slice %67 {offsets = [96, 0], sizes = [32, 32], strides = [1, 1]} : vector<512x32xf32> to vector<32x32xf32>
    %74 = arith.maximumf %72, %73 : vector<32x32xf32>
    %75 = vector.extract_strided_slice %67 {offsets = [128, 0], sizes = [32, 32], strides = [1, 1]} : vector<512x32xf32> to vector<32x32xf32>
    %76 = arith.maximumf %74, %75 : vector<32x32xf32>
    %77 = vector.extract_strided_slice %67 {offsets = [160, 0], sizes = [32, 32], strides = [1, 1]} : vector<512x32xf32> to vector<32x32xf32>
    %78 = arith.maximumf %76, %77 : vector<32x32xf32>
    %79 = vector.extract_strided_slice %67 {offsets = [192, 0], sizes = [32, 32], strides = [1, 1]} : vector<512x32xf32> to vector<32x32xf32>
    %80 = arith.maximumf %78, %79 : vector<32x32xf32>
    %81 = vector.extract_strided_slice %67 {offsets = [224, 0], sizes = [32, 32], strides = [1, 1]} : vector<512x32xf32> to vector<32x32xf32>
    %82 = arith.maximumf %80, %81 : vector<32x32xf32>
    %83 = vector.extract_strided_slice %67 {offsets = [256, 0], sizes = [32, 32], strides = [1, 1]} : vector<512x32xf32> to vector<32x32xf32>
    %84 = arith.maximumf %82, %83 : vector<32x32xf32>
    %85 = vector.extract_strided_slice %67 {offsets = [288, 0], sizes = [32, 32], strides = [1, 1]} : vector<512x32xf32> to vector<32x32xf32>
    %86 = arith.maximumf %84, %85 : vector<32x32xf32>
    %87 = vector.extract_strided_slice %67 {offsets = [320, 0], sizes = [32, 32], strides = [1, 1]} : vector<512x32xf32> to vector<32x32xf32>
    %88 = arith.maximumf %86, %87 : vector<32x32xf32>
    %89 = vector.extract_strided_slice %67 {offsets = [352, 0], sizes = [32, 32], strides = [1, 1]} : vector<512x32xf32> to vector<32x32xf32>
    %90 = arith.maximumf %88, %89 : vector<32x32xf32>
    %91 = vector.extract_strided_slice %67 {offsets = [384, 0], sizes = [32, 32], strides = [1, 1]} : vector<512x32xf32> to vector<32x32xf32>
    %92 = arith.maximumf %90, %91 : vector<32x32xf32>
    %93 = vector.extract_strided_slice %67 {offsets = [416, 0], sizes = [32, 32], strides = [1, 1]} : vector<512x32xf32> to vector<32x32xf32>
    %94 = arith.maximumf %92, %93 : vector<32x32xf32>
    %95 = vector.extract_strided_slice %67 {offsets = [448, 0], sizes = [32, 32], strides = [1, 1]} : vector<512x32xf32> to vector<32x32xf32>
    %96 = arith.maximumf %94, %95 : vector<32x32xf32>
    %97 = vector.extract_strided_slice %67 {offsets = [480, 0], sizes = [32, 32], strides = [1, 1]} : vector<512x32xf32> to vector<32x32xf32>
    %98 = arith.maximumf %96, %97 : vector<32x32xf32>
    %c0_22 = arith.constant 0 : index
    %c0_23 = arith.constant 0 : index
    %c0_24 = arith.constant 0 : index
    %99 = vector.load %arg9[%c0_22, %c0_23, %c0_24] : memref<2x32x32xf32, #tpu.memory_space<vmem>>, vector<1x32x32xf32>
    %100 = vector.shape_cast %99 : vector<1x32x32xf32> to vector<32x32xf32>
    %101 = vector.shape_cast %98 : vector<32x32xf32> to vector<1x32x32xf32>
    tpu.vector_store %arg9[%c0_22, %c0_23, %c0_24], %101 {strides = array<i32>} : memref<2x32x32xf32, #tpu.memory_space<vmem>>, vector<1x32x32xf32>,
    %102 = vector.extract_strided_slice %9 {offsets = [512, 0], sizes = [512, 32], strides = [1, 1]} : vector<1024x32xf32> to vector<512x32xf32>
    %103 = vector.extract_strided_slice %102 {offsets = [0, 0], sizes = [32, 32], strides = [1, 1]} : vector<512x32xf32> to vector<32x32xf32>
    %104 = vector.extract_strided_slice %102 {offsets = [32, 0], sizes = [32, 32], strides = [1, 1]} : vector<512x32xf32> to vector<32x32xf32>
    %105 = arith.maximumf %103, %104 : vector<32x32xf32>
    %106 = vector.extract_strided_slice %102 {offsets = [64, 0], sizes = [32, 32], strides = [1, 1]} : vector<512x32xf32> to vector<32x32xf32>
    %107 = arith.maximumf %105, %106 : vector<32x32xf32>
    %108 = vector.extract_strided_slice %102 {offsets = [96, 0], sizes = [32, 32], strides = [1, 1]} : vector<512x32xf32> to vector<32x32xf32>
    %109 = arith.maximumf %107, %108 : vector<32x32xf32>
    %110 = vector.extract_strided_slice %102 {offsets = [128, 0], sizes = [32, 32], strides = [1, 1]} : vector<512x32xf32> to vector<32x32xf32>
    %111 = arith.maximumf %109, %110 : vector<32x32xf32>
    %112 = vector.extract_strided_slice %102 {offsets = [160, 0], sizes = [32, 32], strides = [1, 1]} : vector<512x32xf32> to vector<32x32xf32>
    %113 = arith.maximumf %111, %112 : vector<32x32xf32>
    %114 = vector.extract_strided_slice %102 {offsets = [192, 0], sizes = [32, 32], strides = [1, 1]} : vector<512x32xf32> to vector<32x32xf32>
    %115 = arith.maximumf %113, %114 : vector<32x32xf32>
    %116 = vector.extract_strided_slice %102 {offsets = [224, 0], sizes = [32, 32], strides = [1, 1]} : vector<512x32xf32> to vector<32x32xf32>
    %117 = arith.maximumf %115, %116 : vector<32x32xf32>
    %118 = vector.extract_strided_slice %102 {offsets = [256, 0], sizes = [32, 32], strides = [1, 1]} : vector<512x32xf32> to vector<32x32xf32>
    %119 = arith.maximumf %117, %118 : vector<32x32xf32>
    %120 = vector.extract_strided_slice %102 {offsets = [288, 0], sizes = [32, 32], strides = [1, 1]} : vector<512x32xf32> to vector<32x32xf32>
    %121 = arith.maximumf %119, %120 : vector<32x32xf32>
    %122 = vector.extract_strided_slice %102 {offsets = [320, 0], sizes = [32, 32], strides = [1, 1]} : vector<512x32xf32> to vector<32x32xf32>
    %123 = arith.maximumf %121, %122 : vector<32x32xf32>
    %124 = vector.extract_strided_slice %102 {offsets = [352, 0], sizes = [32, 32], strides = [1, 1]} : vector<512x32xf32> to vector<32x32xf32>
    %125 = arith.maximumf %123, %124 : vector<32x32xf32>
    %126 = vector.extract_strided_slice %102 {offsets = [384, 0], sizes = [32, 32], strides = [1, 1]} : vector<512x32xf32> to vector<32x32xf32>
    %127 = arith.maximumf %125, %126 : vector<32x32xf32>
    %128 = vector.extract_strided_slice %102 {offsets = [416, 0], sizes = [32, 32], strides = [1, 1]} : vector<512x32xf32> to vector<32x32xf32>
    %129 = arith.maximumf %127, %128 : vector<32x32xf32>
    %130 = vector.extract_strided_slice %102 {offsets = [448, 0], sizes = [32, 32], strides = [1, 1]} : vector<512x32xf32> to vector<32x32xf32>
    %131 = arith.maximumf %129, %130 : vector<32x32xf32>
    %132 = vector.extract_strided_slice %102 {offsets = [480, 0], sizes = [32, 32], strides = [1, 1]} : vector<512x32xf32> to vector<32x32xf32>
    %133 = arith.maximumf %131, %132 : vector<32x32xf32>
    %134 = arith.truncf %133 : vector<32x32xf32> to vector<32x32xbf16>
    %c0_25 = arith.constant 0 : index
    %c0_26 = arith.constant 0 : index
    %135 = vector.load %arg4[%c0_25, %c0_26] : memref<32x64xbf16, #tpu.memory_space<vmem>>, vector<32x64xbf16>
    %cst_27 = arith.constant dense<0.000000e+00> : vector<32x64xf32>
    %136 = tpu.matmul %134, %135, %cst_27 {dimension_numbers = #tpu.dot_dimension_numbers<[1], [0], [0], [1], [0, 0, 1, 1], [], []>} : vector<32x32xbf16>, vector<32x64xbf16>, vector<32x64xf32> -> vector<32x64xf32>
    %137 = vector.extract_strided_slice %12 {offsets = [512, 0], sizes = [512, 64], strides = [1, 1]} : vector<1024x64xf32> to vector<512x64xf32>
    %138 = vector.shape_cast %137 : vector<512x64xf32> to vector<16x32x64xf32>
    %139 = vector.shape_cast %136 : vector<32x64xf32> to vector<1x32x64xf32>
    %140 = vector.broadcast %139 : vector<1x32x64xf32> to vector<16x32x64xf32>
    %141 = arith.addf %138, %140 : vector<16x32x64xf32>
    %c0_28 = arith.constant 0 : index
    %c0_29 = arith.constant 0 : index
    %142 = vector.load %arg6[%c0_28, %c0_29] : memref<1x64xf32, #tpu.memory_space<vmem>>, vector<1x64xf32>
    %143 = vector.shape_cast %142 : vector<1x64xf32> to vector<1x1x64xf32>
    %144 = vector.broadcast %143 : vector<1x1x64xf32> to vector<16x32x64xf32>
    %145 = arith.addf %141, %144 : vector<16x32x64xf32>
    %cst_30 = arith.constant 0.000000e+00 : f32
    %146 = vector.broadcast %cst_30 : f32 to vector<16x32x64xf32>
    %147 = arith.maximumf %145, %146 : vector<16x32x64xf32>
    %148 = vector.shape_cast %147 : vector<16x32x64xf32> to vector<512x64xf32>
    %149 = arith.truncf %148 : vector<512x64xf32> to vector<512x64xbf16>
    %c0_31 = arith.constant 0 : index
    %c0_32 = arith.constant 0 : index
    %150 = vector.load %arg7[%c0_31, %c0_32] : memref<64x32xbf16, #tpu.memory_space<vmem>>, vector<64x32xbf16>
    %cst_33 = arith.constant dense<0.000000e+00> : vector<512x32xf32>
    %151 = tpu.matmul %149, %150, %cst_33 {dimension_numbers = #tpu.dot_dimension_numbers<[1], [0], [0], [1], [0, 0, 1, 1], [], []>} : vector<512x64xbf16>, vector<64x32xbf16>, vector<512x32xf32> -> vector<512x32xf32>
    %c0_34 = arith.constant 0 : index
    %c0_35 = arith.constant 0 : index
    %152 = vector.load %arg8[%c0_34, %c0_35] : memref<1x32xf32, #tpu.memory_space<vmem>>, vector<1x32xf32>
    %153 = vector.broadcast %152 : vector<1x32xf32> to vector<512x32xf32>
    %154 = arith.addf %151, %153 : vector<512x32xf32>
    %cst_36 = arith.constant 0.000000e+00 : f32
    %155 = vector.broadcast %cst_36 : f32 to vector<512x32xf32>
    %156 = arith.maximumf %154, %155 : vector<512x32xf32>
    %157 = vector.extract_strided_slice %156 {offsets = [0, 0], sizes = [32, 32], strides = [1, 1]} : vector<512x32xf32> to vector<32x32xf32>
    %158 = vector.extract_strided_slice %156 {offsets = [32, 0], sizes = [32, 32], strides = [1, 1]} : vector<512x32xf32> to vector<32x32xf32>
    %159 = arith.maximumf %157, %158 : vector<32x32xf32>
    %160 = vector.extract_strided_slice %156 {offsets = [64, 0], sizes = [32, 32], strides = [1, 1]} : vector<512x32xf32> to vector<32x32xf32>
    %161 = arith.maximumf %159, %160 : vector<32x32xf32>
    %162 = vector.extract_strided_slice %156 {offsets = [96, 0], sizes = [32, 32], strides = [1, 1]} : vector<512x32xf32> to vector<32x32xf32>
    %163 = arith.maximumf %161, %162 : vector<32x32xf32>
    %164 = vector.extract_strided_slice %156 {offsets = [128, 0], sizes = [32, 32], strides = [1, 1]} : vector<512x32xf32> to vector<32x32xf32>
    %165 = arith.maximumf %163, %164 : vector<32x32xf32>
    %166 = vector.extract_strided_slice %156 {offsets = [160, 0], sizes = [32, 32], strides = [1, 1]} : vector<512x32xf32> to vector<32x32xf32>
    %167 = arith.maximumf %165, %166 : vector<32x32xf32>
    %168 = vector.extract_strided_slice %156 {offsets = [192, 0], sizes = [32, 32], strides = [1, 1]} : vector<512x32xf32> to vector<32x32xf32>
    %169 = arith.maximumf %167, %168 : vector<32x32xf32>
    %170 = vector.extract_strided_slice %156 {offsets = [224, 0], sizes = [32, 32], strides = [1, 1]} : vector<512x32xf32> to vector<32x32xf32>
    %171 = arith.maximumf %169, %170 : vector<32x32xf32>
    %172 = vector.extract_strided_slice %156 {offsets = [256, 0], sizes = [32, 32], strides = [1, 1]} : vector<512x32xf32> to vector<32x32xf32>
    %173 = arith.maximumf %171, %172 : vector<32x32xf32>
    %174 = vector.extract_strided_slice %156 {offsets = [288, 0], sizes = [32, 32], strides = [1, 1]} : vector<512x32xf32> to vector<32x32xf32>
    %175 = arith.maximumf %173, %174 : vector<32x32xf32>
    %176 = vector.extract_strided_slice %156 {offsets = [320, 0], sizes = [32, 32], strides = [1, 1]} : vector<512x32xf32> to vector<32x32xf32>
    %177 = arith.maximumf %175, %176 : vector<32x32xf32>
    %178 = vector.extract_strided_slice %156 {offsets = [352, 0], sizes = [32, 32], strides = [1, 1]} : vector<512x32xf32> to vector<32x32xf32>
    %179 = arith.maximumf %177, %178 : vector<32x32xf32>
    %180 = vector.extract_strided_slice %156 {offsets = [384, 0], sizes = [32, 32], strides = [1, 1]} : vector<512x32xf32> to vector<32x32xf32>
    %181 = arith.maximumf %179, %180 : vector<32x32xf32>
    %182 = vector.extract_strided_slice %156 {offsets = [416, 0], sizes = [32, 32], strides = [1, 1]} : vector<512x32xf32> to vector<32x32xf32>
    %183 = arith.maximumf %181, %182 : vector<32x32xf32>
    %184 = vector.extract_strided_slice %156 {offsets = [448, 0], sizes = [32, 32], strides = [1, 1]} : vector<512x32xf32> to vector<32x32xf32>
    %185 = arith.maximumf %183, %184 : vector<32x32xf32>
    %186 = vector.extract_strided_slice %156 {offsets = [480, 0], sizes = [32, 32], strides = [1, 1]} : vector<512x32xf32> to vector<32x32xf32>
    %187 = arith.maximumf %185, %186 : vector<32x32xf32>
    %c1 = arith.constant 1 : index
    %c0_37 = arith.constant 0 : index
    %c0_38 = arith.constant 0 : index
    %188 = vector.load %arg9[%c1, %c0_37, %c0_38] : memref<2x32x32xf32, #tpu.memory_space<vmem>>, vector<1x32x32xf32>
    %189 = vector.shape_cast %188 : vector<1x32x32xf32> to vector<32x32xf32>
    %190 = vector.shape_cast %187 : vector<32x32xf32> to vector<1x32x32xf32>
    tpu.vector_store %arg9[%c1, %c0_37, %c0_38], %190 {strides = array<i32>} : memref<2x32x32xf32, #tpu.memory_space<vmem>>, vector<1x32x32xf32>,
    return
  }
  func.func @transform_0(%arg0: i32) -> (i32, i32, i32) {
    %c0_i32 = arith.constant 0 : i32
    %c0_i32_0 = arith.constant 0 : i32
    %c0_i32_1 = arith.constant 0 : i32
    return %arg0, %c0_i32, %c0_i32_0 : i32, i32, i32
  }
  func.func @transform_1(%arg0: i32) -> (i32, i32) {
    %c0_i32 = arith.constant 0 : i32
    %c0_i32_0 = arith.constant 0 : i32
    %c0_i32_1 = arith.constant 0 : i32
    return %c0_i32, %c0_i32_0 : i32, i32
  }
  func.func @transform_2(%arg0: i32) -> (i32, i32) {
    %c0_i32 = arith.constant 0 : i32
    %c0_i32_0 = arith.constant 0 : i32
    %c0_i32_1 = arith.constant 0 : i32
    return %c0_i32, %c0_i32_0 : i32, i32
  }
  func.func @transform_3(%arg0: i32) -> (i32, i32) {
    %c0_i32 = arith.constant 0 : i32
    %c0_i32_0 = arith.constant 0 : i32
    %c0_i32_1 = arith.constant 0 : i32
    return %c0_i32, %c0_i32_0 : i32, i32
  }
  func.func @transform_4(%arg0: i32) -> (i32, i32) {
    %c0_i32 = arith.constant 0 : i32
    %c0_i32_0 = arith.constant 0 : i32
    %c0_i32_1 = arith.constant 0 : i32
    return %c0_i32, %c0_i32_0 : i32, i32
  }
  func.func @transform_5(%arg0: i32) -> (i32, i32) {
    %c0_i32 = arith.constant 0 : i32
    %c0_i32_0 = arith.constant 0 : i32
    %c0_i32_1 = arith.constant 0 : i32
    return %c0_i32, %c0_i32_0 : i32, i32
  }
  func.func @transform_6(%arg0: i32) -> (i32, i32) {
    %c0_i32 = arith.constant 0 : i32
    %c0_i32_0 = arith.constant 0 : i32
    %c0_i32_1 = arith.constant 0 : i32
    return %c0_i32, %c0_i32_0 : i32, i32
  }
  func.func @transform_7(%arg0: i32) -> (i32, i32) {
    %c0_i32 = arith.constant 0 : i32
    %c0_i32_0 = arith.constant 0 : i32
    %c0_i32_1 = arith.constant 0 : i32
    return %c0_i32, %c0_i32_0 : i32, i32
  }
  func.func @transform_8(%arg0: i32) -> (i32, i32, i32) {
    %c0_i32 = arith.constant 0 : i32
    %c0_i32_0 = arith.constant 0 : i32
    %c0_i32_1 = arith.constant 0 : i32
    return %arg0, %c0_i32, %c0_i32_0 : i32, i32, i32
  }
}

module attributes {stable_mosaic.version = 11 : i64} {
  func.func @_token_embed_kernel(%arg0: i32, %arg1: memref<2x32x32xf32, #tpu.memory_space<vmem>>, %arg2: memref<2x32x3xf32, #tpu.memory_space<vmem>>, %arg3: memref<1x32xf32, #tpu.memory_space<vmem>>, %arg4: memref<1x32xf32, #tpu.memory_space<vmem>>, %arg5: memref<32x32xbf16, #tpu.memory_space<vmem>>, %arg6: memref<1x32xf32, #tpu.memory_space<vmem>>, %arg7: memref<3x128xbf16, #tpu.memory_space<vmem>>, %arg8: memref<1x128xf32, #tpu.memory_space<vmem>>, %arg9: memref<128x32xbf16, #tpu.memory_space<vmem>>, %arg10: memref<1x32xf32, #tpu.memory_space<vmem>>, %arg11: memref<2x33x32xf32, #tpu.memory_space<vmem>>, %arg12: memref<2x33x32xf32, #tpu.memory_space<vmem>>) attributes {dimension_semantics = [#tpu.dimension_semantics<parallel>], iteration_bounds = array<i64: 1>, scalar_prefetch = 0 : i64, scratch_operands = 0 : i64, tpu.core_type = #tpu.core_type<tc>, window_params = [{transform_indices = @transform_0, window_bounds = array<i64: 2, 32, 32>}, {transform_indices = @transform_1, window_bounds = array<i64: 2, 32, 3>}, {pipeline_mode = #tpu.pipeline_mode<synchronous>, transform_indices = @transform_2, window_bounds = array<i64: 1, 32>}, {pipeline_mode = #tpu.pipeline_mode<synchronous>, transform_indices = @transform_3, window_bounds = array<i64: 1, 32>}, {pipeline_mode = #tpu.pipeline_mode<synchronous>, transform_indices = @transform_4, window_bounds = array<i64: 32, 32>}, {pipeline_mode = #tpu.pipeline_mode<synchronous>, transform_indices = @transform_5, window_bounds = array<i64: 1, 32>}, {pipeline_mode = #tpu.pipeline_mode<synchronous>, transform_indices = @transform_6, window_bounds = array<i64: 3, 128>}, {pipeline_mode = #tpu.pipeline_mode<synchronous>, transform_indices = @transform_7, window_bounds = array<i64: 1, 128>}, {pipeline_mode = #tpu.pipeline_mode<synchronous>, transform_indices = @transform_8, window_bounds = array<i64: 128, 32>}, {pipeline_mode = #tpu.pipeline_mode<synchronous>, transform_indices = @transform_9, window_bounds = array<i64: 1, 32>}, {transform_indices = @transform_10, window_bounds = array<i64: 2, 33, 32>}, {transform_indices = @transform_11, window_bounds = array<i64: 2, 33, 32>}]} {
    %c0 = arith.constant 0 : index
    %c0_0 = arith.constant 0 : index
    %c0_1 = arith.constant 0 : index
    %0 = vector.load %arg1[%c0, %c0_0, %c0_1] : memref<2x32x32xf32, #tpu.memory_space<vmem>>, vector<2x32x32xf32>
    %1 = vector.shape_cast %0 : vector<2x32x32xf32> to vector<64x32xf32>
    %2 = arith.truncf %1 : vector<64x32xf32> to vector<64x32xbf16>
    %c0_2 = arith.constant 0 : index
    %c0_3 = arith.constant 0 : index
    %c0_4 = arith.constant 0 : index
    %3 = vector.load %arg2[%c0_2, %c0_3, %c0_4] : memref<2x32x3xf32, #tpu.memory_space<vmem>>, vector<2x32x3xf32>
    %4 = vector.shape_cast %3 : vector<2x32x3xf32> to vector<64x3xf32>
    %5 = arith.truncf %4 : vector<64x3xf32> to vector<64x3xbf16>
    %c0_5 = arith.constant 0 : index
    %c0_6 = arith.constant 0 : index
    %6 = vector.load %arg5[%c0_5, %c0_6] : memref<32x32xbf16, #tpu.memory_space<vmem>>, vector<32x32xbf16>
    %cst = arith.constant dense<0.000000e+00> : vector<64x32xf32>
    %7 = tpu.matmul %2, %6, %cst {dimension_numbers = #tpu.dot_dimension_numbers<[1], [0], [0], [1], [0, 0, 1, 1], [], []>} : vector<64x32xbf16>, vector<32x32xbf16>, vector<64x32xf32> -> vector<64x32xf32>
    %c0_7 = arith.constant 0 : index
    %c0_8 = arith.constant 0 : index
    %8 = vector.load %arg6[%c0_7, %c0_8] : memref<1x32xf32, #tpu.memory_space<vmem>>, vector<1x32xf32>
    %9 = vector.broadcast %8 : vector<1x32xf32> to vector<64x32xf32>
    %10 = arith.addf %7, %9 : vector<64x32xf32>
    %c0_9 = arith.constant 0 : index
    %c0_10 = arith.constant 0 : index
    %11 = vector.load %arg7[%c0_9, %c0_10] : memref<3x128xbf16, #tpu.memory_space<vmem>>, vector<3x128xbf16>
    %cst_11 = arith.constant dense<0.000000e+00> : vector<64x128xf32>
    %12 = tpu.matmul %5, %11, %cst_11 {dimension_numbers = #tpu.dot_dimension_numbers<[1], [0], [0], [1], [0, 0, 1, 1], [], []>} : vector<64x3xbf16>, vector<3x128xbf16>, vector<64x128xf32> -> vector<64x128xf32>
    %c0_12 = arith.constant 0 : index
    %c0_13 = arith.constant 0 : index
    %13 = vector.load %arg8[%c0_12, %c0_13] : memref<1x128xf32, #tpu.memory_space<vmem>>, vector<1x128xf32>
    %14 = vector.broadcast %13 : vector<1x128xf32> to vector<64x128xf32>
    %15 = arith.addf %12, %14 : vector<64x128xf32>
    %cst_14 = arith.constant 5.000000e-01 : f32
    %16 = vector.broadcast %cst_14 : f32 to vector<64x128xf32>
    %17 = arith.mulf %16, %15 : vector<64x128xf32>
    %cst_15 = arith.constant 4.471500e-02 : f32
    %18 = vector.broadcast %cst_15 : f32 to vector<64x128xf32>
    %19 = arith.mulf %18, %15 : vector<64x128xf32>
    %20 = arith.mulf %19, %15 : vector<64x128xf32>
    %21 = arith.mulf %20, %15 : vector<64x128xf32>
    %22 = arith.addf %15, %21 : vector<64x128xf32>
    %cst_16 = arith.constant 0.797884583 : f32
    %23 = vector.broadcast %cst_16 : f32 to vector<64x128xf32>
    %24 = arith.mulf %23, %22 : vector<64x128xf32>
    %25 = math.tanh %24 : vector<64x128xf32>
    %cst_17 = arith.constant 1.000000e+00 : f32
    %26 = vector.broadcast %cst_17 : f32 to vector<64x128xf32>
    %27 = arith.addf %26, %25 : vector<64x128xf32>
    %28 = arith.mulf %17, %27 : vector<64x128xf32>
    %29 = arith.truncf %28 : vector<64x128xf32> to vector<64x128xbf16>
    %c0_18 = arith.constant 0 : index
    %c0_19 = arith.constant 0 : index
    %30 = vector.load %arg9[%c0_18, %c0_19] : memref<128x32xbf16, #tpu.memory_space<vmem>>, vector<128x32xbf16>
    %cst_20 = arith.constant dense<0.000000e+00> : vector<64x32xf32>
    %31 = tpu.matmul %29, %30, %cst_20 {dimension_numbers = #tpu.dot_dimension_numbers<[1], [0], [0], [1], [0, 0, 1, 1], [], []>} : vector<64x128xbf16>, vector<128x32xbf16>, vector<64x32xf32> -> vector<64x32xf32>
    %c0_21 = arith.constant 0 : index
    %c0_22 = arith.constant 0 : index
    %32 = vector.load %arg10[%c0_21, %c0_22] : memref<1x32xf32, #tpu.memory_space<vmem>>, vector<1x32xf32>
    %33 = vector.broadcast %32 : vector<1x32xf32> to vector<64x32xf32>
    %34 = arith.addf %31, %33 : vector<64x32xf32>
    %c0_23 = arith.constant 0 : index
    %c0_24 = arith.constant 0 : index
    %35 = vector.load %arg3[%c0_23, %c0_24] : memref<1x32xf32, #tpu.memory_space<vmem>>, vector<1x32xf32>
    %c0_25 = arith.constant 0 : index
    %c0_26 = arith.constant 0 : index
    %36 = vector.load %arg4[%c0_25, %c0_26] : memref<1x32xf32, #tpu.memory_space<vmem>>, vector<1x32xf32>
    %37 = vector.extract_strided_slice %10 {offsets = [0, 0], sizes = [32, 32], strides = [1, 1]} : vector<64x32xf32> to vector<32x32xf32>
    %38 = tpu.concatenate %35, %37 in 0 : vector<1x32xf32>, vector<32x32xf32> -> vector<33x32xf32>
    %c0_27 = arith.constant 0 : index
    %c0_28 = arith.constant 0 : index
    %c0_29 = arith.constant 0 : index
    %39 = vector.load %arg11[%c0_27, %c0_28, %c0_29] : memref<2x33x32xf32, #tpu.memory_space<vmem>>, vector<1x33x32xf32>
    %40 = vector.shape_cast %39 : vector<1x33x32xf32> to vector<33x32xf32>
    %41 = vector.shape_cast %38 : vector<33x32xf32> to vector<1x33x32xf32>
    tpu.vector_store %arg11[%c0_27, %c0_28, %c0_29], %41 {strides = array<i32>} : memref<2x33x32xf32, #tpu.memory_space<vmem>>, vector<1x33x32xf32>,
    %42 = vector.extract_strided_slice %34 {offsets = [0, 0], sizes = [32, 32], strides = [1, 1]} : vector<64x32xf32> to vector<32x32xf32>
    %43 = tpu.concatenate %36, %42 in 0 : vector<1x32xf32>, vector<32x32xf32> -> vector<33x32xf32>
    %c0_30 = arith.constant 0 : index
    %c0_31 = arith.constant 0 : index
    %c0_32 = arith.constant 0 : index
    %44 = vector.load %arg12[%c0_30, %c0_31, %c0_32] : memref<2x33x32xf32, #tpu.memory_space<vmem>>, vector<1x33x32xf32>
    %45 = vector.shape_cast %44 : vector<1x33x32xf32> to vector<33x32xf32>
    %46 = vector.shape_cast %43 : vector<33x32xf32> to vector<1x33x32xf32>
    tpu.vector_store %arg12[%c0_30, %c0_31, %c0_32], %46 {strides = array<i32>} : memref<2x33x32xf32, #tpu.memory_space<vmem>>, vector<1x33x32xf32>,
    %47 = vector.extract_strided_slice %10 {offsets = [32, 0], sizes = [32, 32], strides = [1, 1]} : vector<64x32xf32> to vector<32x32xf32>
    %48 = tpu.concatenate %35, %47 in 0 : vector<1x32xf32>, vector<32x32xf32> -> vector<33x32xf32>
    %c1 = arith.constant 1 : index
    %c0_33 = arith.constant 0 : index
    %c0_34 = arith.constant 0 : index
    %49 = vector.load %arg11[%c1, %c0_33, %c0_34] : memref<2x33x32xf32, #tpu.memory_space<vmem>>, vector<1x33x32xf32>
    %50 = vector.shape_cast %49 : vector<1x33x32xf32> to vector<33x32xf32>
    %51 = vector.shape_cast %48 : vector<33x32xf32> to vector<1x33x32xf32>
    tpu.vector_store %arg11[%c1, %c0_33, %c0_34], %51 {strides = array<i32>} : memref<2x33x32xf32, #tpu.memory_space<vmem>>, vector<1x33x32xf32>,
    %52 = vector.extract_strided_slice %34 {offsets = [32, 0], sizes = [32, 32], strides = [1, 1]} : vector<64x32xf32> to vector<32x32xf32>
    %53 = tpu.concatenate %36, %52 in 0 : vector<1x32xf32>, vector<32x32xf32> -> vector<33x32xf32>
    %c1_35 = arith.constant 1 : index
    %c0_36 = arith.constant 0 : index
    %c0_37 = arith.constant 0 : index
    %54 = vector.load %arg12[%c1_35, %c0_36, %c0_37] : memref<2x33x32xf32, #tpu.memory_space<vmem>>, vector<1x33x32xf32>
    %55 = vector.shape_cast %54 : vector<1x33x32xf32> to vector<33x32xf32>
    %56 = vector.shape_cast %53 : vector<33x32xf32> to vector<1x33x32xf32>
    tpu.vector_store %arg12[%c1_35, %c0_36, %c0_37], %56 {strides = array<i32>} : memref<2x33x32xf32, #tpu.memory_space<vmem>>, vector<1x33x32xf32>,
    return
  }
  func.func @transform_0(%arg0: i32) -> (i32, i32, i32) {
    %c0_i32 = arith.constant 0 : i32
    %c0_i32_0 = arith.constant 0 : i32
    %c0_i32_1 = arith.constant 0 : i32
    return %arg0, %c0_i32, %c0_i32_0 : i32, i32, i32
  }
  func.func @transform_1(%arg0: i32) -> (i32, i32, i32) {
    %c0_i32 = arith.constant 0 : i32
    %c0_i32_0 = arith.constant 0 : i32
    %c0_i32_1 = arith.constant 0 : i32
    return %arg0, %c0_i32, %c0_i32_0 : i32, i32, i32
  }
  func.func @transform_2(%arg0: i32) -> (i32, i32) {
    %c0_i32 = arith.constant 0 : i32
    %c0_i32_0 = arith.constant 0 : i32
    %c0_i32_1 = arith.constant 0 : i32
    return %c0_i32, %c0_i32_0 : i32, i32
  }
  func.func @transform_3(%arg0: i32) -> (i32, i32) {
    %c0_i32 = arith.constant 0 : i32
    %c0_i32_0 = arith.constant 0 : i32
    %c0_i32_1 = arith.constant 0 : i32
    return %c0_i32, %c0_i32_0 : i32, i32
  }
  func.func @transform_4(%arg0: i32) -> (i32, i32) {
    %c0_i32 = arith.constant 0 : i32
    %c0_i32_0 = arith.constant 0 : i32
    %c0_i32_1 = arith.constant 0 : i32
    return %c0_i32, %c0_i32_0 : i32, i32
  }
  func.func @transform_5(%arg0: i32) -> (i32, i32) {
    %c0_i32 = arith.constant 0 : i32
    %c0_i32_0 = arith.constant 0 : i32
    %c0_i32_1 = arith.constant 0 : i32
    return %c0_i32, %c0_i32_0 : i32, i32
  }
  func.func @transform_6(%arg0: i32) -> (i32, i32) {
    %c0_i32 = arith.constant 0 : i32
    %c0_i32_0 = arith.constant 0 : i32
    %c0_i32_1 = arith.constant 0 : i32
    return %c0_i32, %c0_i32_0 : i32, i32
  }
  func.func @transform_7(%arg0: i32) -> (i32, i32) {
    %c0_i32 = arith.constant 0 : i32
    %c0_i32_0 = arith.constant 0 : i32
    %c0_i32_1 = arith.constant 0 : i32
    return %c0_i32, %c0_i32_0 : i32, i32
  }
  func.func @transform_8(%arg0: i32) -> (i32, i32) {
    %c0_i32 = arith.constant 0 : i32
    %c0_i32_0 = arith.constant 0 : i32
    %c0_i32_1 = arith.constant 0 : i32
    return %c0_i32, %c0_i32_0 : i32, i32
  }
  func.func @transform_9(%arg0: i32) -> (i32, i32) {
    %c0_i32 = arith.constant 0 : i32
    %c0_i32_0 = arith.constant 0 : i32
    %c0_i32_1 = arith.constant 0 : i32
    return %c0_i32, %c0_i32_0 : i32, i32
  }
  func.func @transform_10(%arg0: i32) -> (i32, i32, i32) {
    %c0_i32 = arith.constant 0 : i32
    %c0_i32_0 = arith.constant 0 : i32
    %c0_i32_1 = arith.constant 0 : i32
    return %arg0, %c0_i32, %c0_i32_0 : i32, i32, i32
  }
  func.func @transform_11(%arg0: i32) -> (i32, i32, i32) {
    %c0_i32 = arith.constant 0 : i32
    %c0_i32_0 = arith.constant 0 : i32
    %c0_i32_1 = arith.constant 0 : i32
    return %arg0, %c0_i32, %c0_i32_0 : i32, i32, i32
  }
}

module attributes {stable_mosaic.version = 11 : i64} {
  func.func @_vit_stack_kernel(%arg0: i32, %arg1: i32, %arg2: memref<1x33x32xf32, #tpu.memory_space<vmem>>, %arg3: memref<1x33x32xf32, #tpu.memory_space<vmem>>, %arg4: memref<1x1x32xf32, #tpu.memory_space<vmem>>, %arg5: memref<1x1x32xf32, #tpu.memory_space<vmem>>, %arg6: memref<1x32x96xbf16, #tpu.memory_space<vmem>>, %arg7: memref<1x1x96xf32, #tpu.memory_space<vmem>>, %arg8: memref<1x32x32xbf16, #tpu.memory_space<vmem>>, %arg9: memref<1x1x32xf32, #tpu.memory_space<vmem>>, %arg10: memref<1x1x32xf32, #tpu.memory_space<vmem>>, %arg11: memref<1x1x32xf32, #tpu.memory_space<vmem>>, %arg12: memref<1x32x128xbf16, #tpu.memory_space<vmem>>, %arg13: memref<1x1x128xf32, #tpu.memory_space<vmem>>, %arg14: memref<1x128x32xbf16, #tpu.memory_space<vmem>>, %arg15: memref<1x1x32xf32, #tpu.memory_space<vmem>>, %arg16: memref<1x32xf32, #tpu.memory_space<vmem>>, %arg17: memref<1x32xf32, #tpu.memory_space<vmem>>, %arg18: memref<1x33x32xf32, #tpu.memory_space<vmem>>) attributes {dimension_semantics = [#tpu.dimension_semantics<parallel>, #tpu.dimension_semantics<arbitrary>], iteration_bounds = array<i64: 2, 2>, scalar_prefetch = 0 : i64, scratch_operands = 0 : i64, tpu.core_type = #tpu.core_type<tc>, window_params = [{transform_indices = @transform_0, window_bounds = array<i64: 1, 33, 32>}, {transform_indices = @transform_1, window_bounds = array<i64: 1, 33, 32>}, {transform_indices = @transform_2, window_bounds = array<i64: 1, 1, 32>}, {transform_indices = @transform_3, window_bounds = array<i64: 1, 1, 32>}, {transform_indices = @transform_4, window_bounds = array<i64: 1, 32, 96>}, {transform_indices = @transform_5, window_bounds = array<i64: 1, 1, 96>}, {transform_indices = @transform_6, window_bounds = array<i64: 1, 32, 32>}, {transform_indices = @transform_7, window_bounds = array<i64: 1, 1, 32>}, {transform_indices = @transform_8, window_bounds = array<i64: 1, 1, 32>}, {transform_indices = @transform_9, window_bounds = array<i64: 1, 1, 32>}, {transform_indices = @transform_10, window_bounds = array<i64: 1, 32, 128>}, {transform_indices = @transform_11, window_bounds = array<i64: 1, 1, 128>}, {transform_indices = @transform_12, window_bounds = array<i64: 1, 128, 32>}, {transform_indices = @transform_13, window_bounds = array<i64: 1, 1, 32>}, {pipeline_mode = #tpu.pipeline_mode<synchronous>, transform_indices = @transform_14, window_bounds = array<i64: 1, 32>}, {pipeline_mode = #tpu.pipeline_mode<synchronous>, transform_indices = @transform_15, window_bounds = array<i64: 1, 32>}, {transform_indices = @transform_16, window_bounds = array<i64: 1, 33, 32>}]} {
    %c0_i32 = arith.constant 0 : i32
    %0 = arith.cmpi eq, %arg1, %c0_i32 : i32
    %1 = arith.extui %0 : i1 to i32
    %c0_i32_0 = arith.constant 0 : i32
    %2 = arith.cmpi ne, %1, %c0_i32_0 : i32
    scf.if %2 {
      %c0_80 = arith.constant 0 : index
      %c0_81 = arith.constant 0 : index
      %c0_82 = arith.constant 0 : index
      %191 = vector.load %arg2[%c0_80, %c0_81, %c0_82] : memref<1x33x32xf32, #tpu.memory_space<vmem>>, vector<1x33x32xf32>
      %c0_83 = arith.constant 0 : index
      %c0_84 = arith.constant 0 : index
      %c0_85 = arith.constant 0 : index
      %192 = vector.load %arg18[%c0_83, %c0_84, %c0_85] : memref<1x33x32xf32, #tpu.memory_space<vmem>>, vector<1x33x32xf32>
      tpu.vector_store %arg18[%c0_83, %c0_84, %c0_85], %191 {strides = array<i32>} : memref<1x33x32xf32, #tpu.memory_space<vmem>>, vector<1x33x32xf32>,
    } else {
    }
    %c0 = arith.constant 0 : index
    %c0_1 = arith.constant 0 : index
    %c0_2 = arith.constant 0 : index
    %3 = vector.load %arg18[%c0, %c0_1, %c0_2] : memref<1x33x32xf32, #tpu.memory_space<vmem>>, vector<1x33x32xf32>
    %4 = vector.shape_cast %3 : vector<1x33x32xf32> to vector<33x32xf32>
    %c0_3 = arith.constant 0 : index
    %c0_4 = arith.constant 0 : index
    %c0_5 = arith.constant 0 : index
    %5 = vector.load %arg3[%c0_3, %c0_4, %c0_5] : memref<1x33x32xf32, #tpu.memory_space<vmem>>, vector<1x33x32xf32>
    %6 = vector.shape_cast %5 : vector<1x33x32xf32> to vector<33x32xf32>
    %7 = arith.addf %4, %6 : vector<33x32xf32>
    %c0_6 = arith.constant 0 : index
    %c0_7 = arith.constant 0 : index
    %c0_8 = arith.constant 0 : index
    %8 = vector.load %arg4[%c0_6, %c0_7, %c0_8] : memref<1x1x32xf32, #tpu.memory_space<vmem>>, vector<1x1x32xf32>
    %9 = vector.shape_cast %8 : vector<1x1x32xf32> to vector<1x32xf32>
    %c0_9 = arith.constant 0 : index
    %c0_10 = arith.constant 0 : index
    %c0_11 = arith.constant 0 : index
    %10 = vector.load %arg5[%c0_9, %c0_10, %c0_11] : memref<1x1x32xf32, #tpu.memory_space<vmem>>, vector<1x1x32xf32>
    %11 = vector.shape_cast %10 : vector<1x1x32xf32> to vector<1x32xf32>
    %cst = arith.constant dense<0.000000e+00> : vector<33xf32>
    %12 = vector.multi_reduction <add>, %7, %cst [1] : vector<33x32xf32> to vector<33xf32>
    %13 = vector.shape_cast %12 : vector<33xf32> to vector<33x1xf32>
    %cst_12 = arith.constant 3.200000e+01 : f32
    %14 = vector.broadcast %cst_12 : f32 to vector<33x1xf32>
    %15 = arith.divf %13, %14 : vector<33x1xf32>
    %16 = vector.broadcast %15 : vector<33x1xf32> to vector<33x32xf32>
    %17 = arith.subf %7, %16 : vector<33x32xf32>
    %18 = arith.mulf %17, %17 : vector<33x32xf32>
    %cst_13 = arith.constant dense<0.000000e+00> : vector<33xf32>
    %19 = vector.multi_reduction <add>, %18, %cst_13 [1] : vector<33x32xf32> to vector<33xf32>
    %20 = vector.shape_cast %19 : vector<33xf32> to vector<33x1xf32>
    %cst_14 = arith.constant 3.200000e+01 : f32
    %21 = vector.broadcast %cst_14 : f32 to vector<33x1xf32>
    %22 = arith.divf %20, %21 : vector<33x1xf32>
    %cst_15 = arith.constant 9.99999997E-7 : f32
    %23 = vector.broadcast %cst_15 : f32 to vector<33x1xf32>
    %24 = arith.addf %22, %23 : vector<33x1xf32>
    %25 = math.rsqrt %24 : vector<33x1xf32>
    %26 = vector.broadcast %25 : vector<33x1xf32> to vector<33x32xf32>
    %27 = arith.mulf %17, %26 : vector<33x32xf32>
    %28 = vector.broadcast %9 : vector<1x32xf32> to vector<33x32xf32>
    %29 = arith.mulf %27, %28 : vector<33x32xf32>
    %30 = vector.broadcast %11 : vector<1x32xf32> to vector<33x32xf32>
    %31 = arith.addf %29, %30 : vector<33x32xf32>
    %32 = arith.truncf %31 : vector<33x32xf32> to vector<33x32xbf16>
    %c0_16 = arith.constant 0 : index
    %c0_17 = arith.constant 0 : index
    %c0_18 = arith.constant 0 : index
    %33 = vector.load %arg6[%c0_16, %c0_17, %c0_18] : memref<1x32x96xbf16, #tpu.memory_space<vmem>>, vector<1x32x96xbf16>
    %34 = vector.shape_cast %33 : vector<1x32x96xbf16> to vector<32x96xbf16>
    %cst_19 = arith.constant dense<0.000000e+00> : vector<33x96xf32>
    %35 = tpu.matmul %32, %34, %cst_19 {dimension_numbers = #tpu.dot_dimension_numbers<[1], [0], [0], [1], [0, 0, 1, 1], [], []>} : vector<33x32xbf16>, vector<32x96xbf16>, vector<33x96xf32> -> vector<33x96xf32>
    %c0_20 = arith.constant 0 : index
    %c0_21 = arith.constant 0 : index
    %c0_22 = arith.constant 0 : index
    %36 = vector.load %arg7[%c0_20, %c0_21, %c0_22] : memref<1x1x96xf32, #tpu.memory_space<vmem>>, vector<1x1x96xf32>
    %37 = vector.shape_cast %36 : vector<1x1x96xf32> to vector<1x96xf32>
    %38 = vector.broadcast %37 : vector<1x96xf32> to vector<33x96xf32>
    %39 = arith.addf %35, %38 : vector<33x96xf32>
    %40 = vector.extract_strided_slice %39 {offsets = [0, 0], sizes = [33, 8], strides = [1, 1]} : vector<33x96xf32> to vector<33x8xf32>
    %cst_23 = arith.constant 0.353553385 : f32
    %41 = vector.broadcast %cst_23 : f32 to vector<33x8xf32>
    %42 = arith.mulf %40, %41 : vector<33x8xf32>
    %43 = arith.truncf %42 : vector<33x8xf32> to vector<33x8xbf16>
    %44 = vector.extract_strided_slice %39 {offsets = [0, 32], sizes = [33, 8], strides = [1, 1]} : vector<33x96xf32> to vector<33x8xf32>
    %45 = arith.truncf %44 : vector<33x8xf32> to vector<33x8xbf16>
    %cst_24 = arith.constant dense<0.000000e+00> : vector<33x33xf32>
    %46 = tpu.matmul %43, %45, %cst_24 {dimension_numbers = #tpu.dot_dimension_numbers<[1], [1], [0], [0], [0, 0, 1, 0], [], []>} : vector<33x8xbf16>, vector<33x8xbf16>, vector<33x33xf32> -> vector<33x33xf32>
    %47 = vector.extract_strided_slice %39 {offsets = [0, 8], sizes = [33, 8], strides = [1, 1]} : vector<33x96xf32> to vector<33x8xf32>
    %cst_25 = arith.constant 0.353553385 : f32
    %48 = vector.broadcast %cst_25 : f32 to vector<33x8xf32>
    %49 = arith.mulf %47, %48 : vector<33x8xf32>
    %50 = arith.truncf %49 : vector<33x8xf32> to vector<33x8xbf16>
    %51 = vector.extract_strided_slice %39 {offsets = [0, 40], sizes = [33, 8], strides = [1, 1]} : vector<33x96xf32> to vector<33x8xf32>
    %52 = arith.truncf %51 : vector<33x8xf32> to vector<33x8xbf16>
    %cst_26 = arith.constant dense<0.000000e+00> : vector<33x33xf32>
    %53 = tpu.matmul %50, %52, %cst_26 {dimension_numbers = #tpu.dot_dimension_numbers<[1], [1], [0], [0], [0, 0, 1, 0], [], []>} : vector<33x8xbf16>, vector<33x8xbf16>, vector<33x33xf32> -> vector<33x33xf32>
    %54 = vector.extract_strided_slice %39 {offsets = [0, 16], sizes = [33, 8], strides = [1, 1]} : vector<33x96xf32> to vector<33x8xf32>
    %cst_27 = arith.constant 0.353553385 : f32
    %55 = vector.broadcast %cst_27 : f32 to vector<33x8xf32>
    %56 = arith.mulf %54, %55 : vector<33x8xf32>
    %57 = arith.truncf %56 : vector<33x8xf32> to vector<33x8xbf16>
    %58 = vector.extract_strided_slice %39 {offsets = [0, 48], sizes = [33, 8], strides = [1, 1]} : vector<33x96xf32> to vector<33x8xf32>
    %59 = arith.truncf %58 : vector<33x8xf32> to vector<33x8xbf16>
    %cst_28 = arith.constant dense<0.000000e+00> : vector<33x33xf32>
    %60 = tpu.matmul %57, %59, %cst_28 {dimension_numbers = #tpu.dot_dimension_numbers<[1], [1], [0], [0], [0, 0, 1, 0], [], []>} : vector<33x8xbf16>, vector<33x8xbf16>, vector<33x33xf32> -> vector<33x33xf32>
    %61 = vector.extract_strided_slice %39 {offsets = [0, 24], sizes = [33, 8], strides = [1, 1]} : vector<33x96xf32> to vector<33x8xf32>
    %cst_29 = arith.constant 0.353553385 : f32
    %62 = vector.broadcast %cst_29 : f32 to vector<33x8xf32>
    %63 = arith.mulf %61, %62 : vector<33x8xf32>
    %64 = arith.truncf %63 : vector<33x8xf32> to vector<33x8xbf16>
    %65 = vector.extract_strided_slice %39 {offsets = [0, 56], sizes = [33, 8], strides = [1, 1]} : vector<33x96xf32> to vector<33x8xf32>
    %66 = arith.truncf %65 : vector<33x8xf32> to vector<33x8xbf16>
    %cst_30 = arith.constant dense<0.000000e+00> : vector<33x33xf32>
    %67 = tpu.matmul %64, %66, %cst_30 {dimension_numbers = #tpu.dot_dimension_numbers<[1], [1], [0], [0], [0, 0, 1, 0], [], []>} : vector<33x8xbf16>, vector<33x8xbf16>, vector<33x33xf32> -> vector<33x33xf32>
    %68 = vector.shape_cast %46 : vector<33x33xf32> to vector<1x33x33xf32>
    %69 = vector.shape_cast %53 : vector<33x33xf32> to vector<1x33x33xf32>
    %70 = vector.shape_cast %60 : vector<33x33xf32> to vector<1x33x33xf32>
    %71 = vector.shape_cast %67 : vector<33x33xf32> to vector<1x33x33xf32>
    %72 = tpu.concatenate %68, %69, %70, %71 in 0 : vector<1x33x33xf32>, vector<1x33x33xf32>, vector<1x33x33xf32>, vector<1x33x33xf32> -> vector<4x33x33xf32>
    %cst_31 = arith.constant dense<0xFF800000> : vector<4x33xf32>
    %73 = vector.multi_reduction <maximumf>, %72, %cst_31 [2] : vector<4x33x33xf32> to vector<4x33xf32>
    %74 = vector.shape_cast %73 : vector<4x33xf32> to vector<4x33x1xf32>
    %75 = vector.broadcast %74 : vector<4x33x1xf32> to vector<4x33x33xf32>
    %76 = arith.subf %72, %75 : vector<4x33x33xf32>
    %77 = math.exp %76 : vector<4x33x33xf32>
    %cst_32 = arith.constant dense<0.000000e+00> : vector<4x33xf32>
    %78 = vector.multi_reduction <add>, %77, %cst_32 [2] : vector<4x33x33xf32> to vector<4x33xf32>
    %79 = vector.shape_cast %78 : vector<4x33xf32> to vector<4x33x1xf32>
    %80 = tpu.reciprocal %79 {approx = true} : vector<4x33x1xf32> -> vector<4x33x1xf32>
    %81 = vector.broadcast %80 : vector<4x33x1xf32> to vector<4x33x33xf32>
    %82 = arith.mulf %77, %81 : vector<4x33x33xf32>
    %c0_33 = arith.constant 0 : index
    %c0_34 = arith.constant 0 : index
    %c0_35 = arith.constant 0 : index
    %83 = vector.load %arg8[%c0_33, %c0_34, %c0_35] : memref<1x32x32xbf16, #tpu.memory_space<vmem>>, vector<1x32x32xbf16>
    %84 = vector.shape_cast %83 : vector<1x32x32xbf16> to vector<32x32xbf16>
    %cst_36 = arith.constant 0.000000e+00 : f32
    %85 = vector.broadcast %cst_36 : f32 to vector<33x32xf32>
    %86 = vector.extract_strided_slice %39 {offsets = [0, 64], sizes = [33, 8], strides = [1, 1]} : vector<33x96xf32> to vector<33x8xf32>
    %87 = arith.truncf %86 : vector<33x8xf32> to vector<33x8xbf16>
    %88 = vector.extract_strided_slice %82 {offsets = [0, 0, 0], sizes = [1, 33, 33], strides = [1, 1, 1]} : vector<4x33x33xf32> to vector<1x33x33xf32>
    %89 = vector.shape_cast %88 : vector<1x33x33xf32> to vector<33x33xf32>
    %90 = arith.truncf %89 : vector<33x33xf32> to vector<33x33xbf16>
    %cst_37 = arith.constant dense<0.000000e+00> : vector<33x8xf32>
    %91 = tpu.matmul %90, %87, %cst_37 {dimension_numbers = #tpu.dot_dimension_numbers<[1], [0], [0], [1], [0, 0, 1, 1], [], []>} : vector<33x33xbf16>, vector<33x8xbf16>, vector<33x8xf32> -> vector<33x8xf32>
    %92 = arith.truncf %91 : vector<33x8xf32> to vector<33x8xbf16>
    %93 = vector.extract_strided_slice %84 {offsets = [0, 0], sizes = [8, 32], strides = [1, 1]} : vector<32x32xbf16> to vector<8x32xbf16>
    %cst_38 = arith.constant dense<0.000000e+00> : vector<33x32xf32>
    %94 = tpu.matmul %92, %93, %cst_38 {dimension_numbers = #tpu.dot_dimension_numbers<[1], [0], [0], [1], [0, 0, 1, 1], [], []>} : vector<33x8xbf16>, vector<8x32xbf16>, vector<33x32xf32> -> vector<33x32xf32>
    %95 = arith.addf %85, %94 : vector<33x32xf32>
    %96 = vector.extract_strided_slice %39 {offsets = [0, 72], sizes = [33, 8], strides = [1, 1]} : vector<33x96xf32> to vector<33x8xf32>
    %97 = arith.truncf %96 : vector<33x8xf32> to vector<33x8xbf16>
    %98 = vector.extract_strided_slice %82 {offsets = [1, 0, 0], sizes = [1, 33, 33], strides = [1, 1, 1]} : vector<4x33x33xf32> to vector<1x33x33xf32>
    %99 = vector.shape_cast %98 : vector<1x33x33xf32> to vector<33x33xf32>
    %100 = arith.truncf %99 : vector<33x33xf32> to vector<33x33xbf16>
    %cst_39 = arith.constant dense<0.000000e+00> : vector<33x8xf32>
    %101 = tpu.matmul %100, %97, %cst_39 {dimension_numbers = #tpu.dot_dimension_numbers<[1], [0], [0], [1], [0, 0, 1, 1], [], []>} : vector<33x33xbf16>, vector<33x8xbf16>, vector<33x8xf32> -> vector<33x8xf32>
    %102 = arith.truncf %101 : vector<33x8xf32> to vector<33x8xbf16>
    %103 = vector.extract_strided_slice %84 {offsets = [8, 0], sizes = [8, 32], strides = [1, 1]} : vector<32x32xbf16> to vector<8x32xbf16>
    %cst_40 = arith.constant dense<0.000000e+00> : vector<33x32xf32>
    %104 = tpu.matmul %102, %103, %cst_40 {dimension_numbers = #tpu.dot_dimension_numbers<[1], [0], [0], [1], [0, 0, 1, 1], [], []>} : vector<33x8xbf16>, vector<8x32xbf16>, vector<33x32xf32> -> vector<33x32xf32>
    %105 = arith.addf %95, %104 : vector<33x32xf32>
    %106 = vector.extract_strided_slice %39 {offsets = [0, 80], sizes = [33, 8], strides = [1, 1]} : vector<33x96xf32> to vector<33x8xf32>
    %107 = arith.truncf %106 : vector<33x8xf32> to vector<33x8xbf16>
    %108 = vector.extract_strided_slice %82 {offsets = [2, 0, 0], sizes = [1, 33, 33], strides = [1, 1, 1]} : vector<4x33x33xf32> to vector<1x33x33xf32>
    %109 = vector.shape_cast %108 : vector<1x33x33xf32> to vector<33x33xf32>
    %110 = arith.truncf %109 : vector<33x33xf32> to vector<33x33xbf16>
    %cst_41 = arith.constant dense<0.000000e+00> : vector<33x8xf32>
    %111 = tpu.matmul %110, %107, %cst_41 {dimension_numbers = #tpu.dot_dimension_numbers<[1], [0], [0], [1], [0, 0, 1, 1], [], []>} : vector<33x33xbf16>, vector<33x8xbf16>, vector<33x8xf32> -> vector<33x8xf32>
    %112 = arith.truncf %111 : vector<33x8xf32> to vector<33x8xbf16>
    %113 = vector.extract_strided_slice %84 {offsets = [16, 0], sizes = [8, 32], strides = [1, 1]} : vector<32x32xbf16> to vector<8x32xbf16>
    %cst_42 = arith.constant dense<0.000000e+00> : vector<33x32xf32>
    %114 = tpu.matmul %112, %113, %cst_42 {dimension_numbers = #tpu.dot_dimension_numbers<[1], [0], [0], [1], [0, 0, 1, 1], [], []>} : vector<33x8xbf16>, vector<8x32xbf16>, vector<33x32xf32> -> vector<33x32xf32>
    %115 = arith.addf %105, %114 : vector<33x32xf32>
    %116 = vector.extract_strided_slice %39 {offsets = [0, 88], sizes = [33, 8], strides = [1, 1]} : vector<33x96xf32> to vector<33x8xf32>
    %117 = arith.truncf %116 : vector<33x8xf32> to vector<33x8xbf16>
    %118 = vector.extract_strided_slice %82 {offsets = [3, 0, 0], sizes = [1, 33, 33], strides = [1, 1, 1]} : vector<4x33x33xf32> to vector<1x33x33xf32>
    %119 = vector.shape_cast %118 : vector<1x33x33xf32> to vector<33x33xf32>
    %120 = arith.truncf %119 : vector<33x33xf32> to vector<33x33xbf16>
    %cst_43 = arith.constant dense<0.000000e+00> : vector<33x8xf32>
    %121 = tpu.matmul %120, %117, %cst_43 {dimension_numbers = #tpu.dot_dimension_numbers<[1], [0], [0], [1], [0, 0, 1, 1], [], []>} : vector<33x33xbf16>, vector<33x8xbf16>, vector<33x8xf32> -> vector<33x8xf32>
    %122 = arith.truncf %121 : vector<33x8xf32> to vector<33x8xbf16>
    %123 = vector.extract_strided_slice %84 {offsets = [24, 0], sizes = [8, 32], strides = [1, 1]} : vector<32x32xbf16> to vector<8x32xbf16>
    %cst_44 = arith.constant dense<0.000000e+00> : vector<33x32xf32>
    %124 = tpu.matmul %122, %123, %cst_44 {dimension_numbers = #tpu.dot_dimension_numbers<[1], [0], [0], [1], [0, 0, 1, 1], [], []>} : vector<33x8xbf16>, vector<8x32xbf16>, vector<33x32xf32> -> vector<33x32xf32>
    %125 = arith.addf %115, %124 : vector<33x32xf32>
    %126 = arith.addf %7, %125 : vector<33x32xf32>
    %c0_45 = arith.constant 0 : index
    %c0_46 = arith.constant 0 : index
    %c0_47 = arith.constant 0 : index
    %127 = vector.load %arg9[%c0_45, %c0_46, %c0_47] : memref<1x1x32xf32, #tpu.memory_space<vmem>>, vector<1x1x32xf32>
    %128 = vector.shape_cast %127 : vector<1x1x32xf32> to vector<1x32xf32>
    %129 = vector.broadcast %128 : vector<1x32xf32> to vector<33x32xf32>
    %130 = arith.addf %126, %129 : vector<33x32xf32>
    %c0_48 = arith.constant 0 : index
    %c0_49 = arith.constant 0 : index
    %c0_50 = arith.constant 0 : index
    %131 = vector.load %arg10[%c0_48, %c0_49, %c0_50] : memref<1x1x32xf32, #tpu.memory_space<vmem>>, vector<1x1x32xf32>
    %132 = vector.shape_cast %131 : vector<1x1x32xf32> to vector<1x32xf32>
    %c0_51 = arith.constant 0 : index
    %c0_52 = arith.constant 0 : index
    %c0_53 = arith.constant 0 : index
    %133 = vector.load %arg11[%c0_51, %c0_52, %c0_53] : memref<1x1x32xf32, #tpu.memory_space<vmem>>, vector<1x1x32xf32>
    %134 = vector.shape_cast %133 : vector<1x1x32xf32> to vector<1x32xf32>
    %cst_54 = arith.constant dense<0.000000e+00> : vector<33xf32>
    %135 = vector.multi_reduction <add>, %130, %cst_54 [1] : vector<33x32xf32> to vector<33xf32>
    %136 = vector.shape_cast %135 : vector<33xf32> to vector<33x1xf32>
    %cst_55 = arith.constant 3.200000e+01 : f32
    %137 = vector.broadcast %cst_55 : f32 to vector<33x1xf32>
    %138 = arith.divf %136, %137 : vector<33x1xf32>
    %139 = vector.broadcast %138 : vector<33x1xf32> to vector<33x32xf32>
    %140 = arith.subf %130, %139 : vector<33x32xf32>
    %141 = arith.mulf %140, %140 : vector<33x32xf32>
    %cst_56 = arith.constant dense<0.000000e+00> : vector<33xf32>
    %142 = vector.multi_reduction <add>, %141, %cst_56 [1] : vector<33x32xf32> to vector<33xf32>
    %143 = vector.shape_cast %142 : vector<33xf32> to vector<33x1xf32>
    %cst_57 = arith.constant 3.200000e+01 : f32
    %144 = vector.broadcast %cst_57 : f32 to vector<33x1xf32>
    %145 = arith.divf %143, %144 : vector<33x1xf32>
    %cst_58 = arith.constant 9.99999997E-7 : f32
    %146 = vector.broadcast %cst_58 : f32 to vector<33x1xf32>
    %147 = arith.addf %145, %146 : vector<33x1xf32>
    %148 = math.rsqrt %147 : vector<33x1xf32>
    %149 = vector.broadcast %148 : vector<33x1xf32> to vector<33x32xf32>
    %150 = arith.mulf %140, %149 : vector<33x32xf32>
    %151 = vector.broadcast %132 : vector<1x32xf32> to vector<33x32xf32>
    %152 = arith.mulf %150, %151 : vector<33x32xf32>
    %153 = vector.broadcast %134 : vector<1x32xf32> to vector<33x32xf32>
    %154 = arith.addf %152, %153 : vector<33x32xf32>
    %155 = arith.truncf %154 : vector<33x32xf32> to vector<33x32xbf16>
    %c0_59 = arith.constant 0 : index
    %c0_60 = arith.constant 0 : index
    %c0_61 = arith.constant 0 : index
    %156 = vector.load %arg12[%c0_59, %c0_60, %c0_61] : memref<1x32x128xbf16, #tpu.memory_space<vmem>>, vector<1x32x128xbf16>
    %157 = vector.shape_cast %156 : vector<1x32x128xbf16> to vector<32x128xbf16>
    %cst_62 = arith.constant dense<0.000000e+00> : vector<33x128xf32>
    %158 = tpu.matmul %155, %157, %cst_62 {dimension_numbers = #tpu.dot_dimension_numbers<[1], [0], [0], [1], [0, 0, 1, 1], [], []>} : vector<33x32xbf16>, vector<32x128xbf16>, vector<33x128xf32> -> vector<33x128xf32>
    %c0_63 = arith.constant 0 : index
    %c0_64 = arith.constant 0 : index
    %c0_65 = arith.constant 0 : index
    %159 = vector.load %arg13[%c0_63, %c0_64, %c0_65] : memref<1x1x128xf32, #tpu.memory_space<vmem>>, vector<1x1x128xf32>
    %160 = vector.shape_cast %159 : vector<1x1x128xf32> to vector<1x128xf32>
    %161 = vector.broadcast %160 : vector<1x128xf32> to vector<33x128xf32>
    %162 = arith.addf %158, %161 : vector<33x128xf32>
    %cst_66 = arith.constant 5.000000e-01 : f32
    %163 = vector.broadcast %cst_66 : f32 to vector<33x128xf32>
    %164 = arith.mulf %163, %162 : vector<33x128xf32>
    %cst_67 = arith.constant 4.471500e-02 : f32
    %165 = vector.broadcast %cst_67 : f32 to vector<33x128xf32>
    %166 = arith.mulf %165, %162 : vector<33x128xf32>
    %167 = arith.mulf %166, %162 : vector<33x128xf32>
    %168 = arith.mulf %167, %162 : vector<33x128xf32>
    %169 = arith.addf %162, %168 : vector<33x128xf32>
    %cst_68 = arith.constant 0.797884583 : f32
    %170 = vector.broadcast %cst_68 : f32 to vector<33x128xf32>
    %171 = arith.mulf %170, %169 : vector<33x128xf32>
    %172 = math.tanh %171 : vector<33x128xf32>
    %cst_69 = arith.constant 1.000000e+00 : f32
    %173 = vector.broadcast %cst_69 : f32 to vector<33x128xf32>
    %174 = arith.addf %173, %172 : vector<33x128xf32>
    %175 = arith.mulf %164, %174 : vector<33x128xf32>
    %176 = arith.truncf %175 : vector<33x128xf32> to vector<33x128xbf16>
    %c0_70 = arith.constant 0 : index
    %c0_71 = arith.constant 0 : index
    %c0_72 = arith.constant 0 : index
    %177 = vector.load %arg14[%c0_70, %c0_71, %c0_72] : memref<1x128x32xbf16, #tpu.memory_space<vmem>>, vector<1x128x32xbf16>
    %178 = vector.shape_cast %177 : vector<1x128x32xbf16> to vector<128x32xbf16>
    %cst_73 = arith.constant dense<0.000000e+00> : vector<33x32xf32>
    %179 = tpu.matmul %176, %178, %cst_73 {dimension_numbers = #tpu.dot_dimension_numbers<[1], [0], [0], [1], [0, 0, 1, 1], [], []>} : vector<33x128xbf16>, vector<128x32xbf16>, vector<33x32xf32> -> vector<33x32xf32>
    %c0_74 = arith.constant 0 : index
    %c0_75 = arith.constant 0 : index
    %c0_76 = arith.constant 0 : index
    %180 = vector.load %arg15[%c0_74, %c0_75, %c0_76] : memref<1x1x32xf32, #tpu.memory_space<vmem>>, vector<1x1x32xf32>
    %181 = vector.shape_cast %180 : vector<1x1x32xf32> to vector<1x32xf32>
    %182 = vector.broadcast %181 : vector<1x32xf32> to vector<33x32xf32>
    %183 = arith.addf %179, %182 : vector<33x32xf32>
    %184 = arith.addf %130, %183 : vector<33x32xf32>
    %c1_i32 = arith.constant 1 : i32
    %185 = arith.cmpi slt, %arg1, %c1_i32 : i32
    %186 = arith.extui %185 : i1 to i32
    %c0_i32_77 = arith.constant 0 : i32
    %187 = arith.cmpi ne, %186, %c0_i32_77 : i32
    scf.if %187 {
      %c0_80 = arith.constant 0 : index
      %c0_81 = arith.constant 0 : index
      %c0_82 = arith.constant 0 : index
      %191 = vector.load %arg18[%c0_80, %c0_81, %c0_82] : memref<1x33x32xf32, #tpu.memory_space<vmem>>, vector<1x33x32xf32>
      %192 = vector.shape_cast %191 : vector<1x33x32xf32> to vector<33x32xf32>
      %193 = vector.shape_cast %184 : vector<33x32xf32> to vector<1x33x32xf32>
      tpu.vector_store %arg18[%c0_80, %c0_81, %c0_82], %193 {strides = array<i32>} : memref<1x33x32xf32, #tpu.memory_space<vmem>>, vector<1x33x32xf32>,
    } else {
    }
    %c1_i32_78 = arith.constant 1 : i32
    %188 = arith.cmpi eq, %arg1, %c1_i32_78 : i32
    %189 = arith.extui %188 : i1 to i32
    %c0_i32_79 = arith.constant 0 : i32
    %190 = arith.cmpi ne, %189, %c0_i32_79 : i32
    scf.if %190 {
      %c0_80 = arith.constant 0 : index
      %c0_81 = arith.constant 0 : index
      %191 = vector.load %arg16[%c0_80, %c0_81] : memref<1x32xf32, #tpu.memory_space<vmem>>, vector<1x32xf32>
      %c0_82 = arith.constant 0 : index
      %c0_83 = arith.constant 0 : index
      %192 = vector.load %arg17[%c0_82, %c0_83] : memref<1x32xf32, #tpu.memory_space<vmem>>, vector<1x32xf32>
      %cst_84 = arith.constant dense<0.000000e+00> : vector<33xf32>
      %193 = vector.multi_reduction <add>, %184, %cst_84 [1] : vector<33x32xf32> to vector<33xf32>
      %194 = vector.shape_cast %193 : vector<33xf32> to vector<33x1xf32>
      %cst_85 = arith.constant 3.200000e+01 : f32
      %195 = vector.broadcast %cst_85 : f32 to vector<33x1xf32>
      %196 = arith.divf %194, %195 : vector<33x1xf32>
      %197 = vector.broadcast %196 : vector<33x1xf32> to vector<33x32xf32>
      %198 = arith.subf %184, %197 : vector<33x32xf32>
      %199 = arith.mulf %198, %198 : vector<33x32xf32>
      %cst_86 = arith.constant dense<0.000000e+00> : vector<33xf32>
      %200 = vector.multi_reduction <add>, %199, %cst_86 [1] : vector<33x32xf32> to vector<33xf32>
      %201 = vector.shape_cast %200 : vector<33xf32> to vector<33x1xf32>
      %cst_87 = arith.constant 3.200000e+01 : f32
      %202 = vector.broadcast %cst_87 : f32 to vector<33x1xf32>
      %203 = arith.divf %201, %202 : vector<33x1xf32>
      %cst_88 = arith.constant 9.99999997E-7 : f32
      %204 = vector.broadcast %cst_88 : f32 to vector<33x1xf32>
      %205 = arith.addf %203, %204 : vector<33x1xf32>
      %206 = math.rsqrt %205 : vector<33x1xf32>
      %207 = vector.broadcast %206 : vector<33x1xf32> to vector<33x32xf32>
      %208 = arith.mulf %198, %207 : vector<33x32xf32>
      %209 = vector.broadcast %191 : vector<1x32xf32> to vector<33x32xf32>
      %210 = arith.mulf %208, %209 : vector<33x32xf32>
      %211 = vector.broadcast %192 : vector<1x32xf32> to vector<33x32xf32>
      %212 = arith.addf %210, %211 : vector<33x32xf32>
      %c0_89 = arith.constant 0 : index
      %c0_90 = arith.constant 0 : index
      %c0_91 = arith.constant 0 : index
      %213 = vector.load %arg18[%c0_89, %c0_90, %c0_91] : memref<1x33x32xf32, #tpu.memory_space<vmem>>, vector<1x33x32xf32>
      %214 = vector.shape_cast %213 : vector<1x33x32xf32> to vector<33x32xf32>
      %215 = vector.shape_cast %212 : vector<33x32xf32> to vector<1x33x32xf32>
      tpu.vector_store %arg18[%c0_89, %c0_90, %c0_91], %215 {strides = array<i32>} : memref<1x33x32xf32, #tpu.memory_space<vmem>>, vector<1x33x32xf32>,
    } else {
    }
    return
  }
  func.func @transform_0(%arg0: i32, %arg1: i32) -> (i32, i32, i32) {
    %c0_i32 = arith.constant 0 : i32
    %c0_i32_0 = arith.constant 0 : i32
    %c0_i32_1 = arith.constant 0 : i32
    return %arg0, %c0_i32, %c0_i32_0 : i32, i32, i32
  }
  func.func @transform_1(%arg0: i32, %arg1: i32) -> (i32, i32, i32) {
    %c0_i32 = arith.constant 0 : i32
    %c0_i32_0 = arith.constant 0 : i32
    %c0_i32_1 = arith.constant 0 : i32
    return %arg0, %c0_i32, %c0_i32_0 : i32, i32, i32
  }
  func.func @transform_2(%arg0: i32, %arg1: i32) -> (i32, i32, i32) {
    %c0_i32 = arith.constant 0 : i32
    %c0_i32_0 = arith.constant 0 : i32
    %c0_i32_1 = arith.constant 0 : i32
    return %arg1, %c0_i32, %c0_i32_0 : i32, i32, i32
  }
  func.func @transform_3(%arg0: i32, %arg1: i32) -> (i32, i32, i32) {
    %c0_i32 = arith.constant 0 : i32
    %c0_i32_0 = arith.constant 0 : i32
    %c0_i32_1 = arith.constant 0 : i32
    return %arg1, %c0_i32, %c0_i32_0 : i32, i32, i32
  }
  func.func @transform_4(%arg0: i32, %arg1: i32) -> (i32, i32, i32) {
    %c0_i32 = arith.constant 0 : i32
    %c0_i32_0 = arith.constant 0 : i32
    %c0_i32_1 = arith.constant 0 : i32
    return %arg1, %c0_i32, %c0_i32_0 : i32, i32, i32
  }
  func.func @transform_5(%arg0: i32, %arg1: i32) -> (i32, i32, i32) {
    %c0_i32 = arith.constant 0 : i32
    %c0_i32_0 = arith.constant 0 : i32
    %c0_i32_1 = arith.constant 0 : i32
    return %arg1, %c0_i32, %c0_i32_0 : i32, i32, i32
  }
  func.func @transform_6(%arg0: i32, %arg1: i32) -> (i32, i32, i32) {
    %c0_i32 = arith.constant 0 : i32
    %c0_i32_0 = arith.constant 0 : i32
    %c0_i32_1 = arith.constant 0 : i32
    return %arg1, %c0_i32, %c0_i32_0 : i32, i32, i32
  }
  func.func @transform_7(%arg0: i32, %arg1: i32) -> (i32, i32, i32) {
    %c0_i32 = arith.constant 0 : i32
    %c0_i32_0 = arith.constant 0 : i32
    %c0_i32_1 = arith.constant 0 : i32
    return %arg1, %c0_i32, %c0_i32_0 : i32, i32, i32
  }
  func.func @transform_8(%arg0: i32, %arg1: i32) -> (i32, i32, i32) {
    %c0_i32 = arith.constant 0 : i32
    %c0_i32_0 = arith.constant 0 : i32
    %c0_i32_1 = arith.constant 0 : i32
    return %arg1, %c0_i32, %c0_i32_0 : i32, i32, i32
  }
  func.func @transform_9(%arg0: i32, %arg1: i32) -> (i32, i32, i32) {
    %c0_i32 = arith.constant 0 : i32
    %c0_i32_0 = arith.constant 0 : i32
    %c0_i32_1 = arith.constant 0 : i32
    return %arg1, %c0_i32, %c0_i32_0 : i32, i32, i32
  }
  func.func @transform_10(%arg0: i32, %arg1: i32) -> (i32, i32, i32) {
    %c0_i32 = arith.constant 0 : i32
    %c0_i32_0 = arith.constant 0 : i32
    %c0_i32_1 = arith.constant 0 : i32
    return %arg1, %c0_i32, %c0_i32_0 : i32, i32, i32
  }
  func.func @transform_11(%arg0: i32, %arg1: i32) -> (i32, i32, i32) {
    %c0_i32 = arith.constant 0 : i32
    %c0_i32_0 = arith.constant 0 : i32
    %c0_i32_1 = arith.constant 0 : i32
    return %arg1, %c0_i32, %c0_i32_0 : i32, i32, i32
  }
  func.func @transform_12(%arg0: i32, %arg1: i32) -> (i32, i32, i32) {
    %c0_i32 = arith.constant 0 : i32
    %c0_i32_0 = arith.constant 0 : i32
    %c0_i32_1 = arith.constant 0 : i32
    return %arg1, %c0_i32, %c0_i32_0 : i32, i32, i32
  }
  func.func @transform_13(%arg0: i32, %arg1: i32) -> (i32, i32, i32) {
    %c0_i32 = arith.constant 0 : i32
    %c0_i32_0 = arith.constant 0 : i32
    %c0_i32_1 = arith.constant 0 : i32
    return %arg1, %c0_i32, %c0_i32_0 : i32, i32, i32
  }
  func.func @transform_14(%arg0: i32, %arg1: i32) -> (i32, i32) {
    %c0_i32 = arith.constant 0 : i32
    %c0_i32_0 = arith.constant 0 : i32
    %c0_i32_1 = arith.constant 0 : i32
    return %c0_i32, %c0_i32_0 : i32, i32
  }
  func.func @transform_15(%arg0: i32, %arg1: i32) -> (i32, i32) {
    %c0_i32 = arith.constant 0 : i32
    %c0_i32_0 = arith.constant 0 : i32
    %c0_i32_1 = arith.constant 0 : i32
    return %c0_i32, %c0_i32_0 : i32, i32
  }
  func.func @transform_16(%arg0: i32, %arg1: i32) -> (i32, i32, i32) {
    %c0_i32 = arith.constant 0 : i32
    %c0_i32_0 = arith.constant 0 : i32
    %c0_i32_1 = arith.constant 0 : i32
    return %arg0, %c0_i32, %c0_i32_0 : i32, i32, i32
  }
}

</mosaic_0001>

<bundles_post_ra>
// kernel: custom-call.6
= control target key start
LH: loop header
LB: loop body
LE: loop exit
PB: predicated region body
PF: predicated region fallthrough
CT: control target
= control target key end

     0   :  { %s6_s0 = inlined_call_operand.vmem [shape: f32[2,128], index: 0, kind: output, shape index: {}]  }

// kernel: neg.1
= control target key start
LH: loop header
LB: loop body
LE: loop exit
PB: predicated region body
PF: predicated region fallthrough
CT: control target
= control target key end

     0   :  { %s136_s0 = inlined_call_operand.vmem [shape: f32[2,32,128], index: 0, kind: input, shape index: {}]   ;;  %s137_s1 = inlined_call_operand.vmem [shape: f32[2,32,128], index: 1, kind: output, shape index: {}]  }
   0x1   :  { %v2_v0 = vld [vmem:[%s136_s0] sm:$0xff]  ;;  %v66_v2 = vld [vmem:[%s136_s0 + $0x8] sm:$0xff]  ;;  %v70_v7 = vld [vmem:[%s136_s0 + $0x10] sm:$0xff] }
   0x2   :  { %v64_v1 = vld [vmem:[%s136_s0 + $0x20] sm:$0xff]  ;;  %v5_v3 = vxor.u32 2147483648, %v2_v0  ;;  %v20_v5 = vxor.u32 2147483648, %v66_v2  ;;  %v68_v6 = vld [vmem:[%s136_s0 + $0x28] sm:$0xff]  ;;  %v72_v8 = vld [vmem:[%s136_s0 + $0x30] sm:$0xff]  ;;  %v36_v10 = vxor.u32 2147483648, %v70_v7 }
   0x3   :  { %v12_v4 = vxor.u32 2147483648, %v64_v1  ;;  %v28_v9 = vxor.u32 2147483648, %v68_v6  ;;  %v44_v11 = vxor.u32 2147483648, %v72_v8  ;;  %v74_v12 = vld [vmem:[%s136_s0 + $0x18] sm:$0xff] }
   0x4   :  { %v76_v13 = vld [vmem:[%s136_s0 + $0x38] sm:$0xff]  ;;  %7 = vst [vmem:[%s137_s1] sm:$0xff] %v5_v3  ;;  %67 = vst [vmem:[%s137_s1 + $0x8] sm:$0xff] %v20_v5  ;;  %v52_v14 = vxor.u32 2147483648, %v74_v12 }
   0x5   :  { %65 = vst [vmem:[%s137_s1 + $0x20] sm:$0xff] %v12_v4  ;;  %v60_v15 = vxor.u32 2147483648, %v76_v13  ;;  %69 = vst [vmem:[%s137_s1 + $0x28] sm:$0xff] %v28_v9 }
   0x6   :  { %71 = vst [vmem:[%s137_s1 + $0x10] sm:$0xff] %v36_v10  ;;  %73 = vst [vmem:[%s137_s1 + $0x30] sm:$0xff] %v44_v11 }
   0x7   :  { %75 = vst [vmem:[%s137_s1 + $0x18] sm:$0xff] %v52_v14  ;;  %77 = vst [vmem:[%s137_s1 + $0x38] sm:$0xff] %v60_v15 }

// kernel: pointvit_forward.4
= control target key start
LH: loop header
LB: loop body
LE: loop exit
PB: predicated region body
PF: predicated region fallthrough
CT: control target
= control target key end

     0   :  { %vm184_vm0 = vcmask 1040384   ;;  %vm185_vm1 = vcmask 1041408   ;;  %v696_v1 = vmov 65535   ;;  %vm85_vm2 = vcmask 261120   ;;  %s996_s4 = inlined_call_operand.vmem [shape: bf16[32,32], index: 4, kind: input, shape index: {}]   ;;  %s997_s0 = inlined_call_operand.vmem [shape: f32[2,32,32], index: 0, kind: input, shape index: {}]   ;;  %s998_s6 = inlined_call_operand.vmem [shape: bf16[3,128], index: 6, kind: input, shape index: {}]   ;;  %s999_s1 = inlined_call_operand.vmem [shape: f32[2,32,3], index: 1, kind: input, shape index: {}]   ;;  %s1000_s8 = inlined_call_operand.vmem [shape: bf16[128,32], index: 8, kind: input, shape index: {}]   ;;  %s1001_s5 = inlined_call_operand.vmem [shape: f32[1,32], index: 5, kind: input, shape index: {}]   ;;  %s1002_s2 = inlined_call_operand.vmem [shape: f32[1,32], index: 2, kind: input, shape index: {}]   ;;  %s1003_s10 = inlined_call_operand.vmem [shape: f32[2,33,32], index: 10, kind: output, shape index: {0}]   ;;  %s1004_s7 = inlined_call_operand.vmem [shape: f32[1,128], index: 7, kind: input, shape index: {}]   ;;  %s1005_s9 = inlined_call_operand.vmem [shape: f32[1,32], index: 9, kind: input, shape index: {}]   ;;  %s1006_s3 = inlined_call_operand.vmem [shape: f32[1,32], index: 3, kind: input, shape index: {}]   ;;  %s1007_s11 = inlined_call_operand.vmem [shape: f32[2,33,32], index: 11, kind: output, shape index: {1}]  }
   0x1   :  { %v670_v0 = vld [vmem:[%s996_s4] sm:$0xff]   ;;  %v186_v2 = vsel %vm184_vm0, 4294967295, %v696_v1  ;;  %v671_v3 = vld [vmem:[%s996_s4 + $0x8] sm:$0xff]   ;;  %v40_v8 = vld [vmem:[%s997_s0 + $0x10] sm:$0xff]  ;;  %vm171_vm3 = vcmask 23552   ;;  %vm491_vm4 = vcmask 253952  }
   0x2   :  { %v187_v4 = vsel %vm185_vm1, %v186_v2, 0  ;;  %623 = vmatprep.subr.bf16.mxu0 %v670_v0  ;;  %v38_v5 = vld [vmem:[%s997_s0] sm:$0xff]  ;;  %v39_v6 = vld [vmem:[%s997_s0 + $0x8] sm:$0xff]  ;;  %v41_v9 = vld [vmem:[%s997_s0 + $0x18] sm:$0xff] }
   0x3   :  { %624 = vmatpush3.bf16.msra.mxu0 %v670_v0  ;;  %v46_v7 = vpack.c.bf16 %v39_v6, %v38_v5  ;;  %v163_v10 = vld [vmem:[%s998_s6] sm:$0x3]  ;;  %v43_v13 = vld [vmem:[%s997_s0 + $0x28] sm:$0xff]  ;;  %v47_v14 = vpack.c.bf16 %v41_v9, %v40_v8  ;;  %v44_v16 = vld [vmem:[%s997_s0 + $0x30] sm:$0xff] }
   0x4   :  { %625 = vmatprep.subr.bf16.mxu0 %v671_v3  ;;  %v189_v11 = vand.u32 %v187_v4, %v163_v10  ;;  %v42_v12 = vld [vmem:[%s997_s0 + $0x20] sm:$0xff]  ;;  %v45_v17 = vld [vmem:[%s997_s0 + $0x38] sm:$0xff]  ;;  %v51_v19 = vld [vmem:[%s999_s1 + $0x8] sm:$0xff] }
   0x5   :  { %627 = vmatprep.mubr.msk.bf16.mxu0 %vm85_vm2, %v46_v7  ;;  %v48_v15 = vpack.c.bf16 %v43_v13, %v42_v12  ;;  %v50_v18 = vld [vmem:[%s999_s1] sm:$0xff]  ;;  %v49_v20 = vpack.c.bf16 %v45_v17, %v44_v16  ;;  %v52_v22 = vld [vmem:[%s999_s1 + $0x10] sm:$0xff]  ;;  %v53_v23 = vld [vmem:[%s999_s1 + $0x18] sm:$0xff] }
   0x6   :  { %v58_v21 = vpack.c.bf16 %v51_v19, %v50_v18  ;;  %v54_v24 = vld [vmem:[%s999_s1 + $0x20] sm:$0xff]  ;;  %v55_v25 = vld [vmem:[%s999_s1 + $0x28] sm:$0xff]  ;;  %v59_v26 = vpack.c.bf16 %v53_v23, %v52_v22  ;;  %v56_v28 = vld [vmem:[%s999_s1 + $0x30] sm:$0xff] }
   0x7   :  { %626 = vmatpush3.bf16.msra.mxu0 %v671_v3  ;;  %v60_v27 = vpack.c.bf16 %v55_v25, %v54_v24  ;;  %v57_v29 = vld [vmem:[%s999_s1 + $0x38] sm:$0xff]  ;;  %v672_v31 = vld [vmem:[%s1000_s8] sm:$0xff]   ;;  %v673_v32 = vld [vmem:[%s1000_s8 + $0x8] sm:$0xff]  }
   0x8   :  { %635 = vmatprep.subr.bf16.mxu0 %v189_v11  ;;  %v61_v30 = vpack.c.bf16 %v57_v29, %v56_v28  ;;  %645 = vmatprep.subr.bf16.mxu1 %v672_v31  ;;  %v674_v33 = vld [vmem:[%s1000_s8 + $0x10] sm:$0xff]   ;;  %v675_v34 = vld [vmem:[%s1000_s8 + $0x18] sm:$0xff]   ;;  %v676_v35 = vld [vmem:[%s1000_s8 + $0x20] sm:$0xff]  }
   0x9   :  { %646 = vmatpush3.bf16.msra.mxu1 %v672_v31  ;;  %v677_v36 = vld [vmem:[%s1000_s8 + $0x28] sm:$0xff]   ;;  %v678_v37 = vld [vmem:[%s1000_s8 + $0x30] sm:$0xff]   ;;  %v679_v38 = vld [vmem:[%s1000_s8 + $0x38] sm:$0xff]  }
   0xa   :  { %628 = vmatmul.mubr.msk.bf16.vlgmr.msra.gmra.mrb[0].mxu0 %vm85_vm2, %v47_v14  ;;  %647 = vmatprep.subr.bf16.mxu1 %v673_v32  ;;  %v569_v39 = vld [vmem:[%s1001_s5] ss:$0 sm:$0xff] }
   0xb   :  { %636 = vmatpush3.bf16.msra.mxu0 %v189_v11  ;;  %631 = vmatprep.mubr.msk.bf16.mxu0 %vm85_vm2, %v48_v15  ;;  %v468_v45 = vld [vmem:[%s1002_s2] sm:$0x1] }
   0xc   :  { %v576_v6 = vld [vmem:[%s1004_s7] ss:$0 sm:$0xff] }
   0xd   :  { %648 = vmatpush3.bf16.msra.mxu1 %v673_v32 }
   0xe   :  { %649 = vmatprep.subr.bf16.mxu1 %v674_v33 }
  0x11   :  { %650 = vmatpush3.bf16.msra.mxu1 %v674_v33 }
  0x12   :  { %632 = vmatmul.mubr.msk.bf16.gmra.mrb[4].mxu0 %vm85_vm2, %v49_v20  ;;  %651 = vmatprep.subr.bf16.mxu1 %v675_v34 }
  0x13   :  { %637 = vmatprep.mubr.msk.bf16.mxu0 %vm171_vm3, %v58_v21 }
  0x15   :  { %652 = vmatpush3.bf16.msra.mxu1 %v675_v34 }
  0x16   :  { %653 = vmatprep.subr.bf16.mxu1 %v676_v35 }
  0x19   :  { %654 = vmatpush3.bf16.msra.mxu1 %v676_v35 }
  0x1a   :  { %638 = vmatmul.mubr.msk.bf16.vlgmr.msra.gmra.mrb[8].mxu0 %vm171_vm3, %v59_v26  ;;  %655 = vmatprep.subr.bf16.mxu1 %v677_v36 }
  0x1b   :  { %641 = vmatprep.mubr.msk.bf16.mxu0 %vm171_vm3, %v60_v27 }
  0x1d   :  { %656 = vmatpush3.bf16.msra.mxu1 %v677_v36 }
  0x1e   :  { %657 = vmatprep.subr.bf16.mxu1 %v678_v37 }
  0x21   :  { %658 = vmatpush3.bf16.msra.mxu1 %v678_v37 }
  0x22   :  { %642 = vmatmul.mubr.msk.bf16.gmra.mrb[12].mxu0 %vm171_vm3, %v61_v30  ;;  %659 = vmatprep.subr.bf16.mxu1 %v679_v38 }
  0x25   :  { %660 = vmatpush3.bf16.msra.mxu1 %v679_v38 }
  0xdd   :  { %v629_v40 = vpop.f32.mrb[0].mxu0 }
  0xde   :  { %v141_v41 = vadd.f32 %v629_v40, %v569_v39  ;;  %v132_v42 = vpop.f32.mrb[1].mxu0 }
  0xdf   :  { %v133_v43 = vadd.f32 %v569_v39, %v132_v42  ;;  %v630_v44 = vpop.f32.mrb[2].mxu0 }
  0xe0   :  { %v144_v46 = vadd.f32 %v630_v44, %v569_v39  ;;  %v135_v47 = vpop.f32.mrb[3].mxu0  ;;  %v477_v50 = vrot.slane %v141_v41, 7 }
  0xe1   :  { %v474_v48 = vrot.slane %v133_v43, 7  ;;  %v136_v49 = vadd.f32 %v569_v39, %v135_v47 }
  0xe2   :  { %v479_v51 = vrot.slane %v144_v46, 7 }
  0xe3   :  { %v486_v52 = vsel %vm184_vm0, %v468_v45, %v474_v48  ;;  %v475_v53 = vrot.slane %v136_v49, 7 }
  0xe4   :  { %487 = vst.msk [vmem:[%s1003_s10] sm:$0xff] %vm85_vm2, %v486_v52  ;;  %v480_v54 = vsel %vm184_vm0, %v477_v50, %v479_v51 }
  0xe5   :  { %492 = vst.msk [vmem:[%s1003_s10 + $0x20] sm:$0x1] %vm491_vm4, %v479_v51  ;;  %v476_v55 = vsel %vm184_vm0, %v474_v48, %v475_v53  ;;  %v478_v56 = vsel %vm184_vm0, %v475_v53, %v477_v50  ;;  %v633_v57 = vpop.f32.mrb[4].mxu0 }
  0xe6   :  { %490 = vst.msk [vmem:[%s1003_s10 + $0x18] sm:$0xff] %vm85_vm2, %v480_v54  ;;  %488 = vst.msk [vmem:[%s1003_s10 + $0x8] sm:$0xff] %vm85_vm2, %v476_v55  ;;  %v157_v58 = vadd.f32 %v633_v57, %v569_v39  ;;  %v148_v59 = vpop.f32.mrb[5].mxu0 }
  0xe7   :  { %489 = vst.msk [vmem:[%s1003_s10 + $0x10] sm:$0xff] %vm85_vm2, %v478_v56  ;;  %v149_v60 = vadd.f32 %v569_v39, %v148_v59  ;;  %v634_v61 = vpop.f32.mrb[6].mxu0 }
  0xe8   :  { %v160_v62 = vadd.f32 %v634_v61, %v569_v39  ;;  %v151_v63 = vpop.f32.mrb[7].mxu0  ;;  %v522_v2 = vrot.slane %v157_v58, 7 }
  0xe9   :  { %v519_v0 = vrot.slane %v149_v60, 7  ;;  %v152_v1 = vadd.f32 %v569_v39, %v151_v63 }
  0xea   :  { %v524_v3 = vrot.slane %v160_v62, 7 }
  0xeb   :  { %v531_v4 = vsel %vm184_vm0, %v468_v45, %v519_v0  ;;  %v520_v5 = vrot.slane %v152_v1, 7 }
  0xec   :  { %590 = vst.msk [vmem:[%s1003_s10 + $0x28] sm:$0xff] %vm85_vm2, %v531_v4  ;;  %v525_v7 = vsel %vm184_vm0, %v522_v2, %v524_v3 }
  0xed   :  { %594 = vst.msk [vmem:[%s1003_s10 + $0x48] sm:$0x1] %vm491_vm4, %v524_v3  ;;  %v521_v8 = vsel %vm184_vm0, %v519_v0, %v520_v5  ;;  %v523_v9 = vsel %vm184_vm0, %v520_v5, %v522_v2  ;;  %v639_v10 = vpop.f32.mrb[8].mxu0 }
  0xee   :  { %593 = vst.msk [vmem:[%s1003_s10 + $0x40] sm:$0xff] %vm85_vm2, %v525_v7  ;;  %591 = vst.msk [vmem:[%s1003_s10 + $0x30] sm:$0xff] %vm85_vm2, %v521_v8  ;;  %v900_v11 = vadd.f32 %v639_v10, %v576_v6  ;;  %v225_v12 = vpop.f32.mrb[9].mxu0 }
  0xef   :  { %592 = vst.msk [vmem:[%s1003_s10 + $0x38] sm:$0xff] %vm85_vm2, %v523_v9  ;;  %v902_v13 = vadd.f32 %v576_v6, %v225_v12  ;;  %v640_v14 = vpop.f32.mrb[10].mxu0 }
  0xf0   :  { %v266_v15 = vmul.f32 0.044715, %v900_v11  ;;  %v905_v16 = vadd.f32 %v640_v14, %v576_v6  ;;  %v228_v17 = vpop.f32.mrb[11].mxu0  ;;  %v258_v8 = vmul.f32 0.5, %v900_v11 }
  0xf1   :  { %v264_v18 = vmul.f32 0.044715, %v902_v13  ;;  %v908_v19 = vadd.f32 %v576_v6, %v228_v17  ;;  %v256_v12 = vmul.f32 0.5, %v902_v13 }
  0xf2   :  { %v274_v20 = vmul.f32 %v266_v15, %v900_v11  ;;  %v267_v21 = vmul.f32 0.044715, %v905_v16  ;;  %v259_v9 = vmul.f32 0.5, %v905_v16 }
  0xf3   :  { %v265_v22 = vmul.f32 0.044715, %v908_v19  ;;  %v272_v23 = vmul.f32 %v264_v18, %v902_v13  ;;  %v257_v14 = vmul.f32 0.5, %v908_v19 }
  0xf4   :  { %v282_v24 = vmul.f32 %v274_v20, %v900_v11  ;;  %v275_v25 = vmul.f32 %v267_v21, %v905_v16 }
  0xf5   :  { %v643_v26 = vpop.f32.mrb[12].mxu0  ;;  %v273_v27 = vmul.f32 %v265_v22, %v908_v19  ;;  %v280_v28 = vmul.f32 %v272_v23, %v902_v13 }
  0xf6   :  { %v283_v29 = vmul.f32 %v275_v25, %v905_v16  ;;  %v919_v30 = vadd.f32 %v643_v26, %v576_v6  ;;  %v241_v31 = vpop.f32.mrb[13].mxu0  ;;  %v290_v32 = vadd.f32 %v282_v24, %v900_v11 }
  0xf7   :  { %v922_v33 = vadd.f32 %v576_v6, %v241_v31  ;;  %v644_v34 = vpop.f32.mrb[14].mxu0  ;;  %v281_v35 = vmul.f32 %v273_v27, %v908_v19  ;;  %v288_v36 = vadd.f32 %v280_v28, %v902_v13 }
  0xf8   :  { %v270_v37 = vmul.f32 0.044715, %v919_v30  ;;  %v253_v38 = vadd.f32 %v644_v34, %v576_v6  ;;  %v244_v39 = vpop.f32.mrb[15].mxu0  ;;  %v291_v40 = vadd.f32 %v283_v29, %v905_v16  ;;  %v298_v41 = vmul.f32 0.7978846, %v290_v32 }
  0xf9   :  { %v268_v42 = vmul.f32 0.044715, %v922_v33  ;;  %v245_v43 = vadd.f32 %v576_v6, %v244_v39  ;;  %v289_v44 = vadd.f32 %v281_v35, %v908_v19  ;;  %v296_v45 = vmul.f32 0.7978846, %v288_v36 }
  0xfa   :  { %v278_v46 = vmul.f32 %v270_v37, %v919_v30  ;;  %v271_v47 = vmul.f32 0.044715, %v253_v38  ;;  %v299_v48 = vmul.f32 0.7978846, %v291_v40  ;;  %680 = vtanh.f32 %v298_v41  ;;  %v581_v41 = vld [vmem:[%s1005_s9] ss:$0 sm:$0xff] }
  0xfb   :  { %v276_v49 = vmul.f32 %v268_v42, %v922_v33  ;;  %v269_v50 = vmul.f32 0.044715, %v245_v43  ;;  %v297_v51 = vmul.f32 0.7978846, %v289_v44  ;;  %682 = vtanh.f32 %v296_v45 }
  0xfc   :  { %v286_v52 = vmul.f32 %v278_v46, %v919_v30  ;;  %v279_v53 = vmul.f32 %v271_v47, %v253_v38  ;;  %684 = vtanh.f32 %v299_v48  ;;  %v262_v16 = vmul.f32 0.5, %v919_v30 }
  0xfd   :  { %v284_v54 = vmul.f32 %v276_v49, %v922_v33  ;;  %v277_v55 = vmul.f32 %v269_v50, %v245_v43  ;;  %686 = vtanh.f32 %v297_v51  ;;  %v263_v13 = vmul.f32 0.5, %v253_v38 }
  0xfe   :  { %v287_v56 = vmul.f32 %v279_v53, %v253_v38  ;;  %v294_v57 = vadd.f32 %v286_v52, %v919_v30  ;;  %v260_v19 = vmul.f32 0.5, %v922_v33  ;;  %v261_v31 = vmul.f32 0.5, %v245_v43 }
  0xff   :  { %v285_v58 = vmul.f32 %v277_v55, %v245_v43  ;;  %v292_v59 = vadd.f32 %v284_v54, %v922_v33  ;;  %v469_v33 = vld [vmem:[%s1006_s3] sm:$0x1] }
 0x100   :  { %v295_v60 = vadd.f32 %v287_v56, %v253_v38  ;;  %v302_v61 = vmul.f32 0.7978846, %v294_v57 }
 0x101   :  { %v293_v62 = vadd.f32 %v285_v58, %v245_v43  ;;  %v300_v63 = vmul.f32 0.7978846, %v292_v59 }
 0x102   :  { %v303_v0 = vmul.f32 0.7978846, %v295_v60  ;;  %688 = vtanh.f32 %v302_v61 }
 0x103   :  { %v301_v1 = vmul.f32 0.7978846, %v293_v62  ;;  %690 = vtanh.f32 %v300_v63 }
 0x104   :  { %v681_v2 = vpop.eup %680  ;;  %692 = vtanh.f32 %v303_v0 }
 0x105   :  { %v683_v3 = vpop.eup %682  ;;  %v314_v4 = vadd.f32 1.0, %v681_v2  ;;  %694 = vtanh.f32 %v301_v1 }
 0x106   :  { %v685_v5 = vpop.eup %684  ;;  %v312_v6 = vadd.f32 1.0, %v683_v3 }
 0x107   :  { %v687_v7 = vpop.eup %686  ;;  %v315_v10 = vadd.f32 1.0, %v685_v5  ;;  %v322_v17 = vmul.f32 %v314_v4, %v258_v8 }
 0x108   :  { %v313_v15 = vadd.f32 1.0, %v687_v7  ;;  %v320_v20 = vmul.f32 %v312_v6, %v256_v12 }
 0x109   :  { %v323_v18 = vmul.f32 %v315_v10, %v259_v9 }
 0x10a   :  { %v321_v21 = vmul.f32 %v313_v15, %v257_v14 }
 0x10b   :  { %v329_v22 = vpack.c.bf16 %v323_v18, %v322_v17 }
 0x10c   :  { %v689_v23 = vpop.eup %688  ;;  %v328_v24 = vpack.c.bf16 %v321_v21, %v320_v20 }
 0x10d   :  { %v691_v25 = vpop.eup %690  ;;  %v318_v26 = vadd.f32 1.0, %v689_v23 }
 0x10e   :  { %v693_v27 = vpop.eup %692  ;;  %661 = vmatprep.mubr.bf16.mxu1 %v328_v24  ;;  %v316_v11 = vadd.f32 1.0, %v691_v25 }
 0x10f   :  { %v695_v28 = vpop.eup %694  ;;  %662 = vmatmul.mubr.bf16.vlgmr.msra.gmra.mrb[0].mxu1 %v329_v22  ;;  %v319_v29 = vadd.f32 1.0, %v693_v27  ;;  %v326_v34 = vmul.f32 %v318_v26, %v262_v16 }
 0x110   :  { %v317_v32 = vadd.f32 1.0, %v695_v28  ;;  %v324_v36 = vmul.f32 %v316_v11, %v260_v19 }
 0x111   :  { %v327_v35 = vmul.f32 %v319_v29, %v263_v13 }
 0x112   :  { %v325_v37 = vmul.f32 %v317_v32, %v261_v31 }
 0x113   :  { %v331_v39 = vpack.c.bf16 %v327_v35, %v326_v34 }
 0x114   :  { %v330_v40 = vpack.c.bf16 %v325_v37, %v324_v36 }
 0x116   :  { %665 = vmatprep.mubr.bf16.mxu1 %v330_v40 }
 0x117   :  { %666 = vmatmul.mubr.bf16.gmra.mrb[4].mxu1 %v331_v39 }
 0x1e2   :  { %v663_v42 = vpop.f32.mrb[0].mxu1 }
 0x1e3   :  { %v446_v30 = vadd.f32 %v663_v42, %v581_v41  ;;  %v437_v38 = vpop.f32.mrb[1].mxu1 }
 0x1e4   :  { %v438_v44 = vadd.f32 %v581_v41, %v437_v38  ;;  %v664_v45 = vpop.f32.mrb[2].mxu1 }
 0x1e5   :  { %v449_v43 = vadd.f32 %v664_v45, %v581_v41  ;;  %v440_v46 = vpop.f32.mrb[3].mxu1  ;;  %v500_v49 = vrot.slane %v446_v30, 7 }
 0x1e6   :  { %v497_v47 = vrot.slane %v438_v44, 7  ;;  %v441_v48 = vadd.f32 %v581_v41, %v440_v46 }
 0x1e7   :  { %v502_v50 = vrot.slane %v449_v43, 7 }
 0x1e8   :  { %v509_v51 = vsel %vm184_vm0, %v469_v33, %v497_v47  ;;  %v498_v52 = vrot.slane %v441_v48, 7 }
 0x1e9   :  { %510 = vst.msk [vmem:[%s1007_s11] sm:$0xff] %vm85_vm2, %v509_v51  ;;  %v503_v53 = vsel %vm184_vm0, %v500_v49, %v502_v50 }
 0x1ea   :  { %514 = vst.msk [vmem:[%s1007_s11 + $0x20] sm:$0x1] %vm491_vm4, %v502_v50  ;;  %v499_v54 = vsel %vm184_vm0, %v497_v47, %v498_v52  ;;  %v501_v55 = vsel %vm184_vm0, %v498_v52, %v500_v49  ;;  %v667_v56 = vpop.f32.mrb[4].mxu1 }
 0x1eb   :  { %513 = vst.msk [vmem:[%s1007_s11 + $0x18] sm:$0xff] %vm85_vm2, %v503_v53  ;;  %511 = vst.msk [vmem:[%s1007_s11 + $0x8] sm:$0xff] %vm85_vm2, %v499_v54  ;;  %v462_v57 = vadd.f32 %v667_v56, %v581_v41  ;;  %v453_v58 = vpop.f32.mrb[5].mxu1 }
 0x1ec   :  { %512 = vst.msk [vmem:[%s1007_s11 + $0x10] sm:$0xff] %vm85_vm2, %v501_v55  ;;  %v454_v59 = vadd.f32 %v581_v41, %v453_v58  ;;  %v668_v60 = vpop.f32.mrb[6].mxu1 }
 0x1ed   :  { %v465_v61 = vadd.f32 %v668_v60, %v581_v41  ;;  %v456_v62 = vpop.f32.mrb[7].mxu1  ;;  %v545_v1 = vrot.slane %v462_v57, 7 }
 0x1ee   :  { %v542_v63 = vrot.slane %v454_v59, 7  ;;  %v457_v0 = vadd.f32 %v581_v41, %v456_v62 }
 0x1ef   :  { %v547_v2 = vrot.slane %v465_v61, 7 }
 0x1f0   :  { %v554_v3 = vsel %vm184_vm0, %v469_v33, %v542_v63  ;;  %v543_v4 = vrot.slane %v457_v0, 7 }
 0x1f1   :  { %595 = vst.msk [vmem:[%s1007_s11 + $0x28] sm:$0xff] %vm85_vm2, %v554_v3  ;;  %v548_v5 = vsel %vm184_vm0, %v545_v1, %v547_v2 }
 0x1f2   :  { %599 = vst.msk [vmem:[%s1007_s11 + $0x48] sm:$0x1] %vm491_vm4, %v547_v2  ;;  %v544_v6 = vsel %vm184_vm0, %v542_v63, %v543_v4  ;;  %v546_v7 = vsel %vm184_vm0, %v543_v4, %v545_v1 }
 0x1f3   :  { %598 = vst.msk [vmem:[%s1007_s11 + $0x40] sm:$0xff] %vm85_vm2, %v548_v5  ;;  %596 = vst.msk [vmem:[%s1007_s11 + $0x30] sm:$0xff] %vm85_vm2, %v544_v6 }
 0x1f4   :  { %597 = vst.msk [vmem:[%s1007_s11 + $0x38] sm:$0xff] %vm85_vm2, %v546_v7 }

// kernel: pointvit_forward.5
= control target key start
LH: loop header
LB: loop body
LE: loop exit
PB: predicated region body
PF: predicated region fallthrough
CT: control target
= control target key end

     0   :  { %s3599_s21 = smov 0   ;;  %s3601_s22 = smov 0   ;;  %s4349_s0 = inlined_call_operand.vmem [shape: f32[2,33,32], index: 0, kind: input, shape index: {}]   ;;  %s4350_s1 = inlined_call_operand.vmem [shape: f32[2,33,32], index: 1, kind: input, shape index: {}]   ;;  %s4351_s2 = inlined_call_operand.vmem [shape: f32[2,1,32], index: 2, kind: input, shape index: {}, may-alias: {2,8}]   ;;  %s4352_s3 = inlined_call_operand.vmem [shape: f32[2,1,32], index: 3, kind: input, shape index: {}, may-alias: {3,9}]   ;;  %s4353_s4 = inlined_call_operand.vmem [shape: bf16[2,32,96], index: 4, kind: input, shape index: {}]   ;;  %s4354_s5 = inlined_call_operand.vmem [shape: f32[2,1,96], index: 5, kind: input, shape index: {}]   ;;  %s4355_s6 = inlined_call_operand.vmem [shape: bf16[2,32,32], index: 6, kind: input, shape index: {}]   ;;  %s4356_s7 = inlined_call_operand.vmem [shape: f32[2,1,32], index: 7, kind: input, shape index: {}]   ;;  %s4357_s8 = inlined_call_operand.vmem [shape: f32[2,1,32], index: 8, kind: input, shape index: {}, may-alias: {2,8}]   ;;  %s4358_s9 = inlined_call_operand.vmem [shape: f32[2,1,32], index: 9, kind: input, shape index: {}, may-alias: {3,9}]   ;;  %s4359_s10 = inlined_call_operand.vmem [shape: bf16[2,32,128], index: 10, kind: input, shape index: {}]   ;;  %s4360_s11 = inlined_call_operand.vmem [shape: f32[2,1,128], index: 11, kind: input, shape index: {}]   ;;  %s4361_s12 = inlined_call_operand.vmem [shape: bf16[2,128,32], index: 12, kind: input, shape index: {}]   ;;  %s4362_s13 = inlined_call_operand.vmem [shape: f32[2,1,32], index: 13, kind: input, shape index: {}]   ;;  %s4363_s14 = inlined_call_operand.vmem [shape: f32[1,32], index: 14, kind: input, shape index: {}]   ;;  %s4364_s15 = inlined_call_operand.vmem [shape: f32[1,32], index: 15, kind: input, shape index: {}]   ;;  %s4365_s16 = inlined_call_operand.vmem [shape: f32[2,33,32], index: 16, kind: output, shape index: {}]  }
   0x1   :  { %4371 = sst [smem:[#allocation9_spill]] %s4349_s0  ;;  %s3603_s23 = smov 0  }
   0x2   :  { %4372 = sst [smem:[#allocation10_spill]] %s4350_s1  ;;  %s3605_s24 = smov 0  }
   0x3   :  { %4373 = sst [smem:[#allocation11_spill]] %s4351_s2  ;;  %s3607_s25 = smov 0  }
   0x4   :  { %4374 = sst [smem:[#allocation12_spill]] %s4353_s4 }
   0x5   :  { %4375 = sst [smem:[#allocation13_spill]] %s4355_s6 }
   0x6   :  { %4376 = sst [smem:[#allocation14_spill]] %s4363_s14 }
   0x7   :  { %4377 = sst [smem:[#allocation15_spill]] %s4364_s15 }
   0x8   :  { %4378 = sst [smem:[#allocation16_spill]] %s4365_s16 }
   0x9 LB: > { %4379 = sst [smem:[#allocation2_spill]] %s3482_s21  ;;  %s35_s26 = sadd.s32 1, %s3490_s23  ;;  %s3498_s25 = sphi %s3607_s25, %s26_s25   ;;  %s3494_s24 = sphi %s3605_s24, %s4409_s24   ;;  %s3490_s23 = sphi %s3603_s23, %s4408_s23   ;;  %s3486_s22 = sphi %s3601_s22, %s4407_s22   ;;  %s3482_s21 = sphi %s3599_s21, %s4406_s21  }
   0xa   : > { %4380 = sst [smem:[#allocation3_spill]] %s3490_s23  ;;  %s38_s27 = sadd.s32 1, %s3494_s24 }
   0xb   : > { %4381 = sst [smem:[#allocation4_spill]] %s3494_s24  ;;  %p36_p0 = scmp.ge.s32.totalorder %s35_s26, 2 }
   0xc   : > { %4382 = sst [smem:[#allocation5_spill]] %s3498_s25  ;;  %p2843_p1 = scmp.ge.s32.totalorder %s3498_s25, 1 }
   0xd   : > { %p588_p2 = scmp.lt.s32.totalorder %s3498_s25, 5  ;;  %s4411_s26 = smov (%p36_p0, %s35_s26), 0 }
   0xe   : > { %4383 = sst [smem:[#allocation6_spill]] %s4411_s26  ;;  %s4413_s27 = smov (!%p36_p0, %s38_s27), %s3494_s24 }
   0xf   : > { %p589_p3 = pnand %p2843_p1, %p588_p2  ;;  %p40_p4 = scmp.ge.s32.totalorder %s4413_s27, 2 }
  0x11   : > { %s4415_s27 = smov (%p40_p4, %s4413_s27), 0  ;;  %592 = sbr.rel (%p589_p3) target bundleno = 3187 (0xc73), region = 84 }
  0x12   : > { %4384 = sst [smem:[#allocation7_spill]] %s4415_s27 }
  0x18   : > { %p687_p5 = scmp.lt.s32.totalorder %s3486_s22, 1  ;;  %p697_p6 = scmp.lt.s32.totalorder %s3482_s21, 1 }
  0x19   : > { %s4386_s24 = sld [smem:[#allocation9_spill]]  ;;  %s4387_s1 = sld [smem:[#allocation10_spill]] }
  0x1a   : > { %s4417_s22 = smov (!%p687_p5, %s3486_s22), 1  ;;  %s4388_s4 = sld [smem:[#allocation12_spill]] }
  0x1b   : > { %s3633_s28 = scalar_select %p697_p6, %s3482_s21, 1 }
  0x1c   : > { %s3273_s29 = smul.u32 40, %s4417_s22  ;;  %s4389_s6 = sld [smem:[#allocation13_spill]] }
  0x1d   : > { %s2924_s21 = sshll.u32 %s3633_s28, 4  ;;  %s740_s16 = scalar_lea.vmem %s4362_s13, %s3633_s28 }
  0x1f   : > { %s691_s23 = scalar_lea.vmem %s4386_s24, %s3273_s29  ;;  %s3649_s14 = scalar_lea.vmem %s4387_s1, %s3273_s29 }
  0x20   : > { %s3659_s2 = scalar_lea.vmem %s4388_s4, %s2924_s21  ;;  %s3681_s4 = scalar_lea.vmem %s4359_s10, %s2924_s21 }
  0x21   : > { %s4391_s1 = sld [smem:[#allocation16_spill]] }
  0x22   : > { %s3664_s26 = scalar_lea.vmem %s4389_s6, %s2924_s21  ;;  %s732_s6 = scalar_lea.vmem %s4360_s11, %s3633_s28 }
  0x23   : > { %4390 = sst [smem:[#allocation8_spill]] %s3664_s26  ;;  %s2927_s26 = sshll.u32 %s3633_s28, 6 }
  0x24   : > { %s3691_s15 = scalar_lea.vmem %s4361_s12, %s2927_s26  ;;  %s4392_s21 = sld [smem:[#allocation2_spill]] }
  0x27   : > { %s3700_s17 = scalar_lea.vmem %s4391_s1, %s3273_s29 }
  0x2a   : > { %p2855_p7 = scmp.ne.s32.totalorder %s4392_s21, 0 }
  0x2b   : > { %v751_v0 = vld [vmem:[%s691_s23] sm:$0xff] (!%p2855_p7)  ;;  %vm756_vm0 = vcmask (!%p2855_p7), 261120   ;;  %v752_v1 = vld [vmem:[%s691_s23 + $0x8] sm:$0xff] (!%p2855_p7)  ;;  %v753_v2 = vld [vmem:[%s691_s23 + $0x10] sm:$0xff] (!%p2855_p7)  ;;  %vm761_vm1 = vcmask (!%p2855_p7), 253952  }
  0x2c   : > { %750 = sbr.rel (%p2855_p7) target bundleno = 51 (0x33), region = 88  ;;  %757 = vst.msk [vmem:[%s3700_s17] sm:$0xff] (!%p2855_p7), %vm756_vm0, %v751_v0  ;;  %758 = vst.msk [vmem:[%s3700_s17 + $0x8] sm:$0xff] (!%p2855_p7), %vm756_vm0, %v752_v1  ;;  %v754_v3 = vld [vmem:[%s691_s23 + $0x18] sm:$0xff] (!%p2855_p7)  ;;  %v755_v4 = vld [vmem:[%s691_s23 + $0x20] sm:$0x1] (!%p2855_p7) }
  0x2d   : > { %759 = vst.msk [vmem:[%s3700_s17 + $0x10] sm:$0xff] (!%p2855_p7), %vm756_vm0, %v753_v2  ;;  %760 = vst.msk [vmem:[%s3700_s17 + $0x18] sm:$0xff] (!%p2855_p7), %vm756_vm0, %v754_v3 }
  0x2e   : > { %762 = vst.msk [vmem:[%s3700_s17 + $0x20] sm:$0x1] (!%p2855_p7), %vm761_vm1, %v755_v4 }
  0x33 PF: > { %v763_v5 = vld [vmem:[%s3700_s17] sm:$0xff]  ;;  %vm780_vm2 = vcmask 261120   ;;  %v770_v9 = vld [vmem:[%s3649_s14 + $0x10] sm:$0xff]  ;;  %v764_v10 = vld [vmem:[%s3700_s17 + $0x8] sm:$0xff]  ;;  %vm793_vm3 = vcmask 253952   ;;  %v3500_v51 = vmov 0.0   ;;  %s4395_s26 = scalar_lea.vmem %s4352_s3, %s3633_s28  ;;  %s4396_s19 = scalar_lea.vmem %s4354_s5, %s3633_s28 }
  0x34   : > { %v768_v6 = vld [vmem:[%s3649_s14] sm:$0xff]  ;;  %v765_v7 = vld [vmem:[%s3700_s17 + $0x10] sm:$0xff]  ;;  %v769_v11 = vld [vmem:[%s3649_s14 + $0x8] sm:$0xff]  ;;  %3013 = vmatprep.subr.bf16.mxu1 %v3500_v51  ;;  %3047 = vmatprep.subr.bf16.mxu0 %v3500_v51  ;;  %vm3501_vm4 = vmmov 0   ;;  %s3502_s24 = smov 88   ;;  %s3503_s27 = smov 120  }
  0x35   : > { %v3711_v8 = vadd.f32 %v768_v6, %v763_v5  ;;  %v3716_v12 = vadd.f32 %v770_v9, %v765_v7  ;;  %v3718_v13 = vadd.f32 %v769_v11, %v764_v10  ;;  %v766_v14 = vld [vmem:[%s3700_s17 + $0x18] sm:$0xff]  ;;  %v767_v16 = vld [vmem:[%s3700_s17 + $0x20] sm:$0x1]  ;;  %v3329_v52 = vld [vmem:[%s3659_s2 + $0x8] sm:$0xff]   ;;  %3017 = vmatprep.mubr.msk.bf16.mxu1 %vm3501_vm4, %v3500_v51  ;;  %3053 = vmatprep.mubr.msk.bf16.mxu0 %vm3501_vm4, %v3500_v51  ;;  %s3504_s20 = smov 96   ;;  %s3505_s25 = smov 80  }
  0x36   : > { %v771_v15 = vld [vmem:[%s3649_s14 + $0x18] sm:$0xff]  ;;  %v772_v19 = vld [vmem:[%s3649_s14 + $0x20] sm:$0x1]  ;;  %s4393_s14 = sld [smem:[#allocation11_spill]]  ;;  %s3506_s22 = smov 112   ;;  %vm981_vm5 = vcmask 64512  }
  0x37   : > { %v781_v17 = vsel %vm780_vm2, %v3711_v8, 0.0  ;;  %v3725_v18 = vadd.f32 %v771_v15, %v766_v14  ;;  %v787_v20 = vsel %vm780_vm2, %v3716_v12, 0.0  ;;  %v3730_v21 = vadd.f32 %v772_v19, %v767_v16  ;;  %v3328_v50 = vld [vmem:[%s3659_s2] sm:$0xff]   ;;  %s3507_s21 = smov 72   ;;  %s3508_s1 = smov 104  }
  0x38   : > { %782 = vadd.xlane.f32.xlu0 %v781_v17  ;;  %788 = vadd.xlane.f32.xlu1 %v787_v20  ;;  %v784_v22 = vsel %vm780_vm2, %v3718_v13, 0.0  ;;  %v2857_v14 = vld [vmem:[%s4395_s26] ss:$0 sm:$0xff]  ;;  %vm1317_vm6 = vcmask 269312   ;;  %vm1330_vm7 = vcmask 262144   ;;  %s3509_s2 = smov 56   ;;  %s4398_s18 = scalar_lea.vmem %s4356_s7, %s3633_s28 }
  0x39   : > { %v790_v23 = vsel %vm780_vm2, %v3725_v18, 0.0  ;;  %v794_v24 = vsel %vm793_vm3, %v3730_v21, 0.0  ;;  %3014 = vmatpush3.bf16.msra.mxu1 %v3328_v50  ;;  %vm1563_vm8 = vcmask 1040384   ;;  %s3513_s29 = smov 40   ;;  %s4397_s30 = sld [smem:[#allocation8_spill]]  ;;  %vm1719_vm9 = vcmask 1043456  }
  0x3a   : > { %3015 = vmatprep.subr.bf16.mxu1 %v3500_v51 }
  0x3c   : > { %785 = vadd.xlane.f32.xlu0 %v784_v22  ;;  %791 = vadd.xlane.f32.xlu1 %v790_v23  ;;  %s4394_s23 = scalar_lea.vmem %s4393_s14, %s3633_s28  ;;  %s3511_s14 = smov 64  }
  0x3d   : > { %3016 = vmatpush3.bf16.msra.mxu1 %v3329_v52  ;;  %v2856_v6 = vld [vmem:[%s4394_s23] ss:$0 sm:$0xff]  ;;  %s3512_s23 = smov 48  }
  0x3e   : > { %3029 = vmatprep.subr.bf16.mxu1 %v3500_v51 }
  0x40   : > { %795 = vadd.xlane.f32.xlu0 %v794_v24 }
  0xc5   : > { %v783_v25 = vpop.xlane.xlu0 %782  ;;  %v789_v27 = vpop.xlane.xlu1 %788 }
  0xc6   : > { %v798_v26 = vmul.f32 0.03125, %v783_v25  ;;  %v800_v28 = vmul.f32 0.03125, %v789_v27 }
  0xc8   : > { %v803_v29 = vsub.f32 %v3711_v8, %v798_v26  ;;  %v3740_v30 = vsub.f32 %v3716_v12, %v800_v28 }
  0xc9   : > { %v786_v31 = vpop.xlane.xlu0 %785  ;;  %v792_v33 = vpop.xlane.xlu1 %791 }
  0xca   : > { %v799_v32 = vmul.f32 0.03125, %v786_v31  ;;  %v808_v34 = vmul.f32 %v803_v29, %v803_v29  ;;  %v801_v35 = vmul.f32 0.03125, %v792_v33  ;;  %v810_v36 = vmul.f32 %v3740_v30, %v3740_v30 }
  0xcc   : > { %v804_v37 = vsub.f32 %v3718_v13, %v799_v32  ;;  %v813_v38 = vsel %vm780_vm2, %v808_v34, 0.0  ;;  %v806_v39 = vsub.f32 %v3725_v18, %v801_v35  ;;  %v819_v42 = vsel %vm780_vm2, %v810_v36, 0.0  ;;  %v2858_v34 = vld [vmem:[%s4396_s19] ss:$0 sm:$0xff] }
  0xcd   : > { %814 = vadd.xlane.f32.xlu1 %v813_v38  ;;  %v796_v40 = vpop.xlane.xlu0 %795 }
  0xce   : > { %v802_v41 = vmul.f32 0.03125, %v796_v40  ;;  %v809_v43 = vmul.f32 %v804_v37, %v804_v37  ;;  %v811_v44 = vmul.f32 %v806_v39, %v806_v39 }
  0xd0   : > { %v807_v45 = vsub.f32 %v3730_v21, %v802_v41  ;;  %v816_v46 = vsel %vm780_vm2, %v809_v43, 0.0  ;;  %v822_v47 = vsel %vm780_vm2, %v811_v44, 0.0 }
  0xd1   : > { %820 = vadd.xlane.f32.xlu1 %v819_v42  ;;  %817 = vadd.xlane.f32.xlu0 %v816_v46 }
  0xd2   : > { %v812_v48 = vmul.f32 %v807_v45, %v807_v45 }
  0xd4   : > { %v825_v49 = vsel %vm793_vm3, %v812_v48, 0.0 }
  0xd5   : > { %823 = vadd.xlane.f32.xlu0 %v822_v47  ;;  %826 = vadd.xlane.f32.xlu1 %v825_v49 }
 0x15a   : > { %v815_v53 = vpop.xlane.xlu1 %814 }
 0x15b   : > { %v828_v54 = vmul.f32 0.03125, %v815_v53 }
 0x15d   : > { %v833_v55 = vadd.f32 1e-06, %v828_v54 }
 0x15e   : > { %v821_v56 = vpop.xlane.xlu1 %820  ;;  %v818_v57 = vpop.xlane.xlu0 %817 }
 0x15f   : > { %3340 = vrsqrt.f32 %v833_v55  ;;  %v830_v58 = vmul.f32 0.03125, %v821_v56  ;;  %v829_v59 = vmul.f32 0.03125, %v818_v57 }
 0x161   : > { %v834_v60 = vadd.f32 1e-06, %v829_v59  ;;  %v835_v61 = vadd.f32 1e-06, %v830_v58 }
 0x162   : > { %v827_v62 = vpop.xlane.xlu1 %826  ;;  %v824_v63 = vpop.xlane.xlu0 %823 }
 0x163   : > { %v831_v0 = vmul.f32 0.03125, %v824_v63  ;;  %3342 = vrsqrt.f32 %v834_v60  ;;  %v832_v1 = vmul.f32 0.03125, %v827_v62 }
 0x164   : > { %3344 = vrsqrt.f32 %v835_v61 }
 0x165   : > { %v836_v2 = vadd.f32 1e-06, %v831_v0  ;;  %v837_v3 = vadd.f32 1e-06, %v832_v1 }
 0x167   : > { %3346 = vrsqrt.f32 %v836_v2 }
 0x168   : > { %3348 = vrsqrt.f32 %v837_v3 }
 0x169   : > { %v3341_v4 = vpop.eup %3340 }
 0x16a   : > { %v843_v5 = vmul.f32 %v3341_v4, %v803_v29 }
 0x16c   : > { %v854_v10 = vmul.f32 %v2856_v6, %v843_v5 }
 0x16d   : > { %v3343_v7 = vpop.eup %3342 }
 0x16e   : > { %v844_v9 = vmul.f32 %v3343_v7, %v804_v37  ;;  %v3345_v11 = vpop.eup %3344  ;;  %v865_v20 = vadd.f32 %v2857_v14, %v854_v10 }
 0x16f   : > { %v845_v17 = vmul.f32 %v3345_v11, %v3740_v30 }
 0x170   : > { %v855_v15 = vmul.f32 %v2856_v6, %v844_v9 }
 0x171   : > { %v3347_v16 = vpop.eup %3346  ;;  %v856_v26 = vmul.f32 %v2856_v6, %v845_v17 }
 0x172   : > { %v846_v19 = vmul.f32 %v3347_v16, %v806_v39  ;;  %v866_v22 = vadd.f32 %v2857_v14, %v855_v15  ;;  %v3349_v25 = vpop.eup %3348 }
 0x173   : > { %v847_v28 = vmul.f32 %v3349_v25, %v807_v45  ;;  %v867_v29 = vadd.f32 %v2857_v14, %v856_v26 }
 0x174   : > { %v870_v23 = vpack.c.bf16 %v866_v22, %v865_v20  ;;  %v857_v24 = vmul.f32 %v2856_v6, %v846_v19 }
 0x175   : > { %v858_v32 = vmul.f32 %v2856_v6, %v847_v28 }
 0x176   : > { %3018 = vmatmul.mubr.msk.bf16.vlgmr.msra.gmra.mrb[0].mxu1 %vm780_vm2, %v870_v23  ;;  %v868_v27 = vadd.f32 %v2857_v14, %v857_v24 }
 0x177   : > { %3021 = vmatprep.mubr.msk.bf16.mxu1 %vm3501_vm4, %v3500_v51  ;;  %v869_v30 = vadd.f32 %v2857_v14, %v858_v32 }
 0x178   : > { %v871_v31 = vpack.c.bf16 %v868_v27, %v867_v29 }
 0x179   : > { %v872_v33 = vpack.c.bf16 %v869_v30, %v869_v30 }
 0x17e   : > { %3022 = vmatmul.mubr.msk.bf16.gmra.mrb[4].mxu1 %vm780_vm2, %v871_v31 }
 0x17f   : > { %3025 = vmatprep.mubr.msk.bf16.mxu1 %vm3501_vm4, %v3500_v51 }
 0x186   : > { %3026 = vmatmul.mubr.msk.bf16.gmra.mrb[8].mxu1 %vm780_vm2, %v872_v33 }
 0x187   : > { %3035 = vmatprep.mubr.msk.bf16.mxu1 %vm3501_vm4, %v3500_v51 }
 0x249   : > { %v939_v35 = vpop.f32.mrb[0].mxu1 }
 0x24a   : > { %v940_v36 = vadd.f32 %v2858_v34, %v939_v35  ;;  %v3019_v37 = vpop.f32.mrb[1].mxu1 }
 0x24b   : > { %v942_v38 = vpop.f32.mrb[2].mxu1 }
 0x24c   : > { %v943_v39 = vadd.f32 %v2858_v34, %v942_v38  ;;  %v3020_v40 = vpop.f32.mrb[3].mxu1  ;;  %v961_v41 = vmul.f32 0.35355338, %v940_v36 }
 0x24e   : > { %v962_v42 = vmul.f32 0.35355338, %v943_v39  ;;  %v3787_v43 = vpack.c.bf16 %v943_v39, %v940_v36 }
 0x250   : > { %v3789_v44 = vpack.c.bf16 %v962_v42, %v961_v41  ;;  %1065 = vrot.lane.b32.xlu0 %v3787_v43, %s3502_s24 }
 0x251   : > { %v947_v45 = vpop.f32.mrb[4].mxu1 }
 0x252   : > { %v948_v46 = vadd.f32 %v2858_v34, %v947_v45  ;;  %v3023_v47 = vpop.f32.mrb[5].mxu1 }
 0x253   : > { %v950_v48 = vpop.f32.mrb[6].mxu1 }
 0x254   : > { %v951_v49 = vadd.f32 %v2858_v34, %v950_v48  ;;  %v3024_v50 = vpop.f32.mrb[7].mxu1  ;;  %v963_v52 = vmul.f32 0.35355338, %v948_v46 }
 0x256   : > { %v964_v53 = vmul.f32 0.35355338, %v951_v49  ;;  %v3792_v54 = vpack.c.bf16 %v951_v49, %v948_v46 }
 0x258   : > { %v3794_v55 = vpack.c.bf16 %v964_v53, %v963_v52  ;;  %1067 = vrot.lane.b32.xlu1 %v3792_v54, %s3502_s24 }
 0x259   : > { %v955_v56 = vpop.f32.mrb[8].mxu1 }
 0x25a   : > { %v956_v57 = vadd.f32 %v2858_v34, %v955_v56  ;;  %1061 = vrot.lane.b32.xlu0 %v3794_v55, %s3503_s27  ;;  %v3027_v58 = vpop.f32.mrb[9].mxu1 }
 0x25b   : > { %v958_v59 = vpop.f32.mrb[10].mxu1 }
 0x25c   : > { %v3798_v60 = vpack.c.bf16 %v956_v57, %v956_v57  ;;  %v3028_v61 = vpop.f32.mrb[11].mxu1  ;;  %v965_v62 = vmul.f32 0.35355338, %v956_v57 }
 0x25e   : > { %975 = vrot.lane.b32.xlu0 %v3787_v43, %s3504_s20  ;;  %1069 = vrot.lane.b32.xlu1 %v3798_v60, %s3502_s24  ;;  %v3804_v63 = vpack.c.bf16 %v965_v62, %v965_v62  ;;  %s4399_s24 = scalar_lea.vmem %s4357_s8, %s3633_s28 }
 0x262   : > { %979 = vrot.lane.b32.xlu0 %v3798_v60, %s3504_s20  ;;  %1059 = vrot.lane.b32.xlu1 %v3789_v44, %s3503_s27 }
 0x266   : > { %1153 = vrot.lane.b32.xlu0 %v3792_v54, %s3505_s25  ;;  %1063 = vrot.lane.b32.xlu1 %v3804_v63, %s3503_s27 }
 0x26a   : > { %1145 = vrot.lane.b32.xlu0 %v3789_v44, %s3506_s22  ;;  %977 = vrot.lane.b32.xlu1 %v3792_v54, %s3504_s20 }
 0x26e   : > { %1147 = vrot.lane.b32.xlu0 %v3794_v55, %s3506_s22  ;;  %1151 = vrot.lane.b32.xlu1 %v3787_v43, %s3505_s25 }
 0x272   : > { %1241 = vrot.lane.b32.xlu0 %v3798_v60, %s3507_s21  ;;  %1155 = vrot.lane.b32.xlu1 %v3798_v60, %s3505_s25  ;;  %s4400_s25 = scalar_lea.vmem %s4358_s9, %s3633_s28  ;;  %s4401_s28 = sld [smem:[#allocation2_spill]] }
 0x276   : > { %1231 = vrot.lane.b32.xlu0 %v3789_v44, %s3508_s1  ;;  %1237 = vrot.lane.b32.xlu1 %v3787_v43, %s3507_s21 }
 0x278   : > { %p2918_p8 = scmp.ge.s32.totalorder %s4401_s28, 1 }
 0x27a   : > { %1239 = vrot.lane.b32.xlu1 %v3792_v54, %s3507_s21 }
 0x27e   : > { %1233 = vrot.lane.b32.xlu1 %v3794_v55, %s3508_s1 }
 0x282   : > { %1149 = vrot.lane.b32.xlu1 %v3804_v63, %s3506_s22 }
 0x2c2   : > { %v1066_v0 = vpop.permute.xlu0 %1065 }
 0x2c3   : > { %v1081_v1 = vsel %vm981_vm5, %v1066_v0, 0 }
 0x2c4   : > { %3048 = vmatpush3.bf16.xpose.msra.mxu0 %v1081_v1 }
 0x2c5   : > { %3049 = vmatprep.subr.bf16.mxu0 %v3500_v51 }
 0x2ca   : > { %v1068_v2 = vpop.permute.xlu1 %1067 }
 0x2cb   : > { %v1084_v3 = vsel %vm981_vm5, %v1068_v2, 0 }
 0x2cc   : > { %3050 = vmatpush3.bf16.xpose.msra.mxu0 %v1084_v3  ;;  %v1062_v4 = vpop.permute.xlu0 %1061 }
 0x2cd   : > { %3051 = vmatprep.subr.bf16.mxu0 %v3500_v51 }
 0x2d0   : > { %v1070_v5 = vpop.permute.xlu1 %1069  ;;  %v976_v6 = vpop.permute.xlu0 %975 }
 0x2d1   : > { %v992_v7 = vsel %vm981_vm5, %v976_v6, 0  ;;  %v1087_v9 = vsel %vm981_vm5, %v1070_v5, 0 }
 0x2d2   : > { %3030 = vmatpush3.bf16.xpose.msra.mxu1 %v992_v7 }
 0x2d3   : > { %3031 = vmatprep.subr.bf16.mxu1 %v3500_v51 }
 0x2d4   : > { %v1060_v10 = vpop.permute.xlu1 %1059  ;;  %3052 = vmatpush3.bf16.xpose.msra.mxu0 %v1087_v9  ;;  %v980_v16 = vpop.permute.xlu0 %979 }
 0x2d5   : > { %3083 = vmatprep.subr.bf16.mxu0 %v3500_v51  ;;  %v998_v22 = vsel %vm981_vm5, %v980_v16, 0 }
 0x2d8   : > { %v1064_v11 = vpop.permute.xlu1 %1063  ;;  %v1154_v19 = vpop.permute.xlu0 %1153 }
 0x2d9   : > { %v1170_v31 = vsel %vm981_vm5, %v1154_v19, 0 }
 0x2db   : > { %3054 = vmatmul.mubr.msk.bf16.vlgmr.msra.gmra.mrb[0].mxu0 %vm981_vm5, %v1060_v10 }
 0x2dc   : > { %v978_v14 = vpop.permute.xlu1 %977  ;;  %3057 = vmatprep.mubr.msk.bf16.mxu0 %vm3501_vm4, %v3500_v51  ;;  %v1146_v25 = vpop.permute.xlu0 %1145 }
 0x2dd   : > { %v995_v15 = vsel %vm981_vm5, %v978_v14, 0 }
 0x2de   : > { %3032 = vmatpush3.bf16.xpose.msra.mxu1 %v995_v15 }
 0x2df   : > { %3033 = vmatprep.subr.bf16.mxu1 %v3500_v51 }
 0x2e0   : > { %v1152_v17 = vpop.permute.xlu1 %1151  ;;  %v1148_v28 = vpop.permute.xlu0 %1147 }
 0x2e1   : > { %v1167_v26 = vsel %vm981_vm5, %v1152_v17, 0 }
 0x2e3   : > { %3058 = vmatmul.mubr.msk.bf16.gmra.mrb[4].mxu0 %vm981_vm5, %v1062_v4 }
 0x2e4   : > { %v1156_v20 = vpop.permute.xlu1 %1155  ;;  %3061 = vmatprep.mubr.msk.bf16.mxu0 %vm3501_vm4, %v3500_v51  ;;  %v1242_v32 = vpop.permute.xlu0 %1241 }
 0x2e5   : > { %v1259_v30 = vsel %vm981_vm5, %v1242_v32, 0  ;;  %v1173_v33 = vsel %vm981_vm5, %v1156_v20, 0 }
 0x2e6   : > { %3034 = vmatpush3.bf16.xpose.msra.mxu1 %v998_v22 }
 0x2e7   : > { %3065 = vmatprep.subr.bf16.mxu1 %v3500_v51 }
 0x2e8   : > { %v1238_v23 = vpop.permute.xlu1 %1237  ;;  %v1232_v34 = vpop.permute.xlu0 %1231 }
 0x2e9   : > { %v1253_v24 = vsel %vm981_vm5, %v1238_v23, 0 }
 0x2ea   : > { %3084 = vmatpush3.bf16.xpose.msra.mxu0 %v1253_v24 }
 0x2eb   : > { %3062 = vmatmul.mubr.msk.bf16.gmra.mrb[8].mxu0 %vm981_vm5, %v1064_v11  ;;  %3085 = vmatprep.subr.bf16.mxu0 %v3500_v51 }
 0x2ec   : > { %3089 = vmatprep.mubr.msk.bf16.mxu0 %vm3501_vm4, %v3500_v51  ;;  %v1240_v27 = vpop.permute.xlu1 %1239 }
 0x2ed   : > { %3036 = vmatmul.mubr.msk.bf16.vlgmr.msra.gmra.mrb[12].mxu1 %vm981_vm5, %v3789_v44  ;;  %v1256_v29 = vsel %vm981_vm5, %v1240_v27, 0 }
 0x2ee   : > { %3066 = vmatpush3.bf16.xpose.msra.mxu1 %v1167_v26  ;;  %3039 = vmatprep.mubr.msk.bf16.mxu1 %vm3501_vm4, %v3500_v51 }
 0x2ef   : > { %3067 = vmatprep.subr.bf16.mxu1 %v3500_v51 }
 0x2f0   : > { %v1234_v35 = vpop.permute.xlu1 %1233 }
 0x2f2   : > { %3086 = vmatpush3.bf16.xpose.msra.mxu0 %v1256_v29 }
 0x2f3   : > { %3087 = vmatprep.subr.bf16.mxu0 %v3500_v51 }
 0x2f4   : > { %v1150_v36 = vpop.permute.xlu1 %1149 }
 0x2f5   : > { %3040 = vmatmul.mubr.msk.bf16.gmra.mrb[16].mxu1 %vm981_vm5, %v3794_v55 }
 0x2f6   : > { %3068 = vmatpush3.bf16.xpose.msra.mxu1 %v1170_v31  ;;  %3043 = vmatprep.mubr.msk.bf16.mxu1 %vm3501_vm4, %v3500_v51 }
 0x2f7   : > { %3069 = vmatprep.subr.bf16.mxu1 %v3500_v51 }
 0x2fa   : > { %3088 = vmatpush3.bf16.xpose.msra.mxu0 %v1259_v30 }
 0x2fb   : > { %3119 = vmatprep.subr.bf16.mxu0 %v3500_v51 }
 0x2fd   : > { %3044 = vmatmul.mubr.msk.bf16.gmra.mrb[20].mxu1 %vm981_vm5, %v3804_v63 }
 0x2fe   : > { %3070 = vmatpush3.bf16.xpose.msra.mxu1 %v1173_v33  ;;  %3071 = vmatprep.mubr.msk.bf16.mxu1 %vm3501_vm4, %v3500_v51 }
 0x2ff   : > { %3101 = vmatprep.subr.bf16.mxu1 %v3500_v51 }
 0x301   : > { %3090 = vmatmul.mubr.msk.bf16.vlgmr.msra.gmra.mrb[12].mxu0 %vm981_vm5, %v1232_v34 }
 0x302   : > { %3093 = vmatprep.mubr.msk.bf16.mxu0 %vm3501_vm4, %v3500_v51 }
 0x305   : > { %3072 = vmatmul.mubr.msk.bf16.vlgmr.msra.gmra.mrb[24].mxu1 %vm981_vm5, %v1146_v25 }
 0x306   : > { %3075 = vmatprep.mubr.msk.bf16.mxu1 %vm3501_vm4, %v3500_v51 }
 0x309   : > { %3094 = vmatmul.mubr.msk.bf16.gmra.mrb[16].mxu0 %vm981_vm5, %v1234_v35 }
 0x30a   : > { %3097 = vmatprep.mubr.msk.bf16.mxu0 %vm3501_vm4, %v3500_v51 }
 0x30d   : > { %3076 = vmatmul.mubr.msk.bf16.gmra.mrb[28].mxu1 %vm981_vm5, %v1148_v28 }
 0x30e   : > { %3079 = vmatprep.mubr.msk.bf16.mxu1 %vm3501_vm4, %v3500_v51 }
 0x315   : > { %3080 = vmatmul.mubr.msk.bf16.gmra.mrb[32].mxu1 %vm981_vm5, %v1150_v36 }
 0x316   : > { %3107 = vmatprep.mubr.msk.bf16.mxu1 %vm3501_vm4, %v3500_v51 }
 0x3ae   : > { %v3881_v37 = vpop.f32.mrb[0].mxu0 }
 0x3af   : > { %v3055_v38 = vpop.f32.mrb[1].mxu0  ;;  %v1334_v39 = vsel %vm1317_vm6, %v3881_v37, -inf }
 0x3b0   : > { %1335 = vmax.xlane.f32.xlu0 %v1334_v39  ;;  %v3885_v40 = vpop.f32.mrb[2].mxu0 }
 0x3b1   : > { %v3056_v41 = vpop.f32.mrb[3].mxu0  ;;  %v1337_v42 = vsel %vm1317_vm6, %v3885_v40, -inf }
 0x3b2   : > { %1338 = vmax.xlane.f32.xlu1 %v1337_v42 }
 0x3b6   : > { %v3889_v44 = vpop.f32.mrb[4].mxu0 }
 0x3b7   : > { %v3059_v45 = vpop.f32.mrb[5].mxu0  ;;  %v1340_v46 = vsel %vm1317_vm6, %v3889_v44, -inf }
 0x3b8   : > { %1341 = vmax.xlane.f32.xlu0 %v1340_v46  ;;  %v3893_v47 = vpop.f32.mrb[6].mxu0 }
 0x3b9   : > { %v3060_v48 = vpop.f32.mrb[7].mxu0  ;;  %v1343_v49 = vsel %vm1317_vm6, %v3893_v47, -inf }
 0x3bc   : > { %1344 = vmax.xlane.f32.xlu0 %v1343_v49 }
 0x3be   : > { %v3897_v50 = vpop.f32.mrb[8].mxu0 }
 0x3bf   : > { %v3063_v52 = vpop.f32.mrb[9].mxu0  ;;  %v1346_v53 = vsel %vm1330_vm7, %v3897_v50, -inf }
 0x3c0   : > { %1347 = vmax.xlane.f32.xlu1 %v1346_v53  ;;  %v3901_v55 = vpop.f32.mrb[12].mxu1  ;;  %v1142_v56 = vpop.f32.mrb[10].mxu0 }
 0x3c1   : > { %v3037_v57 = vpop.f32.mrb[13].mxu1  ;;  %v3064_v58 = vpop.f32.mrb[11].mxu0  ;;  %v1318_v32 = vsel %vm1317_vm6, %v3901_v55, -inf }
 0x3c2   : > { %v3903_v59 = vpop.f32.mrb[14].mxu1 }
 0x3c3   : > { %v3038_v61 = vpop.f32.mrb[15].mxu1 }
 0x3c8   : > { %v3905_v62 = vpop.f32.mrb[16].mxu1 }
 0x3c9   : > { %v3041_v0 = vpop.f32.mrb[17].mxu1  ;;  %v1324_v30 = vsel %vm1317_vm6, %v3905_v62, -inf }
 0x3ca   : > { %v3907_v1 = vpop.f32.mrb[18].mxu1 }
 0x3cb   : > { %v3042_v2 = vpop.f32.mrb[19].mxu1  ;;  %v1327_v33 = vsel %vm1317_vm6, %v3907_v1, -inf }
 0x3d0   : > { %v3909_v3 = vpop.f32.mrb[20].mxu1 }
 0x3d1   : > { %v3045_v4 = vpop.f32.mrb[21].mxu1  ;;  %v1331_v34 = vsel %vm1330_vm7, %v3909_v3, -inf }
 0x3d2   : > { %1235 = vrot.lane.b32.xlu0 %v3804_v63, %s3508_s1  ;;  %v1053_v5 = vpop.f32.mrb[22].mxu1 }
 0x3d3   : > { %v3046_v6 = vpop.f32.mrb[23].mxu1 }
 0x3d4   : > { %v3913_v7 = vpop.f32.mrb[12].mxu0 }
 0x3d5   : > { %v3091_v9 = vpop.f32.mrb[13].mxu0  ;;  %v1364_v39 = vsel %vm1317_vm6, %v3913_v7, -inf }
 0x3d6   : > { %1631 = vrot.lane.b32.xlu0 %v3787_v43, %s3509_s2  ;;  %v3917_v10 = vpop.f32.mrb[14].mxu0 }
 0x3d7   : > { %v3092_v11 = vpop.f32.mrb[15].mxu0 }
 0x3d8   : > { %v3919_v14 = vpop.f32.mrb[24].mxu1 }
 0x3d9   : > { %v3073_v15 = vpop.f32.mrb[25].mxu1  ;;  %v1349_v35 = vsel %vm1317_vm6, %v3919_v14, -inf }
 0x3da   : > { %1635 = vrot.lane.b32.xlu0 %v3798_v60, %s3509_s2  ;;  %v3923_v16 = vpop.f32.mrb[26].mxu1 }
 0x3db   : > { %v3074_v63 = vpop.f32.mrb[27].mxu1  ;;  %v1352_v36 = vsel %vm1317_vm6, %v3923_v16, -inf }
 0x3dc   : > { %v3925_v17 = vpop.f32.mrb[16].mxu0 }
 0x3dd   : > { %v3095_v19 = vpop.f32.mrb[17].mxu0  ;;  %v1370_v41 = vsel %vm1317_vm6, %v3925_v17, -inf }
 0x3de   : > { %v3927_v20 = vpop.f32.mrb[18].mxu0 }
 0x3df   : > { %v3096_v22 = vpop.f32.mrb[19].mxu0 }
 0x3e0   : > { %v3929_v23 = vpop.f32.mrb[28].mxu1 }
 0x3e1   : > { %v3077_v24 = vpop.f32.mrb[29].mxu1 }
 0x3e2   : > { %v3931_v25 = vpop.f32.mrb[30].mxu1 }
 0x3e3   : > { %v3078_v26 = vpop.f32.mrb[31].mxu1  ;;  %v1358_v38 = vsel %vm1317_vm6, %v3931_v25, -inf }
 0x3e8   : > { %v3933_v27 = vpop.f32.mrb[32].mxu1 }
 0x3e9   : > { %v3081_v28 = vpop.f32.mrb[33].mxu1 }
 0x3ea   : > { %v1228_v29 = vpop.f32.mrb[34].mxu1 }
 0x3eb   : > { %v3082_v31 = vpop.f32.mrb[35].mxu1 }
 0x3ec   : > { %v1321_v31 = vsel %vm1317_vm6, %v3903_v59, -inf }
 0x3f9   : > { %1319 = vmax.xlane.f32.xlu0 %v1318_v32 }
 0x3fd   : > { %1325 = vmax.xlane.f32.xlu0 %v1324_v30  ;;  %v1355_v30 = vsel %vm1317_vm6, %v3929_v23, -inf }
 0x401   : > { %1328 = vmax.xlane.f32.xlu0 %v1327_v33 }
 0x405   : > { %1332 = vmax.xlane.f32.xlu0 %v1331_v34  ;;  %v1361_v34 = vsel %vm1330_vm7, %v3933_v27, -inf }
 0x409   : > { %1350 = vmax.xlane.f32.xlu0 %v1349_v35  ;;  %v1373_v35 = vsel %vm1317_vm6, %v3927_v20, -inf }
 0x40d   : > { %1353 = vmax.xlane.f32.xlu0 %v1352_v36 }
 0x411   : > { %1359 = vmax.xlane.f32.xlu0 %v1358_v38 }
 0x415   : > { %1365 = vmax.xlane.f32.xlu0 %v1364_v39 }
 0x419   : > { %1371 = vmax.xlane.f32.xlu0 %v1370_v41 }
 0x43d   : > { %v1336_v42 = vpop.xlane.xlu0 %1335 }
 0x43e   : > { %v1384_v45 = vsub.f32 %v3881_v37, %v1336_v42 }
 0x43f   : > { %v1339_v46 = vpop.xlane.xlu1 %1338 }
 0x440   : > { %v1409_v48 = vmul.f32 1.442695, %v1384_v45  ;;  %v1385_v49 = vsub.f32 %v3885_v40, %v1339_v46  ;;  %v3510_v46 = vmov 0  }
 0x442   : > { %3350 = vpow2.f32 %v1409_v48  ;;  %v1411_v52 = vmul.f32 1.442695, %v1385_v49  ;;  %v3987_v48 = vsel %vm1563_vm8, 65535, %v3510_v46 }
 0x444   : > { %3352 = vpow2.f32 %v1411_v52 }
 0x445   : > { %v1342_v53 = vpop.xlane.xlu0 %1341 }
 0x446   : > { %v1386_v56 = vsub.f32 %v3889_v44, %v1342_v53 }
 0x448   : > { %v1413_v57 = vmul.f32 1.442695, %v1386_v56 }
 0x449   : > { %v1345_v58 = vpop.xlane.xlu0 %1344 }
 0x44a   : > { %3354 = vpow2.f32 %v1413_v57  ;;  %v1387_v61 = vsub.f32 %v3893_v47, %v1345_v58 }
 0x44c   : > { %v3957_v0 = vpop.eup %3350  ;;  %v1415_v2 = vmul.f32 1.442695, %v1387_v61 }
 0x44d   : > { %v1348_v4 = vpop.xlane.xlu1 %1347  ;;  %v1236_v37 = vpop.permute.xlu0 %1235  ;;  %v1454_v5 = vsel %vm1317_vm6, %v3957_v0, 0.0 }
 0x44e   : > { %v3353_v40 = vpop.eup %3352  ;;  %3356 = vpow2.f32 %v1415_v2  ;;  %v1388_v6 = vsub.f32 %v3897_v50, %v1348_v4  ;;  %1455 = vadd.xlane.f32.xlu1 %v1454_v5  ;;  %3098 = vmatmul.mubr.msk.bf16.gmra.mrb[20].mxu0 %vm981_vm5, %v1236_v37 }
 0x44f   : > { %3125 = vmatprep.mubr.msk.bf16.mxu0 %vm3501_vm4, %v3500_v51  ;;  %v1457_v9 = vsel %vm1317_vm6, %v3353_v40, 0.0 }
 0x450   : > { %v1417_v44 = vmul.f32 1.442695, %v1388_v6 }
 0x451   : > { %v1632_v47 = vpop.permute.xlu0 %1631 }
 0x452   : > { %3358 = vpow2.f32 %v1417_v44  ;;  %1458 = vadd.xlane.f32.xlu1 %v1457_v9  ;;  %3120 = vmatpush3.bf16.msra.mxu0 %v1632_v47 }
 0x453   : > { %3121 = vmatprep.subr.bf16.mxu0 %v3500_v51 }
 0x454   : > { %v3355_v11 = vpop.eup %3354 }
 0x455   : > { %v1460_v15 = vsel %vm1317_vm6, %v3355_v11, 0.0  ;;  %v1636_v24 = vpop.permute.xlu0 %1635 }
 0x456   : > { %1461 = vadd.xlane.f32.xlu1 %v1460_v15  ;;  %v1649_v56 = vand.u32 %v1636_v24, %v3987_v48 }
 0x458   : > { %v3357_v50 = vpop.eup %3356 }
 0x459   : > { %v1463_v63 = vsel %vm1317_vm6, %v3357_v50, 0.0 }
 0x45a   : > { %1464 = vadd.xlane.f32.xlu1 %v1463_v63 }
 0x45c   : > { %v3359_v19 = vpop.eup %3358 }
 0x45d   : > { %v1466_v22 = vsel %vm1330_vm7, %v3359_v19, 0.0 }
 0x45e   : > { %1467 = vadd.xlane.f32.xlu1 %v1466_v22 }
 0x46f   : > { %1633 = vrot.lane.b32.xlu1 %v3792_v54, %s3509_s2 }
 0x486   : > { %v1320_v26 = vpop.xlane.xlu0 %1319 }
 0x487   : > { %v1379_v28 = vsub.f32 %v3901_v55, %v1320_v26  ;;  %v1367_v55 = vsel %vm1317_vm6, %v3917_v10, -inf }
 0x489   : > { %v1399_v29 = vmul.f32 1.442695, %v1379_v28 }
 0x48a   : > { %v1326_v44 = vpop.xlane.xlu0 %1325 }
 0x48b   : > { %3360 = vpow2.f32 %v1399_v29 }
 0x48e   : > { %v1329_v47 = vpop.xlane.xlu0 %1328 }
 0x48f   : > { %v1382_v9 = vsub.f32 %v3907_v1, %v1329_v47 }
 0x491   : > { %v1405_v15 = vmul.f32 1.442695, %v1382_v9 }
 0x493   : > { %1322 = vmax.xlane.f32.xlu1 %v1321_v31 }
 0x495   : > { %v3975_v32 = vpop.eup %3360 }
 0x496   : > { %v1439_v33 = vsel %vm1317_vm6, %v3975_v32, 0.0 }
 0x497   : > { %1356 = vmax.xlane.f32.xlu1 %v1355_v30  ;;  %1440 = vadd.xlane.f32.xlu0 %v1439_v33 }
 0x49b   : > { %1362 = vmax.xlane.f32.xlu1 %v1361_v34 }
 0x49f   : > { %1368 = vmax.xlane.f32.xlu1 %v1367_v55 }
 0x4a3   : > { %1374 = vmax.xlane.f32.xlu1 %v1373_v35 }
 0x4db   : > { %v1456_v36 = vpop.xlane.xlu1 %1455 }
 0x4df   : > { %v1459_v38 = vpop.xlane.xlu1 %1458 }
 0x4e0   : > { %3362 = vrcp.f32 %v1459_v38  ;;  %v1333_v38 = vpop.xlane.xlu0 %1332 }
 0x4e1   : > { %3364 = vrcp.f32 %v1456_v36 }
 0x4e3   : > { %v1462_v39 = vpop.xlane.xlu1 %1461 }
 0x4e7   : > { %v1465_v41 = vpop.xlane.xlu1 %1464 }
 0x4e8   : > { %3366 = vrcp.f32 %v1465_v41 }
 0x4e9   : > { %3368 = vrcp.f32 %v1462_v39  ;;  %v1351_v39 = vpop.xlane.xlu0 %1350 }
 0x4ea   : > { %v3363_v45 = vpop.eup %3362 }
 0x4eb   : > { %v1468_v42 = vpop.xlane.xlu1 %1467  ;;  %v3365_v52 = vpop.eup %3364  ;;  %v1525_v53 = vmul.f32 %v3363_v45, %v3353_v40 }
 0x4ec   : > { %v1524_v57 = vmul.f32 %v3365_v52, %v3957_v0  ;;  %3370 = vrcp.f32 %v1468_v42 }
 0x4ed   : > { %3372 = vpow2.f32 %v1405_v15  ;;  %v1354_v41 = vpop.xlane.xlu0 %1353 }
 0x4ee   : > { %v1628_v58 = vpack.c.bf16 %v1525_v53, %v1524_v57  ;;  %v1390_v42 = vsub.f32 %v3923_v16, %v1354_v41 }
 0x4ef   : > { %v1634_v49 = vpop.permute.xlu1 %1633 }
 0x4f0   : > { %3122 = vmatpush3.bf16.msra.mxu0 %v1634_v49  ;;  %v1421_v46 = vmul.f32 1.442695, %v1390_v42 }
 0x4f1   : > { %3123 = vmatprep.subr.bf16.mxu0 %v3500_v51 }
 0x4f2   : > { %v3367_v61 = vpop.eup %3366 }
 0x4f3   : > { %v3369_v2 = vpop.eup %3368  ;;  %v1527_v4 = vmul.f32 %v3367_v61, %v3357_v50 }
 0x4f4   : > { %3124 = vmatpush3.bf16.msra.mxu0 %v1649_v56  ;;  %v1526_v37 = vmul.f32 %v3369_v2, %v3355_v11  ;;  %v1381_v11 = vsub.f32 %v3905_v62, %v1326_v44  ;;  %v1360_v56 = vpop.xlane.xlu0 %1359  ;;  %v1383_v2 = vsub.f32 %v3909_v3, %v1333_v38 }
 0x4f5   : > { %3151 = vmatprep.subr.bf16.mxu0 %v3500_v51  ;;  %v1392_v57 = vsub.f32 %v3931_v25, %v1360_v56 }
 0x4f6   : > { %v1629_v5 = vpack.c.bf16 %v1527_v4, %v1526_v37  ;;  %v3371_v40 = vpop.eup %3370  ;;  %v1403_v28 = vmul.f32 1.442695, %v1381_v11 }
 0x4f7   : > { %3126 = vmatmul.mubr.msk.bf16.vlgmr.msra.gmra.mrb[24].mxu0 %vm1317_vm6, %v1628_v58  ;;  %v1528_v0 = vmul.f32 %v3371_v40, %v3359_v19  ;;  %v4009_v26 = vpop.eup %3372  ;;  %v1425_v61 = vmul.f32 1.442695, %v1392_v57 }
 0x4f8   : > { %3129 = vmatprep.mubr.msk.bf16.mxu0 %vm3501_vm4, %v3500_v51  ;;  %v1448_v62 = vsel %vm1317_vm6, %v4009_v26, 0.0 }
 0x4f9   : > { %v1630_v6 = vpack.c.bf16 %v1528_v0, %v1528_v0 }
 0x4ff   : > { %3130 = vmatmul.mubr.msk.bf16.gmra.mrb[28].mxu0 %vm1317_vm6, %v1629_v5  ;;  %v1389_v5 = vsub.f32 %v3919_v14, %v1351_v39 }
 0x500   : > { %3133 = vmatprep.mubr.msk.bf16.mxu0 %vm3501_vm4, %v3500_v51 }
 0x501   : > { %v1419_v0 = vmul.f32 1.442695, %v1389_v5 }
 0x507   : > { %3134 = vmatmul.mubr.msk.bf16.gmra.mrb[32].mxu0 %vm1317_vm6, %v1630_v6 }
 0x508   : > { %3153 = vmatprep.mubr.msk.bf16.mxu0 %vm3501_vm4, %v3500_v51 }
 0x520   : > { %v1323_v50 = vpop.xlane.xlu1 %1322 }
 0x521   : > { %v1380_v63 = vsub.f32 %v3903_v59, %v1323_v50  ;;  %v4005_v22 = vpop.f32.mrb[20].mxu0 }
 0x522   : > { %v3099_v19 = vpop.f32.mrb[21].mxu0  ;;  %v1376_v24 = vsel %vm1330_vm7, %v4005_v22, -inf }
 0x523   : > { %v1401_v29 = vmul.f32 1.442695, %v1380_v63  ;;  %v1314_v31 = vpop.f32.mrb[22].mxu0  ;;  %1377 = vmax.xlane.f32.xlu0 %v1376_v24 }
 0x524   : > { %v1357_v1 = vpop.xlane.xlu1 %1356  ;;  %v3100_v30 = vpop.f32.mrb[23].mxu0 }
 0x525   : > { %3374 = vpow2.f32 %v1401_v29  ;;  %v1391_v52 = vsub.f32 %v3929_v23, %v1357_v1  ;;  %v1407_v23 = vmul.f32 1.442695, %v1383_v2 }
 0x526   : > { %3376 = vpow2.f32 %v1403_v28 }
 0x527   : > { %1449 = vadd.xlane.f32.xlu0 %v1448_v62  ;;  %3378 = vpow2.f32 %v1421_v46  ;;  %v1423_v58 = vmul.f32 1.442695, %v1391_v52 }
 0x528   : > { %v4013_v59 = vpop.xlane.xlu1 %1362 }
 0x529   : > { %v1393_v33 = vsub.f32 %v3933_v27, %v4013_v59 }
 0x52b   : > { %v1427_v62 = vmul.f32 1.442695, %v1393_v33 }
 0x52c   : > { %v1369_v45 = vpop.xlane.xlu1 %1368 }
 0x52d   : > { %v1395_v49 = vsub.f32 %v3917_v10, %v1369_v45  ;;  %v1366_v10 = vpop.xlane.xlu0 %1365 }
 0x52e   : > { %v1394_v3 = vsub.f32 %v3913_v7, %v1366_v10  ;;  %v1540_v10 = vld [vmem:[%s4397_s30 + $0x4] sm:$0xf] }
 0x52f   : > { %v4017_v34 = vpop.eup %3374  ;;  %v1431_v53 = vmul.f32 1.442695, %v1395_v49 }
 0x530   : > { %v1442_v55 = vsel %vm1317_vm6, %v4017_v34, 0.0  ;;  %v4021_v35 = vpop.eup %3376  ;;  %v1429_v9 = vmul.f32 1.442695, %v1394_v3  ;;  %v1375_v31 = vpop.xlane.xlu1 %1374 }
 0x531   : > { %1443 = vadd.xlane.f32.xlu1 %v1442_v55  ;;  %v1445_v36 = vsel %vm1317_vm6, %v4021_v35, 0.0  ;;  %3380 = vpow2.f32 %v1431_v53  ;;  %v4036_v16 = vpop.eup %3378  ;;  %v1372_v6 = vpop.xlane.xlu0 %1371  ;;  %v1397_v1 = vsub.f32 %v3927_v20, %v1375_v31 }
 0x532   : > { %3382 = vpow2.f32 %v1423_v58  ;;  %v1472_v4 = vsel %vm1317_vm6, %v4036_v16, 0.0  ;;  %v1396_v14 = vsub.f32 %v3925_v17, %v1372_v6 }
 0x533   : > { %3384 = vpow2.f32 %v1425_v61  ;;  %v1435_v30 = vmul.f32 1.442695, %v1397_v1 }
 0x534   : > { %3386 = vpow2.f32 %v1407_v23  ;;  %v1433_v11 = vmul.f32 1.442695, %v1396_v14 }
 0x535   : > { %1446 = vadd.xlane.f32.xlu1 %v1445_v36  ;;  %3388 = vpow2.f32 %v1419_v0  ;;  %v1441_v55 = vpop.xlane.xlu0 %1440 }
 0x536   : > { %3390 = vpow2.f32 %v1429_v9 }
 0x537   : > { %3392 = vpow2.f32 %v1433_v11 }
 0x538   : > { %3394 = vpow2.f32 %v1435_v30 }
 0x539   : > { %3396 = vpow2.f32 %v1427_v62 }
 0x53b   : > { %v4041_v37 = vpop.eup %3380 }
 0x53c   : > { %v1487_v25 = vsel %vm1317_vm6, %v4041_v37, 0.0  ;;  %v4046_v40 = vpop.eup %3382 }
 0x53d   : > { %1546 = vrot.lane.b32.xlu0 %v3787_v43, %s3511_s14  ;;  %v1475_v44 = vsel %vm1317_vm6, %v4046_v40, 0.0  ;;  %v4051_v47 = vpop.eup %3384 }
 0x53e   : > { %v1478_v15 = vsel %vm1317_vm6, %v4051_v47, 0.0  ;;  %v4056_v50 = vpop.eup %3386 }
 0x53f   : > { %v1451_v7 = vsel %vm1330_vm7, %v4056_v50, 0.0  ;;  %v4060_v63 = vpop.eup %3388 }
 0x540   : > { %v1469_v19 = vsel %vm1317_vm6, %v4060_v63, 0.0  ;;  %v4064_v17 = vpop.eup %3390 }
 0x541   : > { %1850 = vrot.lane.b32.xlu0 %v3787_v43, %s3512_s23  ;;  %v1484_v24 = vsel %vm1317_vm6, %v4064_v17, 0.0  ;;  %v4068_v28 = vpop.eup %3392 }
 0x542   : > { %v1490_v29 = vsel %vm1317_vm6, %v4068_v28, 0.0  ;;  %v4080_v36 = vpop.eup %3394 }
 0x543   : > { %v1493_v41 = vsel %vm1317_vm6, %v4080_v36, 0.0 }
 0x546   : > { %1548 = vrot.lane.b32.xlu1 %v3792_v54, %s3511_s14 }
 0x54a   : > { %1550 = vrot.lane.b32.xlu1 %v3798_v60, %s3511_s14 }
 0x54e   : > { %1852 = vrot.lane.b32.xlu1 %v3792_v54, %s3512_s23 }
 0x560   : > { %1473 = vadd.xlane.f32.xlu0 %v1472_v4 }
 0x564   : > { %1488 = vadd.xlane.f32.xlu0 %v1487_v25 }
 0x568   : > { %1476 = vadd.xlane.f32.xlu0 %v1475_v44 }
 0x56c   : > { %1479 = vadd.xlane.f32.xlu0 %v1478_v15 }
 0x572   : > { %1452 = vadd.xlane.f32.xlu1 %v1451_v7 }
 0x576   : > { %1470 = vadd.xlane.f32.xlu1 %v1469_v19 }
 0x57a   : > { %1485 = vadd.xlane.f32.xlu1 %v1484_v24 }
 0x57e   : > { %1491 = vadd.xlane.f32.xlu1 %v1490_v29 }
 0x582   : > { %1854 = vrot.lane.b32.xlu0 %v3798_v60, %s3512_s23 }
 0x58f   : > { %2005 = vrot.lane.b32.xlu1 %v3787_v43, %s3513_s29  ;;  %v4085_v43 = vpop.eup %3396 }
 0x590   : > { %v1481_v27 = vsel %vm1330_vm7, %v4085_v43, 0.0 }
 0x5b0   : > { %v1378_v38 = vpop.xlane.xlu0 %1377 }
 0x5b1   : > { %v1398_v39 = vsub.f32 %v4005_v22, %v1378_v38 }
 0x5b3   : > { %v1437_v42 = vmul.f32 1.442695, %v1398_v39  ;;  %1494 = vadd.xlane.f32.xlu1 %v1493_v41 }
 0x5b4   : > { %v1450_v20 = vpop.xlane.xlu0 %1449 }
 0x5b5   : > { %3398 = vpow2.f32 %v1437_v42 }
 0x5b6   : > { %3400 = vrcp.f32 %v1441_v55 }
 0x5b7   : > { %1482 = vadd.xlane.f32.xlu1 %v1481_v27 }
 0x5b8   : > { %v1547_v59 = vpop.permute.xlu0 %1546 }
 0x5b9   : > { %3102 = vmatpush3.bf16.msra.mxu1 %v1547_v59  ;;  %v1539_v59 = vld [vmem:[%s4397_s30] sm:$0xf] }
 0x5ba   : > { %3103 = vmatprep.subr.bf16.mxu1 %v3500_v51 }
 0x5be   : > { %v1444_v33 = vpop.xlane.xlu1 %1443 }
 0x5bf   : > { %v4090_v22 = vpop.eup %3398  ;;  %3402 = vrcp.f32 %v1444_v33 }
 0x5c0   : > { %v1496_v45 = vsel %vm1330_vm7, %v4090_v22, 0.0  ;;  %v3401_v52 = vpop.eup %3400 }
 0x5c1   : > { %1497 = vadd.xlane.f32.xlu0 %v1496_v45  ;;  %v1519_v4 = vmul.f32 %v3401_v52, %v3975_v32  ;;  %v1789_v45 = vsel %vm1719_vm9, %v1539_v59, 0 }
 0x5c2   : > { %v1447_v46 = vpop.xlane.xlu1 %1446  ;;  %3152 = vmatpush3.bf16.msra.mxu0 %v1789_v45 }
 0x5c3   : > { %3404 = vrcp.f32 %v1447_v46  ;;  %3183 = vmatprep.subr.bf16.mxu0 %v3500_v51 }
 0x5c4   : > { %3406 = vrcp.f32 %v1450_v20 }
 0x5c6   : > { %v1549_v49 = vpop.permute.xlu1 %1548 }
 0x5c7   : > { %3104 = vmatpush3.bf16.msra.mxu1 %v1549_v49 }
 0x5c8   : > { %2007 = vrot.lane.b32.xlu1 %v3792_v54, %s3513_s29  ;;  %3105 = vmatprep.subr.bf16.mxu1 %v3500_v51 }
 0x5c9   : > { %v3403_v53 = vpop.eup %3402 }
 0x5ca   : > { %v1520_v56 = vmul.f32 %v3403_v53, %v4017_v34  ;;  %v1685_v57 = vpop.f32.mrb[24].mxu0  ;;  %v1551_v58 = vpop.permute.xlu1 %1550  ;;  %v1721_v34 = vsel %vm1719_vm9, %v1540_v10, 0 }
 0x5cb   : > { %v1567_v61 = vand.u32 %v3987_v48, %v1551_v58  ;;  %v3127_v2 = vpop.f32.mrb[25].mxu0 }
 0x5cc   : > { %v1688_v23 = vpop.f32.mrb[26].mxu0  ;;  %2009 = vrot.lane.b32.xlu1 %v3798_v60, %s3513_s29  ;;  %v1543_v25 = vpack.c.bf16 %v1520_v56, %v1519_v4 }
 0x5cd   : > { %v1707_v5 = vpack.c.bf16 %v1688_v23, %v1685_v57  ;;  %3106 = vmatpush3.bf16.msra.mxu1 %v1567_v61  ;;  %v3128_v54 = vpop.f32.mrb[27].mxu0  ;;  %v3405_v0 = vpop.eup %3404 }
 0x5ce   : > { %3137 = vmatprep.subr.bf16.mxu1 %v3500_v51  ;;  %v3407_v3 = vpop.eup %3406  ;;  %v1521_v6 = vmul.f32 %v3405_v0, %v4021_v35  ;;  %v1853_v31 = vpop.permute.xlu1 %1852 }
 0x5cf   : > { %v1522_v9 = vmul.f32 %v3407_v3, %v4009_v26  ;;  %v1851_v35 = vpop.permute.xlu0 %1850 }
 0x5d0   : > { %3108 = vmatmul.mubr.msk.bf16.vlgmr.msra.gmra.mrb[36].mxu1 %vm1317_vm6, %v1543_v25 }
 0x5d1   : > { %3111 = vmatprep.mubr.msk.bf16.mxu1 %vm3501_vm4, %v3500_v51  ;;  %3138 = vmatpush3.bf16.msra.mxu1 %v1721_v34  ;;  %v1544_v11 = vpack.c.bf16 %v1522_v9, %v1521_v6 }
 0x5d2   : > { %v1693_v32 = vpop.f32.mrb[28].mxu0  ;;  %3165 = vmatprep.subr.bf16.mxu1 %v3500_v51 }
 0x5d3   : > { %v3131_v60 = vpop.f32.mrb[29].mxu0 }
 0x5d4   : > { %v1696_v44 = vpop.f32.mrb[30].mxu0 }
 0x5d5   : > { %v1708_v14 = vpack.c.bf16 %v1696_v44, %v1693_v32  ;;  %v3132_v15 = vpop.f32.mrb[31].mxu0 }
 0x5d8   : > { %3112 = vmatmul.mubr.msk.bf16.gmra.mrb[40].mxu1 %vm1317_vm6, %v1544_v11 }
 0x5d9   : > { %3115 = vmatprep.mubr.msk.bf16.mxu1 %vm3501_vm4, %v3500_v51 }
 0x5da   : > { %v1701_v7 = vpop.f32.mrb[32].mxu0 }
 0x5db   : > { %v3135_v19 = vpop.f32.mrb[33].mxu0  ;;  %v1709_v33 = vpack.c.bf16 %v1701_v7, %v1701_v7 }
 0x5dc   : > { %v1704_v24 = vpop.f32.mrb[34].mxu0  ;;  %v1541_v19 = vld [vmem:[%s4397_s30 + $0x8] sm:$0xf] }
 0x5dd   : > { %v3136_v29 = vpop.f32.mrb[35].mxu0 }
 0x5ed   : > { %v1474_v30 = vpop.xlane.xlu0 %1473 }
 0x5f1   : > { %v1489_v62 = vpop.xlane.xlu0 %1488 }
 0x5f5   : > { %v1477_v39 = vpop.xlane.xlu0 %1476 }
 0x5f9   : > { %v1480_v41 = vpop.xlane.xlu0 %1479 }
 0x5fd   : > { %v1855_v20 = vpop.permute.xlu0 %1854 }
 0x5ff   : > { %v1453_v1 = vpop.xlane.xlu1 %1452 }
 0x600   : > { %3408 = vrcp.f32 %v1453_v1 }
 0x603   : > { %v1471_v42 = vpop.xlane.xlu1 %1470 }
 0x604   : > { %3410 = vrcp.f32 %v1471_v42 }
 0x605   : > { %3412 = vrcp.f32 %v1474_v30 }
 0x606   : > { %3414 = vrcp.f32 %v1480_v41 }
 0x607   : > { %v1486_v27 = vpop.xlane.xlu1 %1485  ;;  %3416 = vrcp.f32 %v1477_v39 }
 0x60a   : > { %v3409_v55 = vpop.eup %3408 }
 0x60b   : > { %v1523_v26 = vmul.f32 %v3409_v55, %v4056_v50  ;;  %v1868_v50 = vand.u32 %v1855_v20, %v3987_v48  ;;  %v1492_v53 = vpop.xlane.xlu1 %1491 }
 0x60d   : > { %v1545_v38 = vpack.c.bf16 %v1523_v26, %v1523_v26 }
 0x60e   : > { %v3411_v46 = vpop.eup %3410 }
 0x60f   : > { %3116 = vmatmul.mubr.msk.bf16.gmra.mrb[44].mxu1 %vm1317_vm6, %v1545_v38  ;;  %v3413_v49 = vpop.eup %3412  ;;  %v1529_v52 = vmul.f32 %v3411_v46, %v4060_v63  ;;  %v2006_v61 = vpop.permute.xlu1 %2005 }
 0x610   : > { %3139 = vmatprep.mubr.msk.bf16.mxu1 %vm3501_vm4, %v3500_v51  ;;  %v1530_v56 = vmul.f32 %v3413_v49, %v4036_v16  ;;  %v3415_v58 = vpop.eup %3414 }
 0x611   : > { %v3417_v2 = vpop.eup %3416  ;;  %v1532_v10 = vmul.f32 %v3415_v58, %v4051_v47  ;;  %v1542_v58 = vld [vmem:[%s4397_s30 + $0xc] sm:$0xf] }
 0x612   : > { %v1847_v57 = vpack.c.bf16 %v1530_v56, %v1529_v52  ;;  %v1531_v4 = vmul.f32 %v3417_v2, %v4046_v40 }
 0x614   : > { %v1848_v63 = vpack.c.bf16 %v1532_v10, %v1531_v4 }
 0x617   : > { %3140 = vmatmul.mubr.msk.bf16.vlgmr.msra.gmra.mrb[48].mxu1 %vm981_vm5, %v1707_v5 }
 0x618   : > { %3166 = vmatpush3.bf16.msra.mxu1 %v1851_v35  ;;  %3143 = vmatprep.mubr.msk.bf16.mxu1 %vm3501_vm4, %v3500_v51 }
 0x619   : > { %3167 = vmatprep.subr.bf16.mxu1 %v3500_v51 }
 0x61c   : > { %3168 = vmatpush3.bf16.msra.mxu1 %v1853_v31  ;;  %v1939_v31 = vsel %vm1719_vm9, %v1541_v19, 0 }
 0x61d   : > { %3169 = vmatprep.subr.bf16.mxu1 %v3500_v51 }
 0x61f   : > { %3144 = vmatmul.mubr.msk.bf16.gmra.mrb[52].mxu1 %vm981_vm5, %v1708_v14 }
 0x620   : > { %3170 = vmatpush3.bf16.msra.mxu1 %v1868_v50  ;;  %3147 = vmatprep.mubr.msk.bf16.mxu1 %vm3501_vm4, %v3500_v51 }
 0x621   : > { %3197 = vmatprep.subr.bf16.mxu1 %v3500_v51 }
 0x627   : > { %3148 = vmatmul.mubr.msk.bf16.gmra.mrb[56].mxu1 %vm981_vm5, %v1709_v33 }
 0x628   : > { %3171 = vmatprep.mubr.msk.bf16.mxu1 %vm3501_vm4, %v3500_v51 }
 0x62f   : > { %3172 = vmatmul.mubr.msk.bf16.vlgmr.msra.gmra.mrb[60].mxu1 %vm1317_vm6, %v1847_v57 }
 0x630   : > { %3198 = vmatpush3.bf16.msra.mxu1 %v2006_v61  ;;  %3175 = vmatprep.mubr.msk.bf16.mxu1 %vm3501_vm4, %v3500_v51 }
 0x631   : > { %3199 = vmatprep.subr.bf16.mxu1 %v3500_v51 }
 0x637   : > { %3176 = vmatmul.mubr.msk.bf16.gmra.mrb[64].mxu1 %vm1317_vm6, %v1848_v63  ;;  %v2094_v63 = vsel %vm1719_vm9, %v1542_v58, 0 }
 0x638   : > { %3179 = vmatprep.mubr.msk.bf16.mxu1 %vm3501_vm4, %v3500_v51 }
 0x640   : > { %v1495_v16 = vpop.xlane.xlu1 %1494 }
 0x644   : > { %v1483_v23 = vpop.xlane.xlu1 %1482 }
 0x645   : > { %3418 = vrcp.f32 %v1483_v23 }
 0x646   : > { %3420 = vrcp.f32 %v1486_v27 }
 0x647   : > { %3422 = vrcp.f32 %v1489_v62 }
 0x648   : > { %v2008_v5 = vpop.permute.xlu1 %2007  ;;  %3424 = vrcp.f32 %v1495_v16 }
 0x649   : > { %3200 = vmatpush3.bf16.msra.mxu1 %v2008_v5  ;;  %3426 = vrcp.f32 %v1492_v53 }
 0x64a   : > { %3201 = vmatprep.subr.bf16.mxu1 %v3500_v51 }
 0x64c   : > { %v2010_v47 = vpop.permute.xlu1 %2009 }
 0x64d   : > { %v2023_v54 = vand.u32 %v2010_v47, %v3987_v48 }
 0x64e   : > { %v1498_v6 = vpop.xlane.xlu0 %1497 }
 0x64f   : > { %v3419_v25 = vpop.eup %3418  ;;  %3202 = vmatpush3.bf16.msra.mxu1 %v2023_v54  ;;  %3428 = vrcp.f32 %v1498_v6 }
 0x650   : > { %v1533_v40 = vmul.f32 %v3419_v25, %v4085_v43  ;;  %3229 = vmatprep.subr.bf16.mxu1 %v3500_v51  ;;  %v3421_v0 = vpop.eup %3420 }
 0x651   : > { %v3423_v3 = vpop.eup %3422  ;;  %v1534_v32 = vmul.f32 %v3421_v0, %v4064_v17 }
 0x652   : > { %v1849_v34 = vpack.c.bf16 %v1533_v40, %v1533_v40  ;;  %v1535_v48 = vmul.f32 %v3423_v3, %v4041_v37  ;;  %v3425_v43 = vpop.eup %3424 }
 0x653   : > { %v3427_v44 = vpop.eup %3426  ;;  %v1537_v9 = vmul.f32 %v3425_v43, %v4080_v36 }
 0x654   : > { %3180 = vmatmul.mubr.msk.bf16.gmra.mrb[68].mxu1 %vm1317_vm6, %v1849_v34  ;;  %v2002_v60 = vpack.c.bf16 %v1535_v48, %v1534_v32  ;;  %v1536_v14 = vmul.f32 %v3427_v44, %v4068_v28 }
 0x655   : > { %3203 = vmatprep.mubr.msk.bf16.mxu1 %vm3501_vm4, %v3500_v51 }
 0x656   : > { %v2003_v15 = vpack.c.bf16 %v1537_v9, %v1536_v14 }
 0x659   : > { %v3429_v11 = vpop.eup %3428 }
 0x65a   : > { %v1538_v37 = vmul.f32 %v3429_v11, %v4090_v22 }
 0x65c   : > { %3204 = vmatmul.mubr.msk.bf16.vlgmr.msra.gmra.mrb[72].mxu1 %vm1317_vm6, %v2002_v60  ;;  %v2004_v17 = vpack.c.bf16 %v1538_v37, %v1538_v37 }
 0x65d   : > { %3207 = vmatprep.mubr.msk.bf16.mxu1 %vm3501_vm4, %v3500_v51 }
 0x664   : > { %3208 = vmatmul.mubr.msk.bf16.gmra.mrb[76].mxu1 %vm1317_vm6, %v2003_v15 }
 0x665   : > { %3211 = vmatprep.mubr.msk.bf16.mxu1 %vm3501_vm4, %v3500_v51 }
 0x66c   : > { %3212 = vmatmul.mubr.msk.bf16.gmra.mrb[80].mxu1 %vm1317_vm6, %v2004_v17 }
 0x66d   : > { %3233 = vmatprep.mubr.msk.bf16.mxu1 %vm3501_vm4, %v3500_v51 }
 0x6a3   : > { %v1603_v7 = vpop.f32.mrb[36].mxu1 }
 0x6a4   : > { %v3109_v36 = vpop.f32.mrb[37].mxu1 }
 0x6a5   : > { %v1606_v24 = vpop.f32.mrb[38].mxu1 }
 0x6a6   : > { %v1625_v28 = vpack.c.bf16 %v1606_v24, %v1603_v7  ;;  %v3110_v29 = vpop.f32.mrb[39].mxu1 }
 0x6a8   : > { %3154 = vmatmul.mubr.msk.bf16.vlgmr.msra.gmra.mrb[36].mxu0 %vm981_vm5, %v1625_v28 }
 0x6a9   : > { %3157 = vmatprep.mubr.msk.bf16.mxu0 %vm3501_vm4, %v3500_v51  ;;  %3184 = vmatpush3.bf16.msra.mxu0 %v1939_v31 }
 0x6aa   : > { %3215 = vmatprep.subr.bf16.mxu0 %v3500_v51 }
 0x6ab   : > { %v1611_v22 = vpop.f32.mrb[40].mxu1 }
 0x6ac   : > { %v3113_v35 = vpop.f32.mrb[41].mxu1 }
 0x6ad   : > { %v1614_v1 = vpop.f32.mrb[42].mxu1 }
 0x6ae   : > { %v1626_v30 = vpack.c.bf16 %v1614_v1, %v1611_v22  ;;  %v3114_v62 = vpop.f32.mrb[43].mxu1 }
 0x6b0   : > { %3158 = vmatmul.mubr.msk.bf16.gmra.mrb[40].mxu0 %vm981_vm5, %v1626_v30 }
 0x6b1   : > { %3161 = vmatprep.mubr.msk.bf16.mxu0 %vm3501_vm4, %v3500_v51 }
 0x6e2   : > { %v1619_v55 = vpop.f32.mrb[44].mxu1 }
 0x6e3   : > { %v1627_v26 = vpack.c.bf16 %v1619_v55, %v1619_v55  ;;  %v3117_v38 = vpop.f32.mrb[45].mxu1 }
 0x6e4   : > { %v1622_v39 = vpop.f32.mrb[46].mxu1 }
 0x6e5   : > { %v3118_v41 = vpop.f32.mrb[47].mxu1  ;;  %3162 = vmatmul.mubr.msk.bf16.gmra.mrb[44].mxu0 %vm981_vm5, %v1627_v26 }
 0x6e6   : > { %3185 = vmatprep.mubr.msk.bf16.mxu0 %vm3501_vm4, %v3500_v51 }
 0x6ea   : > { %v1757_v42 = vpop.f32.mrb[48].mxu1 }
 0x6eb   : > { %v3141_v20 = vpop.f32.mrb[49].mxu1 }
 0x6ec   : > { %v1760_v50 = vpop.f32.mrb[50].mxu1 }
 0x6ed   : > { %v3142_v27 = vpop.f32.mrb[51].mxu1 }
 0x6f2   : > { %v1765_v59 = vpop.f32.mrb[52].mxu1 }
 0x6f3   : > { %v3145_v33 = vpop.f32.mrb[53].mxu1 }
 0x6f4   : > { %v1768_v45 = vpop.f32.mrb[54].mxu1 }
 0x6f5   : > { %v3146_v46 = vpop.f32.mrb[55].mxu1 }
 0x6fa   : > { %v4178_v49 = vpop.f32.mrb[56].mxu1 }
 0x6fb   : > { %v3149_v52 = vpop.f32.mrb[57].mxu1 }
 0x6fc   : > { %v1776_v53 = vpop.f32.mrb[58].mxu1 }
 0x6fd   : > { %v3150_v56 = vpop.f32.mrb[59].mxu1 }
 0x702   : > { %v1904_v57 = vpop.f32.mrb[60].mxu1 }
 0x703   : > { %v3173_v61 = vpop.f32.mrb[61].mxu1 }
 0x704   : > { %v1907_v2 = vpop.f32.mrb[62].mxu1 }
 0x705   : > { %v1926_v10 = vpack.c.bf16 %v1907_v2, %v1904_v57  ;;  %v3174_v4 = vpop.f32.mrb[63].mxu1 }
 0x707   : > { %3186 = vmatmul.mubr.msk.bf16.vlgmr.msra.gmra.mrb[48].mxu0 %vm981_vm5, %v1926_v10 }
 0x708   : > { %3189 = vmatprep.mubr.msk.bf16.mxu0 %vm3501_vm4, %v3500_v51  ;;  %3216 = vmatpush3.bf16.msra.mxu0 %v2094_v63 }
 0x709   : > { %3245 = vmatprep.subr.bf16.mxu0 %v3500_v51 }
 0x70a   : > { %v1912_v16 = vpop.f32.mrb[64].mxu1 }
 0x70b   : > { %v3177_v23 = vpop.f32.mrb[65].mxu1 }
 0x70c   : > { %v1915_v5 = vpop.f32.mrb[66].mxu1 }
 0x70d   : > { %v1927_v47 = vpack.c.bf16 %v1915_v5, %v1912_v16  ;;  %v3178_v54 = vpop.f32.mrb[67].mxu1 }
 0x70e   : > { %v2900_v54 = vld [vmem:[%s4398_s18] ss:$0 sm:$0xff] }
 0x70f   : > { %3190 = vmatmul.mubr.msk.bf16.gmra.mrb[52].mxu0 %vm981_vm5, %v1927_v47 }
 0x710   : > { %3193 = vmatprep.mubr.msk.bf16.mxu0 %vm3501_vm4, %v3500_v51 }
 0x727   : > { %v1920_v25 = vpop.f32.mrb[68].mxu1 }
 0x728   : > { %v1928_v40 = vpack.c.bf16 %v1920_v25, %v1920_v25  ;;  %v3181_v34 = vpop.f32.mrb[69].mxu1 }
 0x729   : > { %v1923_v0 = vpop.f32.mrb[70].mxu1 }
 0x72a   : > { %v3182_v3 = vpop.f32.mrb[71].mxu1  ;;  %3194 = vmatmul.mubr.msk.bf16.gmra.mrb[56].mxu0 %vm981_vm5, %v1928_v40 }
 0x72b   : > { %3217 = vmatprep.mubr.msk.bf16.mxu0 %vm3501_vm4, %v3500_v51 }
 0x72f   : > { %v2059_v32 = vpop.f32.mrb[72].mxu1 }
 0x730   : > { %v3205_v6 = vpop.f32.mrb[73].mxu1 }
 0x731   : > { %v2062_v48 = vpop.f32.mrb[74].mxu1 }
 0x732   : > { %v2081_v60 = vpack.c.bf16 %v2062_v48, %v2059_v32  ;;  %v3206_v43 = vpop.f32.mrb[75].mxu1 }
 0x734   : > { %3218 = vmatmul.mubr.msk.bf16.vlgmr.msra.gmra.mrb[60].mxu0 %vm981_vm5, %v2081_v60 }
 0x735   : > { %3221 = vmatprep.mubr.msk.bf16.mxu0 %vm3501_vm4, %v3500_v51 }
 0x737   : > { %v2067_v44 = vpop.f32.mrb[76].mxu1 }
 0x738   : > { %v3209_v9 = vpop.f32.mrb[77].mxu1 }
 0x739   : > { %v2070_v14 = vpop.f32.mrb[78].mxu1 }
 0x73a   : > { %v2082_v15 = vpack.c.bf16 %v2070_v14, %v2067_v44  ;;  %v3210_v11 = vpop.f32.mrb[79].mxu1 }
 0x73c   : > { %3222 = vmatmul.mubr.msk.bf16.gmra.mrb[64].mxu0 %vm981_vm5, %v2082_v15 }
 0x73d   : > { %3225 = vmatprep.mubr.msk.bf16.mxu0 %vm3501_vm4, %v3500_v51 }
 0x73f   : > { %v2075_v37 = vpop.f32.mrb[80].mxu1 }
 0x740   : > { %v3213_v17 = vpop.f32.mrb[81].mxu1  ;;  %v2083_v19 = vpack.c.bf16 %v2075_v37, %v2075_v37 }
 0x741   : > { %v2078_v7 = vpop.f32.mrb[82].mxu1 }
 0x742   : > { %v3214_v36 = vpop.f32.mrb[83].mxu1 }
 0x744   : > { %3226 = vmatmul.mubr.msk.bf16.gmra.mrb[68].mxu0 %vm981_vm5, %v2083_v19 }
 0x745   : > { %3261 = vmatprep.mubr.msk.bf16.mxu0 %vm3501_vm4, %v3500_v51 }
 0x77b   : > { %v1825_v24 = vpop.f32.mrb[36].mxu0 }
 0x77c   : > { %v1826_v28 = vadd.f32 %v1825_v24, %v1757_v42  ;;  %v3155_v29 = vpop.f32.mrb[37].mxu0 }
 0x77d   : > { %v1828_v31 = vpop.f32.mrb[38].mxu0 }
 0x77e   : > { %v1829_v22 = vadd.f32 %v1828_v31, %v1760_v50  ;;  %v3156_v35 = vpop.f32.mrb[39].mxu0 }
 0x783   : > { %v1833_v1 = vpop.f32.mrb[40].mxu0 }
 0x784   : > { %v1834_v30 = vadd.f32 %v1833_v1, %v1765_v59  ;;  %v3159_v62 = vpop.f32.mrb[41].mxu0 }
 0x785   : > { %v1836_v55 = vpop.f32.mrb[42].mxu0 }
 0x786   : > { %v1837_v26 = vadd.f32 %v1836_v55, %v1768_v45  ;;  %v3160_v38 = vpop.f32.mrb[43].mxu0 }
 0x7b8   : > { %v1841_v39 = vpop.f32.mrb[44].mxu0 }
 0x7b9   : > { %v1842_v41 = vadd.f32 %v1841_v39, %v4178_v49  ;;  %v3163_v20 = vpop.f32.mrb[45].mxu0 }
 0x7ba   : > { %v1844_v27 = vpop.f32.mrb[46].mxu0 }
 0x7bb   : > { %v3164_v33 = vpop.f32.mrb[47].mxu0 }
 0x7da   : > { %v1975_v46 = vpop.f32.mrb[48].mxu0 }
 0x7db   : > { %v1997_v52 = vadd.f32 %v1975_v46, %v1826_v28  ;;  %v3187_v53 = vpop.f32.mrb[49].mxu0 }
 0x7dc   : > { %v1978_v42 = vpop.f32.mrb[50].mxu0 }
 0x7dd   : > { %v1998_v56 = vadd.f32 %v1978_v42, %v1829_v22  ;;  %v3188_v50 = vpop.f32.mrb[51].mxu0 }
 0x7e2   : > { %v1983_v57 = vpop.f32.mrb[52].mxu0 }
 0x7e3   : > { %v1999_v58 = vadd.f32 %v1983_v57, %v1834_v30  ;;  %v3191_v59 = vpop.f32.mrb[53].mxu0 }
 0x7e4   : > { %v1986_v61 = vpop.f32.mrb[54].mxu0 }
 0x7e5   : > { %v2000_v2 = vadd.f32 %v1986_v61, %v1837_v26  ;;  %v3192_v45 = vpop.f32.mrb[55].mxu0 }
 0x7fd   : > { %v1991_v10 = vpop.f32.mrb[56].mxu0 }
 0x7fe   : > { %v2001_v4 = vadd.f32 %v1991_v10, %v1842_v41  ;;  %v3195_v63 = vpop.f32.mrb[57].mxu0  ;;  %v3330_v10 = vld [vmem:[%s3681_s4] sm:$0xff]  }
 0x7ff   : > { %v1994_v49 = vpop.f32.mrb[58].mxu0  ;;  %3230 = vmatpush3.bf16.msra.mxu1 %v3330_v10 }
 0x800   : > { %v3196_v16 = vpop.f32.mrb[59].mxu0  ;;  %3231 = vmatprep.subr.bf16.mxu1 %v3500_v51 }
 0x807   : > { %v2130_v23 = vpop.f32.mrb[60].mxu0 }
 0x808   : > { %v2152_v5 = vadd.f32 %v2130_v23, %v1997_v52  ;;  %v3219_v47 = vpop.f32.mrb[61].mxu0 }
 0x809   : > { %v2133_v25 = vpop.f32.mrb[62].mxu0 }
 0x80a   : > { %v2157_v40 = vadd.f32 %v2152_v5, %v3711_v8  ;;  %v2153_v34 = vadd.f32 %v2133_v25, %v1998_v56  ;;  %v3220_v0 = vpop.f32.mrb[63].mxu0 }
 0x80c   : > { %v4208_v3 = vadd.f32 %v2900_v54, %v2157_v40  ;;  %v2158_v32 = vadd.f32 %v2153_v34, %v3718_v13 }
 0x80e   : > { %v4211_v6 = vadd.f32 %v2900_v54, %v2158_v32  ;;  %v2176_v48 = vsel %vm780_vm2, %v4208_v3, 0.0 }
 0x80f   : > { %2177 = vadd.xlane.f32.xlu1 %v2176_v48  ;;  %v2138_v60 = vpop.f32.mrb[64].mxu0  ;;  %v2901_v48 = vld [vmem:[%s4399_s24] ss:$0 sm:$0xff] }
 0x810   : > { %v2154_v43 = vadd.f32 %v2138_v60, %v1999_v58  ;;  %v3223_v44 = vpop.f32.mrb[65].mxu0  ;;  %v2179_v9 = vsel %vm780_vm2, %v4211_v6, 0.0 }
 0x811   : > { %2180 = vadd.xlane.f32.xlu0 %v2179_v9  ;;  %v2141_v8 = vpop.f32.mrb[66].mxu0 }
 0x812   : > { %v2159_v14 = vadd.f32 %v2154_v43, %v3716_v12  ;;  %v2155_v15 = vadd.f32 %v2141_v8, %v2000_v2  ;;  %v3224_v11 = vpop.f32.mrb[67].mxu0 }
 0x813   : > { %v2902_v11 = vld [vmem:[%s4400_s25] ss:$0 sm:$0xff] }
 0x814   : > { %v4218_v37 = vadd.f32 %v2900_v54, %v2159_v14  ;;  %v2160_v13 = vadd.f32 %v2155_v15, %v3725_v18 }
 0x816   : > { %v4221_v17 = vadd.f32 %v2900_v54, %v2160_v13  ;;  %v2182_v7 = vsel %vm780_vm2, %v4218_v37, 0.0 }
 0x817   : > { %2183 = vadd.xlane.f32.xlu0 %v2182_v7  ;;  %v2146_v19 = vpop.f32.mrb[68].mxu0 }
 0x818   : > { %v2156_v36 = vadd.f32 %v2146_v19, %v2001_v4  ;;  %v3227_v24 = vpop.f32.mrb[69].mxu0  ;;  %v2185_v12 = vsel %vm780_vm2, %v4221_v17, 0.0  ;;  %v3331_v4 = vld [vmem:[%s3681_s4 + $0x8] sm:$0xff]  }
 0x819   : > { %v2149_v28 = vpop.f32.mrb[70].mxu0  ;;  %3232 = vmatpush3.bf16.msra.mxu1 %v3331_v4 }
 0x81a   : > { %v2161_v29 = vadd.f32 %v2156_v36, %v3730_v21  ;;  %v3228_v31 = vpop.f32.mrb[71].mxu0 }
 0x81b   : > { %2186 = vadd.xlane.f32.xlu0 %v2185_v12 }
 0x81c   : > { %v4228_v22 = vadd.f32 %v2900_v54, %v2161_v29 }
 0x81e   : > { %v2188_v18 = vsel %vm793_vm3, %v4228_v22, 0.0 }
 0x81f   : > { %2189 = vadd.xlane.f32.xlu0 %v2188_v18 }
 0x89c   : > { %v2178_v35 = vpop.xlane.xlu1 %2177 }
 0x89d   : > { %v2191_v1 = vmul.f32 0.03125, %v2178_v35 }
 0x89e   : > { %v2181_v30 = vpop.xlane.xlu0 %2180 }
 0x89f   : > { %v2196_v62 = vsub.f32 %v4208_v3, %v2191_v1  ;;  %v2192_v55 = vmul.f32 0.03125, %v2181_v30 }
 0x8a1   : > { %v2197_v26 = vsub.f32 %v4211_v6, %v2192_v55  ;;  %v2201_v21 = vmul.f32 %v2196_v62, %v2196_v62 }
 0x8a3   : > { %v2206_v38 = vsel %vm780_vm2, %v2201_v21, 0.0  ;;  %v2202_v39 = vmul.f32 %v2197_v26, %v2197_v26 }
 0x8a4   : > { %2207 = vadd.xlane.f32.xlu0 %v2206_v38  ;;  %v2184_v41 = vpop.xlane.xlu0 %2183 }
 0x8a5   : > { %v2193_v20 = vmul.f32 0.03125, %v2184_v41  ;;  %v2209_v27 = vsel %vm780_vm2, %v2202_v39, 0.0  ;;  %v3332_v41 = vld [vmem:[%s3691_s15] sm:$0xff]  }
 0x8a6   : > { %2210 = vadd.xlane.f32.xlu1 %v2209_v27  ;;  %3246 = vmatpush3.bf16.msra.mxu0 %v3332_v41  ;;  %v3334_v27 = vld [vmem:[%s3691_s15 + $0x10] sm:$0xff]  }
 0x8a7   : > { %v2198_v33 = vsub.f32 %v4218_v37, %v2193_v20  ;;  %3247 = vmatprep.subr.bf16.mxu0 %v3500_v51  ;;  %v3333_v20 = vld [vmem:[%s3691_s15 + $0x8] sm:$0xff]  }
 0x8a8   : > { %v2187_v46 = vpop.xlane.xlu0 %2186 }
 0x8a9   : > { %v2194_v52 = vmul.f32 0.03125, %v2187_v46  ;;  %v2203_v53 = vmul.f32 %v2198_v33, %v2198_v33  ;;  %v3336_v46 = vld [vmem:[%s3691_s15 + $0x20] sm:$0xff]  }
 0x8aa   : > { %3248 = vmatpush3.bf16.msra.mxu0 %v3333_v20 }
 0x8ab   : > { %v2199_v42 = vsub.f32 %v4221_v17, %v2194_v52  ;;  %v2212_v56 = vsel %vm780_vm2, %v2203_v53, 0.0  ;;  %3249 = vmatprep.subr.bf16.mxu0 %v3500_v51  ;;  %v3337_v52 = vld [vmem:[%s3691_s15 + $0x28] sm:$0xff]   ;;  %v3338_v53 = vld [vmem:[%s3691_s15 + $0x30] sm:$0xff]  }
 0x8ac   : > { %2213 = vadd.xlane.f32.xlu0 %v2212_v56  ;;  %v2190_v50 = vpop.xlane.xlu0 %2189  ;;  %v2903_v56 = vld [vmem:[%s732_s6] ss:$0 sm:$0xff] }
 0x8ad   : > { %v2195_v57 = vmul.f32 0.03125, %v2190_v50  ;;  %v2204_v58 = vmul.f32 %v2199_v42, %v2199_v42 }
 0x8ae   : > { %3250 = vmatpush3.bf16.msra.mxu0 %v3334_v27 }
 0x8af   : > { %v2200_v59 = vsub.f32 %v4228_v22, %v2195_v57  ;;  %v2215_v61 = vsel %vm780_vm2, %v2204_v58, 0.0  ;;  %3251 = vmatprep.subr.bf16.mxu0 %v3500_v51 }
 0x8b0   : > { %2216 = vadd.xlane.f32.xlu1 %v2215_v61 }
 0x8b1   : > { %v2205_v2 = vmul.f32 %v2200_v59, %v2200_v59 }
 0x8b3   : > { %v2218_v45 = vsel %vm793_vm3, %v2205_v2, 0.0 }
 0x8b4   : > { %2219 = vadd.xlane.f32.xlu0 %v2218_v45 }
 0x931   : > { %v2208_v63 = vpop.xlane.xlu0 %2207 }
 0x932   : > { %v2221_v49 = vmul.f32 0.03125, %v2208_v63 }
 0x933   : > { %v2211_v16 = vpop.xlane.xlu1 %2210 }
 0x934   : > { %v2226_v23 = vadd.f32 1e-06, %v2221_v49  ;;  %v2222_v5 = vmul.f32 0.03125, %v2211_v16 }
 0x936   : > { %3430 = vrsqrt.f32 %v2226_v23  ;;  %v2227_v47 = vadd.f32 1e-06, %v2222_v5 }
 0x938   : > { %3432 = vrsqrt.f32 %v2227_v47 }
 0x939   : > { %v2214_v54 = vpop.xlane.xlu0 %2213 }
 0x93a   : > { %v2223_v25 = vmul.f32 0.03125, %v2214_v54 }
 0x93c   : > { %v2228_v40 = vadd.f32 1e-06, %v2223_v25 }
 0x93d   : > { %v2217_v34 = vpop.xlane.xlu1 %2216 }
 0x93e   : > { %3434 = vrsqrt.f32 %v2228_v40  ;;  %v2224_v0 = vmul.f32 0.03125, %v2217_v34 }
 0x940   : > { %v3431_v32 = vpop.eup %3430  ;;  %v2229_v60 = vadd.f32 1e-06, %v2224_v0 }
 0x941   : > { %v2236_v43 = vmul.f32 %v3431_v32, %v2196_v62  ;;  %v2220_v44 = vpop.xlane.xlu0 %2219 }
 0x942   : > { %v3433_v9 = vpop.eup %3432  ;;  %3436 = vrsqrt.f32 %v2229_v60  ;;  %v2225_v8 = vmul.f32 0.03125, %v2220_v44 }
 0x943   : > { %v2247_v14 = vmul.f32 %v2901_v48, %v2236_v43  ;;  %v2237_v15 = vmul.f32 %v3433_v9, %v2197_v26 }
 0x944   : > { %v2230_v13 = vadd.f32 1e-06, %v2225_v8 }
 0x945   : > { %v2248_v7 = vmul.f32 %v2901_v48, %v2237_v15  ;;  %v2258_v19 = vadd.f32 %v2902_v11, %v2247_v14 }
 0x946   : > { %3438 = vrsqrt.f32 %v2230_v13 }
 0x947   : > { %v2259_v36 = vadd.f32 %v2902_v11, %v2248_v7 }
 0x948   : > { %v3435_v24 = vpop.eup %3434 }
 0x949   : > { %v2238_v28 = vmul.f32 %v3435_v24, %v2198_v33  ;;  %v2263_v29 = vpack.c.bf16 %v2259_v36, %v2258_v19  ;;  %v3335_v33 = vld [vmem:[%s3691_s15 + $0x18] sm:$0xff]  }
 0x94a   : > { %3252 = vmatpush3.bf16.msra.mxu0 %v3335_v33 }
 0x94b   : > { %3234 = vmatmul.mubr.msk.bf16.vlgmr.msra.gmra.mrb[84].mxu1 %vm780_vm2, %v2263_v29  ;;  %v2249_v18 = vmul.f32 %v2901_v48, %v2238_v28  ;;  %3253 = vmatprep.subr.bf16.mxu0 %v3500_v51 }
 0x94c   : > { %v3437_v31 = vpop.eup %3436  ;;  %3237 = vmatprep.mubr.msk.bf16.mxu1 %vm3501_vm4, %v3500_v51 }
 0x94d   : > { %v2239_v12 = vmul.f32 %v3437_v31, %v2199_v42  ;;  %v2260_v62 = vadd.f32 %v2902_v11, %v2249_v18  ;;  %v3339_v42 = vld [vmem:[%s3691_s15 + $0x38] sm:$0xff]  }
 0x94e   : > { %3254 = vmatpush3.bf16.msra.mxu0 %v3336_v46 }
 0x94f   : > { %v2250_v35 = vmul.f32 %v2901_v48, %v2239_v12  ;;  %3255 = vmatprep.subr.bf16.mxu0 %v3500_v51 }
 0x950   : > { %v3439_v1 = vpop.eup %3438 }
 0x951   : > { %v2240_v30 = vmul.f32 %v3439_v1, %v2200_v59  ;;  %v2261_v55 = vadd.f32 %v2902_v11, %v2250_v35 }
 0x952   : > { %3256 = vmatpush3.bf16.msra.mxu0 %v3337_v52 }
 0x953   : > { %v2264_v26 = vpack.c.bf16 %v2261_v55, %v2260_v62  ;;  %v2251_v21 = vmul.f32 %v2901_v48, %v2240_v30  ;;  %3257 = vmatprep.subr.bf16.mxu0 %v3500_v51 }
 0x955   : > { %3238 = vmatmul.mubr.msk.bf16.gmra.mrb[88].mxu1 %vm780_vm2, %v2264_v26  ;;  %v2262_v38 = vadd.f32 %v2902_v11, %v2251_v21 }
 0x956   : > { %3241 = vmatprep.mubr.msk.bf16.mxu1 %vm3501_vm4, %v3500_v51  ;;  %3258 = vmatpush3.bf16.msra.mxu0 %v3338_v53 }
 0x957   : > { %v2265_v39 = vpack.c.bf16 %v2262_v38, %v2262_v38  ;;  %3259 = vmatprep.subr.bf16.mxu0 %v3500_v51 }
 0x95a   : > { %3260 = vmatpush3.bf16.msra.mxu0 %v3339_v42 }
 0x95d   : > { %3242 = vmatmul.mubr.msk.bf16.gmra.mrb[92].mxu1 %vm780_vm2, %v2265_v39 }
 0xa1e   : > { %v2332_v50 = vpop.f32.mrb[84].mxu1 }
 0xa1f   : > { %v2333_v57 = vadd.f32 %v2903_v56, %v2332_v50  ;;  %v3235_v58 = vpop.f32.mrb[85].mxu1 }
 0xa20   : > { %v2335_v59 = vpop.f32.mrb[86].mxu1 }
 0xa21   : > { %v2359_v61 = vmul.f32 0.044715, %v2333_v57  ;;  %v2336_v2 = vadd.f32 %v2903_v56, %v2335_v59  ;;  %v3236_v45 = vpop.f32.mrb[87].mxu1  ;;  %v2354_v62 = vmul.f32 0.5, %v2333_v57 }
 0xa23   : > { %v2364_v10 = vmul.f32 %v2359_v61, %v2333_v57  ;;  %v2360_v4 = vmul.f32 0.044715, %v2336_v2  ;;  %v2355_v55 = vmul.f32 0.5, %v2336_v2 }
 0xa25   : > { %v2369_v63 = vmul.f32 %v2364_v10, %v2333_v57  ;;  %v2365_v49 = vmul.f32 %v2360_v4, %v2336_v2  ;;  %v2909_v10 = vld [vmem:[%s740_s16] ss:$0 sm:$0xff] }
 0xa27   : > { %v2374_v16 = vadd.f32 %v2369_v63, %v2333_v57  ;;  %v2370_v23 = vmul.f32 %v2365_v49, %v2336_v2 }
 0xa28   : > { %v2340_v5 = vpop.f32.mrb[88].mxu1 }
 0xa29   : > { %v2379_v47 = vmul.f32 0.7978846, %v2374_v16  ;;  %v2375_v54 = vadd.f32 %v2370_v23, %v2336_v2  ;;  %v2341_v25 = vadd.f32 %v2903_v56, %v2340_v5  ;;  %v3239_v40 = vpop.f32.mrb[89].mxu1 }
 0xa2a   : > { %v2343_v34 = vpop.f32.mrb[90].mxu1 }
 0xa2b   : > { %3440 = vtanh.f32 %v2379_v47  ;;  %v2380_v0 = vmul.f32 0.7978846, %v2375_v54  ;;  %v2361_v32 = vmul.f32 0.044715, %v2341_v25  ;;  %v2344_v48 = vadd.f32 %v2903_v56, %v2343_v34  ;;  %v3240_v60 = vpop.f32.mrb[91].mxu1 }
 0xa2c   : > { %v2356_v52 = vmul.f32 0.5, %v2341_v25 }
 0xa2d   : > { %3442 = vtanh.f32 %v2380_v0  ;;  %v2366_v43 = vmul.f32 %v2361_v32, %v2341_v25  ;;  %v2362_v44 = vmul.f32 0.044715, %v2344_v48  ;;  %v2357_v53 = vmul.f32 0.5, %v2344_v48 }
 0xa2f   : > { %v2371_v9 = vmul.f32 %v2366_v43, %v2341_v25  ;;  %v2367_v8 = vmul.f32 %v2362_v44, %v2344_v48 }
 0xa30   : > { %v2348_v14 = vpop.f32.mrb[92].mxu1 }
 0xa31   : > { %v2372_v15 = vmul.f32 %v2367_v8, %v2344_v48  ;;  %v2349_v11 = vadd.f32 %v2903_v56, %v2348_v14  ;;  %v3243_v13 = vpop.f32.mrb[93].mxu1  ;;  %v2376_v7 = vadd.f32 %v2371_v9, %v2341_v25 }
 0xa32   : > { %v2351_v19 = vpop.f32.mrb[94].mxu1 }
 0xa33   : > { %v2363_v36 = vmul.f32 0.044715, %v2349_v11  ;;  %v3244_v24 = vpop.f32.mrb[95].mxu1  ;;  %v2377_v28 = vadd.f32 %v2372_v15, %v2344_v48  ;;  %v2381_v29 = vmul.f32 0.7978846, %v2376_v7  ;;  %v2358_v59 = vmul.f32 0.5, %v2349_v11 }
 0xa35   : > { %v3441_v31 = vpop.eup %3440  ;;  %v2368_v12 = vmul.f32 %v2363_v36, %v2349_v11  ;;  %v2382_v18 = vmul.f32 0.7978846, %v2377_v28  ;;  %3444 = vtanh.f32 %v2381_v29 }
 0xa36   : > { %v2389_v35 = vadd.f32 1.0, %v3441_v31 }
 0xa37   : > { %v3443_v1 = vpop.eup %3442  ;;  %3446 = vtanh.f32 %v2382_v18  ;;  %v2373_v30 = vmul.f32 %v2368_v12, %v2349_v11 }
 0xa38   : > { %v2390_v26 = vadd.f32 1.0, %v3443_v1  ;;  %v2394_v38 = vmul.f32 %v2389_v35, %v2354_v62 }
 0xa39   : > { %v2378_v21 = vadd.f32 %v2373_v30, %v2349_v11 }
 0xa3a   : > { %v2395_v39 = vmul.f32 %v2390_v26, %v2355_v55 }
 0xa3b   : > { %v2383_v41 = vmul.f32 0.7978846, %v2378_v21 }
 0xa3c   : > { %v2399_v20 = vpack.c.bf16 %v2395_v39, %v2394_v38 }
 0xa3d   : > { %3448 = vtanh.f32 %v2383_v41 }
 0xa3e   : > { %3262 = vmatmul.mubr.bf16.vlgmr.msra.gmra.mrb[72].mxu0 %v2399_v20 }
 0xa3f   : > { %v3445_v27 = vpop.eup %3444  ;;  %3265 = vmatprep.mubr.msk.bf16.mxu0 %vm3501_vm4, %v3500_v51 }
 0xa40   : > { %v2391_v33 = vadd.f32 1.0, %v3445_v27 }
 0xa41   : > { %v3447_v46 = vpop.eup %3446 }
 0xa42   : > { %v2392_v42 = vadd.f32 1.0, %v3447_v46  ;;  %v2396_v56 = vmul.f32 %v2391_v33, %v2356_v52 }
 0xa44   : > { %v2397_v50 = vmul.f32 %v2392_v42, %v2357_v53 }
 0xa46   : > { %v2400_v57 = vpack.c.bf16 %v2397_v50, %v2396_v56 }
 0xa47   : > { %v3449_v58 = vpop.eup %3448 }
 0xa48   : > { %3266 = vmatmul.mubr.bf16.gmra.mrb[76].mxu0 %v2400_v57  ;;  %v2393_v61 = vadd.f32 1.0, %v3449_v58 }
 0xa49   : > { %3269 = vmatprep.mubr.msk.bf16.mxu0 %vm3501_vm4, %v3500_v51 }
 0xa4a   : > { %v2398_v2 = vmul.f32 %v2393_v61, %v2358_v59 }
 0xa4c   : > { %v2401_v45 = vpack.c.bf16 %v2398_v2, %v2398_v2 }
 0xa50   : > { %3270 = vmatmul.mubr.bf16.gmra.mrb[80].mxu0 %v2401_v45 }
 0xb11   : > { %v2507_v4 = vpop.f32.mrb[72].mxu0 }
 0xb12   : > { %v2508_v63 = vadd.f32 %v2909_v10, %v2507_v4  ;;  %v3263_v49 = vpop.f32.mrb[73].mxu0 }
 0xb13   : > { %v2510_v16 = vpop.f32.mrb[74].mxu0 }
 0xb14   : > { %v2529_v23 = vadd.f32 %v2508_v63, %v4208_v3  ;;  %v2511_v5 = vadd.f32 %v2909_v10, %v2510_v16  ;;  %v3264_v47 = vpop.f32.mrb[75].mxu0 }
 0xb16   : > { %v2530_v54 = vadd.f32 %v2511_v5, %v4211_v6  ;;  %2538 = vst.msk [vmem:[%s3700_s17] sm:$0xff] (!%p2918_p8), %vm780_vm2, %v2529_v23 }
 0xb18   : > { %2539 = vst.msk [vmem:[%s3700_s17 + $0x8] sm:$0xff] (!%p2918_p8), %vm780_vm2, %v2530_v54 }
 0xb1b   : > { %v2515_v25 = vpop.f32.mrb[76].mxu0 }
 0xb1c   : > { %v2516_v51 = vadd.f32 %v2909_v10, %v2515_v25  ;;  %v3267_v40 = vpop.f32.mrb[77].mxu0 }
 0xb1d   : > { %v2518_v34 = vpop.f32.mrb[78].mxu0 }
 0xb1e   : > { %v2531_v0 = vadd.f32 %v2516_v51, %v4218_v37  ;;  %v2519_v32 = vadd.f32 %v2909_v10, %v2518_v34  ;;  %v3268_v48 = vpop.f32.mrb[79].mxu0 }
 0xb20   : > { %v2532_v60 = vadd.f32 %v2519_v32, %v4221_v17  ;;  %2537 = sbr.rel (%p2918_p8) target bundleno = 2857 (0xb29), region = 92  ;;  %2540 = vst.msk [vmem:[%s3700_s17 + $0x10] sm:$0xff] (!%p2918_p8), %vm780_vm2, %v2531_v0 }
 0xb22   : > { %2541 = vst.msk [vmem:[%s3700_s17 + $0x18] sm:$0xff] (!%p2918_p8), %vm780_vm2, %v2532_v60 }
 0xb23   : > { %v2523_v43 = vpop.f32.mrb[80].mxu0 }
 0xb24   : > { %v2524_v44 = vadd.f32 %v2909_v10, %v2523_v43  ;;  %v3271_v9 = vpop.f32.mrb[81].mxu0 }
 0xb25   : > { %v2526_v8 = vpop.f32.mrb[82].mxu0 }
 0xb26   : > { %v2533_v3 = vadd.f32 %v2524_v44, %v4228_v22  ;;  %v3272_v14 = vpop.f32.mrb[83].mxu0 }
 0xb28   : > { %2542 = vst.msk [vmem:[%s3700_s17 + $0x20] sm:$0x1] %vm793_vm3, %v2533_v3 }
 0xb29 PF: > { %s4402_s16 = sld [smem:[#allocation2_spill]] }
 0xb2f   : > { %p2919_p9 = scmp.ne.s32.totalorder %s4402_s16, 1 }
 0xb30   : > { %v2549_v6 = vsel (!%p2919_p9), %vm780_vm2, %v2529_v23, 0.0  ;;  %v2555_v37 = vsel (!%p2919_p9), %vm780_vm2, %v2531_v0, 0.0  ;;  %v2552_v17 = vsel (!%p2919_p9), %vm780_vm2, %v2530_v54, 0.0  ;;  %v2558_v22 = vsel (!%p2919_p9), %vm780_vm2, %v2532_v60, 0.0  ;;  %s4403_s14 = sld [smem:[#allocation14_spill]] (!%p2919_p9)  ;;  %s4404_s30 = sld [smem:[#allocation15_spill]] (!%p2919_p9) }
 0xb31   : > { %2546 = sbr.rel (%p2919_p9) target bundleno = 3187 (0xc73), region = 96  ;;  %2550 = vadd.xlane.f32.xlu0 (!%p2919_p9), %v2549_v6  ;;  %2556 = vadd.xlane.f32.xlu1 (!%p2919_p9), %v2555_v37  ;;  %v2561_v15 = vsel (!%p2919_p9), %vm793_vm3, %v2533_v3, 0.0 }
 0xb35   : > { %2553 = vadd.xlane.f32.xlu0 (!%p2919_p9), %v2552_v17  ;;  %2559 = vadd.xlane.f32.xlu1 (!%p2919_p9), %v2558_v22 }
 0xb36   : > { %v2921_v47 = vld [vmem:[%s4404_s30] ss:$0 sm:$0xff] (!%p2919_p9) }
 0xb39   : > { %2562 = vadd.xlane.f32.xlu0 %v2561_v15 }
 0xbbe   : > { %v2551_v11 = vpop.xlane.xlu0 %2550  ;;  %v2557_v13 = vpop.xlane.xlu1 %2556 }
 0xbbf   : > { %v2564_v7 = vmul.f32 0.03125, %v2551_v11  ;;  %v2566_v19 = vmul.f32 0.03125, %v2557_v13 }
 0xbc1   : > { %v2569_v36 = vsub.f32 %v2529_v23, %v2564_v7  ;;  %v2571_v24 = vsub.f32 %v2531_v0, %v2566_v19  ;;  %v2920_v23 = vld [vmem:[%s4403_s14] ss:$0 sm:$0xff] }
 0xbc2   : > { %v2554_v28 = vpop.xlane.xlu0 %2553  ;;  %v2560_v29 = vpop.xlane.xlu1 %2559 }
 0xbc3   : > { %v2565_v31 = vmul.f32 0.03125, %v2554_v28  ;;  %v2567_v12 = vmul.f32 0.03125, %v2560_v29  ;;  %v2574_v18 = vmul.f32 %v2569_v36, %v2569_v36  ;;  %v2576_v35 = vmul.f32 %v2571_v24, %v2571_v24 }
 0xbc5   : > { %v2570_v1 = vsub.f32 %v2530_v54, %v2565_v31  ;;  %v2572_v30 = vsub.f32 %v2532_v60, %v2567_v12  ;;  %v2579_v62 = vsel %vm780_vm2, %v2574_v18, 0.0  ;;  %v2585_v21 = vsel %vm780_vm2, %v2576_v35, 0.0 }
 0xbc6   : > { %2580 = vadd.xlane.f32.xlu1 %v2579_v62  ;;  %v2563_v55 = vpop.xlane.xlu0 %2562 }
 0xbc7   : > { %v2568_v26 = vmul.f32 0.03125, %v2563_v55  ;;  %v2575_v38 = vmul.f32 %v2570_v1, %v2570_v1  ;;  %v2577_v39 = vmul.f32 %v2572_v30, %v2572_v30 }
 0xbc9   : > { %v2573_v41 = vsub.f32 %v2533_v3, %v2568_v26  ;;  %v2582_v20 = vsel %vm780_vm2, %v2575_v38, 0.0  ;;  %v2588_v27 = vsel %vm780_vm2, %v2577_v39, 0.0 }
 0xbca   : > { %2586 = vadd.xlane.f32.xlu1 %v2585_v21  ;;  %2583 = vadd.xlane.f32.xlu0 %v2582_v20 }
 0xbcb   : > { %v2578_v33 = vmul.f32 %v2573_v41, %v2573_v41 }
 0xbcd   : > { %v2591_v46 = vsel %vm793_vm3, %v2578_v33, 0.0 }
 0xbce   : > { %2589 = vadd.xlane.f32.xlu0 %v2588_v27  ;;  %2592 = vadd.xlane.f32.xlu1 %v2591_v46 }
 0xc53   : > { %v2581_v52 = vpop.xlane.xlu1 %2580 }
 0xc54   : > { %v2594_v53 = vmul.f32 0.03125, %v2581_v52 }
 0xc56   : > { %v2599_v42 = vadd.f32 1e-06, %v2594_v53 }
 0xc57   : > { %v2587_v56 = vpop.xlane.xlu1 %2586  ;;  %v2584_v50 = vpop.xlane.xlu0 %2583 }
 0xc58   : > { %3450 = vrsqrt.f32 %v2599_v42  ;;  %v2596_v57 = vmul.f32 0.03125, %v2587_v56  ;;  %v2595_v58 = vmul.f32 0.03125, %v2584_v50 }
 0xc5a   : > { %v2601_v59 = vadd.f32 1e-06, %v2596_v57  ;;  %v2600_v61 = vadd.f32 1e-06, %v2595_v58 }
 0xc5b   : > { %v2593_v2 = vpop.xlane.xlu1 %2592  ;;  %v2590_v45 = vpop.xlane.xlu0 %2589 }
 0xc5c   : > { %3452 = vrsqrt.f32 %v2601_v59  ;;  %v2598_v10 = vmul.f32 0.03125, %v2593_v2  ;;  %v2597_v4 = vmul.f32 0.03125, %v2590_v45 }
 0xc5d   : > { %3454 = vrsqrt.f32 %v2600_v61 }
 0xc5e   : > { %v2603_v63 = vadd.f32 1e-06, %v2598_v10  ;;  %v2602_v49 = vadd.f32 1e-06, %v2597_v4 }
 0xc60   : > { %3456 = vrsqrt.f32 %v2603_v63 }
 0xc61   : > { %3458 = vrsqrt.f32 %v2602_v49 }
 0xc62   : > { %v3451_v16 = vpop.eup %3450 }
 0xc63   : > { %v2609_v5 = vmul.f32 %v3451_v16, %v2569_v36 }
 0xc65   : > { %v2620_v54 = vmul.f32 %v2920_v23, %v2609_v5 }
 0xc66   : > { %v3453_v25 = vpop.eup %3452 }
 0xc67   : > { %v3455_v51 = vpop.eup %3454  ;;  %v2631_v40 = vadd.f32 %v2921_v47, %v2620_v54  ;;  %v2611_v34 = vmul.f32 %v3453_v25, %v2571_v24 }
 0xc68   : > { %v2610_v0 = vmul.f32 %v3455_v51, %v2570_v1 }
 0xc69   : > { %2636 = vst.msk [vmem:[%s3700_s17] sm:$0xff] %vm780_vm2, %v2631_v40  ;;  %v2622_v32 = vmul.f32 %v2920_v23, %v2611_v34 }
 0xc6a   : > { %v3457_v48 = vpop.eup %3456  ;;  %v2621_v60 = vmul.f32 %v2920_v23, %v2610_v0 }
 0xc6b   : > { %v3459_v43 = vpop.eup %3458  ;;  %v2633_v44 = vadd.f32 %v2921_v47, %v2622_v32  ;;  %v2613_v9 = vmul.f32 %v3457_v48, %v2573_v41 }
 0xc6c   : > { %v2632_v8 = vadd.f32 %v2921_v47, %v2621_v60  ;;  %v2612_v3 = vmul.f32 %v3459_v43, %v2572_v30 }
 0xc6d   : > { %2638 = vst.msk [vmem:[%s3700_s17 + $0x10] sm:$0xff] %vm780_vm2, %v2633_v44  ;;  %v2624_v14 = vmul.f32 %v2920_v23, %v2613_v9 }
 0xc6e   : > { %2637 = vst.msk [vmem:[%s3700_s17 + $0x8] sm:$0xff] %vm780_vm2, %v2632_v8  ;;  %v2623_v6 = vmul.f32 %v2920_v23, %v2612_v3 }
 0xc6f   : > { %v2635_v37 = vadd.f32 %v2921_v47, %v2624_v14 }
 0xc70   : > { %v2634_v17 = vadd.f32 %v2921_v47, %v2623_v6 }
 0xc71   : > { %2640 = vst.msk [vmem:[%s3700_s17 + $0x20] sm:$0x1] %vm793_vm3, %v2635_v37 }
 0xc72   : > { %2639 = vst.msk [vmem:[%s3700_s17 + $0x18] sm:$0xff] %vm780_vm2, %v2634_v17 }
 0xc73 PF: > { %s4405_s26 = sld [smem:[#allocation5_spill]]  ;;  %s4406_s21 = sld [smem:[#allocation3_spill]] }
 0xc74   : > { %s4407_s22 = sld [smem:[#allocation4_spill]]  ;;  %s4408_s23 = sld [smem:[#allocation6_spill]] }
 0xc75   : > { %s4409_s24 = sld [smem:[#allocation7_spill]] }
 0xc79   : > { %s26_s25 = sadd.s32 1, %s4405_s26  }
 0xc7a   : > { %p23_p10 = scmp.ge.s32.totalorder %s26_s25, 6  }
 0xc7c   :  { %25 = sbr.rel (!%p23_p10) target bundleno = 9 (0x9), region = 165 }

// kernel: pointvit_forward.3
= control target key start
LH: loop header
LB: loop body
LE: loop exit
PB: predicated region body
PF: predicated region fallthrough
CT: control target
= control target key end

     0   :  { %vm423_vm0 = vcmask 1042432   ;;  %vm230_vm1 = vcmask 48128   ;;  %vm1180_vm2 = vcmask 261120   ;;  %vm2321_vm3 = vcmask 523264   ;;  %s6397_s1 = inlined_call_operand.vmem [shape: bf16[6,32], index: 1, kind: input, shape index: {}]   ;;  %s6398_s0 = inlined_call_operand.vmem [shape: f32[2,512,6], index: 0, kind: input, shape index: {}]   ;;  %s6399_s3 = inlined_call_operand.vmem [shape: bf16[32,64], index: 3, kind: input, shape index: {}]   ;;  %s6400_s4 = inlined_call_operand.vmem [shape: bf16[32,64], index: 4, kind: input, shape index: {}]   ;;  %s6401_s2 = inlined_call_operand.vmem [shape: f32[1,32], index: 2, kind: input, shape index: {}]   ;;  %s6402_s6 = inlined_call_operand.vmem [shape: bf16[64,32], index: 6, kind: input, shape index: {}]   ;;  %s6403_s5 = inlined_call_operand.vmem [shape: f32[1,64], index: 5, kind: input, shape index: {}]   ;;  %s6404_s7 = inlined_call_operand.vmem [shape: f32[1,32], index: 7, kind: input, shape index: {}]   ;;  %s6405_s8 = inlined_call_operand.vmem [shape: f32[2,32,32], index: 8, kind: output, shape index: {}]  }
   0x1   :  { %v222_v0 = vld [vmem:[%s6397_s1] sm:$0x7]  ;;  %v31_v2 = vld [vmem:[%s6398_s0 + $0x8] sm:$0xff]  ;;  %v32_v5 = vld [vmem:[%s6398_s0 + $0x10] sm:$0xff] }
   0x2   :  { %v30_v1 = vld [vmem:[%s6398_s0] sm:$0xff]  ;;  %4610 = vmatprep.subr.msk.bf16.mxu0 %vm423_vm0, %v222_v0  ;;  %v425_v3 = vsel %vm423_vm0, %v222_v0, 0  ;;  %v33_v6 = vld [vmem:[%s6398_s0 + $0x18] sm:$0xff]  ;;  %4611 = vmatprep.subr.msk.bf16.mxu1 %vm423_vm0, %v222_v0  ;;  %v35_v9 = vld [vmem:[%s6398_s0 + $0x28] sm:$0xff] }
   0x3   :  { %v158_v4 = vpack.c.bf16 %v31_v2, %v30_v1  ;;  %v34_v7 = vld [vmem:[%s6398_s0 + $0x20] sm:$0xff]  ;;  %4187 = vmatpush3.bf16.msra.mxu0 %v425_v3  ;;  %v159_v8 = vpack.c.bf16 %v33_v6, %v32_v5  ;;  %4609 = vmatpush3.bf16.msra.mxu1 %v425_v3  ;;  %v36_v11 = vld [vmem:[%s6398_s0 + $0x30] sm:$0xff]  ;;  %v37_v12 = vld [vmem:[%s6398_s0 + $0x38] sm:$0xff] }
   0x4   :  { %v160_v10 = vpack.c.bf16 %v35_v9, %v34_v7  ;;  %v38_v13 = vld [vmem:[%s6398_s0 + $0x40] sm:$0xff]  ;;  %v39_v14 = vld [vmem:[%s6398_s0 + $0x48] sm:$0xff]  ;;  %v161_v15 = vpack.c.bf16 %v37_v12, %v36_v11  ;;  %v40_v17 = vld [vmem:[%s6398_s0 + $0x50] sm:$0xff] }
   0x5   :  { %4188 = vmatprep.mubr.msk.bf16.mxu0 %vm230_vm1, %v158_v4  ;;  %v162_v16 = vpack.c.bf16 %v39_v14, %v38_v13  ;;  %v41_v18 = vld [vmem:[%s6398_s0 + $0x58] sm:$0xff]  ;;  %v42_v19 = vld [vmem:[%s6398_s0 + $0x60] sm:$0xff]  ;;  %v43_v20 = vld [vmem:[%s6398_s0 + $0x68] sm:$0xff] }
   0x6   :  { %4189 = vmatmul.mubr.msk.bf16.vlgmr.msra.gmra.mrb[0].mxu0 %vm230_vm1, %v159_v8  ;;  %v163_v21 = vpack.c.bf16 %v41_v18, %v40_v17  ;;  %v164_v22 = vpack.c.bf16 %v43_v20, %v42_v19  ;;  %v44_v23 = vld [vmem:[%s6398_s0 + $0x70] sm:$0xff]  ;;  %v45_v24 = vld [vmem:[%s6398_s0 + $0x78] sm:$0xff]  ;;  %v46_v25 = vld [vmem:[%s6398_s0 + $0x80] sm:$0xff] }
   0x7   :  { %4192 = vmatprep.mubr.msk.bf16.mxu0 %vm230_vm1, %v160_v10  ;;  %v47_v26 = vld [vmem:[%s6398_s0 + $0x88] sm:$0xff]  ;;  %v165_v27 = vpack.c.bf16 %v45_v24, %v44_v23  ;;  %v48_v29 = vld [vmem:[%s6398_s0 + $0x90] sm:$0xff]  ;;  %v49_v30 = vld [vmem:[%s6398_s0 + $0x98] sm:$0xff] }
   0x8   :  { %v166_v28 = vpack.c.bf16 %v47_v26, %v46_v25  ;;  %v50_v31 = vld [vmem:[%s6398_s0 + $0xa0] sm:$0xff]  ;;  %v51_v32 = vld [vmem:[%s6398_s0 + $0xa8] sm:$0xff]  ;;  %v167_v33 = vpack.c.bf16 %v49_v30, %v48_v29  ;;  %v52_v35 = vld [vmem:[%s6398_s0 + $0xb0] sm:$0xff] }
   0x9   :  { %v168_v34 = vpack.c.bf16 %v51_v32, %v50_v31  ;;  %v53_v36 = vld [vmem:[%s6398_s0 + $0xb8] sm:$0xff]  ;;  %v54_v37 = vld [vmem:[%s6398_s0 + $0xc0] sm:$0xff]  ;;  %v55_v38 = vld [vmem:[%s6398_s0 + $0xc8] sm:$0xff] }
   0xa   :  { %v169_v39 = vpack.c.bf16 %v53_v36, %v52_v35  ;;  %v170_v40 = vpack.c.bf16 %v55_v38, %v54_v37  ;;  %v56_v41 = vld [vmem:[%s6398_s0 + $0xd0] sm:$0xff]  ;;  %v57_v42 = vld [vmem:[%s6398_s0 + $0xd8] sm:$0xff]  ;;  %v58_v43 = vld [vmem:[%s6398_s0 + $0xe0] sm:$0xff] }
   0xb   :  { %v59_v44 = vld [vmem:[%s6398_s0 + $0xe8] sm:$0xff]  ;;  %v171_v45 = vpack.c.bf16 %v57_v42, %v56_v41  ;;  %v60_v47 = vld [vmem:[%s6398_s0 + $0xf0] sm:$0xff]  ;;  %v61_v48 = vld [vmem:[%s6398_s0 + $0xf8] sm:$0xff] }
   0xc   :  { %v172_v46 = vpack.c.bf16 %v59_v44, %v58_v43  ;;  %v62_v49 = vld [vmem:[%s6398_s0 + $0x100] sm:$0xff]  ;;  %v63_v50 = vld [vmem:[%s6398_s0 + $0x108] sm:$0xff]  ;;  %v173_v51 = vpack.c.bf16 %v61_v48, %v60_v47  ;;  %v64_v53 = vld [vmem:[%s6398_s0 + $0x110] sm:$0xff] }
   0xd   :  { %v174_v52 = vpack.c.bf16 %v63_v50, %v62_v49  ;;  %v65_v54 = vld [vmem:[%s6398_s0 + $0x118] sm:$0xff]  ;;  %v66_v55 = vld [vmem:[%s6398_s0 + $0x120] sm:$0xff]  ;;  %v67_v56 = vld [vmem:[%s6398_s0 + $0x128] sm:$0xff] }
   0xe   :  { %4193 = vmatmul.mubr.msk.bf16.gmra.mrb[4].mxu0 %vm230_vm1, %v161_v15  ;;  %v175_v57 = vpack.c.bf16 %v65_v54, %v64_v53  ;;  %v176_v58 = vpack.c.bf16 %v67_v56, %v66_v55  ;;  %v68_v59 = vld [vmem:[%s6398_s0 + $0x130] sm:$0xff]  ;;  %v69_v60 = vld [vmem:[%s6398_s0 + $0x138] sm:$0xff]  ;;  %v70_v61 = vld [vmem:[%s6398_s0 + $0x140] sm:$0xff] }
   0xf   :  { %4196 = vmatprep.mubr.msk.bf16.mxu0 %vm230_vm1, %v162_v16  ;;  %v71_v62 = vld [vmem:[%s6398_s0 + $0x148] sm:$0xff]  ;;  %v177_v63 = vpack.c.bf16 %v69_v60, %v68_v59  ;;  %v72_v1 = vld [vmem:[%s6398_s0 + $0x150] sm:$0xff]  ;;  %v73_v2 = vld [vmem:[%s6398_s0 + $0x158] sm:$0xff] }
  0x10   :  { %v178_v0 = vpack.c.bf16 %v71_v62, %v70_v61  ;;  %v74_v3 = vld [vmem:[%s6398_s0 + $0x160] sm:$0xff]  ;;  %v75_v4 = vld [vmem:[%s6398_s0 + $0x168] sm:$0xff]  ;;  %v179_v5 = vpack.c.bf16 %v73_v2, %v72_v1  ;;  %v76_v7 = vld [vmem:[%s6398_s0 + $0x170] sm:$0xff] }
  0x11   :  { %v180_v6 = vpack.c.bf16 %v75_v4, %v74_v3  ;;  %v77_v8 = vld [vmem:[%s6398_s0 + $0x178] sm:$0xff]  ;;  %v78_v9 = vld [vmem:[%s6398_s0 + $0x180] sm:$0xff]  ;;  %v79_v10 = vld [vmem:[%s6398_s0 + $0x188] sm:$0xff] }
  0x12   :  { %v4612_v11 = vld [vmem:[%s6399_s3] sm:$0xff]   ;;  %v155_v13 = vld [vmem:[%s6398_s0 + $0x3e8] sm:$0xff]  ;;  %v156_v15 = vld [vmem:[%s6398_s0 + $0x3f0] sm:$0xff]  ;;  %v181_v17 = vpack.c.bf16 %v77_v8, %v76_v7  ;;  %v182_v20 = vpack.c.bf16 %v79_v10, %v78_v9 }
  0x13   :  { %v154_v12 = vld [vmem:[%s6398_s0 + $0x3e0] sm:$0xff]  ;;  %4448 = vmatprep.subr.bf16.mxu0 %v4612_v11  ;;  %v157_v16 = vld [vmem:[%s6398_s0 + $0x3f8] sm:$0xff]  ;;  %v83_v25 = vld [vmem:[%s6398_s0 + $0x1a8] sm:$0xff] }
  0x14   :  { %v220_v14 = vpack.c.bf16 %v155_v13, %v154_v12  ;;  %4449 = vmatpush3.bf16.msra.mxu0 %v4612_v11  ;;  %v221_v18 = vpack.c.bf16 %v157_v16, %v156_v15  ;;  %v4613_v19 = vld [vmem:[%s6400_s4] sm:$0xff]   ;;  %v81_v23 = vld [vmem:[%s6398_s0 + $0x198] sm:$0xff]  ;;  %v87_v31 = vld [vmem:[%s6398_s0 + $0x1c8] sm:$0xff] }
  0x15   :  { %4316 = vmatprep.subr.bf16.mxu1 %v4613_v19  ;;  %v82_v24 = vld [vmem:[%s6398_s0 + $0x1a0] sm:$0xff]  ;;  %v85_v29 = vld [vmem:[%s6398_s0 + $0x1b8] sm:$0xff]  ;;  %v91_v37 = vld [vmem:[%s6398_s0 + $0x1e8] sm:$0xff] }
  0x16   :  { %4197 = vmatmul.mubr.msk.bf16.gmra.mrb[8].mxu0 %vm230_vm1, %v163_v21  ;;  %4312 = vmatprep.mubr.msk.bf16.mxu1 %vm230_vm1, %v220_v14  ;;  %v4614_v21 = vld [vmem:[%s6400_s4 + $0x8] sm:$0xff]   ;;  %v86_v30 = vld [vmem:[%s6398_s0 + $0x1c0] sm:$0xff]  ;;  %v89_v35 = vld [vmem:[%s6398_s0 + $0x1d8] sm:$0xff] }
  0x17   :  { %4200 = vmatprep.mubr.msk.bf16.mxu0 %vm230_vm1, %v164_v22  ;;  %4313 = vmatmul.mubr.msk.bf16.vlgmr.msra.gmra.mrb[0].mxu1 %vm230_vm1, %v221_v18  ;;  %v80_v22 = vld [vmem:[%s6398_s0 + $0x190] sm:$0xff]  ;;  %v90_v36 = vld [vmem:[%s6398_s0 + $0x1e0] sm:$0xff]  ;;  %v93_v41 = vld [vmem:[%s6398_s0 + $0x1f8] sm:$0xff] }
  0x18   :  { %4317 = vmatpush3.bf16.msra.mxu1 %v4613_v19  ;;  %v183_v26 = vpack.c.bf16 %v81_v23, %v80_v22  ;;  %v94_v42 = vld [vmem:[%s6398_s0 + $0x200] sm:$0xff]  ;;  %v95_v43 = vld [vmem:[%s6398_s0 + $0x208] sm:$0xff]  ;;  %v97_v47 = vld [vmem:[%s6398_s0 + $0x218] sm:$0xff] }
  0x19   :  { %4318 = vmatprep.subr.bf16.mxu1 %v4614_v21  ;;  %v98_v48 = vld [vmem:[%s6398_s0 + $0x220] sm:$0xff]  ;;  %v99_v49 = vld [vmem:[%s6398_s0 + $0x228] sm:$0xff]  ;;  %v101_v53 = vld [vmem:[%s6398_s0 + $0x238] sm:$0xff] }
  0x1a   :  { %v102_v54 = vld [vmem:[%s6398_s0 + $0x240] sm:$0xff]  ;;  %v103_v55 = vld [vmem:[%s6398_s0 + $0x248] sm:$0xff]  ;;  %v105_v59 = vld [vmem:[%s6398_s0 + $0x258] sm:$0xff] }
  0x1b   :  { %v106_v60 = vld [vmem:[%s6398_s0 + $0x260] sm:$0xff]  ;;  %v107_v61 = vld [vmem:[%s6398_s0 + $0x268] sm:$0xff]  ;;  %v109_v1 = vld [vmem:[%s6398_s0 + $0x278] sm:$0xff] }
  0x1c   :  { %4319 = vmatpush3.bf16.msra.mxu1 %v4614_v21  ;;  %v110_v2 = vld [vmem:[%s6398_s0 + $0x280] sm:$0xff]  ;;  %v111_v3 = vld [vmem:[%s6398_s0 + $0x288] sm:$0xff]  ;;  %v113_v7 = vld [vmem:[%s6398_s0 + $0x298] sm:$0xff] }
  0x1d   :  { %v114_v8 = vld [vmem:[%s6398_s0 + $0x2a0] sm:$0xff]  ;;  %v115_v9 = vld [vmem:[%s6398_s0 + $0x2a8] sm:$0xff]  ;;  %v116_v12 = vld [vmem:[%s6398_s0 + $0x2b0] sm:$0xff] }
  0x1e   :  { %4201 = vmatmul.mubr.msk.bf16.gmra.mrb[12].mxu0 %vm230_vm1, %v165_v27  ;;  %v184_v27 = vpack.c.bf16 %v83_v25, %v82_v24  ;;  %v200_v11 = vpack.c.bf16 %v115_v9, %v114_v8  ;;  %v117_v13 = vld [vmem:[%s6398_s0 + $0x2b8] sm:$0xff]  ;;  %v118_v14 = vld [vmem:[%s6398_s0 + $0x2c0] sm:$0xff]  ;;  %v119_v15 = vld [vmem:[%s6398_s0 + $0x2c8] sm:$0xff] }
  0x1f   :  { %4204 = vmatprep.mubr.msk.bf16.mxu0 %vm230_vm1, %v166_v28  ;;  %v84_v28 = vld [vmem:[%s6398_s0 + $0x1b0] sm:$0xff]  ;;  %v201_v16 = vpack.c.bf16 %v117_v13, %v116_v12  ;;  %v121_v19 = vld [vmem:[%s6398_s0 + $0x2d8] sm:$0xff]  ;;  %v123_v21 = vld [vmem:[%s6398_s0 + $0x2e8] sm:$0xff] }
  0x20   :  { %v185_v32 = vpack.c.bf16 %v85_v29, %v84_v28  ;;  %v120_v18 = vld [vmem:[%s6398_s0 + $0x2d0] sm:$0xff]  ;;  %v125_v25 = vld [vmem:[%s6398_s0 + $0x2f8] sm:$0xff]  ;;  %v147_v8 = vld [vmem:[%s6398_s0 + $0x3a8] sm:$0xff] }
  0x21   :  { %v203_v22 = vpack.c.bf16 %v121_v19, %v120_v18  ;;  %v124_v24 = vld [vmem:[%s6398_s0 + $0x2f0] sm:$0xff] }
  0x22   :  { %v205_v28 = vpack.c.bf16 %v125_v25, %v124_v24 }
  0x26   :  { %4205 = vmatmul.mubr.msk.bf16.gmra.mrb[16].mxu0 %vm230_vm1, %v167_v33  ;;  %v186_v33 = vpack.c.bf16 %v87_v31, %v86_v30  ;;  %v128_v30 = vld [vmem:[%s6398_s0 + $0x310] sm:$0xff]  ;;  %v129_v31 = vld [vmem:[%s6398_s0 + $0x318] sm:$0xff] }
  0x27   :  { %4208 = vmatprep.mubr.msk.bf16.mxu0 %vm230_vm1, %v168_v34  ;;  %v88_v34 = vld [vmem:[%s6398_s0 + $0x1d0] sm:$0xff] }
  0x28   :  { %v187_v38 = vpack.c.bf16 %v89_v35, %v88_v34  ;;  %v207_v34 = vpack.c.bf16 %v129_v31, %v128_v30  ;;  %v150_v30 = vld [vmem:[%s6398_s0 + $0x3c0] sm:$0xff]  ;;  %v151_v31 = vld [vmem:[%s6398_s0 + $0x3c8] sm:$0xff] }
  0x2e   :  { %4209 = vmatmul.mubr.msk.bf16.gmra.mrb[20].mxu0 %vm230_vm1, %v169_v39  ;;  %v188_v39 = vpack.c.bf16 %v91_v37, %v90_v36  ;;  %v132_v36 = vld [vmem:[%s6398_s0 + $0x330] sm:$0xff]  ;;  %v133_v37 = vld [vmem:[%s6398_s0 + $0x338] sm:$0xff] }
  0x2f   :  { %4212 = vmatprep.mubr.msk.bf16.mxu0 %vm230_vm1, %v170_v40  ;;  %v92_v40 = vld [vmem:[%s6398_s0 + $0x1f0] sm:$0xff] }
  0x30   :  { %v189_v44 = vpack.c.bf16 %v93_v41, %v92_v40  ;;  %v209_v40 = vpack.c.bf16 %v133_v37, %v132_v36 }
  0x36   :  { %4213 = vmatmul.mubr.msk.bf16.gmra.mrb[24].mxu0 %vm230_vm1, %v171_v45  ;;  %v190_v45 = vpack.c.bf16 %v95_v43, %v94_v42  ;;  %v136_v42 = vld [vmem:[%s6398_s0 + $0x350] sm:$0xff]  ;;  %v137_v43 = vld [vmem:[%s6398_s0 + $0x358] sm:$0xff] }
  0x37   :  { %4216 = vmatprep.mubr.msk.bf16.mxu0 %vm230_vm1, %v172_v46  ;;  %v96_v46 = vld [vmem:[%s6398_s0 + $0x210] sm:$0xff] }
  0x38   :  { %v191_v50 = vpack.c.bf16 %v97_v47, %v96_v46  ;;  %v211_v46 = vpack.c.bf16 %v137_v43, %v136_v42 }
  0x3e   :  { %4217 = vmatmul.mubr.msk.bf16.gmra.mrb[28].mxu0 %vm230_vm1, %v173_v51  ;;  %v192_v51 = vpack.c.bf16 %v99_v49, %v98_v48  ;;  %v5086_v48 = vld [vmem:[%s6401_s2] ss:$0 sm:$0xff]  ;;  %v140_v49 = vld [vmem:[%s6398_s0 + $0x370] sm:$0xff] }
  0x3f   :  { %4220 = vmatprep.mubr.msk.bf16.mxu0 %vm230_vm1, %v174_v52  ;;  %v100_v52 = vld [vmem:[%s6398_s0 + $0x230] sm:$0xff] }
  0x40   :  { %v193_v56 = vpack.c.bf16 %v101_v53, %v100_v52  ;;  %v143_v52 = vld [vmem:[%s6398_s0 + $0x388] sm:$0xff] }
  0x41   :  { %v4615_v53 = vld [vmem:[%s6399_s3 + $0x8] sm:$0xff]  }
  0x42   :  { %4450 = vmatprep.subr.bf16.mxu0 %v4615_v53 }
  0x43   :  { %4451 = vmatpush3.bf16.msra.mxu0 %v4615_v53 }
  0x46   :  { %4221 = vmatmul.mubr.msk.bf16.gmra.mrb[32].mxu0 %vm230_vm1, %v175_v57  ;;  %v194_v57 = vpack.c.bf16 %v103_v55, %v102_v54 }
  0x47   :  { %4224 = vmatprep.mubr.msk.bf16.mxu0 %vm230_vm1, %v176_v58  ;;  %v104_v58 = vld [vmem:[%s6398_s0 + $0x250] sm:$0xff] }
  0x48   :  { %v195_v62 = vpack.c.bf16 %v105_v59, %v104_v58 }
  0x4e   :  { %4225 = vmatmul.mubr.msk.bf16.gmra.mrb[36].mxu0 %vm230_vm1, %v177_v63  ;;  %v196_v63 = vpack.c.bf16 %v107_v61, %v106_v60 }
  0x4f   :  { %4228 = vmatprep.mubr.msk.bf16.mxu0 %vm230_vm1, %v178_v0  ;;  %v108_v0 = vld [vmem:[%s6398_s0 + $0x270] sm:$0xff] }
  0x50   :  { %v197_v4 = vpack.c.bf16 %v109_v1, %v108_v0 }
  0x56   :  { %4229 = vmatmul.mubr.msk.bf16.gmra.mrb[40].mxu0 %vm230_vm1, %v179_v5  ;;  %v198_v5 = vpack.c.bf16 %v111_v3, %v110_v2 }
  0x57   :  { %4232 = vmatprep.mubr.msk.bf16.mxu0 %vm230_vm1, %v180_v6  ;;  %v112_v6 = vld [vmem:[%s6398_s0 + $0x290] sm:$0xff] }
  0x58   :  { %v199_v10 = vpack.c.bf16 %v113_v7, %v112_v6  ;;  %v146_v7 = vld [vmem:[%s6398_s0 + $0x3a0] sm:$0xff] }
  0x5e   :  { %4233 = vmatmul.mubr.msk.bf16.gmra.mrb[44].mxu0 %vm230_vm1, %v181_v17  ;;  %v202_v17 = vpack.c.bf16 %v119_v15, %v118_v14 }
  0x5f   :  { %4236 = vmatprep.mubr.msk.bf16.mxu0 %vm230_vm1, %v182_v20  ;;  %v122_v20 = vld [vmem:[%s6398_s0 + $0x2e0] sm:$0xff] }
  0x60   :  { %v204_v23 = vpack.c.bf16 %v123_v21, %v122_v20 }
  0x66   :  { %4237 = vmatmul.mubr.msk.bf16.gmra.mrb[48].mxu0 %vm230_vm1, %v183_v26  ;;  %v126_v26 = vld [vmem:[%s6398_s0 + $0x300] sm:$0xff] }
  0x67   :  { %4240 = vmatprep.mubr.msk.bf16.mxu0 %vm230_vm1, %v184_v27  ;;  %v127_v27 = vld [vmem:[%s6398_s0 + $0x308] sm:$0xff] }
  0x68   :  { %v206_v29 = vpack.c.bf16 %v127_v27, %v126_v26  ;;  %v148_v26 = vld [vmem:[%s6398_s0 + $0x3b0] sm:$0xff]  ;;  %v149_v27 = vld [vmem:[%s6398_s0 + $0x3b8] sm:$0xff] }
  0x69   :  { %v217_v37 = vpack.c.bf16 %v149_v27, %v148_v26 }
  0x6e   :  { %4241 = vmatmul.mubr.msk.bf16.gmra.mrb[52].mxu0 %vm230_vm1, %v185_v32  ;;  %v130_v32 = vld [vmem:[%s6398_s0 + $0x320] sm:$0xff] }
  0x6f   :  { %4244 = vmatprep.mubr.msk.bf16.mxu0 %vm230_vm1, %v186_v33  ;;  %v131_v33 = vld [vmem:[%s6398_s0 + $0x328] sm:$0xff] }
  0x70   :  { %v208_v35 = vpack.c.bf16 %v131_v33, %v130_v32 }
  0x76   :  { %4245 = vmatmul.mubr.msk.bf16.gmra.mrb[56].mxu0 %vm230_vm1, %v187_v38  ;;  %v134_v38 = vld [vmem:[%s6398_s0 + $0x340] sm:$0xff] }
  0x77   :  { %4248 = vmatprep.mubr.msk.bf16.mxu0 %vm230_vm1, %v188_v39  ;;  %v135_v39 = vld [vmem:[%s6398_s0 + $0x348] sm:$0xff] }
  0x78   :  { %v210_v41 = vpack.c.bf16 %v135_v39, %v134_v38 }
  0x7e   :  { %4249 = vmatmul.mubr.msk.bf16.gmra.mrb[60].mxu0 %vm230_vm1, %v189_v44  ;;  %v138_v44 = vld [vmem:[%s6398_s0 + $0x360] sm:$0xff] }
  0x7f   :  { %4252 = vmatprep.mubr.msk.bf16.mxu0 %vm230_vm1, %v190_v45  ;;  %v139_v45 = vld [vmem:[%s6398_s0 + $0x368] sm:$0xff] }
  0x80   :  { %v212_v47 = vpack.c.bf16 %v139_v45, %v138_v44 }
  0x86   :  { %4253 = vmatmul.mubr.msk.bf16.gmra.mrb[64].mxu0 %vm230_vm1, %v191_v50  ;;  %v141_v50 = vld [vmem:[%s6398_s0 + $0x378] sm:$0xff] }
  0x87   :  { %4256 = vmatprep.mubr.msk.bf16.mxu0 %vm230_vm1, %v192_v51  ;;  %v142_v51 = vld [vmem:[%s6398_s0 + $0x380] sm:$0xff] }
  0x88   :  { %v214_v60 = vpack.c.bf16 %v143_v52, %v142_v51  ;;  %v152_v51 = vld [vmem:[%s6398_s0 + $0x3d0] sm:$0xff]  ;;  %v153_v52 = vld [vmem:[%s6398_s0 + $0x3d8] sm:$0xff] }
  0x8e   :  { %4257 = vmatmul.mubr.msk.bf16.gmra.mrb[68].mxu0 %vm230_vm1, %v193_v56 }
  0x8f   :  { %4260 = vmatprep.mubr.msk.bf16.mxu0 %vm230_vm1, %v194_v57  ;;  %v213_v57 = vpack.c.bf16 %v141_v50, %v140_v49 }
  0x96   :  { %4261 = vmatmul.mubr.msk.bf16.gmra.mrb[72].mxu0 %vm230_vm1, %v195_v62 }
  0x97   :  { %4264 = vmatprep.mubr.msk.bf16.mxu0 %vm230_vm1, %v196_v63 }
  0x9e   :  { %4265 = vmatmul.mubr.msk.bf16.gmra.mrb[76].mxu0 %vm230_vm1, %v197_v4  ;;  %v144_v4 = vld [vmem:[%s6398_s0 + $0x390] sm:$0xff] }
  0x9f   :  { %4268 = vmatprep.mubr.msk.bf16.mxu0 %vm230_vm1, %v198_v5  ;;  %v145_v5 = vld [vmem:[%s6398_s0 + $0x398] sm:$0xff] }
  0xa0   :  { %v215_v13 = vpack.c.bf16 %v145_v5, %v144_v4 }
  0xa6   :  { %4269 = vmatmul.mubr.msk.bf16.gmra.mrb[80].mxu0 %vm230_vm1, %v199_v10 }
  0xa7   :  { %4272 = vmatprep.mubr.msk.bf16.mxu0 %vm230_vm1, %v200_v11 }
  0xae   :  { %4273 = vmatmul.mubr.msk.bf16.gmra.mrb[84].mxu0 %vm230_vm1, %v201_v16  ;;  %v216_v16 = vpack.c.bf16 %v147_v8, %v146_v7 }
  0xaf   :  { %4276 = vmatprep.mubr.msk.bf16.mxu0 %vm230_vm1, %v202_v17 }
  0xb6   :  { %4277 = vmatmul.mubr.msk.bf16.gmra.mrb[88].mxu0 %vm230_vm1, %v203_v22 }
  0xb7   :  { %4280 = vmatprep.mubr.msk.bf16.mxu0 %vm230_vm1, %v204_v23 }
  0xbe   :  { %4281 = vmatmul.mubr.msk.bf16.gmra.mrb[92].mxu0 %vm230_vm1, %v205_v28 }
  0xbf   :  { %4284 = vmatprep.mubr.msk.bf16.mxu0 %vm230_vm1, %v206_v29 }
  0xc6   :  { %4285 = vmatmul.mubr.msk.bf16.gmra.mrb[96].mxu0 %vm230_vm1, %v207_v34 }
  0xc7   :  { %4288 = vmatprep.mubr.msk.bf16.mxu0 %vm230_vm1, %v208_v35 }
  0xce   :  { %4289 = vmatmul.mubr.msk.bf16.gmra.mrb[100].mxu0 %vm230_vm1, %v209_v40  ;;  %v218_v40 = vpack.c.bf16 %v151_v31, %v150_v30 }
  0xcf   :  { %4292 = vmatprep.mubr.msk.bf16.mxu0 %vm230_vm1, %v210_v41 }
  0xd6   :  { %4293 = vmatmul.mubr.msk.bf16.gmra.mrb[104].mxu0 %vm230_vm1, %v211_v46 }
  0xd7   :  { %4296 = vmatprep.mubr.msk.bf16.mxu0 %vm230_vm1, %v212_v47 }
  0xd9   :  { %v4190_v54 = vpop.f32.mrb[0].mxu0 }
  0xda   :  { %v470_v55 = vadd.f32 %v4190_v54, %v5086_v48  ;;  %v461_v56 = vpop.f32.mrb[1].mxu0 }
  0xdb   :  { %v462_v58 = vadd.f32 %v5086_v48, %v461_v56  ;;  %v4191_v59 = vpop.f32.mrb[2].mxu0 }
  0xdc   :  { %v473_v61 = vadd.f32 %v4191_v59, %v5086_v48  ;;  %v464_v62 = vpop.f32.mrb[3].mxu0  ;;  %v974_v0 = vmax.f32 %v470_v55, 0.0 }
  0xdd   :  { %v465_v63 = vadd.f32 %v5086_v48, %v464_v62  ;;  %v972_v2 = vmax.f32 %v462_v58, 0.0 }
  0xde   :  { %v975_v1 = vmax.f32 %v473_v61, 0.0  ;;  %4297 = vmatmul.mubr.msk.bf16.gmra.mrb[108].mxu0 %vm230_vm1, %v213_v57 }
  0xdf   :  { %v973_v3 = vmax.f32 %v465_v63, 0.0  ;;  %4300 = vmatprep.mubr.msk.bf16.mxu0 %vm230_vm1, %v214_v60  ;;  %v219_v60 = vpack.c.bf16 %v153_v52, %v152_v51 }
  0xe0   :  { %v1101_v6 = vpack.c.bf16 %v975_v1, %v974_v0 }
  0xe1   :  { %v1100_v9 = vpack.c.bf16 %v973_v3, %v972_v2  ;;  %v4194_v10 = vpop.f32.mrb[4].mxu0 }
  0xe2   :  { %v486_v11 = vadd.f32 %v4194_v10, %v5086_v48  ;;  %v477_v12 = vpop.f32.mrb[5].mxu0 }
  0xe3   :  { %v478_v14 = vadd.f32 %v5086_v48, %v477_v12  ;;  %v4195_v15 = vpop.f32.mrb[6].mxu0  ;;  %4320 = vmatprep.mubr.msk.bf16.mxu1 %vm1180_vm2, %v1100_v9 }
  0xe4   :  { %v978_v17 = vmax.f32 %v486_v11, 0.0  ;;  %v489_v18 = vadd.f32 %v4195_v15, %v5086_v48  ;;  %v480_v19 = vpop.f32.mrb[7].mxu0  ;;  %4321 = vmatmul.mubr.msk.bf16.vlgmr.msra.gmra.mrb[4].mxu1 %vm1180_vm2, %v1101_v6 }
  0xe5   :  { %v976_v20 = vmax.f32 %v478_v14, 0.0  ;;  %v481_v21 = vadd.f32 %v5086_v48, %v480_v19 }
  0xe6   :  { %v1920_v22 = vmax.f32 %v974_v0, %v978_v17  ;;  %v979_v23 = vmax.f32 %v489_v18, 0.0  ;;  %4301 = vmatmul.mubr.msk.bf16.gmra.mrb[112].mxu0 %vm230_vm1, %v215_v13 }
  0xe7   :  { %v1918_v24 = vmax.f32 %v972_v2, %v976_v20  ;;  %v977_v25 = vmax.f32 %v481_v21, 0.0  ;;  %4304 = vmatprep.mubr.msk.bf16.mxu0 %vm230_vm1, %v216_v16 }
  0xe8   :  { %v1103_v28 = vpack.c.bf16 %v979_v23, %v978_v17  ;;  %v1921_v29 = vmax.f32 %v975_v1, %v979_v23 }
  0xe9   :  { %v1102_v32 = vpack.c.bf16 %v977_v25, %v976_v20  ;;  %v1919_v33 = vmax.f32 %v973_v3, %v977_v25  ;;  %v4198_v34 = vpop.f32.mrb[8].mxu0 }
  0xea   :  { %v502_v35 = vadd.f32 %v4198_v34, %v5086_v48  ;;  %v493_v36 = vpop.f32.mrb[9].mxu0 }
  0xeb   :  { %v494_v38 = vadd.f32 %v5086_v48, %v493_v36  ;;  %v4199_v39 = vpop.f32.mrb[10].mxu0  ;;  %4324 = vmatprep.mubr.msk.bf16.mxu1 %vm1180_vm2, %v1102_v32 }
  0xec   :  { %v982_v41 = vmax.f32 %v502_v35, 0.0  ;;  %v505_v42 = vadd.f32 %v4199_v39, %v5086_v48  ;;  %v496_v43 = vpop.f32.mrb[11].mxu0  ;;  %4325 = vmatmul.mubr.msk.bf16.gmra.mrb[8].mxu1 %vm1180_vm2, %v1103_v28 }
  0xed   :  { %v980_v44 = vmax.f32 %v494_v38, 0.0  ;;  %v497_v45 = vadd.f32 %v5086_v48, %v496_v43 }
  0xee   :  { %v1924_v46 = vmax.f32 %v1920_v22, %v982_v41  ;;  %v983_v47 = vmax.f32 %v505_v42, 0.0  ;;  %4305 = vmatmul.mubr.msk.bf16.gmra.mrb[116].mxu0 %vm230_vm1, %v217_v37 }
  0xef   :  { %v1922_v49 = vmax.f32 %v1918_v24, %v980_v44  ;;  %v981_v50 = vmax.f32 %v497_v45, 0.0  ;;  %4308 = vmatprep.mubr.msk.bf16.mxu0 %vm230_vm1, %v218_v40 }
  0xf0   :  { %v1105_v53 = vpack.c.bf16 %v983_v47, %v982_v41  ;;  %v1925_v54 = vmax.f32 %v1921_v29, %v983_v47 }
  0xf1   :  { %v1104_v55 = vpack.c.bf16 %v981_v50, %v980_v44  ;;  %v1923_v56 = vmax.f32 %v1919_v33, %v981_v50  ;;  %v4202_v57 = vpop.f32.mrb[12].mxu0 }
  0xf2   :  { %v518_v58 = vadd.f32 %v4202_v57, %v5086_v48  ;;  %v509_v59 = vpop.f32.mrb[13].mxu0 }
  0xf3   :  { %v510_v61 = vadd.f32 %v5086_v48, %v509_v59  ;;  %v4203_v62 = vpop.f32.mrb[14].mxu0  ;;  %4328 = vmatprep.mubr.msk.bf16.mxu1 %vm1180_vm2, %v1104_v55 }
  0xf4   :  { %v986_v63 = vmax.f32 %v518_v58, 0.0  ;;  %v521_v0 = vadd.f32 %v4203_v62, %v5086_v48  ;;  %v512_v1 = vpop.f32.mrb[15].mxu0  ;;  %4329 = vmatmul.mubr.msk.bf16.gmra.mrb[12].mxu1 %vm1180_vm2, %v1105_v53 }
  0xf5   :  { %v984_v2 = vmax.f32 %v510_v61, 0.0  ;;  %v513_v3 = vadd.f32 %v5086_v48, %v512_v1 }
  0xf6   :  { %v1928_v4 = vmax.f32 %v1924_v46, %v986_v63  ;;  %v987_v5 = vmax.f32 %v521_v0, 0.0  ;;  %4309 = vmatmul.mubr.msk.bf16.gmra.mrb[120].mxu0 %vm230_vm1, %v219_v60 }
  0xf7   :  { %v1926_v6 = vmax.f32 %v1922_v49, %v984_v2  ;;  %v985_v7 = vmax.f32 %v513_v3, 0.0 }
  0xf8   :  { %v1107_v8 = vpack.c.bf16 %v987_v5, %v986_v63  ;;  %v1929_v9 = vmax.f32 %v1925_v54, %v987_v5 }
  0xf9   :  { %v1106_v10 = vpack.c.bf16 %v985_v7, %v984_v2  ;;  %v1927_v11 = vmax.f32 %v1923_v56, %v985_v7  ;;  %v4206_v12 = vpop.f32.mrb[16].mxu0 }
  0xfa   :  { %v534_v13 = vadd.f32 %v4206_v12, %v5086_v48  ;;  %v525_v14 = vpop.f32.mrb[17].mxu0 }
  0xfb   :  { %v526_v15 = vadd.f32 %v5086_v48, %v525_v14  ;;  %v4207_v16 = vpop.f32.mrb[18].mxu0  ;;  %4332 = vmatprep.mubr.msk.bf16.mxu1 %vm1180_vm2, %v1106_v10 }
  0xfc   :  { %v990_v17 = vmax.f32 %v534_v13, 0.0  ;;  %v537_v18 = vadd.f32 %v4207_v16, %v5086_v48  ;;  %v528_v19 = vpop.f32.mrb[19].mxu0  ;;  %4333 = vmatmul.mubr.msk.bf16.gmra.mrb[16].mxu1 %vm1180_vm2, %v1107_v8 }
  0xfd   :  { %v988_v20 = vmax.f32 %v526_v15, 0.0  ;;  %v529_v21 = vadd.f32 %v5086_v48, %v528_v19 }
  0xfe   :  { %v1932_v22 = vmax.f32 %v1928_v4, %v990_v17  ;;  %v991_v23 = vmax.f32 %v537_v18, 0.0 }
  0xff   :  { %v1930_v24 = vmax.f32 %v1926_v6, %v988_v20  ;;  %v989_v25 = vmax.f32 %v529_v21, 0.0 }
 0x100   :  { %v1109_v26 = vpack.c.bf16 %v991_v23, %v990_v17  ;;  %v1933_v27 = vmax.f32 %v1929_v9, %v991_v23 }
 0x101   :  { %v1108_v28 = vpack.c.bf16 %v989_v25, %v988_v20  ;;  %v1931_v29 = vmax.f32 %v1927_v11, %v989_v25  ;;  %v4210_v30 = vpop.f32.mrb[20].mxu0 }
 0x102   :  { %v550_v31 = vadd.f32 %v4210_v30, %v5086_v48  ;;  %v541_v32 = vpop.f32.mrb[21].mxu0 }
 0x103   :  { %v542_v33 = vadd.f32 %v5086_v48, %v541_v32  ;;  %v4211_v34 = vpop.f32.mrb[22].mxu0  ;;  %4336 = vmatprep.mubr.msk.bf16.mxu1 %vm1180_vm2, %v1108_v28 }
 0x104   :  { %v994_v35 = vmax.f32 %v550_v31, 0.0  ;;  %v553_v36 = vadd.f32 %v4211_v34, %v5086_v48  ;;  %v544_v37 = vpop.f32.mrb[23].mxu0  ;;  %4337 = vmatmul.mubr.msk.bf16.gmra.mrb[20].mxu1 %vm1180_vm2, %v1109_v26 }
 0x105   :  { %v992_v38 = vmax.f32 %v542_v33, 0.0  ;;  %v545_v39 = vadd.f32 %v5086_v48, %v544_v37 }
 0x106   :  { %v1936_v40 = vmax.f32 %v1932_v22, %v994_v35  ;;  %v995_v41 = vmax.f32 %v553_v36, 0.0 }
 0x107   :  { %v1934_v42 = vmax.f32 %v1930_v24, %v992_v38  ;;  %v993_v43 = vmax.f32 %v545_v39, 0.0 }
 0x108   :  { %v1111_v44 = vpack.c.bf16 %v995_v41, %v994_v35  ;;  %v1937_v45 = vmax.f32 %v1933_v27, %v995_v41 }
 0x109   :  { %v1110_v46 = vpack.c.bf16 %v993_v43, %v992_v38  ;;  %v1935_v47 = vmax.f32 %v1931_v29, %v993_v43  ;;  %v4214_v49 = vpop.f32.mrb[24].mxu0 }
 0x10a   :  { %v566_v50 = vadd.f32 %v4214_v49, %v5086_v48  ;;  %v557_v51 = vpop.f32.mrb[25].mxu0 }
 0x10b   :  { %v558_v52 = vadd.f32 %v5086_v48, %v557_v51  ;;  %v4215_v53 = vpop.f32.mrb[26].mxu0  ;;  %4340 = vmatprep.mubr.msk.bf16.mxu1 %vm1180_vm2, %v1110_v46 }
 0x10c   :  { %v998_v54 = vmax.f32 %v566_v50, 0.0  ;;  %v569_v55 = vadd.f32 %v4215_v53, %v5086_v48  ;;  %v560_v56 = vpop.f32.mrb[27].mxu0  ;;  %4341 = vmatmul.mubr.msk.bf16.gmra.mrb[24].mxu1 %vm1180_vm2, %v1111_v44 }
 0x10d   :  { %v996_v57 = vmax.f32 %v558_v52, 0.0  ;;  %v561_v58 = vadd.f32 %v5086_v48, %v560_v56 }
 0x10e   :  { %v1940_v59 = vmax.f32 %v1936_v40, %v998_v54  ;;  %v999_v60 = vmax.f32 %v569_v55, 0.0 }
 0x10f   :  { %v1938_v61 = vmax.f32 %v1934_v42, %v996_v57  ;;  %v997_v62 = vmax.f32 %v561_v58, 0.0 }
 0x110   :  { %v1113_v63 = vpack.c.bf16 %v999_v60, %v998_v54  ;;  %v1941_v0 = vmax.f32 %v1937_v45, %v999_v60 }
 0x111   :  { %v1112_v1 = vpack.c.bf16 %v997_v62, %v996_v57  ;;  %v1939_v2 = vmax.f32 %v1935_v47, %v997_v62  ;;  %v4218_v3 = vpop.f32.mrb[28].mxu0 }
 0x112   :  { %v582_v4 = vadd.f32 %v4218_v3, %v5086_v48  ;;  %v573_v5 = vpop.f32.mrb[29].mxu0 }
 0x113   :  { %v574_v6 = vadd.f32 %v5086_v48, %v573_v5  ;;  %v4219_v7 = vpop.f32.mrb[30].mxu0  ;;  %4344 = vmatprep.mubr.msk.bf16.mxu1 %vm1180_vm2, %v1112_v1 }
 0x114   :  { %v1002_v8 = vmax.f32 %v582_v4, 0.0  ;;  %v585_v9 = vadd.f32 %v4219_v7, %v5086_v48  ;;  %v576_v10 = vpop.f32.mrb[31].mxu0  ;;  %4345 = vmatmul.mubr.msk.bf16.gmra.mrb[28].mxu1 %vm1180_vm2, %v1113_v63 }
 0x115   :  { %v1000_v11 = vmax.f32 %v574_v6, 0.0  ;;  %v577_v12 = vadd.f32 %v5086_v48, %v576_v10 }
 0x116   :  { %v1944_v13 = vmax.f32 %v1940_v59, %v1002_v8  ;;  %v1003_v14 = vmax.f32 %v585_v9, 0.0 }
 0x117   :  { %v1942_v15 = vmax.f32 %v1938_v61, %v1000_v11  ;;  %v1001_v16 = vmax.f32 %v577_v12, 0.0 }
 0x118   :  { %v1115_v17 = vpack.c.bf16 %v1003_v14, %v1002_v8  ;;  %v1945_v18 = vmax.f32 %v1941_v0, %v1003_v14 }
 0x119   :  { %v1114_v19 = vpack.c.bf16 %v1001_v16, %v1000_v11  ;;  %v1943_v20 = vmax.f32 %v1939_v2, %v1001_v16  ;;  %v4222_v21 = vpop.f32.mrb[32].mxu0 }
 0x11a   :  { %v598_v22 = vadd.f32 %v4222_v21, %v5086_v48  ;;  %v589_v23 = vpop.f32.mrb[33].mxu0 }
 0x11b   :  { %v590_v24 = vadd.f32 %v5086_v48, %v589_v23  ;;  %v4223_v25 = vpop.f32.mrb[34].mxu0  ;;  %4348 = vmatprep.mubr.msk.bf16.mxu1 %vm1180_vm2, %v1114_v19 }
 0x11c   :  { %v1006_v26 = vmax.f32 %v598_v22, 0.0  ;;  %v601_v27 = vadd.f32 %v4223_v25, %v5086_v48  ;;  %v592_v28 = vpop.f32.mrb[35].mxu0  ;;  %4349 = vmatmul.mubr.msk.bf16.gmra.mrb[32].mxu1 %vm1180_vm2, %v1115_v17  ;;  %v4314_v17 = vpop.f32.mrb[0].mxu1 }
 0x11d   :  { %v1004_v29 = vmax.f32 %v590_v24, 0.0  ;;  %v593_v30 = vadd.f32 %v5086_v48, %v592_v28  ;;  %v957_v21 = vpop.f32.mrb[1].mxu1 }
 0x11e   :  { %v1948_v31 = vmax.f32 %v1944_v13, %v1006_v26  ;;  %v1007_v32 = vmax.f32 %v601_v27, 0.0  ;;  %v4315_v24 = vpop.f32.mrb[2].mxu1 }
 0x11f   :  { %v1946_v33 = vmax.f32 %v1942_v15, %v1004_v29  ;;  %v1005_v34 = vmax.f32 %v593_v30, 0.0  ;;  %v960_v27 = vpop.f32.mrb[3].mxu1 }
 0x120   :  { %v1117_v35 = vpack.c.bf16 %v1007_v32, %v1006_v26  ;;  %v1949_v36 = vmax.f32 %v1945_v18, %v1007_v32  ;;  %v5212_v32 = vadd.f32 %v4314_v17, %v5086_v48 }
 0x121   :  { %v1116_v37 = vpack.c.bf16 %v1005_v34, %v1004_v29  ;;  %v1947_v38 = vmax.f32 %v1943_v20, %v1005_v34  ;;  %v4226_v39 = vpop.f32.mrb[36].mxu0 }
 0x122   :  { %v614_v40 = vadd.f32 %v4226_v39, %v5086_v48  ;;  %v605_v41 = vpop.f32.mrb[37].mxu0 }
 0x123   :  { %v606_v42 = vadd.f32 %v5086_v48, %v605_v41  ;;  %v4227_v43 = vpop.f32.mrb[38].mxu0  ;;  %4352 = vmatprep.mubr.msk.bf16.mxu1 %vm1180_vm2, %v1116_v37  ;;  %v5218_v37 = vadd.f32 %v4315_v24, %v5086_v48  ;;  %v5223_v41 = vadd.f32 %v5086_v48, %v960_v27 }
 0x124   :  { %v1010_v44 = vmax.f32 %v614_v40, 0.0  ;;  %v617_v45 = vadd.f32 %v4227_v43, %v5086_v48  ;;  %v608_v46 = vpop.f32.mrb[39].mxu0  ;;  %4353 = vmatmul.mubr.msk.bf16.gmra.mrb[36].mxu1 %vm1180_vm2, %v1117_v35  ;;  %v1098_v40 = vmax.f32 %v5212_v32, 0.0 }
 0x125   :  { %v1008_v47 = vmax.f32 %v606_v42, 0.0  ;;  %v609_v49 = vadd.f32 %v5086_v48, %v608_v46  ;;  %v4616_v46 = vld [vmem:[%s6402_s6] sm:$0xff]  }
 0x126   :  { %v1952_v50 = vmax.f32 %v1948_v31, %v1010_v44  ;;  %v1011_v51 = vmax.f32 %v617_v45, 0.0  ;;  %v1099_v45 = vmax.f32 %v5218_v37, 0.0  ;;  %4456 = vmatprep.subr.bf16.mxu1 %v4616_v46 }
 0x127   :  { %v1950_v52 = vmax.f32 %v1946_v33, %v1008_v47  ;;  %v1009_v53 = vmax.f32 %v609_v49, 0.0  ;;  %4457 = vmatpush3.bf16.msra.mxu1 %v4616_v46 }
 0x128   :  { %v1119_v54 = vpack.c.bf16 %v1011_v51, %v1010_v44  ;;  %v1953_v55 = vmax.f32 %v1949_v36, %v1011_v51  ;;  %v5215_v36 = vadd.f32 %v5086_v48, %v957_v21  ;;  %v1097_v51 = vmax.f32 %v5223_v41, 0.0 }
 0x129   :  { %v1118_v56 = vpack.c.bf16 %v1009_v53, %v1008_v47  ;;  %v1951_v57 = vmax.f32 %v1947_v38, %v1009_v53  ;;  %v4230_v58 = vpop.f32.mrb[40].mxu0 }
 0x12a   :  { %v630_v59 = vadd.f32 %v4230_v58, %v5086_v48  ;;  %v621_v60 = vpop.f32.mrb[41].mxu0  ;;  %v1096_v44 = vmax.f32 %v5215_v36, 0.0 }
 0x12b   :  { %v622_v61 = vadd.f32 %v5086_v48, %v621_v60  ;;  %v4231_v62 = vpop.f32.mrb[42].mxu0  ;;  %4356 = vmatprep.mubr.msk.bf16.mxu1 %vm1180_vm2, %v1118_v56 }
 0x12c   :  { %v1014_v63 = vmax.f32 %v630_v59, 0.0  ;;  %v633_v0 = vadd.f32 %v4231_v62, %v5086_v48  ;;  %v624_v1 = vpop.f32.mrb[43].mxu0  ;;  %4357 = vmatmul.mubr.msk.bf16.gmra.mrb[40].mxu1 %vm1180_vm2, %v1119_v54  ;;  %v5240_v54 = vpack.c.bf16 %v1099_v45, %v1098_v40 }
 0x12d   :  { %v1012_v2 = vmax.f32 %v622_v61, 0.0  ;;  %v625_v3 = vadd.f32 %v5086_v48, %v624_v1 }
 0x12e   :  { %v1956_v4 = vmax.f32 %v1952_v50, %v1014_v63  ;;  %v1015_v5 = vmax.f32 %v633_v0, 0.0 }
 0x12f   :  { %v1954_v6 = vmax.f32 %v1950_v52, %v1012_v2  ;;  %v1013_v7 = vmax.f32 %v625_v3, 0.0 }
 0x130   :  { %v1121_v8 = vpack.c.bf16 %v1015_v5, %v1014_v63  ;;  %v1957_v9 = vmax.f32 %v1953_v55, %v1015_v5 }
 0x131   :  { %v1120_v10 = vpack.c.bf16 %v1013_v7, %v1012_v2  ;;  %v1955_v11 = vmax.f32 %v1951_v57, %v1013_v7  ;;  %v4234_v12 = vpop.f32.mrb[44].mxu0  ;;  %v5246_v57 = vpack.c.bf16 %v1097_v51, %v1096_v44 }
 0x132   :  { %v646_v13 = vadd.f32 %v4234_v12, %v5086_v48  ;;  %v637_v14 = vpop.f32.mrb[45].mxu0 }
 0x133   :  { %v638_v15 = vadd.f32 %v5086_v48, %v637_v14  ;;  %v4235_v16 = vpop.f32.mrb[46].mxu0  ;;  %4360 = vmatprep.mubr.msk.bf16.mxu1 %vm1180_vm2, %v1120_v10 }
 0x134   :  { %v1018_v18 = vmax.f32 %v646_v13, 0.0  ;;  %v649_v19 = vadd.f32 %v4235_v16, %v5086_v48  ;;  %v640_v20 = vpop.f32.mrb[47].mxu0  ;;  %4361 = vmatmul.mubr.msk.bf16.gmra.mrb[44].mxu1 %vm1180_vm2, %v1121_v8 }
 0x135   :  { %v1016_v22 = vmax.f32 %v638_v15, 0.0  ;;  %v641_v23 = vadd.f32 %v5086_v48, %v640_v20 }
 0x136   :  { %v1960_v25 = vmax.f32 %v1956_v4, %v1018_v18  ;;  %v1019_v26 = vmax.f32 %v649_v19, 0.0 }
 0x137   :  { %v1958_v28 = vmax.f32 %v1954_v6, %v1016_v22  ;;  %v1017_v29 = vmax.f32 %v641_v23, 0.0 }
 0x138   :  { %v1123_v30 = vpack.c.bf16 %v1019_v26, %v1018_v18  ;;  %v1961_v31 = vmax.f32 %v1957_v9, %v1019_v26 }
 0x139   :  { %v1122_v33 = vpack.c.bf16 %v1017_v29, %v1016_v22  ;;  %v1959_v34 = vmax.f32 %v1955_v11, %v1017_v29  ;;  %v4238_v35 = vpop.f32.mrb[48].mxu0 }
 0x13a   :  { %v662_v38 = vadd.f32 %v4238_v35, %v5086_v48  ;;  %v653_v39 = vpop.f32.mrb[49].mxu0 }
 0x13b   :  { %v654_v42 = vadd.f32 %v5086_v48, %v653_v39  ;;  %v4239_v43 = vpop.f32.mrb[50].mxu0  ;;  %4364 = vmatprep.mubr.msk.bf16.mxu1 %vm1180_vm2, %v1122_v33 }
 0x13c   :  { %v1022_v47 = vmax.f32 %v662_v38, 0.0  ;;  %v665_v49 = vadd.f32 %v4239_v43, %v5086_v48  ;;  %v656_v50 = vpop.f32.mrb[51].mxu0  ;;  %4365 = vmatmul.mubr.msk.bf16.gmra.mrb[48].mxu1 %vm1180_vm2, %v1123_v30  ;;  %v4617_v30 = vld [vmem:[%s6399_s3] sm:$0xff]  }
 0x13d   :  { %v1020_v52 = vmax.f32 %v654_v42, 0.0  ;;  %v657_v53 = vadd.f32 %v5086_v48, %v656_v50  ;;  %4528 = vmatprep.subr.bf16.mxu0 %v4617_v30 }
 0x13e   :  { %v1964_v55 = vmax.f32 %v1960_v25, %v1022_v47  ;;  %v1023_v56 = vmax.f32 %v665_v49, 0.0 }
 0x13f   :  { %v1962_v58 = vmax.f32 %v1958_v28, %v1020_v52  ;;  %v1021_v59 = vmax.f32 %v657_v53, 0.0 }
 0x140   :  { %v1125_v60 = vpack.c.bf16 %v1023_v56, %v1022_v47  ;;  %v1965_v61 = vmax.f32 %v1961_v31, %v1023_v56 }
 0x141   :  { %v1124_v62 = vpack.c.bf16 %v1021_v59, %v1020_v52  ;;  %v1963_v63 = vmax.f32 %v1959_v34, %v1021_v59  ;;  %v4242_v0 = vpop.f32.mrb[52].mxu0 }
 0x142   :  { %v678_v1 = vadd.f32 %v4242_v0, %v5086_v48  ;;  %v669_v2 = vpop.f32.mrb[53].mxu0 }
 0x143   :  { %v670_v3 = vadd.f32 %v5086_v48, %v669_v2  ;;  %v4243_v4 = vpop.f32.mrb[54].mxu0  ;;  %4368 = vmatprep.mubr.msk.bf16.mxu1 %vm1180_vm2, %v1124_v62 }
 0x144   :  { %v1026_v5 = vmax.f32 %v678_v1, 0.0  ;;  %v681_v6 = vadd.f32 %v4243_v4, %v5086_v48  ;;  %v672_v7 = vpop.f32.mrb[55].mxu0  ;;  %4369 = vmatmul.mubr.msk.bf16.gmra.mrb[52].mxu1 %vm1180_vm2, %v1125_v60 }
 0x145   :  { %v1024_v8 = vmax.f32 %v670_v3, 0.0  ;;  %v673_v9 = vadd.f32 %v5086_v48, %v672_v7 }
 0x146   :  { %v1968_v10 = vmax.f32 %v1964_v55, %v1026_v5  ;;  %v1027_v11 = vmax.f32 %v681_v6, 0.0 }
 0x147   :  { %v1966_v12 = vmax.f32 %v1962_v58, %v1024_v8  ;;  %v1025_v13 = vmax.f32 %v673_v9, 0.0 }
 0x148   :  { %v1127_v14 = vpack.c.bf16 %v1027_v11, %v1026_v5  ;;  %v1969_v15 = vmax.f32 %v1965_v61, %v1027_v11  ;;  %v4618_v11 = vld [vmem:[%s6399_s3 + $0x8] sm:$0xff]  }
 0x149   :  { %v1126_v16 = vpack.c.bf16 %v1025_v13, %v1024_v8  ;;  %v1967_v17 = vmax.f32 %v1963_v63, %v1025_v13  ;;  %v4246_v18 = vpop.f32.mrb[56].mxu0 }
 0x14a   :  { %v694_v19 = vadd.f32 %v4246_v18, %v5086_v48  ;;  %v685_v20 = vpop.f32.mrb[57].mxu0 }
 0x14b   :  { %v686_v21 = vadd.f32 %v5086_v48, %v685_v20  ;;  %v4247_v22 = vpop.f32.mrb[58].mxu0  ;;  %4372 = vmatprep.mubr.msk.bf16.mxu1 %vm1180_vm2, %v1126_v16 }
 0x14c   :  { %v1030_v23 = vmax.f32 %v694_v19, 0.0  ;;  %v697_v24 = vadd.f32 %v4247_v22, %v5086_v48  ;;  %v688_v25 = vpop.f32.mrb[59].mxu0  ;;  %4373 = vmatmul.mubr.msk.bf16.gmra.mrb[56].mxu1 %vm1180_vm2, %v1127_v14 }
 0x14d   :  { %v1028_v26 = vmax.f32 %v686_v21, 0.0  ;;  %v689_v27 = vadd.f32 %v5086_v48, %v688_v25 }
 0x14e   :  { %v1972_v28 = vmax.f32 %v1968_v10, %v1030_v23  ;;  %v1031_v29 = vmax.f32 %v697_v24, 0.0 }
 0x14f   :  { %v1970_v31 = vmax.f32 %v1966_v12, %v1028_v26  ;;  %v1029_v33 = vmax.f32 %v689_v27, 0.0 }
 0x150   :  { %v1129_v34 = vpack.c.bf16 %v1031_v29, %v1030_v23  ;;  %v1973_v35 = vmax.f32 %v1969_v15, %v1031_v29 }
 0x151   :  { %v1128_v38 = vpack.c.bf16 %v1029_v33, %v1028_v26  ;;  %v1971_v39 = vmax.f32 %v1967_v17, %v1029_v33  ;;  %v4250_v42 = vpop.f32.mrb[60].mxu0 }
 0x152   :  { %v710_v43 = vadd.f32 %v4250_v42, %v5086_v48  ;;  %v701_v46 = vpop.f32.mrb[61].mxu0 }
 0x153   :  { %v702_v47 = vadd.f32 %v5086_v48, %v701_v46  ;;  %v4251_v49 = vpop.f32.mrb[62].mxu0  ;;  %4376 = vmatprep.mubr.msk.bf16.mxu1 %vm1180_vm2, %v1128_v38 }
 0x154   :  { %v1034_v50 = vmax.f32 %v710_v43, 0.0  ;;  %v713_v52 = vadd.f32 %v4251_v49, %v5086_v48  ;;  %v704_v53 = vpop.f32.mrb[63].mxu0  ;;  %4377 = vmatmul.mubr.msk.bf16.gmra.mrb[60].mxu1 %vm1180_vm2, %v1129_v34 }
 0x155   :  { %v1032_v55 = vmax.f32 %v702_v47, 0.0  ;;  %v705_v56 = vadd.f32 %v5086_v48, %v704_v53 }
 0x156   :  { %v1976_v58 = vmax.f32 %v1972_v28, %v1034_v50  ;;  %v1035_v59 = vmax.f32 %v713_v52, 0.0 }
 0x157   :  { %v1974_v60 = vmax.f32 %v1970_v31, %v1032_v55  ;;  %v1033_v61 = vmax.f32 %v705_v56, 0.0 }
 0x158   :  { %v1131_v62 = vpack.c.bf16 %v1035_v59, %v1034_v50  ;;  %v1977_v63 = vmax.f32 %v1973_v35, %v1035_v59 }
 0x159   :  { %v1130_v0 = vpack.c.bf16 %v1033_v61, %v1032_v55  ;;  %v1975_v1 = vmax.f32 %v1971_v39, %v1033_v61  ;;  %v4254_v2 = vpop.f32.mrb[64].mxu0 }
 0x15a   :  { %v1979_v3 = vpack.c.bf16 %v1977_v63, %v1976_v58  ;;  %v726_v4 = vadd.f32 %v4254_v2, %v5086_v48  ;;  %v717_v5 = vpop.f32.mrb[65].mxu0 }
 0x15b   :  { %v1978_v6 = vpack.c.bf16 %v1975_v1, %v1974_v60  ;;  %v718_v7 = vadd.f32 %v5086_v48, %v717_v5  ;;  %v4255_v8 = vpop.f32.mrb[66].mxu0  ;;  %4380 = vmatprep.mubr.msk.bf16.mxu1 %vm1180_vm2, %v1130_v0 }
 0x15c   :  { %v729_v9 = vadd.f32 %v4255_v8, %v5086_v48  ;;  %v720_v10 = vpop.f32.mrb[67].mxu0  ;;  %4381 = vmatmul.mubr.msk.bf16.gmra.mrb[64].mxu1 %vm1180_vm2, %v1131_v62  ;;  %v1038_v13 = vmax.f32 %v726_v4, 0.0 }
 0x15d   :  { %v721_v12 = vadd.f32 %v5086_v48, %v720_v10  ;;  %4452 = vmatprep.mubr.msk.bf16.mxu0 %vm1180_vm2, %v1978_v6  ;;  %v1036_v15 = vmax.f32 %v718_v7, 0.0 }
 0x15e   :  { %v1039_v14 = vmax.f32 %v729_v9, 0.0  ;;  %4453 = vmatmul.mubr.msk.bf16.vlgmr.msra.gmra.mrb[124].mxu0 %vm1180_vm2, %v1979_v3 }
 0x15f   :  { %v1037_v16 = vmax.f32 %v721_v12, 0.0  ;;  %4529 = vmatpush3.bf16.msra.mxu0 %v4617_v30 }
 0x160   :  { %v1133_v17 = vpack.c.bf16 %v1039_v14, %v1038_v13  ;;  %4530 = vmatprep.subr.bf16.mxu0 %v4618_v11 }
 0x161   :  { %v1132_v18 = vpack.c.bf16 %v1037_v16, %v1036_v15  ;;  %v4258_v19 = vpop.f32.mrb[68].mxu0 }
 0x162   :  { %v742_v20 = vadd.f32 %v4258_v19, %v5086_v48  ;;  %v733_v21 = vpop.f32.mrb[69].mxu0 }
 0x163   :  { %v734_v22 = vadd.f32 %v5086_v48, %v733_v21  ;;  %v4259_v23 = vpop.f32.mrb[70].mxu0  ;;  %4384 = vmatprep.mubr.msk.bf16.mxu1 %vm1180_vm2, %v1132_v18  ;;  %4531 = vmatpush3.bf16.msra.mxu0 %v4618_v11 }
 0x164   :  { %v1042_v24 = vmax.f32 %v742_v20, 0.0  ;;  %v745_v25 = vadd.f32 %v4259_v23, %v5086_v48  ;;  %v736_v26 = vpop.f32.mrb[71].mxu0  ;;  %4385 = vmatmul.mubr.msk.bf16.gmra.mrb[68].mxu1 %vm1180_vm2, %v1133_v17 }
 0x165   :  { %v1040_v27 = vmax.f32 %v734_v22, 0.0  ;;  %v737_v28 = vadd.f32 %v5086_v48, %v736_v26 }
 0x166   :  { %v2837_v29 = vmax.f32 %v1038_v13, %v1042_v24  ;;  %v1043_v30 = vmax.f32 %v745_v25, 0.0 }
 0x167   :  { %v2835_v31 = vmax.f32 %v1036_v15, %v1040_v27  ;;  %v1041_v33 = vmax.f32 %v737_v28, 0.0 }
 0x168   :  { %v1135_v34 = vpack.c.bf16 %v1043_v30, %v1042_v24  ;;  %v2838_v35 = vmax.f32 %v1039_v14, %v1043_v30 }
 0x169   :  { %v1134_v38 = vpack.c.bf16 %v1041_v33, %v1040_v27  ;;  %v2836_v39 = vmax.f32 %v1037_v16, %v1041_v33  ;;  %v4262_v42 = vpop.f32.mrb[72].mxu0  ;;  %v4619_v16 = vld [vmem:[%s6402_s6 + $0x8] sm:$0xff]  }
 0x16a   :  { %v758_v43 = vadd.f32 %v4262_v42, %v5086_v48  ;;  %v749_v46 = vpop.f32.mrb[73].mxu0  ;;  %4458 = vmatprep.subr.bf16.mxu1 %v4619_v16 }
 0x16b   :  { %v750_v47 = vadd.f32 %v5086_v48, %v749_v46  ;;  %v4263_v49 = vpop.f32.mrb[74].mxu0  ;;  %4388 = vmatprep.mubr.msk.bf16.mxu1 %vm1180_vm2, %v1134_v38  ;;  %4459 = vmatpush3.bf16.msra.mxu1 %v4619_v16 }
 0x16c   :  { %v1046_v50 = vmax.f32 %v758_v43, 0.0  ;;  %v761_v52 = vadd.f32 %v4263_v49, %v5086_v48  ;;  %v752_v53 = vpop.f32.mrb[75].mxu0  ;;  %4389 = vmatmul.mubr.msk.bf16.gmra.mrb[72].mxu1 %vm1180_vm2, %v1135_v34 }
 0x16d   :  { %v1044_v55 = vmax.f32 %v750_v47, 0.0  ;;  %v753_v56 = vadd.f32 %v5086_v48, %v752_v53 }
 0x16e   :  { %v2841_v58 = vmax.f32 %v2837_v29, %v1046_v50  ;;  %v1047_v59 = vmax.f32 %v761_v52, 0.0 }
 0x16f   :  { %v2839_v60 = vmax.f32 %v2835_v31, %v1044_v55  ;;  %v1045_v61 = vmax.f32 %v753_v56, 0.0 }
 0x170   :  { %v1137_v62 = vpack.c.bf16 %v1047_v59, %v1046_v50  ;;  %v2842_v63 = vmax.f32 %v2838_v35, %v1047_v59 }
 0x171   :  { %v1136_v0 = vpack.c.bf16 %v1045_v61, %v1044_v55  ;;  %v2840_v1 = vmax.f32 %v2836_v39, %v1045_v61  ;;  %v4266_v2 = vpop.f32.mrb[76].mxu0 }
 0x172   :  { %v774_v3 = vadd.f32 %v4266_v2, %v5086_v48  ;;  %v765_v4 = vpop.f32.mrb[77].mxu0 }
 0x173   :  { %v766_v5 = vadd.f32 %v5086_v48, %v765_v4  ;;  %v4267_v6 = vpop.f32.mrb[78].mxu0  ;;  %4392 = vmatprep.mubr.msk.bf16.mxu1 %vm1180_vm2, %v1136_v0 }
 0x174   :  { %v1050_v7 = vmax.f32 %v774_v3, 0.0  ;;  %v777_v8 = vadd.f32 %v4267_v6, %v5086_v48  ;;  %v768_v9 = vpop.f32.mrb[79].mxu0  ;;  %4393 = vmatmul.mubr.msk.bf16.gmra.mrb[76].mxu1 %vm1180_vm2, %v1137_v62 }
 0x175   :  { %v1048_v10 = vmax.f32 %v766_v5, 0.0  ;;  %v769_v11 = vadd.f32 %v5086_v48, %v768_v9  ;;  %v5316_v5 = vld [vmem:[%s6401_s2] ss:$0 sm:$0xff] }
 0x176   :  { %v2845_v12 = vmax.f32 %v2841_v58, %v1050_v7  ;;  %v1051_v13 = vmax.f32 %v777_v8, 0.0 }
 0x177   :  { %v2843_v14 = vmax.f32 %v2839_v60, %v1048_v10  ;;  %v1049_v15 = vmax.f32 %v769_v11, 0.0 }
 0x178   :  { %v1139_v17 = vpack.c.bf16 %v1051_v13, %v1050_v7  ;;  %v2846_v18 = vmax.f32 %v2842_v63, %v1051_v13 }
 0x179   :  { %v1138_v19 = vpack.c.bf16 %v1049_v15, %v1048_v10  ;;  %v2844_v20 = vmax.f32 %v2840_v1, %v1049_v15  ;;  %v4270_v21 = vpop.f32.mrb[80].mxu0 }
 0x17a   :  { %v790_v22 = vadd.f32 %v4270_v21, %v5086_v48  ;;  %v781_v23 = vpop.f32.mrb[81].mxu0 }
 0x17b   :  { %v782_v24 = vadd.f32 %v5086_v48, %v781_v23  ;;  %v4271_v25 = vpop.f32.mrb[82].mxu0  ;;  %4396 = vmatprep.mubr.msk.bf16.mxu1 %vm1180_vm2, %v1138_v19 }
 0x17c   :  { %v1054_v26 = vmax.f32 %v790_v22, 0.0  ;;  %v793_v27 = vadd.f32 %v4271_v25, %v5086_v48  ;;  %v784_v28 = vpop.f32.mrb[83].mxu0  ;;  %4397 = vmatmul.mubr.msk.bf16.gmra.mrb[80].mxu1 %vm1180_vm2, %v1139_v17 }
 0x17d   :  { %v1052_v29 = vmax.f32 %v782_v24, 0.0  ;;  %v785_v30 = vadd.f32 %v5086_v48, %v784_v28 }
 0x17e   :  { %v2849_v31 = vmax.f32 %v2845_v12, %v1054_v26  ;;  %v1055_v33 = vmax.f32 %v793_v27, 0.0 }
 0x17f   :  { %v2847_v34 = vmax.f32 %v2843_v14, %v1052_v29  ;;  %v1053_v35 = vmax.f32 %v785_v30, 0.0 }
 0x180   :  { %v1141_v38 = vpack.c.bf16 %v1055_v33, %v1054_v26  ;;  %v2850_v39 = vmax.f32 %v2846_v18, %v1055_v33 }
 0x181   :  { %v1140_v42 = vpack.c.bf16 %v1053_v35, %v1052_v29  ;;  %v2848_v43 = vmax.f32 %v2844_v20, %v1053_v35  ;;  %v4274_v46 = vpop.f32.mrb[84].mxu0 }
 0x182   :  { %v806_v47 = vadd.f32 %v4274_v46, %v5086_v48  ;;  %v797_v49 = vpop.f32.mrb[85].mxu0 }
 0x183   :  { %v798_v50 = vadd.f32 %v5086_v48, %v797_v49  ;;  %v4275_v52 = vpop.f32.mrb[86].mxu0  ;;  %4400 = vmatprep.mubr.msk.bf16.mxu1 %vm1180_vm2, %v1140_v42 }
 0x184   :  { %v1058_v53 = vmax.f32 %v806_v47, 0.0  ;;  %v809_v55 = vadd.f32 %v4275_v52, %v5086_v48  ;;  %v800_v56 = vpop.f32.mrb[87].mxu0  ;;  %4401 = vmatmul.mubr.msk.bf16.gmra.mrb[84].mxu1 %vm1180_vm2, %v1141_v38 }
 0x185   :  { %v1056_v58 = vmax.f32 %v798_v50, 0.0  ;;  %v801_v59 = vadd.f32 %v5086_v48, %v800_v56 }
 0x186   :  { %v2853_v60 = vmax.f32 %v2849_v31, %v1058_v53  ;;  %v1059_v61 = vmax.f32 %v809_v55, 0.0 }
 0x187   :  { %v2851_v62 = vmax.f32 %v2847_v34, %v1056_v58  ;;  %v1057_v63 = vmax.f32 %v801_v59, 0.0 }
 0x188   :  { %v1143_v0 = vpack.c.bf16 %v1059_v61, %v1058_v53  ;;  %v2854_v1 = vmax.f32 %v2850_v39, %v1059_v61 }
 0x189   :  { %v1142_v2 = vpack.c.bf16 %v1057_v63, %v1056_v58  ;;  %v2852_v3 = vmax.f32 %v2848_v43, %v1057_v63  ;;  %v4278_v4 = vpop.f32.mrb[88].mxu0 }
 0x18a   :  { %v822_v6 = vadd.f32 %v5316_v5, %v4278_v4  ;;  %v813_v7 = vpop.f32.mrb[89].mxu0 }
 0x18b   :  { %v814_v8 = vadd.f32 %v5316_v5, %v813_v7  ;;  %v4279_v48 = vpop.f32.mrb[90].mxu0  ;;  %4404 = vmatprep.mubr.msk.bf16.mxu1 %vm1180_vm2, %v1142_v2 }
 0x18c   :  { %v1062_v9 = vmax.f32 %v822_v6, 0.0  ;;  %v825_v10 = vadd.f32 %v5316_v5, %v4279_v48  ;;  %v816_v11 = vpop.f32.mrb[91].mxu0  ;;  %4405 = vmatmul.mubr.msk.bf16.gmra.mrb[88].mxu1 %vm1180_vm2, %v1143_v0 }
 0x18d   :  { %v1060_v12 = vmax.f32 %v814_v8, 0.0  ;;  %v817_v13 = vadd.f32 %v5316_v5, %v816_v11 }
 0x18e   :  { %v2857_v14 = vmax.f32 %v2853_v60, %v1062_v9  ;;  %v1063_v15 = vmax.f32 %v825_v10, 0.0 }
 0x18f   :  { %v2855_v16 = vmax.f32 %v2851_v62, %v1060_v12  ;;  %v1061_v17 = vmax.f32 %v817_v13, 0.0 }
 0x190   :  { %v1145_v18 = vpack.c.bf16 %v1063_v15, %v1062_v9  ;;  %v2858_v19 = vmax.f32 %v2854_v1, %v1063_v15 }
 0x191   :  { %v1144_v20 = vpack.c.bf16 %v1061_v17, %v1060_v12  ;;  %v2856_v21 = vmax.f32 %v2852_v3, %v1061_v17  ;;  %v4282_v22 = vpop.f32.mrb[92].mxu0 }
 0x192   :  { %v838_v23 = vadd.f32 %v5316_v5, %v4282_v22  ;;  %v829_v24 = vpop.f32.mrb[93].mxu0 }
 0x193   :  { %v830_v25 = vadd.f32 %v5316_v5, %v829_v24  ;;  %v4283_v26 = vpop.f32.mrb[94].mxu0  ;;  %4408 = vmatprep.mubr.msk.bf16.mxu1 %vm1180_vm2, %v1144_v20 }
 0x194   :  { %v1066_v27 = vmax.f32 %v838_v23, 0.0  ;;  %v841_v28 = vadd.f32 %v5316_v5, %v4283_v26  ;;  %v832_v29 = vpop.f32.mrb[95].mxu0  ;;  %4409 = vmatmul.mubr.msk.bf16.gmra.mrb[92].mxu1 %vm1180_vm2, %v1145_v18 }
 0x195   :  { %v1064_v30 = vmax.f32 %v830_v25, 0.0  ;;  %v833_v31 = vadd.f32 %v5316_v5, %v832_v29 }
 0x196   :  { %v2861_v33 = vmax.f32 %v2857_v14, %v1066_v27  ;;  %v1067_v34 = vmax.f32 %v841_v28, 0.0 }
 0x197   :  { %v2859_v35 = vmax.f32 %v2855_v16, %v1064_v30  ;;  %v1065_v38 = vmax.f32 %v833_v31, 0.0 }
 0x198   :  { %v1147_v39 = vpack.c.bf16 %v1067_v34, %v1066_v27  ;;  %v2862_v42 = vmax.f32 %v2858_v19, %v1067_v34 }
 0x199   :  { %v1146_v43 = vpack.c.bf16 %v1065_v38, %v1064_v30  ;;  %v2860_v46 = vmax.f32 %v2856_v21, %v1065_v38  ;;  %v4286_v47 = vpop.f32.mrb[96].mxu0 }
 0x19a   :  { %v854_v49 = vadd.f32 %v5316_v5, %v4286_v47  ;;  %v845_v50 = vpop.f32.mrb[97].mxu0 }
 0x19b   :  { %v846_v52 = vadd.f32 %v5316_v5, %v845_v50  ;;  %v4287_v53 = vpop.f32.mrb[98].mxu0  ;;  %4412 = vmatprep.mubr.msk.bf16.mxu1 %vm1180_vm2, %v1146_v43 }
 0x19c   :  { %v1070_v55 = vmax.f32 %v854_v49, 0.0  ;;  %v857_v56 = vadd.f32 %v5316_v5, %v4287_v53  ;;  %v848_v58 = vpop.f32.mrb[99].mxu0  ;;  %4413 = vmatmul.mubr.msk.bf16.gmra.mrb[96].mxu1 %vm1180_vm2, %v1147_v39 }
 0x19d   :  { %v1068_v59 = vmax.f32 %v846_v52, 0.0  ;;  %v849_v60 = vadd.f32 %v5316_v5, %v848_v58 }
 0x19e   :  { %v2865_v61 = vmax.f32 %v2861_v33, %v1070_v55  ;;  %v1071_v62 = vmax.f32 %v857_v56, 0.0 }
 0x19f   :  { %v2863_v63 = vmax.f32 %v2859_v35, %v1068_v59  ;;  %v1069_v0 = vmax.f32 %v849_v60, 0.0  ;;  %v4620_v60 = vld [vmem:[%s6402_s6 + $0x10] sm:$0xff]  }
 0x1a0   :  { %v1149_v1 = vpack.c.bf16 %v1071_v62, %v1070_v55  ;;  %v2866_v2 = vmax.f32 %v2862_v42, %v1071_v62  ;;  %4460 = vmatprep.subr.bf16.mxu1 %v4620_v60 }
 0x1a1   :  { %v1148_v3 = vpack.c.bf16 %v1069_v0, %v1068_v59  ;;  %v2864_v4 = vmax.f32 %v2860_v46, %v1069_v0  ;;  %v4290_v6 = vpop.f32.mrb[100].mxu0  ;;  %4461 = vmatpush3.bf16.msra.mxu1 %v4620_v60 }
 0x1a2   :  { %v870_v7 = vadd.f32 %v5316_v5, %v4290_v6  ;;  %v861_v8 = vpop.f32.mrb[101].mxu0 }
 0x1a3   :  { %v862_v48 = vadd.f32 %v5316_v5, %v861_v8  ;;  %v4291_v9 = vpop.f32.mrb[102].mxu0  ;;  %4416 = vmatprep.mubr.msk.bf16.mxu1 %vm1180_vm2, %v1148_v3  ;;  %v4621_v8 = vld [vmem:[%s6402_s6 + $0x18] sm:$0xff]  }
 0x1a4   :  { %v1074_v10 = vmax.f32 %v870_v7, 0.0  ;;  %v873_v11 = vadd.f32 %v5316_v5, %v4291_v9  ;;  %v864_v12 = vpop.f32.mrb[103].mxu0  ;;  %4417 = vmatmul.mubr.msk.bf16.gmra.mrb[100].mxu1 %vm1180_vm2, %v1149_v1  ;;  %4462 = vmatprep.subr.bf16.mxu1 %v4621_v8 }
 0x1a5   :  { %v1072_v13 = vmax.f32 %v862_v48, 0.0  ;;  %v865_v14 = vadd.f32 %v5316_v5, %v864_v12  ;;  %4463 = vmatpush3.bf16.msra.mxu1 %v4621_v8 }
 0x1a6   :  { %v2869_v15 = vmax.f32 %v2865_v61, %v1074_v10  ;;  %v1075_v16 = vmax.f32 %v873_v11, 0.0 }
 0x1a7   :  { %v2867_v17 = vmax.f32 %v2863_v63, %v1072_v13  ;;  %v1073_v18 = vmax.f32 %v865_v14, 0.0 }
 0x1a8   :  { %v1151_v19 = vpack.c.bf16 %v1075_v16, %v1074_v10  ;;  %v2870_v20 = vmax.f32 %v2866_v2, %v1075_v16 }
 0x1a9   :  { %v1150_v21 = vpack.c.bf16 %v1073_v18, %v1072_v13  ;;  %v2868_v22 = vmax.f32 %v2864_v4, %v1073_v18  ;;  %v4294_v23 = vpop.f32.mrb[104].mxu0 }
 0x1aa   :  { %v886_v24 = vadd.f32 %v5316_v5, %v4294_v23  ;;  %v877_v25 = vpop.f32.mrb[105].mxu0 }
 0x1ab   :  { %v878_v26 = vadd.f32 %v5316_v5, %v877_v25  ;;  %v4295_v27 = vpop.f32.mrb[106].mxu0  ;;  %4420 = vmatprep.mubr.msk.bf16.mxu1 %vm1180_vm2, %v1150_v21 }
 0x1ac   :  { %v1078_v28 = vmax.f32 %v886_v24, 0.0  ;;  %v889_v29 = vadd.f32 %v5316_v5, %v4295_v27  ;;  %v880_v30 = vpop.f32.mrb[107].mxu0  ;;  %4421 = vmatmul.mubr.msk.bf16.gmra.mrb[104].mxu1 %vm1180_vm2, %v1151_v19 }
 0x1ad   :  { %v1076_v31 = vmax.f32 %v878_v26, 0.0  ;;  %v881_v33 = vadd.f32 %v5316_v5, %v880_v30 }
 0x1ae   :  { %v2873_v34 = vmax.f32 %v2869_v15, %v1078_v28  ;;  %v1079_v35 = vmax.f32 %v889_v29, 0.0 }
 0x1af   :  { %v2871_v38 = vmax.f32 %v2867_v17, %v1076_v31  ;;  %v1077_v39 = vmax.f32 %v881_v33, 0.0 }
 0x1b0   :  { %v1153_v42 = vpack.c.bf16 %v1079_v35, %v1078_v28  ;;  %v2874_v43 = vmax.f32 %v2870_v20, %v1079_v35 }
 0x1b1   :  { %v1152_v46 = vpack.c.bf16 %v1077_v39, %v1076_v31  ;;  %v2872_v47 = vmax.f32 %v2868_v22, %v1077_v39  ;;  %v4298_v49 = vpop.f32.mrb[108].mxu0 }
 0x1b2   :  { %v902_v50 = vadd.f32 %v5316_v5, %v4298_v49  ;;  %v893_v52 = vpop.f32.mrb[109].mxu0 }
 0x1b3   :  { %v894_v53 = vadd.f32 %v5316_v5, %v893_v52  ;;  %v4299_v55 = vpop.f32.mrb[110].mxu0  ;;  %4424 = vmatprep.mubr.msk.bf16.mxu1 %vm1180_vm2, %v1152_v46 }
 0x1b4   :  { %v1082_v56 = vmax.f32 %v902_v50, 0.0  ;;  %v905_v58 = vadd.f32 %v5316_v5, %v4299_v55  ;;  %v896_v59 = vpop.f32.mrb[111].mxu0  ;;  %4425 = vmatmul.mubr.msk.bf16.gmra.mrb[108].mxu1 %vm1180_vm2, %v1153_v42 }
 0x1b5   :  { %v1080_v61 = vmax.f32 %v894_v53, 0.0  ;;  %v897_v62 = vadd.f32 %v5316_v5, %v896_v59 }
 0x1b6   :  { %v2877_v63 = vmax.f32 %v2873_v34, %v1082_v56  ;;  %v1083_v0 = vmax.f32 %v905_v58, 0.0 }
 0x1b7   :  { %v2875_v1 = vmax.f32 %v2871_v38, %v1080_v61  ;;  %v1081_v2 = vmax.f32 %v897_v62, 0.0  ;;  %v5357_v3 = vpop.f32.mrb[4].mxu1 }
 0x1b8   :  { %v1155_v4 = vpack.c.bf16 %v1083_v0, %v1082_v56  ;;  %v2878_v6 = vmax.f32 %v2874_v43, %v1083_v0  ;;  %v5359_v7 = vpop.f32.mrb[5].mxu1 }
 0x1b9   :  { %v1154_v48 = vpack.c.bf16 %v1081_v2, %v1080_v61  ;;  %v2876_v9 = vmax.f32 %v2872_v47, %v1081_v2  ;;  %v4302_v10 = vpop.f32.mrb[112].mxu0  ;;  %v5364_v11 = vpop.f32.mrb[6].mxu1 }
 0x1ba   :  { %v918_v12 = vadd.f32 %v5316_v5, %v4302_v10  ;;  %v909_v13 = vpop.f32.mrb[113].mxu0  ;;  %v5367_v14 = vpop.f32.mrb[7].mxu1 }
 0x1bb   :  { %v910_v15 = vadd.f32 %v5316_v5, %v909_v13  ;;  %v4303_v16 = vpop.f32.mrb[114].mxu0  ;;  %4428 = vmatprep.mubr.msk.bf16.mxu1 %vm1180_vm2, %v1154_v48 }
 0x1bc   :  { %v1086_v17 = vmax.f32 %v918_v12, 0.0  ;;  %v921_v18 = vadd.f32 %v5316_v5, %v4303_v16  ;;  %v912_v19 = vpop.f32.mrb[115].mxu0  ;;  %4429 = vmatmul.mubr.msk.bf16.gmra.mrb[112].mxu1 %vm1180_vm2, %v1155_v4 }
 0x1bd   :  { %v1084_v20 = vmax.f32 %v910_v15, 0.0  ;;  %v913_v21 = vadd.f32 %v5316_v5, %v912_v19 }
 0x1be   :  { %v2881_v22 = vmax.f32 %v2877_v63, %v1086_v17  ;;  %v1087_v23 = vmax.f32 %v921_v18, 0.0 }
 0x1bf   :  { %v2879_v24 = vmax.f32 %v2875_v1, %v1084_v20  ;;  %v1085_v25 = vmax.f32 %v913_v21, 0.0  ;;  %v5374_v26 = vpop.f32.mrb[8].mxu1 }
 0x1c0   :  { %v1157_v27 = vpack.c.bf16 %v1087_v23, %v1086_v17  ;;  %v2882_v28 = vmax.f32 %v2878_v6, %v1087_v23  ;;  %v5376_v29 = vpop.f32.mrb[9].mxu1 }
 0x1c1   :  { %v1156_v30 = vpack.c.bf16 %v1085_v25, %v1084_v20  ;;  %v2880_v31 = vmax.f32 %v2876_v9, %v1085_v25  ;;  %v4306_v33 = vpop.f32.mrb[116].mxu0  ;;  %v5378_v34 = vpop.f32.mrb[10].mxu1 }
 0x1c2   :  { %v934_v35 = vadd.f32 %v5316_v5, %v4306_v33  ;;  %v925_v38 = vpop.f32.mrb[117].mxu0  ;;  %v5381_v39 = vpop.f32.mrb[11].mxu1 }
 0x1c3   :  { %v926_v42 = vadd.f32 %v5316_v5, %v925_v38  ;;  %v4307_v43 = vpop.f32.mrb[118].mxu0  ;;  %4432 = vmatprep.mubr.msk.bf16.mxu1 %vm1180_vm2, %v1156_v30 }
 0x1c4   :  { %v1090_v46 = vmax.f32 %v934_v35, 0.0  ;;  %v937_v47 = vadd.f32 %v5316_v5, %v4307_v43  ;;  %v928_v49 = vpop.f32.mrb[119].mxu0  ;;  %4433 = vmatmul.mubr.msk.bf16.gmra.mrb[116].mxu1 %vm1180_vm2, %v1157_v27 }
 0x1c5   :  { %v1088_v50 = vmax.f32 %v926_v42, 0.0  ;;  %v929_v52 = vadd.f32 %v5316_v5, %v928_v49 }
 0x1c6   :  { %v2885_v53 = vmax.f32 %v2881_v22, %v1090_v46  ;;  %v1091_v55 = vmax.f32 %v937_v47, 0.0 }
 0x1c7   :  { %v2883_v56 = vmax.f32 %v2879_v24, %v1088_v50  ;;  %v1089_v58 = vmax.f32 %v929_v52, 0.0  ;;  %v5388_v59 = vpop.f32.mrb[12].mxu1 }
 0x1c8   :  { %v1159_v60 = vpack.c.bf16 %v1091_v55, %v1090_v46  ;;  %v2886_v61 = vmax.f32 %v2882_v28, %v1091_v55  ;;  %v5390_v62 = vpop.f32.mrb[13].mxu1 }
 0x1c9   :  { %v1158_v63 = vpack.c.bf16 %v1089_v58, %v1088_v50  ;;  %v2884_v0 = vmax.f32 %v2880_v31, %v1089_v58  ;;  %v4310_v1 = vpop.f32.mrb[120].mxu0  ;;  %v5392_v2 = vpop.f32.mrb[14].mxu1 }
 0x1ca   :  { %v950_v4 = vadd.f32 %v5316_v5, %v4310_v1  ;;  %v941_v6 = vpop.f32.mrb[121].mxu0  ;;  %v5395_v8 = vpop.f32.mrb[15].mxu1 }
 0x1cb   :  { %v942_v48 = vadd.f32 %v5316_v5, %v941_v6  ;;  %v4311_v9 = vpop.f32.mrb[122].mxu0  ;;  %4436 = vmatprep.mubr.msk.bf16.mxu1 %vm1180_vm2, %v1158_v63 }
 0x1cc   :  { %v1094_v10 = vmax.f32 %v950_v4, 0.0  ;;  %v953_v12 = vadd.f32 %v5316_v5, %v4311_v9  ;;  %v944_v13 = vpop.f32.mrb[123].mxu0  ;;  %4437 = vmatmul.mubr.msk.bf16.gmra.mrb[120].mxu1 %vm1180_vm2, %v1159_v60 }
 0x1cd   :  { %v1092_v15 = vmax.f32 %v942_v48, 0.0  ;;  %v945_v16 = vadd.f32 %v5316_v5, %v944_v13 }
 0x1ce   :  { %v2889_v17 = vmax.f32 %v2885_v53, %v1094_v10  ;;  %v1095_v18 = vmax.f32 %v953_v12, 0.0 }
 0x1cf   :  { %v2887_v19 = vmax.f32 %v2883_v56, %v1092_v15  ;;  %v1093_v20 = vmax.f32 %v945_v16, 0.0  ;;  %v5402_v21 = vpop.f32.mrb[16].mxu1 }
 0x1d0   :  { %v2893_v22 = vmax.f32 %v2889_v17, %v1098_v40  ;;  %v1161_v23 = vpack.c.bf16 %v1095_v18, %v1094_v10  ;;  %v2890_v24 = vmax.f32 %v2886_v61, %v1095_v18  ;;  %v5406_v25 = vpop.f32.mrb[17].mxu1 }
 0x1d1   :  { %v2891_v27 = vmax.f32 %v2887_v19, %v1096_v44  ;;  %v1160_v28 = vpack.c.bf16 %v1093_v20, %v1092_v15  ;;  %v2888_v30 = vmax.f32 %v2884_v0, %v1093_v20  ;;  %v5410_v31 = vpop.f32.mrb[18].mxu1 }
 0x1d2   :  { %v2894_v5 = vmax.f32 %v2890_v24, %v1099_v45  ;;  %v5414_v33 = vpop.f32.mrb[19].mxu1 }
 0x1d3   :  { %v2892_v32 = vmax.f32 %v2888_v30, %v1097_v51  ;;  %4440 = vmatprep.mubr.msk.bf16.mxu1 %vm1180_vm2, %v1160_v28  ;;  %v4622_v28 = vld [vmem:[%s6402_s6] sm:$0xff]  }
 0x1d4   :  { %v2896_v40 = vpack.c.bf16 %v2894_v5, %v2893_v22  ;;  %4441 = vmatmul.mubr.msk.bf16.gmra.mrb[124].mxu1 %vm1180_vm2, %v1161_v23  ;;  %4536 = vmatprep.subr.bf16.mxu0 %v4622_v28 }
 0x1d5   :  { %v2895_v35 = vpack.c.bf16 %v2892_v32, %v2891_v27  ;;  %4444 = vmatprep.mubr.msk.bf16.mxu1 %vm1180_vm2, %v5246_v57  ;;  %v4623_v32 = vld [vmem:[%s6402_s6 + $0x8] sm:$0xff]  }
 0x1d7   :  { %v5422_v36 = vpop.f32.mrb[20].mxu1  ;;  %4532 = vmatprep.mubr.msk.bf16.mxu0 %vm1180_vm2, %v2895_v35 }
 0x1d8   :  { %v5425_v37 = vpop.f32.mrb[21].mxu1  ;;  %4533 = vmatmul.mubr.msk.bf16.vlgmr.msra.gmra.mrb[128].mxu0 %vm1180_vm2, %v2896_v40 }
 0x1d9   :  { %v5428_v44 = vpop.f32.mrb[22].mxu1  ;;  %4537 = vmatpush3.bf16.msra.mxu0 %v4622_v28 }
 0x1da   :  { %v5430_v41 = vpop.f32.mrb[23].mxu1  ;;  %4538 = vmatprep.subr.bf16.mxu0 %v4623_v32 }
 0x1dc   :  { %4445 = vmatmul.mubr.msk.bf16.gmra.mrb[128].mxu1 %vm1180_vm2, %v5240_v54 }
 0x1dd   :  { %4539 = vmatpush3.bf16.msra.mxu0 %v4623_v32 }
 0x1df   :  { %v5434_v45 = vpop.f32.mrb[24].mxu1 }
 0x1e0   :  { %v5436_v51 = vpop.f32.mrb[25].mxu1 }
 0x1e1   :  { %v5438_v57 = vpop.f32.mrb[26].mxu1 }
 0x1e2   :  { %v5440_v38 = vpop.f32.mrb[27].mxu1 }
 0x1e7   :  { %v5442_v42 = vpop.f32.mrb[28].mxu1 }
 0x1e8   :  { %v5444_v43 = vpop.f32.mrb[29].mxu1 }
 0x1e9   :  { %v5446_v46 = vpop.f32.mrb[30].mxu1 }
 0x1ea   :  { %v5448_v47 = vpop.f32.mrb[31].mxu1 }
 0x1ef   :  { %v5450_v49 = vpop.f32.mrb[32].mxu1 }
 0x1f0   :  { %v5452_v50 = vpop.f32.mrb[33].mxu1 }
 0x1f1   :  { %v5454_v54 = vpop.f32.mrb[34].mxu1 }
 0x1f2   :  { %v5456_v52 = vpop.f32.mrb[35].mxu1 }
 0x1f7   :  { %v5458_v53 = vpop.f32.mrb[36].mxu1 }
 0x1f8   :  { %v5460_v55 = vpop.f32.mrb[37].mxu1 }
 0x1f9   :  { %v5462_v56 = vpop.f32.mrb[38].mxu1 }
 0x1fa   :  { %v5464_v58 = vpop.f32.mrb[39].mxu1 }
 0x1ff   :  { %v5466_v60 = vpop.f32.mrb[40].mxu1 }
 0x200   :  { %v5468_v61 = vpop.f32.mrb[41].mxu1 }
 0x201   :  { %v5470_v63 = vpop.f32.mrb[42].mxu1 }
 0x202   :  { %v5472_v0 = vpop.f32.mrb[43].mxu1 }
 0x207   :  { %v5474_v1 = vpop.f32.mrb[44].mxu1 }
 0x208   :  { %v5476_v4 = vpop.f32.mrb[45].mxu1 }
 0x209   :  { %v5478_v6 = vpop.f32.mrb[46].mxu1 }
 0x20a   :  { %v5480_v48 = vpop.f32.mrb[47].mxu1 }
 0x20f   :  { %v5482_v9 = vpop.f32.mrb[48].mxu1 }
 0x210   :  { %6406 = vst [vmem:[#allocation2_spill] sm:$0xff] %v5482_v9  ;;  %v5484_v10 = vpop.f32.mrb[49].mxu1 }
 0x211   :  { %v5486_v12 = vpop.f32.mrb[50].mxu1 }
 0x212   :  { %6407 = vst [vmem:[#allocation3_spill] sm:$0xff] %v5486_v12  ;;  %v5488_v13 = vpop.f32.mrb[51].mxu1 }
 0x217   :  { %v5490_v15 = vpop.f32.mrb[52].mxu1 }
 0x218   :  { %6408 = vst [vmem:[#allocation4_spill] sm:$0xff] %v5490_v15  ;;  %v5492_v16 = vpop.f32.mrb[53].mxu1 }
 0x219   :  { %6409 = vst [vmem:[#allocation5_spill] sm:$0xff] %v5492_v16  ;;  %v5494_v17 = vpop.f32.mrb[54].mxu1 }
 0x21a   :  { %6410 = vst [vmem:[#allocation6_spill] sm:$0xff] %v5494_v17  ;;  %v5496_v18 = vpop.f32.mrb[55].mxu1 }
 0x21b   :  { %6411 = vst [vmem:[#allocation7_spill] sm:$0xff] %v5496_v18 }
 0x21f   :  { %v5498_v19 = vpop.f32.mrb[56].mxu1 }
 0x220   :  { %6412 = vst [vmem:[#allocation8_spill] sm:$0xff] %v5498_v19  ;;  %v5500_v20 = vpop.f32.mrb[57].mxu1 }
 0x221   :  { %6413 = vst [vmem:[#allocation9_spill] sm:$0xff] %v5500_v20  ;;  %v5502_v22 = vpop.f32.mrb[58].mxu1 }
 0x222   :  { %6414 = vst [vmem:[#allocation10_spill] sm:$0xff] %v5502_v22  ;;  %v5504_v23 = vpop.f32.mrb[59].mxu1 }
 0x223   :  { %6415 = vst [vmem:[#allocation11_spill] sm:$0xff] %v5504_v23 }
 0x227   :  { %v5506_v24 = vpop.f32.mrb[60].mxu1 }
 0x228   :  { %6416 = vst [vmem:[#allocation12_spill] sm:$0xff] %v5506_v24  ;;  %v5508_v27 = vpop.f32.mrb[61].mxu1 }
 0x229   :  { %6417 = vst [vmem:[#allocation13_spill] sm:$0xff] %v5508_v27  ;;  %v5513_v30 = vpop.f32.mrb[62].mxu1 }
 0x22a   :  { %6418 = vst [vmem:[#allocation14_spill] sm:$0xff] %v5513_v30  ;;  %v5515_v5 = vpop.f32.mrb[63].mxu1  ;;  %v5531_v30 = vld [vmem:[%s6403_s5] ss:$0 sm:$0xff] }
 0x22b   :  { %6419 = vst [vmem:[#allocation15_spill] sm:$0xff] %v5515_v5 }
 0x22f   :  { %v5520_v40 = vpop.f32.mrb[64].mxu1 }
 0x230   :  { %6420 = vst [vmem:[#allocation16_spill] sm:$0xff] %v5520_v40  ;;  %v5522_v35 = vpop.f32.mrb[65].mxu1 }
 0x231   :  { %6421 = vst [vmem:[#allocation17_spill] sm:$0xff] %v5522_v35  ;;  %v5524_v24 = vpop.f32.mrb[66].mxu1  ;;  %v5526_v27 = vpop.f32.mrb[124].mxu0 }
 0x232   :  { %6422 = vst [vmem:[#allocation18_spill] sm:$0xff] %v5524_v24  ;;  %v5533_v28 = vpop.f32.mrb[67].mxu1  ;;  %v5535_v5 = vpop.f32.mrb[125].mxu0  ;;  %v2053_v40 = vadd.f32 %v5526_v27, %v5357_v3  ;;  %v2057_v32 = vadd.f32 %v5526_v27, %v5374_v26  ;;  %v2061_v24 = vadd.f32 %v5526_v27, %v5388_v59  ;;  %v2065_v35 = vadd.f32 %v5526_v27, %v5402_v21 }
 0x233   :  { %6423 = vst [vmem:[#allocation19_spill] sm:$0xff] %v5533_v28  ;;  %v5545_v22 = vpop.f32.mrb[126].mxu0  ;;  %v2051_v28 = vadd.f32 %v5535_v5, %v5359_v7  ;;  %v2055_v19 = vadd.f32 %v5535_v5, %v5376_v29  ;;  %v2059_v3 = vadd.f32 %v5535_v5, %v5390_v62  ;;  %v2063_v26 = vadd.f32 %v5535_v5, %v5406_v25 }
 0x234   :  { %v5555_v23 = vpop.f32.mrb[127].mxu0  ;;  %v2054_v59 = vadd.f32 %v5545_v22, %v5364_v11  ;;  %v2124_v21 = vadd.f32 %v5531_v30, %v2053_v40  ;;  %v2058_v20 = vadd.f32 %v5545_v22, %v5378_v34  ;;  %v2128_v7 = vadd.f32 %v5531_v30, %v2057_v32  ;;  %v4624_v11 = vld [vmem:[%s6402_s6 + $0x10] sm:$0xff]  }
 0x235   :  { %v2052_v29 = vadd.f32 %v5555_v23, %v5367_v14  ;;  %v2122_v62 = vadd.f32 %v5531_v30, %v2051_v28  ;;  %v2056_v25 = vadd.f32 %v5555_v23, %v5381_v39  ;;  %v2126_v17 = vadd.f32 %v5531_v30, %v2055_v19  ;;  %4540 = vmatprep.subr.bf16.mxu0 %v4624_v11 }
 0x236   :  { %v2125_v40 = vadd.f32 %v5531_v30, %v2054_v59  ;;  %v2188_v15 = vmax.f32 %v2124_v21, 0.0  ;;  %v2129_v34 = vadd.f32 %v5531_v30, %v2058_v20  ;;  %v2192_v32 = vmax.f32 %v2128_v7, 0.0  ;;  %4541 = vmatpush3.bf16.msra.mxu0 %v4624_v11 }
 0x237   :  { %v5574_v18 = vpop.f32.mrb[68].mxu1  ;;  %v2123_v14 = vadd.f32 %v5531_v30, %v2052_v29  ;;  %v2186_v28 = vmax.f32 %v2122_v62, 0.0  ;;  %v2127_v16 = vadd.f32 %v5531_v30, %v2056_v25  ;;  %v2190_v39 = vmax.f32 %v2126_v17, 0.0  ;;  %v4625_v62 = vld [vmem:[%s6402_s6 + $0x18] sm:$0xff]  }
 0x238   :  { %6424 = vst [vmem:[#allocation20_spill] sm:$0xff] %v5574_v18  ;;  %v5578_v19 = vpop.f32.mrb[69].mxu1  ;;  %v2189_v12 = vmax.f32 %v2125_v40, 0.0  ;;  %v2193_v9 = vmax.f32 %v2129_v34, 0.0  ;;  %v2060_v59 = vadd.f32 %v5555_v23, %v5395_v8  ;;  %v2130_v21 = vadd.f32 %v5531_v30, %v2059_v3  ;;  %4542 = vmatprep.subr.bf16.mxu0 %v4625_v62 }
 0x239   :  { %6425 = vst [vmem:[#allocation21_spill] sm:$0xff] %v5578_v19  ;;  %v5583_v20 = vpop.f32.mrb[70].mxu1  ;;  %v2187_v7 = vmax.f32 %v2123_v14, 0.0  ;;  %v2191_v18 = vmax.f32 %v2127_v16, 0.0  ;;  %v2062_v29 = vadd.f32 %v5545_v22, %v5392_v2  ;;  %v2132_v17 = vadd.f32 %v5531_v30, %v2061_v24 }
 0x23a   :  { %6426 = vst [vmem:[#allocation22_spill] sm:$0xff] %v5583_v20  ;;  %v5591_v25 = vpop.f32.mrb[71].mxu1  ;;  %v2251_v40 = vpack.c.bf16 %v2189_v12, %v2188_v15  ;;  %v2253_v8 = vpack.c.bf16 %v2193_v9, %v2192_v32  ;;  %v2131_v3 = vadd.f32 %v5531_v30, %v2060_v59  ;;  %v2194_v11 = vmax.f32 %v2130_v21, 0.0  ;;  %4543 = vmatpush3.bf16.msra.mxu0 %v4625_v62 }
 0x23b   :  { %6427 = vst [vmem:[#allocation23_spill] sm:$0xff] %v5591_v25  ;;  %v2250_v34 = vpack.c.bf16 %v2187_v7, %v2186_v28  ;;  %v2252_v20 = vpack.c.bf16 %v2191_v18, %v2190_v39  ;;  %v2133_v16 = vadd.f32 %v5531_v30, %v2062_v29  ;;  %v2196_v14 = vmax.f32 %v2132_v17, 0.0 }
 0x23c   :  { %v2195_v2 = vmax.f32 %v2131_v3, 0.0  ;;  %v2064_v24 = vadd.f32 %v5555_v23, %v5414_v33  ;;  %v2134_v19 = vadd.f32 %v5531_v30, %v2063_v26  ;;  %v2066_v25 = vadd.f32 %v5545_v22, %v5410_v31 }
 0x23d   :  { %4464 = vmatprep.mubr.msk.bf16.mxu1 %vm2321_vm3, %v2250_v34  ;;  %v2197_v9 = vmax.f32 %v2133_v16, 0.0  ;;  %v2136_v12 = vadd.f32 %v5531_v30, %v2065_v35  ;;  %v2067_v15 = vadd.f32 %v5535_v5, %v5425_v37  ;;  %v2068_v18 = vadd.f32 %v5555_v23, %v5430_v41 }
 0x23e   :  { %4465 = vmatmul.mubr.msk.bf16.vlgmr.msra.gmra.mrb[132].mxu1 %vm2321_vm3, %v2251_v40  ;;  %v2254_v33 = vpack.c.bf16 %v2195_v2, %v2194_v11  ;;  %v2135_v26 = vadd.f32 %v5531_v30, %v2064_v24  ;;  %v2198_v32 = vmax.f32 %v2134_v19, 0.0  ;;  %v2137_v31 = vadd.f32 %v5531_v30, %v2066_v25 }
 0x23f   :  { %v5609_v28 = vpop.f32.mrb[72].mxu1  ;;  %4468 = vmatprep.mubr.msk.bf16.mxu1 %vm2321_vm3, %v2252_v20  ;;  %v5612_v39 = vpack.c.bf16 %v2197_v9, %v2196_v14  ;;  %v2200_v35 = vmax.f32 %v2136_v12, 0.0  ;;  %v2138_v37 = vadd.f32 %v5531_v30, %v2067_v15  ;;  %v2139_v59 = vadd.f32 %v5531_v30, %v2068_v18 }
 0x240   :  { %v5616_v41 = vpop.f32.mrb[73].mxu1  ;;  %v2199_v21 = vmax.f32 %v2135_v26, 0.0  ;;  %v2201_v7 = vmax.f32 %v2137_v31, 0.0  ;;  %v2069_v19 = vadd.f32 %v5526_v27, %v5422_v36  ;;  %v2070_v29 = vadd.f32 %v5545_v22, %v5428_v44 }
 0x241   :  { %v5622_v17 = vpop.f32.mrb[74].mxu1  ;;  %v2202_v20 = vmax.f32 %v2138_v37, 0.0  ;;  %v2203_v62 = vmax.f32 %v2139_v59, 0.0  ;;  %v2071_v25 = vadd.f32 %v5535_v5, %v5436_v51  ;;  %v2072_v40 = vadd.f32 %v5555_v23, %v5440_v38 }
 0x242   :  { %v5628_v3 = vpop.f32.mrb[75].mxu1  ;;  %v2256_v11 = vpack.c.bf16 %v2199_v21, %v2198_v32  ;;  %v5630_v34 = vpack.c.bf16 %v2201_v7, %v2200_v35  ;;  %v2140_v36 = vadd.f32 %v5531_v30, %v2069_v19  ;;  %v2141_v16 = vadd.f32 %v5531_v30, %v2070_v29 }
 0x243   :  { %v5634_v44 = vpack.c.bf16 %v2203_v62, %v2202_v20  ;;  %v2142_v14 = vadd.f32 %v5531_v30, %v2071_v25  ;;  %v2143_v2 = vadd.f32 %v5531_v30, %v2072_v40  ;;  %v2073_v51 = vadd.f32 %v5526_v27, %v5434_v45 }
 0x244   :  { %v2204_v24 = vmax.f32 %v2140_v36, 0.0  ;;  %v2205_v38 = vmax.f32 %v2141_v16, 0.0  ;;  %v2074_v9 = vadd.f32 %v5545_v22, %v5438_v57  ;;  %v2075_v12 = vadd.f32 %v5535_v5, %v5444_v43 }
 0x245   :  { %v2206_v15 = vmax.f32 %v2142_v14, 0.0  ;;  %v2207_v18 = vmax.f32 %v2143_v2, 0.0  ;;  %v2144_v26 = vadd.f32 %v5531_v30, %v2073_v51  ;;  %v2076_v32 = vadd.f32 %v5555_v23, %v5448_v47 }
 0x246   :  { %4469 = vmatmul.mubr.msk.bf16.gmra.mrb[136].mxu1 %vm2321_vm3, %v2253_v8  ;;  %v5648_v31 = vpack.c.bf16 %v2205_v38, %v2204_v24  ;;  %v2145_v45 = vadd.f32 %v5531_v30, %v2074_v9  ;;  %v2146_v35 = vadd.f32 %v5531_v30, %v2075_v12  ;;  %v2077_v57 = vadd.f32 %v5526_v27, %v5442_v42 }
 0x247   :  { %v5654_v37 = vpop.f32.mrb[76].mxu1  ;;  %4472 = vmatprep.mubr.msk.bf16.mxu1 %vm2321_vm3, %v2254_v33  ;;  %v5657_v43 = vpack.c.bf16 %v2207_v18, %v2206_v15  ;;  %v2208_v59 = vmax.f32 %v2144_v26, 0.0  ;;  %v2147_v47 = vadd.f32 %v5531_v30, %v2076_v32  ;;  %v2078_v8 = vadd.f32 %v5545_v22, %v5446_v46 }
 0x248   :  { %v5662_v21 = vpop.f32.mrb[77].mxu1  ;;  %v2209_v7 = vmax.f32 %v2145_v45, 0.0  ;;  %v2210_v19 = vmax.f32 %v2146_v35, 0.0  ;;  %v2148_v29 = vadd.f32 %v5531_v30, %v2077_v57  ;;  %v2079_v42 = vadd.f32 %v5535_v5, %v5452_v50 }
 0x249   :  { %v5667_v20 = vpop.f32.mrb[78].mxu1  ;;  %v2211_v33 = vmax.f32 %v2147_v47, 0.0  ;;  %v2149_v62 = vadd.f32 %v5531_v30, %v2078_v8  ;;  %v2080_v25 = vadd.f32 %v5555_v23, %v5456_v52  ;;  %v2081_v46 = vadd.f32 %v5526_v27, %v5450_v49 }
 0x24a   :  { %v5674_v40 = vpop.f32.mrb[79].mxu1  ;;  %v5676_v36 = vpack.c.bf16 %v2209_v7, %v2208_v59  ;;  %v2212_v16 = vmax.f32 %v2148_v29, 0.0  ;;  %v2150_v14 = vadd.f32 %v5531_v30, %v2079_v42  ;;  %v2082_v50 = vadd.f32 %v5545_v22, %v5454_v54 }
 0x24b   :  { %v5681_v2 = vpack.c.bf16 %v2211_v33, %v2210_v19  ;;  %v2213_v51 = vmax.f32 %v2149_v62, 0.0  ;;  %v2151_v24 = vadd.f32 %v5531_v30, %v2080_v25  ;;  %v2152_v52 = vadd.f32 %v5531_v30, %v2081_v46 }
 0x24c   :  { %v2214_v38 = vmax.f32 %v2150_v14, 0.0  ;;  %v2153_v49 = vadd.f32 %v5531_v30, %v2082_v50  ;;  %v2083_v9 = vadd.f32 %v5535_v5, %v5460_v55  ;;  %v2084_v12 = vadd.f32 %v5555_v23, %v5464_v58 }
 0x24d   :  { %v5690_v15 = vpack.c.bf16 %v2213_v51, %v2212_v16  ;;  %v2215_v18 = vmax.f32 %v2151_v24, 0.0  ;;  %v2216_v54 = vmax.f32 %v2152_v52, 0.0  ;;  %v2085_v26 = vadd.f32 %v5526_v27, %v5458_v53 }
 0x24e   :  { %4473 = vmatmul.mubr.msk.bf16.gmra.mrb[140].mxu1 %vm2321_vm3, %v5612_v39  ;;  %v2217_v32 = vmax.f32 %v2153_v49, 0.0  ;;  %v2154_v45 = vadd.f32 %v5531_v30, %v2083_v9  ;;  %v2155_v35 = vadd.f32 %v5531_v30, %v2084_v12  ;;  %v2086_v55 = vadd.f32 %v5545_v22, %v5462_v56 }
 0x24f   :  { %v5700_v57 = vpop.f32.mrb[80].mxu1  ;;  %4476 = vmatprep.mubr.msk.bf16.mxu1 %vm2321_vm3, %v2256_v11  ;;  %v5703_v58 = vpack.c.bf16 %v2215_v18, %v2214_v38  ;;  %v2156_v59 = vadd.f32 %v5531_v30, %v2085_v26  ;;  %v2087_v53 = vadd.f32 %v5535_v5, %v5468_v61  ;;  %v2088_v39 = vadd.f32 %v5555_v23, %v5472_v0 }
 0x250   :  { %v5710_v47 = vpop.f32.mrb[81].mxu1  ;;  %v5712_v8 = vpack.c.bf16 %v2217_v32, %v2216_v54  ;;  %v2218_v7 = vmax.f32 %v2154_v45, 0.0  ;;  %v2219_v56 = vmax.f32 %v2155_v35, 0.0  ;;  %v2157_v19 = vadd.f32 %v5531_v30, %v2086_v55  ;;  %v6428_v35 = vld [vmem:[#allocation2_spill] sm:$0xff] }
 0x251   :  { %v5715_v29 = vpop.f32.mrb[82].mxu1  ;;  %v2220_v11 = vmax.f32 %v2156_v59, 0.0  ;;  %v2158_v42 = vadd.f32 %v5531_v30, %v2087_v53  ;;  %v2159_v33 = vadd.f32 %v5531_v30, %v2088_v39  ;;  %v2089_v61 = vadd.f32 %v5526_v27, %v5466_v60  ;;  %v6429_v39 = vld [vmem:[#allocation3_spill] sm:$0xff] }
 0x252   :  { %v5721_v62 = vpop.f32.mrb[83].mxu1  ;;  %v5723_v0 = vpack.c.bf16 %v2219_v56, %v2218_v7  ;;  %v2221_v25 = vmax.f32 %v2157_v19, 0.0  ;;  %v2090_v46 = vadd.f32 %v5545_v22, %v5470_v63  ;;  %v2091_v16 = vadd.f32 %v5535_v5, %v5476_v4 }
 0x253   :  { %v2222_v14 = vmax.f32 %v2158_v42, 0.0  ;;  %v2223_v50 = vmax.f32 %v2159_v33, 0.0  ;;  %v2160_v51 = vadd.f32 %v5531_v30, %v2089_v61  ;;  %v2092_v24 = vadd.f32 %v5555_v23, %v5480_v48 }
 0x254   :  { %v5732_v52 = vpack.c.bf16 %v2221_v25, %v2220_v11  ;;  %v2161_v60 = vadd.f32 %v5531_v30, %v2090_v46  ;;  %v2162_v38 = vadd.f32 %v5531_v30, %v2091_v16  ;;  %v2093_v49 = vadd.f32 %v5526_v27, %v5474_v1  ;;  %v6430_v25 = vld [vmem:[#allocation5_spill] sm:$0xff]  ;;  %v6431_v16 = vld [vmem:[#allocation7_spill] sm:$0xff] }
 0x255   :  { %v5738_v63 = vpack.c.bf16 %v2223_v50, %v2222_v14  ;;  %v2224_v9 = vmax.f32 %v2160_v51, 0.0  ;;  %v2163_v4 = vadd.f32 %v5531_v30, %v2092_v24  ;;  %v2094_v12 = vadd.f32 %v5545_v22, %v5478_v6 }
 0x256   :  { %4477 = vmatmul.mubr.msk.bf16.gmra.mrb[144].mxu1 %vm2321_vm3, %v5630_v34  ;;  %v2225_v48 = vmax.f32 %v2161_v60, 0.0  ;;  %v2226_v18 = vmax.f32 %v2162_v38, 0.0  ;;  %v2164_v54 = vadd.f32 %v5531_v30, %v2093_v49  ;;  %v2095_v26 = vadd.f32 %v5535_v5, %v5484_v10  ;;  %v6432_v60 = vld [vmem:[#allocation4_spill] sm:$0xff] }
 0x257   :  { %v5748_v32 = vpop.f32.mrb[84].mxu1  ;;  %4480 = vmatprep.mubr.msk.bf16.mxu1 %vm2321_vm3, %v5634_v44  ;;  %v2227_v1 = vmax.f32 %v2163_v4, 0.0  ;;  %v2165_v45 = vadd.f32 %v5531_v30, %v2094_v12  ;;  %v2096_v6 = vadd.f32 %v5555_v23, %v5488_v13  ;;  %v2097_v34 = vadd.f32 %v5526_v27, %v6428_v35  ;;  %v6433_v12 = vld [vmem:[#allocation6_spill] sm:$0xff] }
 0x258   :  { %v5757_v55 = vpop.f32.mrb[85].mxu1  ;;  %v5759_v59 = vpack.c.bf16 %v2225_v48, %v2224_v9  ;;  %v2228_v53 = vmax.f32 %v2164_v54, 0.0  ;;  %v2166_v10 = vadd.f32 %v5531_v30, %v2095_v26  ;;  %v2098_v7 = vadd.f32 %v5545_v22, %v6429_v39  ;;  %v6434_v26 = vld [vmem:[#allocation9_spill] sm:$0xff] }
 0x259   :  { %v5764_v44 = vpop.f32.mrb[86].mxu1  ;;  %v5766_v56 = vpack.c.bf16 %v2227_v1, %v2226_v18  ;;  %v2229_v19 = vmax.f32 %v2165_v45, 0.0  ;;  %v2167_v13 = vadd.f32 %v5531_v30, %v2096_v6  ;;  %v2168_v11 = vadd.f32 %v5531_v30, %v2097_v34  ;;  %v6435_v45 = vld [vmem:[#allocation11_spill] sm:$0xff] }
 0x25a   :  { %v5770_v42 = vpop.f32.mrb[87].mxu1  ;;  %v2230_v33 = vmax.f32 %v2166_v10, 0.0  ;;  %v2169_v61 = vadd.f32 %v5531_v30, %v2098_v7  ;;  %v2099_v46 = vadd.f32 %v5535_v5, %v6430_v25  ;;  %v2100_v14 = vadd.f32 %v5555_v23, %v6431_v16 }
 0x25b   :  { %v5777_v50 = vpack.c.bf16 %v2229_v19, %v2228_v53  ;;  %v2231_v51 = vmax.f32 %v2167_v13, 0.0  ;;  %v2232_v24 = vmax.f32 %v2168_v11, 0.0  ;;  %v2101_v38 = vadd.f32 %v5526_v27, %v6432_v60  ;;  %v6436_v11 = vld [vmem:[#allocation8_spill] sm:$0xff] }
 0x25c   :  { %v2233_v49 = vmax.f32 %v2169_v61, 0.0  ;;  %v2170_v9 = vadd.f32 %v5531_v30, %v2099_v46  ;;  %v2171_v4 = vadd.f32 %v5531_v30, %v2100_v14  ;;  %v2102_v48 = vadd.f32 %v5545_v22, %v6433_v12  ;;  %v6437_v46 = vld [vmem:[#allocation10_spill] sm:$0xff]  ;;  %v6438_v14 = vld [vmem:[#allocation13_spill] sm:$0xff] }
 0x25d   :  { %v5785_v18 = vpack.c.bf16 %v2231_v51, %v2230_v33  ;;  %v2172_v54 = vadd.f32 %v5531_v30, %v2101_v38  ;;  %v2103_v1 = vadd.f32 %v5535_v5, %v6434_v26  ;;  %v2104_v6 = vadd.f32 %v5555_v23, %v6435_v45  ;;  %v6440_v26 = vld [vmem:[#allocation12_spill] sm:$0xff] }
 0x25e   :  { %4481 = vmatmul.mubr.msk.bf16.gmra.mrb[148].mxu1 %vm2321_vm3, %v5648_v31  ;;  %v5794_v35 = vpack.c.bf16 %v2233_v49, %v2232_v24  ;;  %v2234_v34 = vmax.f32 %v2170_v9, 0.0  ;;  %v2235_v53 = vmax.f32 %v2171_v4, 0.0  ;;  %v2173_v10 = vadd.f32 %v5531_v30, %v2102_v48  ;;  %v6439_v49 = vld [vmem:[#allocation15_spill] sm:$0xff] }
 0x25f   :  { %v5797_v39 = vpop.f32.mrb[88].mxu1  ;;  %4484 = vmatprep.mubr.msk.bf16.mxu1 %vm2321_vm3, %v5657_v43  ;;  %v2236_v7 = vmax.f32 %v2172_v54, 0.0  ;;  %v2174_v19 = vadd.f32 %v5531_v30, %v2103_v1  ;;  %v2175_v13 = vadd.f32 %v5531_v30, %v2104_v6  ;;  %v2105_v33 = vadd.f32 %v5526_v27, %v6436_v11  ;;  %v6442_v11 = vld [vmem:[#allocation17_spill] sm:$0xff] }
 0x260   :  { %v5805_v31 = vpop.f32.mrb[89].mxu1  ;;  %v5807_v61 = vpack.c.bf16 %v2235_v53, %v2234_v34  ;;  %v2237_v25 = vmax.f32 %v2173_v10, 0.0  ;;  %v2106_v16 = vadd.f32 %v5545_v22, %v6437_v46  ;;  %v2107_v51 = vadd.f32 %v5535_v5, %v6438_v14  ;;  %v6441_v53 = vld [vmem:[#allocation14_spill] sm:$0xff] }
 0x261   :  { %v5813_v43 = vpop.f32.mrb[90].mxu1  ;;  %v2238_v24 = vmax.f32 %v2174_v19, 0.0  ;;  %v2239_v60 = vmax.f32 %v2175_v13, 0.0  ;;  %v2176_v38 = vadd.f32 %v5531_v30, %v2105_v33  ;;  %v2108_v9 = vadd.f32 %v5555_v23, %v6439_v49 }
 0x262   :  { %v5818_v4 = vpop.f32.mrb[91].mxu1  ;;  %v5820_v12 = vpack.c.bf16 %v2237_v25, %v2236_v7  ;;  %v2177_v48 = vadd.f32 %v5531_v30, %v2106_v16  ;;  %v2178_v54 = vadd.f32 %v5531_v30, %v2107_v51  ;;  %v2109_v1 = vadd.f32 %v5526_v27, %v6440_v26  ;;  %v6443_v16 = vld [vmem:[#allocation19_spill] sm:$0xff]  ;;  %v6444_v51 = vld [vmem:[#allocation16_spill] sm:$0xff] }
 0x263   :  { %v5826_v45 = vpack.c.bf16 %v2239_v60, %v2238_v24  ;;  %v2240_v6 = vmax.f32 %v2176_v38, 0.0  ;;  %v2179_v34 = vadd.f32 %v5531_v30, %v2108_v9  ;;  %v2110_v10 = vadd.f32 %v5545_v22, %v6441_v53  ;;  %v6445_v9 = vld [vmem:[#allocation18_spill] sm:$0xff] }
 0x264   :  { %v2241_v19 = vmax.f32 %v2177_v48, 0.0  ;;  %v2242_v13 = vmax.f32 %v2178_v54, 0.0  ;;  %v2180_v7 = vadd.f32 %v5531_v30, %v2109_v1  ;;  %v2111_v33 = vadd.f32 %v5535_v5, %v6442_v11 }
 0x265   :  { %v2243_v25 = vmax.f32 %v2179_v34, 0.0  ;;  %v2181_v46 = vadd.f32 %v5531_v30, %v2110_v10  ;;  %v2112_v14 = vadd.f32 %v5555_v23, %v6443_v16  ;;  %v2113_v24 = vadd.f32 %v5526_v27, %v6444_v51 }
 0x266   :  { %4485 = vmatmul.mubr.msk.bf16.gmra.mrb[152].mxu1 %vm2321_vm3, %v5676_v36  ;;  %v5841_v60 = vpack.c.bf16 %v2241_v19, %v2240_v6  ;;  %v2244_v38 = vmax.f32 %v2180_v7, 0.0  ;;  %v2182_v49 = vadd.f32 %v5531_v30, %v2111_v33  ;;  %v2114_v5 = vadd.f32 %v5545_v22, %v6445_v9 }
 0x267   :  { %v5846_v48 = vpop.f32.mrb[92].mxu1  ;;  %4488 = vmatprep.mubr.msk.bf16.mxu1 %vm2321_vm3, %v5681_v2  ;;  %v2278_v23 = vpack.c.bf16 %v2243_v25, %v2242_v13  ;;  %v2245_v54 = vmax.f32 %v2181_v46, 0.0  ;;  %v2183_v27 = vadd.f32 %v5531_v30, %v2112_v14  ;;  %v2184_v26 = vadd.f32 %v5531_v30, %v2113_v24 }
 0x268   :  { %v5852_v36 = vpop.f32.mrb[93].mxu1  ;;  %v2185_v1 = vadd.f32 %v5531_v30, %v2114_v5  ;;  %v2246_v22 = vmax.f32 %v2182_v49, 0.0 }
 0x269   :  { %v5855_v6 = vpop.f32.mrb[94].mxu1  ;;  %v5857_v34 = vpack.c.bf16 %v2245_v54, %v2244_v38  ;;  %v2247_v53 = vmax.f32 %v2183_v27, 0.0  ;;  %v2248_v19 = vmax.f32 %v2184_v26, 0.0 }
 0x26a   :  { %v5859_v10 = vpop.f32.mrb[95].mxu1  ;;  %v2249_v2 = vmax.f32 %v2185_v1, 0.0 }
 0x26b   :  { %v5861_v13 = vpack.c.bf16 %v2247_v53, %v2246_v22 }
 0x26c   :  { %v5863_v7 = vpack.c.bf16 %v2249_v2, %v2248_v19 }
 0x26e   :  { %4489 = vmatmul.mubr.msk.bf16.gmra.mrb[156].mxu1 %vm2321_vm3, %v5690_v15 }
 0x26f   :  { %v5867_v11 = vpop.f32.mrb[96].mxu1  ;;  %4492 = vmatprep.mubr.msk.bf16.mxu1 %vm2321_vm3, %v5703_v58 }
 0x270   :  { %v5871_v33 = vpop.f32.mrb[97].mxu1 }
 0x271   :  { %v5873_v25 = vpop.f32.mrb[98].mxu1 }
 0x272   :  { %v5875_v46 = vpop.f32.mrb[99].mxu1 }
 0x276   :  { %4493 = vmatmul.mubr.msk.bf16.gmra.mrb[160].mxu1 %vm2321_vm3, %v5712_v8 }
 0x277   :  { %v5879_v16 = vpop.f32.mrb[100].mxu1  ;;  %4496 = vmatprep.mubr.msk.bf16.mxu1 %vm2321_vm3, %v5723_v0 }
 0x278   :  { %v5883_v15 = vpop.f32.mrb[101].mxu1 }
 0x279   :  { %v5885_v14 = vpop.f32.mrb[102].mxu1 }
 0x27a   :  { %v5887_v51 = vpop.f32.mrb[103].mxu1 }
 0x27e   :  { %4497 = vmatmul.mubr.msk.bf16.gmra.mrb[164].mxu1 %vm2321_vm3, %v5732_v52 }
 0x27f   :  { %v5891_v58 = vpop.f32.mrb[104].mxu1  ;;  %4500 = vmatprep.mubr.msk.bf16.mxu1 %vm2321_vm3, %v5738_v63 }
 0x280   :  { %v5895_v8 = vpop.f32.mrb[105].mxu1 }
 0x281   :  { %v5897_v24 = vpop.f32.mrb[106].mxu1 }
 0x282   :  { %6446 = vst [vmem:[#allocation2_spill] sm:$0xff] %v5897_v24  ;;  %v5899_v38 = vpop.f32.mrb[107].mxu1 }
 0x286   :  { %4501 = vmatmul.mubr.msk.bf16.gmra.mrb[168].mxu1 %vm2321_vm3, %v5759_v59 }
 0x287   :  { %v5903_v0 = vpop.f32.mrb[108].mxu1  ;;  %4504 = vmatprep.mubr.msk.bf16.mxu1 %vm2321_vm3, %v5766_v56 }
 0x288   :  { %6447 = vst [vmem:[#allocation3_spill] sm:$0xff] %v5903_v0  ;;  %v5907_v52 = vpop.f32.mrb[109].mxu1 }
 0x289   :  { %6448 = vst [vmem:[#allocation5_spill] sm:$0xff] %v5907_v52  ;;  %v5909_v49 = vpop.f32.mrb[110].mxu1 }
 0x28a   :  { %6449 = vst [vmem:[#allocation7_spill] sm:$0xff] %v5909_v49  ;;  %v5911_v9 = vpop.f32.mrb[111].mxu1 }
 0x28b   :  { %6450 = vst [vmem:[#allocation4_spill] sm:$0xff] %v5911_v9 }
 0x28e   :  { %4505 = vmatmul.mubr.msk.bf16.gmra.mrb[172].mxu1 %vm2321_vm3, %v5777_v50 }
 0x28f   :  { %v5915_v63 = vpop.f32.mrb[112].mxu1  ;;  %4508 = vmatprep.mubr.msk.bf16.mxu1 %vm2321_vm3, %v5785_v18 }
 0x290   :  { %6451 = vst [vmem:[#allocation6_spill] sm:$0xff] %v5915_v63  ;;  %v5919_v59 = vpop.f32.mrb[113].mxu1 }
 0x291   :  { %6452 = vst [vmem:[#allocation9_spill] sm:$0xff] %v5919_v59  ;;  %v5921_v5 = vpop.f32.mrb[114].mxu1 }
 0x292   :  { %6453 = vst [vmem:[#allocation11_spill] sm:$0xff] %v5921_v5  ;;  %v5923_v54 = vpop.f32.mrb[115].mxu1 }
 0x293   :  { %6454 = vst [vmem:[#allocation8_spill] sm:$0xff] %v5923_v54 }
 0x296   :  { %4509 = vmatmul.mubr.msk.bf16.gmra.mrb[176].mxu1 %vm2321_vm3, %v5794_v35 }
 0x297   :  { %v5927_v56 = vpop.f32.mrb[116].mxu1  ;;  %4512 = vmatprep.mubr.msk.bf16.mxu1 %vm2321_vm3, %v5807_v61 }
 0x298   :  { %6455 = vst [vmem:[#allocation10_spill] sm:$0xff] %v5927_v56  ;;  %v5931_v50 = vpop.f32.mrb[117].mxu1 }
 0x299   :  { %6456 = vst [vmem:[#allocation13_spill] sm:$0xff] %v5931_v50  ;;  %v5933_v27 = vpop.f32.mrb[118].mxu1 }
 0x29a   :  { %6457 = vst [vmem:[#allocation15_spill] sm:$0xff] %v5933_v27  ;;  %v5935_v26 = vpop.f32.mrb[119].mxu1 }
 0x29b   :  { %6458 = vst [vmem:[#allocation12_spill] sm:$0xff] %v5935_v26 }
 0x29e   :  { %4513 = vmatmul.mubr.msk.bf16.gmra.mrb[180].mxu1 %vm2321_vm3, %v5820_v12 }
 0x29f   :  { %v5939_v18 = vpop.f32.mrb[120].mxu1  ;;  %4516 = vmatprep.mubr.msk.bf16.mxu1 %vm2321_vm3, %v5826_v45 }
 0x2a0   :  { %6459 = vst [vmem:[#allocation14_spill] sm:$0xff] %v5939_v18  ;;  %v5943_v35 = vpop.f32.mrb[121].mxu1 }
 0x2a1   :  { %6460 = vst [vmem:[#allocation17_spill] sm:$0xff] %v5943_v35  ;;  %v5945_v1 = vpop.f32.mrb[122].mxu1 }
 0x2a2   :  { %6461 = vst [vmem:[#allocation19_spill] sm:$0xff] %v5945_v1  ;;  %v5947_v22 = vpop.f32.mrb[123].mxu1  ;;  %v6467_v1 = vld [vmem:[#allocation20_spill] sm:$0xff] }
 0x2a3   :  { %6462 = vst [vmem:[#allocation16_spill] sm:$0xff] %v5947_v22 }
 0x2a6   :  { %4517 = vmatmul.mubr.msk.bf16.gmra.mrb[184].mxu1 %vm2321_vm3, %v5841_v60 }
 0x2a7   :  { %v5951_v61 = vpop.f32.mrb[124].mxu1  ;;  %4520 = vmatprep.mubr.msk.bf16.mxu1 %vm2321_vm3, %v2278_v23 }
 0x2a8   :  { %6463 = vst [vmem:[#allocation18_spill] sm:$0xff] %v5951_v61  ;;  %v5954_v53 = vpop.f32.mrb[125].mxu1 }
 0x2a9   :  { %6464 = vst [vmem:[#allocation24_spill] sm:$0xff] %v5954_v53  ;;  %v5956_v12 = vpop.f32.mrb[126].mxu1 }
 0x2aa   :  { %6465 = vst [vmem:[#allocation25_spill] sm:$0xff] %v5956_v12  ;;  %v5958_v19 = vpop.f32.mrb[127].mxu1 }
 0x2ab   :  { %6466 = vst [vmem:[#allocation26_spill] sm:$0xff] %v5958_v19  ;;  %v5960_v45 = vpop.f32.mrb[128].mxu0  ;;  %v6468_v19 = vld [vmem:[#allocation21_spill] sm:$0xff] }
 0x2ac   :  { %v5962_v2 = vpop.f32.mrb[129].mxu0  ;;  %v2970_v18 = vadd.f32 %v5960_v45, %v6467_v1  ;;  %v2974_v60 = vadd.f32 %v5960_v45, %v5609_v28  ;;  %v2978_v61 = vadd.f32 %v5960_v45, %v5654_v37  ;;  %v5972_v23 = vadd.f32 %v5960_v45, %v5700_v57  ;;  %v6469_v57 = vld [vmem:[#allocation22_spill] sm:$0xff] }
 0x2ad   :  { %v5974_v12 = vpop.f32.mrb[130].mxu0  ;;  %v2968_v53 = vadd.f32 %v5962_v2, %v6468_v19  ;;  %v2972_v22 = vadd.f32 %v5962_v2, %v5616_v41  ;;  %v2976_v1 = vadd.f32 %v5962_v2, %v5662_v21  ;;  %v2980_v28 = vadd.f32 %v5962_v2, %v5710_v47  ;;  %v6470_v21 = vld [vmem:[#allocation23_spill] sm:$0xff] }
 0x2ae   :  { %4521 = vmatmul.mubr.msk.bf16.gmra.mrb[188].mxu1 %vm2321_vm3, %v5857_v34  ;;  %v5986_v37 = vpop.f32.mrb[131].mxu0  ;;  %v2971_v35 = vadd.f32 %v5974_v12, %v6469_v57  ;;  %v3041_v27 = vadd.f32 %v5531_v30, %v2970_v18  ;;  %v2975_v19 = vadd.f32 %v5974_v12, %v5622_v17  ;;  %v3045_v41 = vadd.f32 %v5531_v30, %v2974_v60 }
 0x2af   :  { %v4446_v56 = vpop.f32.mrb[128].mxu1  ;;  %4524 = vmatprep.mubr.msk.bf16.mxu1 %vm2321_vm3, %v5861_v13  ;;  %v2969_v47 = vadd.f32 %v5986_v37, %v6470_v21  ;;  %v3039_v34 = vadd.f32 %v5531_v30, %v2968_v53  ;;  %v2973_v26 = vadd.f32 %v5986_v37, %v5628_v3  ;;  %v3043_v57 = vadd.f32 %v5531_v30, %v2972_v22 }
 0x2b0   :  { %v3030_v18 = vadd.f32 %v5960_v45, %v4446_v56  ;;  %v1903_v50 = vpop.f32.mrb[129].mxu1  ;;  %v3042_v17 = vadd.f32 %v5531_v30, %v2971_v35  ;;  %v3105_v60 = vmax.f32 %v3041_v27, 0.0  ;;  %v3046_v5 = vadd.f32 %v5531_v30, %v2975_v19 }
 0x2b1   :  { %v3028_v13 = vadd.f32 %v5962_v2, %v1903_v50  ;;  %v4447_v63 = vpop.f32.mrb[130].mxu1  ;;  %v3040_v21 = vadd.f32 %v5531_v30, %v2969_v47  ;;  %v3103_v54 = vmax.f32 %v3039_v34, 0.0  ;;  %v3044_v53 = vadd.f32 %v5531_v30, %v2973_v26 }
 0x2b2   :  { %v3101_v3 = vadd.f32 %v5531_v30, %v3030_v18  ;;  %v3031_v22 = vadd.f32 %v5974_v12, %v4447_v63  ;;  %v1906_v59 = vpop.f32.mrb[131].mxu1  ;;  %v3106_v56 = vmax.f32 %v3042_v17, 0.0  ;;  %v3107_v49 = vmax.f32 %v3043_v57, 0.0 }
 0x2b3   :  { %v3099_v35 = vadd.f32 %v5531_v30, %v3028_v13  ;;  %v3029_v27 = vadd.f32 %v5986_v37, %v1906_v59  ;;  %v3104_v19 = vmax.f32 %v3040_v21, 0.0  ;;  %v3108_v0 = vmax.f32 %v3044_v53, 0.0 }
 0x2b4   :  { %v3165_v50 = vmax.f32 %v3101_v3, 0.0  ;;  %v3102_v9 = vadd.f32 %v5531_v30, %v3031_v22  ;;  %v3168_v47 = vpack.c.bf16 %v3106_v56, %v3105_v60  ;;  %v3109_v34 = vmax.f32 %v3045_v41, 0.0 }
 0x2b5   :  { %v3163_v52 = vmax.f32 %v3099_v35, 0.0  ;;  %v3100_v26 = vadd.f32 %v5531_v30, %v3029_v27  ;;  %v3167_v18 = vpack.c.bf16 %v3104_v19, %v3103_v54  ;;  %v3169_v24 = vpack.c.bf16 %v3108_v0, %v3107_v49 }
 0x2b6   :  { %v3166_v63 = vmax.f32 %v3102_v9, 0.0  ;;  %4525 = vmatmul.mubr.msk.bf16.gmra.mrb[192].mxu1 %vm2321_vm3, %v5863_v7  ;;  %v3110_v57 = vmax.f32 %v3046_v5, 0.0  ;;  %v2977_v59 = vadd.f32 %v5986_v37, %v5674_v40  ;;  %v3047_v17 = vadd.f32 %v5531_v30, %v2976_v1 }
 0x2b7   :  { %v3164_v13 = vmax.f32 %v3100_v26, 0.0  ;;  %4544 = vmatprep.mubr.msk.bf16.mxu0 %vm2321_vm3, %v3167_v18  ;;  %v2979_v41 = vadd.f32 %v5974_v12, %v5667_v20  ;;  %v3049_v60 = vadd.f32 %v5531_v30, %v2978_v61  ;;  %v2981_v0 = vadd.f32 %v5986_v37, %v5721_v62 }
 0x2b8   :  { %v6025_v49 = vpack.c.bf16 %v3166_v63, %v3165_v50  ;;  %4545 = vmatmul.mubr.msk.bf16.vlgmr.msra.gmra.mrb[132].mxu0 %vm2321_vm3, %v3168_v47  ;;  %v3170_v7 = vpack.c.bf16 %v3110_v57, %v3109_v34  ;;  %v3048_v40 = vadd.f32 %v5531_v30, %v2977_v59  ;;  %v3111_v9 = vmax.f32 %v3047_v17, 0.0 }
 0x2b9   :  { %v6029_v5 = vpack.c.bf16 %v3164_v13, %v3163_v52  ;;  %4548 = vmatprep.mubr.msk.bf16.mxu0 %vm2321_vm3, %v3169_v24  ;;  %v3050_v54 = vadd.f32 %v5531_v30, %v2979_v41  ;;  %v3113_v20 = vmax.f32 %v3049_v60, 0.0  ;;  %v3051_v61 = vadd.f32 %v5531_v30, %v2980_v28 }
 0x2ba   :  { %v3112_v1 = vmax.f32 %v3048_v40, 0.0  ;;  %v3052_v62 = vadd.f32 %v5531_v30, %v2981_v0  ;;  %v2983_v21 = vadd.f32 %v5974_v12, %v5715_v29  ;;  %v3053_v53 = vadd.f32 %v5531_v30, %v5972_v23 }
 0x2bb   :  { %v3114_v3 = vmax.f32 %v3050_v54, 0.0  ;;  %v3115_v22 = vmax.f32 %v3051_v61, 0.0  ;;  %v2984_v52 = vadd.f32 %v5962_v2, %v5757_v55  ;;  %v2985_v24 = vadd.f32 %v5986_v37, %v5770_v42 }
 0x2bc   :  { %v3171_v56 = vpack.c.bf16 %v3112_v1, %v3111_v9  ;;  %v3116_v35 = vmax.f32 %v3052_v62, 0.0  ;;  %v3054_v28 = vadd.f32 %v5531_v30, %v2983_v21  ;;  %v3117_v27 = vmax.f32 %v3053_v53, 0.0 }
 0x2bd   :  { %v3172_v19 = vpack.c.bf16 %v3114_v3, %v3113_v20  ;;  %v3055_v50 = vadd.f32 %v5531_v30, %v2984_v52  ;;  %v3056_v29 = vadd.f32 %v5531_v30, %v2985_v24  ;;  %v2986_v23 = vadd.f32 %v5960_v45, %v5748_v32 }
 0x2be   :  { %v3173_v47 = vpack.c.bf16 %v3116_v35, %v3115_v22  ;;  %v3118_v34 = vmax.f32 %v3054_v28, 0.0  ;;  %v2987_v55 = vadd.f32 %v5974_v12, %v5764_v44  ;;  %v2988_v42 = vadd.f32 %v5962_v2, %v5805_v31 }
 0x2bf   :  { %v3119_v26 = vmax.f32 %v3055_v50, 0.0  ;;  %v3120_v18 = vmax.f32 %v3056_v29, 0.0  ;;  %v3057_v63 = vadd.f32 %v5531_v30, %v2986_v23  ;;  %v2989_v57 = vadd.f32 %v5986_v37, %v5818_v4 }
 0x2c0   :  { %4549 = vmatmul.mubr.msk.bf16.gmra.mrb[136].mxu0 %vm2321_vm3, %v3170_v7  ;;  %v6056_v59 = vpack.c.bf16 %v3118_v34, %v3117_v27  ;;  %v3058_v32 = vadd.f32 %v5531_v30, %v2987_v55  ;;  %v3059_v17 = vadd.f32 %v5531_v30, %v2988_v42  ;;  %v2990_v44 = vadd.f32 %v5960_v45, %v5797_v39 }
 0x2c1   :  { %4552 = vmatprep.mubr.msk.bf16.mxu0 %vm2321_vm3, %v3171_v56  ;;  %v6063_v31 = vpack.c.bf16 %v3120_v18, %v3119_v26  ;;  %v3121_v13 = vmax.f32 %v3057_v63, 0.0  ;;  %v3060_v41 = vadd.f32 %v5531_v30, %v2989_v57  ;;  %v2991_v4 = vadd.f32 %v5974_v12, %v5813_v43 }
 0x2c2   :  { %v3122_v60 = vmax.f32 %v3058_v32, 0.0  ;;  %v3123_v0 = vmax.f32 %v3059_v17, 0.0  ;;  %v3061_v7 = vadd.f32 %v5531_v30, %v2990_v44  ;;  %v2992_v40 = vadd.f32 %v5962_v2, %v5852_v36 }
 0x2c3   :  { %v3124_v9 = vmax.f32 %v3060_v41, 0.0  ;;  %v3062_v39 = vadd.f32 %v5531_v30, %v2991_v4  ;;  %v2993_v54 = vadd.f32 %v5986_v37, %v5859_v10  ;;  %v2994_v20 = vadd.f32 %v5960_v45, %v5846_v48 }
 0x2c4   :  { %v6076_v61 = vpack.c.bf16 %v3122_v60, %v3121_v13  ;;  %v3125_v1 = vmax.f32 %v3061_v7, 0.0  ;;  %v3063_v43 = vadd.f32 %v5531_v30, %v2992_v40  ;;  %v2995_v62 = vadd.f32 %v5974_v12, %v5855_v6  ;;  %v6471_v7 = vld [vmem:[#allocation2_spill] sm:$0xff] }
 0x2c5   :  { %v6081_v21 = vpack.c.bf16 %v3124_v9, %v3123_v0  ;;  %v3126_v36 = vmax.f32 %v3062_v39, 0.0  ;;  %v3064_v53 = vadd.f32 %v5531_v30, %v2993_v54  ;;  %v3065_v3 = vadd.f32 %v5531_v30, %v2994_v20  ;;  %v6472_v54 = vld [vmem:[#allocation5_spill] sm:$0xff] }
 0x2c6   :  { %v3127_v22 = vmax.f32 %v3063_v43, 0.0  ;;  %v3066_v10 = vadd.f32 %v5531_v30, %v2995_v62  ;;  %v2996_v48 = vadd.f32 %v5962_v2, %v5871_v33  ;;  %v2997_v52 = vadd.f32 %v5986_v37, %v5875_v46  ;;  %v6473_v43 = vld [vmem:[#allocation4_spill] sm:$0xff] }
 0x2c7   :  { %v6090_v24 = vpack.c.bf16 %v3126_v36, %v3125_v1  ;;  %v3128_v56 = vmax.f32 %v3064_v53, 0.0  ;;  %v3129_v6 = vmax.f32 %v3065_v3, 0.0  ;;  %v2998_v35 = vadd.f32 %v5960_v45, %v5867_v11  ;;  %v6474_v36 = vld [vmem:[#allocation3_spill] sm:$0xff] }
 0x2c8   :  { %4553 = vmatmul.mubr.msk.bf16.gmra.mrb[140].mxu0 %vm2321_vm3, %v3172_v19  ;;  %v3130_v28 = vmax.f32 %v3066_v10, 0.0  ;;  %v3067_v27 = vadd.f32 %v5531_v30, %v2996_v48  ;;  %v3068_v50 = vadd.f32 %v5531_v30, %v2997_v52  ;;  %v2999_v33 = vadd.f32 %v5974_v12, %v5873_v25  ;;  %v6475_v10 = vld [vmem:[#allocation7_spill] sm:$0xff] }
 0x2c9   :  { %4556 = vmatprep.mubr.msk.bf16.mxu0 %vm2321_vm3, %v3173_v47  ;;  %v6100_v46 = vpack.c.bf16 %v3128_v56, %v3127_v22  ;;  %v3069_v29 = vadd.f32 %v5531_v30, %v2998_v35  ;;  %v3000_v23 = vadd.f32 %v5962_v2, %v5883_v15  ;;  %v3001_v11 = vadd.f32 %v5986_v37, %v5887_v51 }
 0x2ca   :  { %v6107_v19 = vpack.c.bf16 %v3130_v28, %v3129_v6  ;;  %v3131_v34 = vmax.f32 %v3067_v27, 0.0  ;;  %v3132_v55 = vmax.f32 %v3068_v50, 0.0  ;;  %v3070_v42 = vadd.f32 %v5531_v30, %v2999_v33  ;;  %v6476_v27 = vld [vmem:[#allocation9_spill] sm:$0xff]  ;;  %v6477_v33 = vld [vmem:[#allocation8_spill] sm:$0xff] }
 0x2cb   :  { %v3133_v26 = vmax.f32 %v3069_v29, 0.0  ;;  %v3071_v25 = vadd.f32 %v5531_v30, %v3000_v23  ;;  %v3072_v47 = vadd.f32 %v5531_v30, %v3001_v11  ;;  %v3002_v18 = vadd.f32 %v5960_v45, %v5879_v16 }
 0x2cc   :  { %v6114_v63 = vpack.c.bf16 %v3132_v55, %v3131_v34  ;;  %v3134_v15 = vmax.f32 %v3070_v42, 0.0  ;;  %v3003_v51 = vadd.f32 %v5974_v12, %v5885_v14  ;;  %v3004_v57 = vadd.f32 %v5962_v2, %v5895_v8  ;;  %v6478_v55 = vld [vmem:[#allocation6_spill] sm:$0xff] }
 0x2cd   :  { %v3135_v32 = vmax.f32 %v3071_v25, 0.0  ;;  %v3136_v17 = vmax.f32 %v3072_v47, 0.0  ;;  %v3073_v44 = vadd.f32 %v5531_v30, %v3002_v18  ;;  %v3005_v13 = vadd.f32 %v5986_v37, %v5899_v38  ;;  %v4627_v25 = vld [vmem:[%s6403_s5] ss:$0 sm:$0xff]  ;;  %v6479_v18 = vld [vmem:[#allocation11_spill] sm:$0xff] }
 0x2ce   :  { %v6123_v41 = vpack.c.bf16 %v3134_v15, %v3133_v26  ;;  %v3074_v16 = vadd.f32 %v5531_v30, %v3003_v51  ;;  %v3075_v4 = vadd.f32 %v5531_v30, %v3004_v57  ;;  %v3006_v60 = vadd.f32 %v5960_v45, %v5891_v58 }
 0x2cf   :  { %v6129_v14 = vpack.c.bf16 %v3136_v17, %v3135_v32  ;;  %v3137_v0 = vmax.f32 %v3073_v44, 0.0  ;;  %v3076_v8 = vadd.f32 %v5531_v30, %v3005_v13  ;;  %v3007_v40 = vadd.f32 %v5974_v12, %v6471_v7  ;;  %v6480_v32 = vld [vmem:[#allocation13_spill] sm:$0xff]  ;;  %v6481_v44 = vld [vmem:[#allocation12_spill] sm:$0xff] }
 0x2d0   :  { %4557 = vmatmul.mubr.msk.bf16.gmra.mrb[144].mxu0 %vm2321_vm3, %v6056_v59  ;;  %v3138_v38 = vmax.f32 %v3074_v16, 0.0  ;;  %v3139_v9 = vmax.f32 %v3075_v4, 0.0  ;;  %v3077_v39 = vadd.f32 %v5531_v30, %v3006_v60  ;;  %v3008_v20 = vadd.f32 %v5962_v2, %v6472_v54 }
 0x2d1   :  { %4560 = vmatprep.mubr.msk.bf16.mxu0 %vm2321_vm3, %v6063_v31  ;;  %v3140_v58 = vmax.f32 %v3076_v8, 0.0  ;;  %v3078_v1 = vadd.f32 %v5531_v30, %v3007_v40  ;;  %v3009_v62 = vadd.f32 %v5986_v37, %v6473_v43  ;;  %v3010_v53 = vadd.f32 %v5960_v45, %v6474_v36 }
 0x2d2   :  { %v6146_v59 = vpack.c.bf16 %v3138_v38, %v3137_v0  ;;  %v3141_v3 = vmax.f32 %v3077_v39, 0.0  ;;  %v3079_v22 = vadd.f32 %v5531_v30, %v3008_v20  ;;  %v3011_v48 = vadd.f32 %v5974_v12, %v6475_v10  ;;  %v6482_v38 = vld [vmem:[#allocation10_spill] sm:$0xff]  ;;  %v6483_v20 = vld [vmem:[#allocation15_spill] sm:$0xff] }
 0x2d3   :  { %v6151_v52 = vpack.c.bf16 %v3140_v58, %v3139_v9  ;;  %v3142_v31 = vmax.f32 %v3078_v1, 0.0  ;;  %v3080_v56 = vadd.f32 %v5531_v30, %v3009_v62  ;;  %v3081_v6 = vadd.f32 %v5531_v30, %v3010_v53  ;;  %v6484_v1 = vld [vmem:[#allocation17_spill] sm:$0xff]  ;;  %v6485_v53 = vld [vmem:[#allocation16_spill] sm:$0xff] }
 0x2d4   :  { %v3143_v35 = vmax.f32 %v3079_v22, 0.0  ;;  %v3082_v28 = vadd.f32 %v5531_v30, %v3011_v48  ;;  %v3012_v50 = vadd.f32 %v5962_v2, %v6476_v27  ;;  %v3013_v29 = vadd.f32 %v5986_v37, %v6477_v33  ;;  %v6486_v48 = vld [vmem:[#allocation14_spill] sm:$0xff] }
 0x2d5   :  { %v6160_v23 = vpack.c.bf16 %v3142_v31, %v3141_v3  ;;  %v3144_v11 = vmax.f32 %v3080_v56, 0.0  ;;  %v3145_v34 = vmax.f32 %v3081_v6, 0.0  ;;  %v3014_v42 = vadd.f32 %v5960_v45, %v6478_v55 }
 0x2d6   :  { %v3146_v26 = vmax.f32 %v3082_v28, 0.0  ;;  %v3083_v47 = vadd.f32 %v4627_v25, %v3012_v50  ;;  %v3084_v30 = vadd.f32 %v4627_v25, %v3013_v29  ;;  %v3015_v15 = vadd.f32 %v5974_v12, %v6479_v18  ;;  %v6487_v28 = vld [vmem:[#allocation19_spill] sm:$0xff] }
 0x2d7   :  { %v6169_v51 = vpack.c.bf16 %v3144_v11, %v3143_v35  ;;  %v3085_v57 = vadd.f32 %v4627_v25, %v3014_v42  ;;  %v3016_v17 = vadd.f32 %v5962_v2, %v6480_v32  ;;  %v3017_v13 = vadd.f32 %v5986_v37, %v6481_v44  ;;  %v6488_v11 = vld [vmem:[#allocation24_spill] sm:$0xff] }
 0x2d8   :  { %4561 = vmatmul.mubr.msk.bf16.gmra.mrb[148].mxu0 %vm2321_vm3, %v6076_v61  ;;  %v3188_v16 = vpack.c.bf16 %v3146_v26, %v3145_v34  ;;  %v3147_v4 = vmax.f32 %v3083_v47, 0.0  ;;  %v3148_v60 = vmax.f32 %v3084_v30, 0.0  ;;  %v3086_v0 = vadd.f32 %v4627_v25, %v3015_v15  ;;  %v6489_v26 = vld [vmem:[#allocation26_spill] sm:$0xff] }
 0x2d9   :  { %4564 = vmatprep.mubr.msk.bf16.mxu0 %vm2321_vm3, %v6081_v21  ;;  %v3149_v8 = vmax.f32 %v3085_v57, 0.0  ;;  %v3087_v7 = vadd.f32 %v4627_v25, %v3016_v17  ;;  %v3088_v40 = vadd.f32 %v4627_v25, %v3017_v13  ;;  %v3018_v9 = vadd.f32 %v5960_v45, %v6482_v38  ;;  %v6490_v30 = vld [vmem:[#allocation18_spill] sm:$0xff]  ;;  %v6491_v17 = vld [vmem:[#allocation25_spill] sm:$0xff] }
 0x2da   :  { %v3189_v39 = vpack.c.bf16 %v3148_v60, %v3147_v4  ;;  %v3150_v54 = vmax.f32 %v3086_v0, 0.0  ;;  %v3019_v58 = vadd.f32 %v5974_v12, %v6483_v20  ;;  %v3020_v61 = vadd.f32 %v5962_v2, %v6484_v1 }
 0x2db   :  { %v3151_v43 = vmax.f32 %v3087_v7, 0.0  ;;  %v3152_v62 = vmax.f32 %v3088_v40, 0.0  ;;  %v3089_v36 = vadd.f32 %v4627_v25, %v3018_v9  ;;  %v3021_v21 = vadd.f32 %v5986_v37, %v6485_v53 }
 0x2dc   :  { %v3190_v3 = vpack.c.bf16 %v3150_v54, %v3149_v8  ;;  %v3090_v22 = vadd.f32 %v4627_v25, %v3019_v58  ;;  %v3091_v10 = vadd.f32 %v4627_v25, %v3020_v61  ;;  %v3022_v31 = vadd.f32 %v5960_v45, %v6486_v48 }
 0x2dd   :  { %v3191_v56 = vpack.c.bf16 %v3152_v62, %v3151_v43  ;;  %v3153_v6 = vmax.f32 %v3089_v36, 0.0  ;;  %v3092_v35 = vadd.f32 %v4627_v25, %v3021_v21  ;;  %v3023_v27 = vadd.f32 %v5974_v12, %v6487_v28 }
 0x2de   :  { %v3154_v50 = vmax.f32 %v3090_v22, 0.0  ;;  %v3155_v33 = vmax.f32 %v3091_v10, 0.0  ;;  %v3093_v29 = vadd.f32 %v4627_v25, %v3022_v31  ;;  %v3024_v34 = vadd.f32 %v5962_v2, %v6488_v11 }
 0x2df   :  { %v3156_v55 = vmax.f32 %v3092_v35, 0.0  ;;  %v3094_v42 = vadd.f32 %v4627_v25, %v3023_v27  ;;  %v3025_v47 = vadd.f32 %v5986_v37, %v6489_v26  ;;  %v3026_v18 = vadd.f32 %v5960_v45, %v6490_v30 }
 0x2e0   :  { %4565 = vmatmul.mubr.msk.bf16.gmra.mrb[152].mxu0 %vm2321_vm3, %v6090_v24  ;;  %v3192_v15 = vpack.c.bf16 %v3154_v50, %v3153_v6  ;;  %v3157_v57 = vmax.f32 %v3093_v29, 0.0  ;;  %v3095_v32 = vadd.f32 %v4627_v25, %v3024_v34  ;;  %v3027_v44 = vadd.f32 %v5974_v12, %v6491_v17 }
 0x2e1   :  { %4568 = vmatprep.mubr.msk.bf16.mxu0 %vm2321_vm3, %v6100_v46  ;;  %v3193_v2 = vpack.c.bf16 %v3156_v55, %v3155_v33  ;;  %v3158_v13 = vmax.f32 %v3094_v42, 0.0  ;;  %v3096_v4 = vadd.f32 %v4627_v25, %v3025_v47  ;;  %v3097_v60 = vadd.f32 %v4627_v25, %v3026_v18 }
 0x2e2   :  { %v3098_v37 = vadd.f32 %v4627_v25, %v3027_v44  ;;  %v3159_v8 = vmax.f32 %v3095_v32, 0.0 }
 0x2e3   :  { %v3194_v0 = vpack.c.bf16 %v3158_v13, %v3157_v57  ;;  %v3160_v45 = vmax.f32 %v3096_v4, 0.0  ;;  %v3161_v7 = vmax.f32 %v3097_v60, 0.0 }
 0x2e4   :  { %v3162_v40 = vmax.f32 %v3098_v37, 0.0 }
 0x2e5   :  { %v3195_v24 = vpack.c.bf16 %v3160_v45, %v3159_v8 }
 0x2e6   :  { %v3196_v38 = vpack.c.bf16 %v3162_v40, %v3161_v7 }
 0x2e8   :  { %4569 = vmatmul.mubr.msk.bf16.gmra.mrb[156].mxu0 %vm2321_vm3, %v6107_v19 }
 0x2e9   :  { %4572 = vmatprep.mubr.msk.bf16.mxu0 %vm2321_vm3, %v6114_v63 }
 0x2f0   :  { %4573 = vmatmul.mubr.msk.bf16.gmra.mrb[160].mxu0 %vm2321_vm3, %v6123_v41  ;;  %v6226_v41 = vld [vmem:[%s6404_s7] ss:$0 sm:$0xff] }
 0x2f1   :  { %4576 = vmatprep.mubr.msk.bf16.mxu0 %vm2321_vm3, %v6129_v14 }
 0x2f8   :  { %4577 = vmatmul.mubr.msk.bf16.gmra.mrb[164].mxu0 %vm2321_vm3, %v6146_v59 }
 0x2f9   :  { %4580 = vmatprep.mubr.msk.bf16.mxu0 %vm2321_vm3, %v6151_v52 }
 0x300   :  { %4581 = vmatmul.mubr.msk.bf16.gmra.mrb[168].mxu0 %vm2321_vm3, %v6160_v23 }
 0x301   :  { %4584 = vmatprep.mubr.msk.bf16.mxu0 %vm2321_vm3, %v6169_v51 }
 0x308   :  { %4585 = vmatmul.mubr.msk.bf16.gmra.mrb[172].mxu0 %vm2321_vm3, %v3188_v16 }
 0x309   :  { %4588 = vmatprep.mubr.msk.bf16.mxu0 %vm2321_vm3, %v3189_v39 }
 0x310   :  { %4589 = vmatmul.mubr.msk.bf16.gmra.mrb[176].mxu0 %vm2321_vm3, %v3190_v3 }
 0x311   :  { %v4466_v12 = vpop.f32.mrb[132].mxu1  ;;  %4592 = vmatprep.mubr.msk.bf16.mxu0 %vm2321_vm3, %v3191_v56 }
 0x312   :  { %v2452_v46 = vpop.f32.mrb[133].mxu1  ;;  %v2461_v14 = vadd.f32 %v4466_v12, %v6226_v41 }
 0x313   :  { %v4467_v19 = vpop.f32.mrb[134].mxu1  ;;  %v2453_v59 = vadd.f32 %v6226_v41, %v2452_v46 }
 0x314   :  { %v2455_v63 = vpop.f32.mrb[135].mxu1  ;;  %v2464_v23 = vadd.f32 %v4467_v19, %v6226_v41  ;;  %v2709_v54 = vmax.f32 %v2461_v14, 0.0 }
 0x315   :  { %v2456_v16 = vadd.f32 %v6226_v41, %v2455_v63  ;;  %v2707_v61 = vmax.f32 %v2453_v59, 0.0 }
 0x316   :  { %v2710_v36 = vmax.f32 %v2464_v23, 0.0 }
 0x317   :  { %v2708_v3 = vmax.f32 %v2456_v16, 0.0 }
 0x318   :  { %4593 = vmatmul.mubr.msk.bf16.gmra.mrb[180].mxu0 %vm2321_vm3, %v3192_v15 }
 0x319   :  { %v4470_v52 = vpop.f32.mrb[136].mxu1  ;;  %4596 = vmatprep.mubr.msk.bf16.mxu0 %vm2321_vm3, %v3193_v2 }
 0x31a   :  { %v2477_v25 = vadd.f32 %v4470_v52, %v6226_v41  ;;  %v2468_v51 = vpop.f32.mrb[137].mxu1 }
 0x31b   :  { %v2469_v9 = vadd.f32 %v6226_v41, %v2468_v51  ;;  %v4471_v39 = vpop.f32.mrb[138].mxu1 }
 0x31c   :  { %v2713_v20 = vmax.f32 %v2477_v25, 0.0  ;;  %v2480_v58 = vadd.f32 %v4471_v39, %v6226_v41  ;;  %v2471_v1 = vpop.f32.mrb[139].mxu1 }
 0x31d   :  { %v2711_v43 = vmax.f32 %v2469_v9, 0.0  ;;  %v2472_v62 = vadd.f32 %v6226_v41, %v2471_v1 }
 0x31e   :  { %v2773_v53 = vmax.f32 %v2709_v54, %v2713_v20  ;;  %v2714_v21 = vmax.f32 %v2480_v58, 0.0 }
 0x31f   :  { %v2771_v22 = vmax.f32 %v2707_v61, %v2711_v43  ;;  %v2712_v10 = vmax.f32 %v2472_v62, 0.0 }
 0x320   :  { %v2774_v48 = vmax.f32 %v2710_v36, %v2714_v21  ;;  %4597 = vmatmul.mubr.msk.bf16.gmra.mrb[184].mxu0 %vm2321_vm3, %v3194_v0 }
 0x321   :  { %v2772_v31 = vmax.f32 %v2708_v3, %v2712_v10  ;;  %v4474_v56 = vpop.f32.mrb[140].mxu1  ;;  %4600 = vmatprep.mubr.msk.bf16.mxu0 %vm2321_vm3, %v3195_v24 }
 0x322   :  { %v2493_v6 = vadd.f32 %v4474_v56, %v6226_v41  ;;  %v2484_v35 = vpop.f32.mrb[141].mxu1 }
 0x323   :  { %v2485_v28 = vadd.f32 %v6226_v41, %v2484_v35  ;;  %v4475_v27 = vpop.f32.mrb[142].mxu1 }
 0x324   :  { %v2717_v50 = vmax.f32 %v2493_v6, 0.0  ;;  %v2496_v33 = vadd.f32 %v4475_v27, %v6226_v41  ;;  %v2487_v29 = vpop.f32.mrb[143].mxu1 }
 0x325   :  { %v2715_v11 = vmax.f32 %v2485_v28, 0.0  ;;  %v2488_v34 = vadd.f32 %v6226_v41, %v2487_v29 }
 0x326   :  { %v2777_v55 = vmax.f32 %v2773_v53, %v2717_v50  ;;  %v2718_v42 = vmax.f32 %v2496_v33, 0.0 }
 0x327   :  { %v2775_v26 = vmax.f32 %v2771_v22, %v2715_v11  ;;  %v2716_v47 = vmax.f32 %v2488_v34, 0.0 }
 0x328   :  { %v2778_v30 = vmax.f32 %v2774_v48, %v2718_v42  ;;  %4601 = vmatmul.mubr.msk.bf16.gmra.mrb[188].mxu0 %vm2321_vm3, %v3196_v38 }
 0x329   :  { %v2776_v18 = vmax.f32 %v2772_v31, %v2716_v47  ;;  %v4478_v15 = vpop.f32.mrb[144].mxu1  ;;  %4604 = vmatprep.mubr.msk.bf16.mxu0 %vm2321_vm3, %v6029_v5 }
 0x32a   :  { %v2509_v57 = vadd.f32 %v4478_v15, %v6226_v41  ;;  %v2500_v32 = vpop.f32.mrb[145].mxu1 }
 0x32b   :  { %v2501_v17 = vadd.f32 %v6226_v41, %v2500_v32  ;;  %v4479_v44 = vpop.f32.mrb[146].mxu1 }
 0x32c   :  { %v2721_v2 = vmax.f32 %v2509_v57, 0.0  ;;  %v2512_v13 = vadd.f32 %v4479_v44, %v6226_v41  ;;  %v2503_v4 = vpop.f32.mrb[147].mxu1 }
 0x32d   :  { %v2719_v60 = vmax.f32 %v2501_v17, 0.0  ;;  %v2504_v37 = vadd.f32 %v6226_v41, %v2503_v4 }
 0x32e   :  { %v2781_v0 = vmax.f32 %v2777_v55, %v2721_v2  ;;  %v2722_v8 = vmax.f32 %v2512_v13, 0.0 }
 0x32f   :  { %v2779_v45 = vmax.f32 %v2775_v26, %v2719_v60  ;;  %v2720_v7 = vmax.f32 %v2504_v37, 0.0 }
 0x330   :  { %v2782_v40 = vmax.f32 %v2778_v30, %v2722_v8  ;;  %4605 = vmatmul.mubr.msk.bf16.gmra.mrb[192].mxu0 %vm2321_vm3, %v6025_v49 }
 0x331   :  { %v2780_v5 = vmax.f32 %v2776_v18, %v2720_v7  ;;  %v4482_v24 = vpop.f32.mrb[148].mxu1 }
 0x332   :  { %v2525_v38 = vadd.f32 %v4482_v24, %v6226_v41  ;;  %v2516_v12 = vpop.f32.mrb[149].mxu1 }
 0x333   :  { %v2517_v46 = vadd.f32 %v6226_v41, %v2516_v12  ;;  %v4483_v19 = vpop.f32.mrb[150].mxu1 }
 0x334   :  { %v2725_v63 = vmax.f32 %v2525_v38, 0.0  ;;  %v2528_v14 = vadd.f32 %v4483_v19, %v6226_v41  ;;  %v2519_v59 = vpop.f32.mrb[151].mxu1 }
 0x335   :  { %v2723_v52 = vmax.f32 %v2517_v46, 0.0  ;;  %v2520_v23 = vadd.f32 %v6226_v41, %v2519_v59 }
 0x336   :  { %v2785_v25 = vmax.f32 %v2781_v0, %v2725_v63  ;;  %v2726_v51 = vmax.f32 %v2528_v14, 0.0 }
 0x337   :  { %v2783_v16 = vmax.f32 %v2779_v45, %v2723_v52  ;;  %v2724_v9 = vmax.f32 %v2520_v23, 0.0 }
 0x338   :  { %v2786_v49 = vmax.f32 %v2782_v40, %v2726_v51 }
 0x339   :  { %v2784_v39 = vmax.f32 %v2780_v5, %v2724_v9  ;;  %v4486_v54 = vpop.f32.mrb[152].mxu1 }
 0x33a   :  { %v2541_v20 = vadd.f32 %v4486_v54, %v6226_v41  ;;  %v2532_v58 = vpop.f32.mrb[153].mxu1 }
 0x33b   :  { %v2533_v1 = vadd.f32 %v6226_v41, %v2532_v58  ;;  %v4487_v61 = vpop.f32.mrb[154].mxu1 }
 0x33c   :  { %v2729_v43 = vmax.f32 %v2541_v20, 0.0  ;;  %v2544_v62 = vadd.f32 %v4487_v61, %v6226_v41  ;;  %v2535_v36 = vpop.f32.mrb[155].mxu1 }
 0x33d   :  { %v2727_v53 = vmax.f32 %v2533_v1, 0.0  ;;  %v2536_v21 = vadd.f32 %v6226_v41, %v2535_v36 }
 0x33e   :  { %v2789_v3 = vmax.f32 %v2785_v25, %v2729_v43  ;;  %v2730_v22 = vmax.f32 %v2544_v62, 0.0 }
 0x33f   :  { %v2787_v10 = vmax.f32 %v2783_v16, %v2727_v53  ;;  %v2728_v48 = vmax.f32 %v2536_v21, 0.0 }
 0x340   :  { %v2790_v31 = vmax.f32 %v2786_v49, %v2730_v22 }
 0x341   :  { %v2788_v56 = vmax.f32 %v2784_v39, %v2728_v48  ;;  %v4490_v6 = vpop.f32.mrb[156].mxu1 }
 0x342   :  { %v2557_v35 = vadd.f32 %v4490_v6, %v6226_v41  ;;  %v2548_v28 = vpop.f32.mrb[157].mxu1 }
 0x343   :  { %v2549_v27 = vadd.f32 %v6226_v41, %v2548_v28  ;;  %v4491_v50 = vpop.f32.mrb[158].mxu1 }
 0x344   :  { %v2733_v33 = vmax.f32 %v2557_v35, 0.0  ;;  %v2560_v29 = vadd.f32 %v4491_v50, %v6226_v41  ;;  %v2551_v11 = vpop.f32.mrb[159].mxu1 }
 0x345   :  { %v2731_v34 = vmax.f32 %v2549_v27, 0.0  ;;  %v2552_v55 = vadd.f32 %v6226_v41, %v2551_v11 }
 0x346   :  { %v2793_v42 = vmax.f32 %v2789_v3, %v2733_v33  ;;  %v2734_v26 = vmax.f32 %v2560_v29, 0.0 }
 0x347   :  { %v2791_v47 = vmax.f32 %v2787_v10, %v2731_v34  ;;  %v2732_v30 = vmax.f32 %v2552_v55, 0.0 }
 0x348   :  { %v2794_v18 = vmax.f32 %v2790_v31, %v2734_v26 }
 0x349   :  { %v2792_v15 = vmax.f32 %v2788_v56, %v2732_v30  ;;  %v4494_v57 = vpop.f32.mrb[160].mxu1 }
 0x34a   :  { %v2573_v32 = vadd.f32 %v4494_v57, %v6226_v41  ;;  %v2564_v17 = vpop.f32.mrb[161].mxu1 }
 0x34b   :  { %v2565_v44 = vadd.f32 %v6226_v41, %v2564_v17  ;;  %v4495_v2 = vpop.f32.mrb[162].mxu1 }
 0x34c   :  { %v2737_v13 = vmax.f32 %v2573_v32, 0.0  ;;  %v2576_v4 = vadd.f32 %v4495_v2, %v6226_v41  ;;  %v2567_v60 = vpop.f32.mrb[163].mxu1 }
 0x34d   :  { %v2735_v37 = vmax.f32 %v2565_v44, 0.0  ;;  %v2568_v0 = vadd.f32 %v6226_v41, %v2567_v60 }
 0x34e   :  { %v2797_v8 = vmax.f32 %v2793_v42, %v2737_v13  ;;  %v2738_v45 = vmax.f32 %v2576_v4, 0.0 }
 0x34f   :  { %v2795_v7 = vmax.f32 %v2791_v47, %v2735_v37  ;;  %v2736_v40 = vmax.f32 %v2568_v0, 0.0 }
 0x350   :  { %v2798_v5 = vmax.f32 %v2794_v18, %v2738_v45 }
 0x351   :  { %v2796_v24 = vmax.f32 %v2792_v15, %v2736_v40  ;;  %v4498_v38 = vpop.f32.mrb[164].mxu1 }
 0x352   :  { %v2589_v12 = vadd.f32 %v4498_v38, %v6226_v41  ;;  %v2580_v46 = vpop.f32.mrb[165].mxu1 }
 0x353   :  { %v2581_v19 = vadd.f32 %v6226_v41, %v2580_v46  ;;  %v4499_v63 = vpop.f32.mrb[166].mxu1 }
 0x354   :  { %v2741_v14 = vmax.f32 %v2589_v12, 0.0  ;;  %v2592_v59 = vadd.f32 %v4499_v63, %v6226_v41  ;;  %v2583_v52 = vpop.f32.mrb[167].mxu1 }
 0x355   :  { %v2739_v23 = vmax.f32 %v2581_v19, 0.0  ;;  %v2584_v25 = vadd.f32 %v6226_v41, %v2583_v52 }
 0x356   :  { %v2801_v51 = vmax.f32 %v2797_v8, %v2741_v14  ;;  %v2742_v16 = vmax.f32 %v2592_v59, 0.0 }
 0x357   :  { %v2799_v9 = vmax.f32 %v2795_v7, %v2739_v23  ;;  %v2740_v49 = vmax.f32 %v2584_v25, 0.0 }
 0x358   :  { %v2802_v39 = vmax.f32 %v2798_v5, %v2742_v16 }
 0x359   :  { %v2800_v54 = vmax.f32 %v2796_v24, %v2740_v49  ;;  %v4502_v20 = vpop.f32.mrb[168].mxu1 }
 0x35a   :  { %v2605_v58 = vadd.f32 %v4502_v20, %v6226_v41  ;;  %v2596_v1 = vpop.f32.mrb[169].mxu1 }
 0x35b   :  { %v2597_v61 = vadd.f32 %v6226_v41, %v2596_v1  ;;  %v4503_v43 = vpop.f32.mrb[170].mxu1 }
 0x35c   :  { %v2745_v62 = vmax.f32 %v2605_v58, 0.0  ;;  %v2608_v36 = vadd.f32 %v4503_v43, %v6226_v41  ;;  %v2599_v53 = vpop.f32.mrb[171].mxu1 }
 0x35d   :  { %v2743_v21 = vmax.f32 %v2597_v61, 0.0  ;;  %v2600_v3 = vadd.f32 %v6226_v41, %v2599_v53 }
 0x35e   :  { %v2805_v22 = vmax.f32 %v2801_v51, %v2745_v62  ;;  %v2746_v10 = vmax.f32 %v2608_v36, 0.0 }
 0x35f   :  { %v2803_v48 = vmax.f32 %v2799_v9, %v2743_v21  ;;  %v2744_v31 = vmax.f32 %v2600_v3, 0.0 }
 0x360   :  { %v2806_v56 = vmax.f32 %v2802_v39, %v2746_v10 }
 0x361   :  { %v2804_v6 = vmax.f32 %v2800_v54, %v2744_v31  ;;  %v4506_v35 = vpop.f32.mrb[172].mxu1 }
 0x362   :  { %v2621_v28 = vadd.f32 %v4506_v35, %v6226_v41  ;;  %v2612_v27 = vpop.f32.mrb[173].mxu1 }
 0x363   :  { %v2613_v50 = vadd.f32 %v6226_v41, %v2612_v27  ;;  %v4507_v33 = vpop.f32.mrb[174].mxu1 }
 0x364   :  { %v2749_v29 = vmax.f32 %v2621_v28, 0.0  ;;  %v2624_v11 = vadd.f32 %v4507_v33, %v6226_v41  ;;  %v2615_v34 = vpop.f32.mrb[175].mxu1 }
 0x365   :  { %v2747_v55 = vmax.f32 %v2613_v50, 0.0  ;;  %v2616_v42 = vadd.f32 %v6226_v41, %v2615_v34 }
 0x366   :  { %v2809_v26 = vmax.f32 %v2805_v22, %v2749_v29  ;;  %v2750_v47 = vmax.f32 %v2624_v11, 0.0 }
 0x367   :  { %v2807_v30 = vmax.f32 %v2803_v48, %v2747_v55  ;;  %v2748_v18 = vmax.f32 %v2616_v42, 0.0 }
 0x368   :  { %v2810_v15 = vmax.f32 %v2806_v56, %v2750_v47 }
 0x369   :  { %v2808_v57 = vmax.f32 %v2804_v6, %v2748_v18  ;;  %v4510_v32 = vpop.f32.mrb[176].mxu1 }
 0x36a   :  { %v2637_v17 = vadd.f32 %v4510_v32, %v6226_v41  ;;  %v2628_v44 = vpop.f32.mrb[177].mxu1 }
 0x36b   :  { %v2629_v2 = vadd.f32 %v6226_v41, %v2628_v44  ;;  %v4511_v13 = vpop.f32.mrb[178].mxu1 }
 0x36c   :  { %v2753_v4 = vmax.f32 %v2637_v17, 0.0  ;;  %v2640_v60 = vadd.f32 %v4511_v13, %v6226_v41  ;;  %v2631_v37 = vpop.f32.mrb[179].mxu1 }
 0x36d   :  { %v2751_v0 = vmax.f32 %v2629_v2, 0.0  ;;  %v2632_v8 = vadd.f32 %v6226_v41, %v2631_v37 }
 0x36e   :  { %v2813_v45 = vmax.f32 %v2809_v26, %v2753_v4  ;;  %v2754_v7 = vmax.f32 %v2640_v60, 0.0 }
 0x36f   :  { %v2811_v40 = vmax.f32 %v2807_v30, %v2751_v0  ;;  %v2752_v5 = vmax.f32 %v2632_v8, 0.0 }
 0x370   :  { %v2814_v24 = vmax.f32 %v2810_v15, %v2754_v7 }
 0x371   :  { %v2812_v38 = vmax.f32 %v2808_v57, %v2752_v5  ;;  %v4514_v12 = vpop.f32.mrb[180].mxu1 }
 0x372   :  { %v2653_v46 = vadd.f32 %v4514_v12, %v6226_v41  ;;  %v2644_v19 = vpop.f32.mrb[181].mxu1 }
 0x373   :  { %v2645_v63 = vadd.f32 %v6226_v41, %v2644_v19  ;;  %v4515_v14 = vpop.f32.mrb[182].mxu1 }
 0x374   :  { %v2757_v59 = vmax.f32 %v2653_v46, 0.0  ;;  %v2656_v52 = vadd.f32 %v4515_v14, %v6226_v41  ;;  %v2647_v23 = vpop.f32.mrb[183].mxu1 }
 0x375   :  { %v2755_v25 = vmax.f32 %v2645_v63, 0.0  ;;  %v2648_v51 = vadd.f32 %v6226_v41, %v2647_v23 }
 0x376   :  { %v2817_v16 = vmax.f32 %v2813_v45, %v2757_v59  ;;  %v2758_v9 = vmax.f32 %v2656_v52, 0.0 }
 0x377   :  { %v2815_v49 = vmax.f32 %v2811_v40, %v2755_v25  ;;  %v2756_v39 = vmax.f32 %v2648_v51, 0.0 }
 0x378   :  { %v2818_v54 = vmax.f32 %v2814_v24, %v2758_v9 }
 0x379   :  { %v2816_v20 = vmax.f32 %v2812_v38, %v2756_v39  ;;  %v4518_v58 = vpop.f32.mrb[184].mxu1 }
 0x37a   :  { %v2669_v1 = vadd.f32 %v4518_v58, %v6226_v41  ;;  %v2660_v61 = vpop.f32.mrb[185].mxu1 }
 0x37b   :  { %v2661_v43 = vadd.f32 %v6226_v41, %v2660_v61  ;;  %v4519_v62 = vpop.f32.mrb[186].mxu1 }
 0x37c   :  { %v2761_v36 = vmax.f32 %v2669_v1, 0.0  ;;  %v2672_v53 = vadd.f32 %v4519_v62, %v6226_v41  ;;  %v2663_v21 = vpop.f32.mrb[187].mxu1 }
 0x37d   :  { %v2759_v3 = vmax.f32 %v2661_v43, 0.0  ;;  %v2664_v22 = vadd.f32 %v6226_v41, %v2663_v21 }
 0x37e   :  { %v2821_v10 = vmax.f32 %v2817_v16, %v2761_v36  ;;  %v2762_v48 = vmax.f32 %v2672_v53, 0.0 }
 0x37f   :  { %v2819_v31 = vmax.f32 %v2815_v49, %v2759_v3  ;;  %v2760_v56 = vmax.f32 %v2664_v22, 0.0 }
 0x380   :  { %v2822_v6 = vmax.f32 %v2818_v54, %v2762_v48 }
 0x381   :  { %v2820_v35 = vmax.f32 %v2816_v20, %v2760_v56  ;;  %v4522_v28 = vpop.f32.mrb[188].mxu1 }
 0x382   :  { %v2685_v27 = vadd.f32 %v4522_v28, %v6226_v41  ;;  %v2676_v50 = vpop.f32.mrb[189].mxu1 }
 0x383   :  { %v2677_v33 = vadd.f32 %v6226_v41, %v2676_v50  ;;  %v4523_v29 = vpop.f32.mrb[190].mxu1 }
 0x384   :  { %v2765_v11 = vmax.f32 %v2685_v27, 0.0  ;;  %v2688_v34 = vadd.f32 %v4523_v29, %v6226_v41  ;;  %v2679_v55 = vpop.f32.mrb[191].mxu1 }
 0x385   :  { %v2763_v42 = vmax.f32 %v2677_v33, 0.0  ;;  %v2680_v26 = vadd.f32 %v6226_v41, %v2679_v55 }
 0x386   :  { %v2825_v47 = vmax.f32 %v2821_v10, %v2765_v11  ;;  %v2766_v30 = vmax.f32 %v2688_v34, 0.0 }
 0x387   :  { %v2823_v18 = vmax.f32 %v2819_v31, %v2763_v42  ;;  %v2764_v15 = vmax.f32 %v2680_v26, 0.0 }
 0x388   :  { %v2826_v57 = vmax.f32 %v2822_v6, %v2766_v30 }
 0x389   :  { %v2824_v32 = vmax.f32 %v2820_v35, %v2764_v15  ;;  %v4526_v17 = vpop.f32.mrb[192].mxu1 }
 0x38a   :  { %v2701_v44 = vadd.f32 %v4526_v17, %v6226_v41  ;;  %v2692_v2 = vpop.f32.mrb[193].mxu1 }
 0x38b   :  { %v2693_v13 = vadd.f32 %v6226_v41, %v2692_v2  ;;  %v4527_v4 = vpop.f32.mrb[194].mxu1  ;;  %v4546_v60 = vpop.f32.mrb[132].mxu0 }
 0x38c   :  { %v2769_v37 = vmax.f32 %v2701_v44, 0.0  ;;  %v2704_v0 = vadd.f32 %v4527_v4, %v6226_v41  ;;  %v2695_v8 = vpop.f32.mrb[195].mxu1  ;;  %v3368_v45 = vpop.f32.mrb[133].mxu0  ;;  %v3377_v59 = vadd.f32 %v4546_v60, %v6226_v41 }
 0x38d   :  { %v2767_v7 = vmax.f32 %v2693_v13, 0.0  ;;  %v2696_v40 = vadd.f32 %v6226_v41, %v2695_v8  ;;  %v4547_v5 = vpop.f32.mrb[134].mxu0  ;;  %v3369_v52 = vadd.f32 %v6226_v41, %v3368_v45 }
 0x38e   :  { %v2829_v24 = vmax.f32 %v2825_v47, %v2769_v37  ;;  %v2770_v38 = vmax.f32 %v2704_v0, 0.0  ;;  %v3371_v12 = vpop.f32.mrb[135].mxu0  ;;  %v3380_v25 = vadd.f32 %v4547_v5, %v6226_v41  ;;  %v3625_v54 = vmax.f32 %v3377_v59, 0.0 }
 0x38f   :  { %v2827_v46 = vmax.f32 %v2823_v18, %v2767_v7  ;;  %v2768_v19 = vmax.f32 %v2696_v40, 0.0  ;;  %v3372_v9 = vadd.f32 %v6226_v41, %v3371_v12  ;;  %v3623_v61 = vmax.f32 %v3369_v52, 0.0 }
 0x390   :  { %2833 = vst.msk [vmem:[%s6405_s8 + $0x10] sm:$0xff] %vm1180_vm2, %v2829_v24  ;;  %v2830_v63 = vmax.f32 %v2826_v57, %v2770_v38  ;;  %v3626_v36 = vmax.f32 %v3380_v25, 0.0 }
 0x391   :  { %2831 = vst.msk [vmem:[%s6405_s8] sm:$0xff] %vm1180_vm2, %v2827_v46  ;;  %v2828_v14 = vmax.f32 %v2824_v32, %v2768_v19  ;;  %v3624_v3 = vmax.f32 %v3372_v9, 0.0 }
 0x392   :  { %2834 = vst.msk [vmem:[%s6405_s8 + $0x18] sm:$0xff] %vm1180_vm2, %v2830_v63 }
 0x393   :  { %2832 = vst.msk [vmem:[%s6405_s8 + $0x8] sm:$0xff] %vm1180_vm2, %v2828_v14  ;;  %v4550_v23 = vpop.f32.mrb[136].mxu0 }
 0x394   :  { %v3393_v51 = vadd.f32 %v4550_v23, %v6226_v41  ;;  %v3384_v16 = vpop.f32.mrb[137].mxu0 }
 0x395   :  { %v3385_v49 = vadd.f32 %v6226_v41, %v3384_v16  ;;  %v4551_v39 = vpop.f32.mrb[138].mxu0 }
 0x396   :  { %v3629_v20 = vmax.f32 %v3393_v51, 0.0  ;;  %v3396_v58 = vadd.f32 %v4551_v39, %v6226_v41  ;;  %v3387_v1 = vpop.f32.mrb[139].mxu0 }
 0x397   :  { %v3627_v43 = vmax.f32 %v3385_v49, 0.0  ;;  %v3388_v62 = vadd.f32 %v6226_v41, %v3387_v1 }
 0x398   :  { %v3689_v53 = vmax.f32 %v3625_v54, %v3629_v20  ;;  %v3630_v21 = vmax.f32 %v3396_v58, 0.0 }
 0x399   :  { %v3687_v22 = vmax.f32 %v3623_v61, %v3627_v43  ;;  %v3628_v10 = vmax.f32 %v3388_v62, 0.0 }
 0x39a   :  { %v3690_v48 = vmax.f32 %v3626_v36, %v3630_v21 }
 0x39b   :  { %v3688_v31 = vmax.f32 %v3624_v3, %v3628_v10  ;;  %v4554_v56 = vpop.f32.mrb[140].mxu0 }
 0x39c   :  { %v3409_v6 = vadd.f32 %v4554_v56, %v6226_v41  ;;  %v3400_v35 = vpop.f32.mrb[141].mxu0 }
 0x39d   :  { %v3401_v28 = vadd.f32 %v6226_v41, %v3400_v35  ;;  %v4555_v27 = vpop.f32.mrb[142].mxu0 }
 0x39e   :  { %v3633_v50 = vmax.f32 %v3409_v6, 0.0  ;;  %v3412_v33 = vadd.f32 %v4555_v27, %v6226_v41  ;;  %v3403_v29 = vpop.f32.mrb[143].mxu0 }
 0x39f   :  { %v3631_v11 = vmax.f32 %v3401_v28, 0.0  ;;  %v3404_v34 = vadd.f32 %v6226_v41, %v3403_v29 }
 0x3a0   :  { %v3693_v55 = vmax.f32 %v3689_v53, %v3633_v50  ;;  %v3634_v42 = vmax.f32 %v3412_v33, 0.0 }
 0x3a1   :  { %v3691_v26 = vmax.f32 %v3687_v22, %v3631_v11  ;;  %v3632_v47 = vmax.f32 %v3404_v34, 0.0 }
 0x3a2   :  { %v3694_v30 = vmax.f32 %v3690_v48, %v3634_v42 }
 0x3a3   :  { %v3692_v18 = vmax.f32 %v3688_v31, %v3632_v47  ;;  %v4558_v15 = vpop.f32.mrb[144].mxu0 }
 0x3a4   :  { %v3425_v57 = vadd.f32 %v4558_v15, %v6226_v41  ;;  %v3416_v32 = vpop.f32.mrb[145].mxu0 }
 0x3a5   :  { %v3417_v17 = vadd.f32 %v6226_v41, %v3416_v32  ;;  %v4559_v44 = vpop.f32.mrb[146].mxu0 }
 0x3a6   :  { %v3637_v2 = vmax.f32 %v3425_v57, 0.0  ;;  %v3428_v13 = vadd.f32 %v4559_v44, %v6226_v41  ;;  %v3419_v4 = vpop.f32.mrb[147].mxu0 }
 0x3a7   :  { %v3635_v60 = vmax.f32 %v3417_v17, 0.0  ;;  %v3420_v37 = vadd.f32 %v6226_v41, %v3419_v4 }
 0x3a8   :  { %v3697_v0 = vmax.f32 %v3693_v55, %v3637_v2  ;;  %v3638_v8 = vmax.f32 %v3428_v13, 0.0 }
 0x3a9   :  { %v3695_v45 = vmax.f32 %v3691_v26, %v3635_v60  ;;  %v3636_v7 = vmax.f32 %v3420_v37, 0.0 }
 0x3aa   :  { %v3698_v40 = vmax.f32 %v3694_v30, %v3638_v8 }
 0x3ab   :  { %v3696_v5 = vmax.f32 %v3692_v18, %v3636_v7  ;;  %v4562_v24 = vpop.f32.mrb[148].mxu0 }
 0x3ac   :  { %v3441_v38 = vadd.f32 %v4562_v24, %v6226_v41  ;;  %v3432_v12 = vpop.f32.mrb[149].mxu0 }
 0x3ad   :  { %v3433_v46 = vadd.f32 %v6226_v41, %v3432_v12  ;;  %v4563_v19 = vpop.f32.mrb[150].mxu0 }
 0x3ae   :  { %v3641_v63 = vmax.f32 %v3441_v38, 0.0  ;;  %v3444_v14 = vadd.f32 %v4563_v19, %v6226_v41  ;;  %v3435_v59 = vpop.f32.mrb[151].mxu0 }
 0x3af   :  { %v3639_v52 = vmax.f32 %v3433_v46, 0.0  ;;  %v3436_v23 = vadd.f32 %v6226_v41, %v3435_v59 }
 0x3b0   :  { %v3701_v25 = vmax.f32 %v3697_v0, %v3641_v63  ;;  %v3642_v51 = vmax.f32 %v3444_v14, 0.0 }
 0x3b1   :  { %v3699_v16 = vmax.f32 %v3695_v45, %v3639_v52  ;;  %v3640_v9 = vmax.f32 %v3436_v23, 0.0 }
 0x3b2   :  { %v3702_v49 = vmax.f32 %v3698_v40, %v3642_v51 }
 0x3b3   :  { %v3700_v39 = vmax.f32 %v3696_v5, %v3640_v9  ;;  %v4566_v54 = vpop.f32.mrb[152].mxu0 }
 0x3b4   :  { %v3457_v20 = vadd.f32 %v4566_v54, %v6226_v41  ;;  %v3448_v58 = vpop.f32.mrb[153].mxu0 }
 0x3b5   :  { %v3449_v1 = vadd.f32 %v6226_v41, %v3448_v58  ;;  %v4567_v61 = vpop.f32.mrb[154].mxu0 }
 0x3b6   :  { %v3645_v43 = vmax.f32 %v3457_v20, 0.0  ;;  %v3460_v62 = vadd.f32 %v4567_v61, %v6226_v41  ;;  %v3451_v36 = vpop.f32.mrb[155].mxu0 }
 0x3b7   :  { %v3643_v53 = vmax.f32 %v3449_v1, 0.0  ;;  %v3452_v21 = vadd.f32 %v6226_v41, %v3451_v36 }
 0x3b8   :  { %v3705_v3 = vmax.f32 %v3701_v25, %v3645_v43  ;;  %v3646_v22 = vmax.f32 %v3460_v62, 0.0 }
 0x3b9   :  { %v3703_v10 = vmax.f32 %v3699_v16, %v3643_v53  ;;  %v3644_v48 = vmax.f32 %v3452_v21, 0.0 }
 0x3ba   :  { %v3706_v31 = vmax.f32 %v3702_v49, %v3646_v22 }
 0x3bb   :  { %v3704_v56 = vmax.f32 %v3700_v39, %v3644_v48  ;;  %v4570_v6 = vpop.f32.mrb[156].mxu0 }
 0x3bc   :  { %v3473_v35 = vadd.f32 %v4570_v6, %v6226_v41  ;;  %v3464_v28 = vpop.f32.mrb[157].mxu0 }
 0x3bd   :  { %v3465_v27 = vadd.f32 %v6226_v41, %v3464_v28  ;;  %v4571_v50 = vpop.f32.mrb[158].mxu0 }
 0x3be   :  { %v3649_v33 = vmax.f32 %v3473_v35, 0.0  ;;  %v3476_v29 = vadd.f32 %v4571_v50, %v6226_v41  ;;  %v3467_v11 = vpop.f32.mrb[159].mxu0 }
 0x3bf   :  { %v3647_v34 = vmax.f32 %v3465_v27, 0.0  ;;  %v3468_v55 = vadd.f32 %v6226_v41, %v3467_v11 }
 0x3c0   :  { %v3709_v42 = vmax.f32 %v3705_v3, %v3649_v33  ;;  %v3650_v26 = vmax.f32 %v3476_v29, 0.0 }
 0x3c1   :  { %v3707_v47 = vmax.f32 %v3703_v10, %v3647_v34  ;;  %v3648_v30 = vmax.f32 %v3468_v55, 0.0 }
 0x3c2   :  { %v3710_v18 = vmax.f32 %v3706_v31, %v3650_v26 }
 0x3c3   :  { %v3708_v15 = vmax.f32 %v3704_v56, %v3648_v30  ;;  %v4574_v57 = vpop.f32.mrb[160].mxu0 }
 0x3c4   :  { %v3489_v32 = vadd.f32 %v4574_v57, %v6226_v41  ;;  %v3480_v17 = vpop.f32.mrb[161].mxu0 }
 0x3c5   :  { %v3481_v44 = vadd.f32 %v6226_v41, %v3480_v17  ;;  %v4575_v2 = vpop.f32.mrb[162].mxu0 }
 0x3c6   :  { %v3653_v13 = vmax.f32 %v3489_v32, 0.0  ;;  %v3492_v4 = vadd.f32 %v4575_v2, %v6226_v41  ;;  %v3483_v60 = vpop.f32.mrb[163].mxu0 }
 0x3c7   :  { %v3651_v37 = vmax.f32 %v3481_v44, 0.0  ;;  %v3484_v0 = vadd.f32 %v6226_v41, %v3483_v60 }
 0x3c8   :  { %v3713_v8 = vmax.f32 %v3709_v42, %v3653_v13  ;;  %v3654_v45 = vmax.f32 %v3492_v4, 0.0 }
 0x3c9   :  { %v3711_v7 = vmax.f32 %v3707_v47, %v3651_v37  ;;  %v3652_v40 = vmax.f32 %v3484_v0, 0.0 }
 0x3ca   :  { %v3714_v5 = vmax.f32 %v3710_v18, %v3654_v45 }
 0x3cb   :  { %v3712_v24 = vmax.f32 %v3708_v15, %v3652_v40  ;;  %v4578_v38 = vpop.f32.mrb[164].mxu0 }
 0x3cc   :  { %v3505_v12 = vadd.f32 %v4578_v38, %v6226_v41  ;;  %v3496_v46 = vpop.f32.mrb[165].mxu0 }
 0x3cd   :  { %v3497_v19 = vadd.f32 %v6226_v41, %v3496_v46  ;;  %v4579_v63 = vpop.f32.mrb[166].mxu0 }
 0x3ce   :  { %v3657_v14 = vmax.f32 %v3505_v12, 0.0  ;;  %v3508_v59 = vadd.f32 %v4579_v63, %v6226_v41  ;;  %v3499_v52 = vpop.f32.mrb[167].mxu0 }
 0x3cf   :  { %v3655_v23 = vmax.f32 %v3497_v19, 0.0  ;;  %v3500_v25 = vadd.f32 %v6226_v41, %v3499_v52 }
 0x3d0   :  { %v3717_v51 = vmax.f32 %v3713_v8, %v3657_v14  ;;  %v3658_v16 = vmax.f32 %v3508_v59, 0.0 }
 0x3d1   :  { %v3715_v9 = vmax.f32 %v3711_v7, %v3655_v23  ;;  %v3656_v49 = vmax.f32 %v3500_v25, 0.0 }
 0x3d2   :  { %v3718_v39 = vmax.f32 %v3714_v5, %v3658_v16 }
 0x3d3   :  { %v3716_v54 = vmax.f32 %v3712_v24, %v3656_v49  ;;  %v4582_v20 = vpop.f32.mrb[168].mxu0 }
 0x3d4   :  { %v3521_v58 = vadd.f32 %v4582_v20, %v6226_v41  ;;  %v3512_v1 = vpop.f32.mrb[169].mxu0 }
 0x3d5   :  { %v3513_v61 = vadd.f32 %v6226_v41, %v3512_v1  ;;  %v4583_v43 = vpop.f32.mrb[170].mxu0 }
 0x3d6   :  { %v3661_v62 = vmax.f32 %v3521_v58, 0.0  ;;  %v3524_v36 = vadd.f32 %v4583_v43, %v6226_v41  ;;  %v3515_v53 = vpop.f32.mrb[171].mxu0 }
 0x3d7   :  { %v3659_v21 = vmax.f32 %v3513_v61, 0.0  ;;  %v3516_v3 = vadd.f32 %v6226_v41, %v3515_v53 }
 0x3d8   :  { %v3721_v22 = vmax.f32 %v3717_v51, %v3661_v62  ;;  %v3662_v10 = vmax.f32 %v3524_v36, 0.0 }
 0x3d9   :  { %v3719_v48 = vmax.f32 %v3715_v9, %v3659_v21  ;;  %v3660_v31 = vmax.f32 %v3516_v3, 0.0 }
 0x3da   :  { %v3722_v56 = vmax.f32 %v3718_v39, %v3662_v10 }
 0x3db   :  { %v3720_v6 = vmax.f32 %v3716_v54, %v3660_v31  ;;  %v4586_v35 = vpop.f32.mrb[172].mxu0 }
 0x3dc   :  { %v3537_v28 = vadd.f32 %v4586_v35, %v6226_v41  ;;  %v3528_v27 = vpop.f32.mrb[173].mxu0 }
 0x3dd   :  { %v3529_v50 = vadd.f32 %v6226_v41, %v3528_v27  ;;  %v4587_v33 = vpop.f32.mrb[174].mxu0 }
 0x3de   :  { %v3665_v29 = vmax.f32 %v3537_v28, 0.0  ;;  %v3540_v11 = vadd.f32 %v4587_v33, %v6226_v41  ;;  %v3531_v34 = vpop.f32.mrb[175].mxu0 }
 0x3df   :  { %v3663_v55 = vmax.f32 %v3529_v50, 0.0  ;;  %v3532_v42 = vadd.f32 %v6226_v41, %v3531_v34 }
 0x3e0   :  { %v3725_v26 = vmax.f32 %v3721_v22, %v3665_v29  ;;  %v3666_v47 = vmax.f32 %v3540_v11, 0.0 }
 0x3e1   :  { %v3723_v30 = vmax.f32 %v3719_v48, %v3663_v55  ;;  %v3664_v18 = vmax.f32 %v3532_v42, 0.0 }
 0x3e2   :  { %v3726_v15 = vmax.f32 %v3722_v56, %v3666_v47 }
 0x3e3   :  { %v3724_v57 = vmax.f32 %v3720_v6, %v3664_v18  ;;  %v4590_v32 = vpop.f32.mrb[176].mxu0 }
 0x3e4   :  { %v3553_v17 = vadd.f32 %v4590_v32, %v6226_v41  ;;  %v3544_v44 = vpop.f32.mrb[177].mxu0 }
 0x3e5   :  { %v3545_v2 = vadd.f32 %v6226_v41, %v3544_v44  ;;  %v4591_v13 = vpop.f32.mrb[178].mxu0 }
 0x3e6   :  { %v3669_v4 = vmax.f32 %v3553_v17, 0.0  ;;  %v3556_v60 = vadd.f32 %v4591_v13, %v6226_v41  ;;  %v3547_v37 = vpop.f32.mrb[179].mxu0 }
 0x3e7   :  { %v3667_v0 = vmax.f32 %v3545_v2, 0.0  ;;  %v3548_v8 = vadd.f32 %v6226_v41, %v3547_v37 }
 0x3e8   :  { %v3729_v45 = vmax.f32 %v3725_v26, %v3669_v4  ;;  %v3670_v7 = vmax.f32 %v3556_v60, 0.0 }
 0x3e9   :  { %v3727_v40 = vmax.f32 %v3723_v30, %v3667_v0  ;;  %v3668_v5 = vmax.f32 %v3548_v8, 0.0 }
 0x3ea   :  { %v3730_v24 = vmax.f32 %v3726_v15, %v3670_v7 }
 0x3eb   :  { %v3728_v38 = vmax.f32 %v3724_v57, %v3668_v5  ;;  %v4594_v12 = vpop.f32.mrb[180].mxu0 }
 0x3ec   :  { %v3569_v46 = vadd.f32 %v4594_v12, %v6226_v41  ;;  %v3560_v19 = vpop.f32.mrb[181].mxu0 }
 0x3ed   :  { %v3561_v63 = vadd.f32 %v6226_v41, %v3560_v19  ;;  %v4595_v14 = vpop.f32.mrb[182].mxu0 }
 0x3ee   :  { %v3673_v59 = vmax.f32 %v3569_v46, 0.0  ;;  %v3572_v52 = vadd.f32 %v4595_v14, %v6226_v41  ;;  %v3563_v23 = vpop.f32.mrb[183].mxu0 }
 0x3ef   :  { %v3671_v25 = vmax.f32 %v3561_v63, 0.0  ;;  %v3564_v51 = vadd.f32 %v6226_v41, %v3563_v23 }
 0x3f0   :  { %v3733_v16 = vmax.f32 %v3729_v45, %v3673_v59  ;;  %v3674_v9 = vmax.f32 %v3572_v52, 0.0 }
 0x3f1   :  { %v3731_v49 = vmax.f32 %v3727_v40, %v3671_v25  ;;  %v3672_v39 = vmax.f32 %v3564_v51, 0.0 }
 0x3f2   :  { %v3734_v54 = vmax.f32 %v3730_v24, %v3674_v9 }
 0x3f3   :  { %v3732_v20 = vmax.f32 %v3728_v38, %v3672_v39  ;;  %v4598_v58 = vpop.f32.mrb[184].mxu0 }
 0x3f4   :  { %v3585_v1 = vadd.f32 %v4598_v58, %v6226_v41  ;;  %v3576_v61 = vpop.f32.mrb[185].mxu0 }
 0x3f5   :  { %v3577_v43 = vadd.f32 %v6226_v41, %v3576_v61  ;;  %v4599_v62 = vpop.f32.mrb[186].mxu0 }
 0x3f6   :  { %v3677_v36 = vmax.f32 %v3585_v1, 0.0  ;;  %v3588_v53 = vadd.f32 %v4599_v62, %v6226_v41  ;;  %v3579_v21 = vpop.f32.mrb[187].mxu0 }
 0x3f7   :  { %v3675_v3 = vmax.f32 %v3577_v43, 0.0  ;;  %v3580_v22 = vadd.f32 %v6226_v41, %v3579_v21 }
 0x3f8   :  { %v3737_v10 = vmax.f32 %v3733_v16, %v3677_v36  ;;  %v3678_v48 = vmax.f32 %v3588_v53, 0.0 }
 0x3f9   :  { %v3735_v31 = vmax.f32 %v3731_v49, %v3675_v3  ;;  %v3676_v56 = vmax.f32 %v3580_v22, 0.0 }
 0x3fa   :  { %v3738_v6 = vmax.f32 %v3734_v54, %v3678_v48 }
 0x3fb   :  { %v3736_v35 = vmax.f32 %v3732_v20, %v3676_v56  ;;  %v4602_v28 = vpop.f32.mrb[188].mxu0 }
 0x3fc   :  { %v3601_v27 = vadd.f32 %v4602_v28, %v6226_v41  ;;  %v3592_v50 = vpop.f32.mrb[189].mxu0 }
 0x3fd   :  { %v3593_v33 = vadd.f32 %v6226_v41, %v3592_v50  ;;  %v4603_v29 = vpop.f32.mrb[190].mxu0 }
 0x3fe   :  { %v3681_v11 = vmax.f32 %v3601_v27, 0.0  ;;  %v3604_v34 = vadd.f32 %v4603_v29, %v6226_v41  ;;  %v3595_v55 = vpop.f32.mrb[191].mxu0 }
 0x3ff   :  { %v3679_v42 = vmax.f32 %v3593_v33, 0.0  ;;  %v3596_v26 = vadd.f32 %v6226_v41, %v3595_v55 }
 0x400   :  { %v3741_v47 = vmax.f32 %v3737_v10, %v3681_v11  ;;  %v3682_v30 = vmax.f32 %v3604_v34, 0.0 }
 0x401   :  { %v3739_v18 = vmax.f32 %v3735_v31, %v3679_v42  ;;  %v3680_v15 = vmax.f32 %v3596_v26, 0.0 }
 0x402   :  { %v3742_v57 = vmax.f32 %v3738_v6, %v3682_v30 }
 0x403   :  { %v3740_v32 = vmax.f32 %v3736_v35, %v3680_v15  ;;  %v4606_v17 = vpop.f32.mrb[192].mxu0 }
 0x404   :  { %v3617_v44 = vadd.f32 %v4606_v17, %v6226_v41  ;;  %v3608_v2 = vpop.f32.mrb[193].mxu0 }
 0x405   :  { %v3609_v13 = vadd.f32 %v6226_v41, %v3608_v2  ;;  %v4607_v4 = vpop.f32.mrb[194].mxu0 }
 0x406   :  { %v3685_v60 = vmax.f32 %v3617_v44, 0.0  ;;  %v3620_v37 = vadd.f32 %v4607_v4, %v6226_v41  ;;  %v3611_v0 = vpop.f32.mrb[195].mxu0 }
 0x407   :  { %v3683_v8 = vmax.f32 %v3609_v13, 0.0  ;;  %v3612_v45 = vadd.f32 %v6226_v41, %v3611_v0 }
 0x408   :  { %v3745_v7 = vmax.f32 %v3741_v47, %v3685_v60  ;;  %v3686_v40 = vmax.f32 %v3620_v37, 0.0 }
 0x409   :  { %v3743_v5 = vmax.f32 %v3739_v18, %v3683_v8  ;;  %v3684_v24 = vmax.f32 %v3612_v45, 0.0 }
 0x40a   :  { %3973 = vst.msk [vmem:[%s6405_s8 + $0x30] sm:$0xff] %vm1180_vm2, %v3745_v7  ;;  %v3746_v38 = vmax.f32 %v3742_v57, %v3686_v40 }
 0x40b   :  { %3971 = vst.msk [vmem:[%s6405_s8 + $0x20] sm:$0xff] %vm1180_vm2, %v3743_v5  ;;  %v3744_v12 = vmax.f32 %v3740_v32, %v3684_v24 }
 0x40c   :  { %3974 = vst.msk [vmem:[%s6405_s8 + $0x38] sm:$0xff] %vm1180_vm2, %v3746_v38 }
 0x40d   :  { %3972 = vst.msk [vmem:[%s6405_s8 + $0x28] sm:$0xff] %vm1180_vm2, %v3744_v12 }

</bundles_post_ra>
